<compile_context>
chip_gen: v5e
topology: v5e:2x2
jax: 0.10.0
libtpu: 0.0.40
codegen_flags: <defaults>
</compile_context>

<pallas_src>
import functools

import jax
import jax.numpy as jnp
from jax import lax
from jax.experimental import pallas as pl
from jax.experimental.pallas import tpu as pltpu


# ---------------------------------------------------------------------------
# In-kernel helpers
# ---------------------------------------------------------------------------
def _elu(v):
    # torch.nn.functional.elu, alpha=1.0
    return jnp.where(v > 0, v, jnp.exp(jnp.minimum(v, 0.0)) - 1.0)


def _caps_normalize(v, masks):
    """Per-capsule L2 normalization along lanes == F.normalize(v.view(r,k,dd), dim=2)."""
    vv = v * v
    inv_full = None
    for mk in masks:
        ss = jnp.sum(jnp.where(mk, vv, 0.0), axis=1, keepdims=True)   # [rows, 1]
        inv = lax.rsqrt(jnp.maximum(ss, 1e-24))                       # == 1/max(||.||, 1e-12)
        term = jnp.where(mk, inv, 0.0)                                # [rows, d]
        inv_full = term if inv_full is None else inv_full + term
    return v * inv_full


def _neib_rout(x, s_oh, g_oh, masks, niter, inv_tau):
    """NeibRoutLayer: disentangled neighborhood routing (returns u)."""
    f32 = jnp.float32
    x = _caps_normalize(x, masks)                                     # [n, d]
    z = jnp.dot(s_oh, x, preferred_element_type=f32)                  # [m, d] == x[src]
    u = x
    for _ in range(niter):
        ut = jnp.dot(g_oh, u, preferred_element_type=f32)             # [m, d] == u[trg]
        zu = z * ut
        # per-capsule logits [m, 1], softmax over capsules
        logits = [jnp.sum(jnp.where(mk, zu, 0.0), axis=1, keepdims=True) * inv_tau
                  for mk in masks]
        mx = logits[0]
        for l in logits[1:]:
            mx = jnp.maximum(mx, l)
        exps = [jnp.exp(l - mx) for l in logits]
        den = exps[0]
        for e in exps[1:]:
            den = den + e
        inv_den = pl.reciprocal(den, approx=True)                     # EUP
        # expand p back to [m, d] via capsule lane-masks (no k-wide MXU matmul)
        p_full = None
        for mk, e in zip(masks, exps):
            term = jnp.where(mk, e * inv_den, 0.0)
            p_full = term if p_full is None else p_full + term
        ssrc = z * p_full                                             # [m, d]
        # scatter_add over edge targets: G^T @ ssrc, contracting the edge axis
        agg = lax.dot_general(g_oh, ssrc, (((0,), (0,)), ((), ())),
                              preferred_element_type=f32)             # [n, d]
        u = _caps_normalize(agg + x, masks)
    return u


# ---------------------------------------------------------------------------
# Fused whole-forward kernel
# ---------------------------------------------------------------------------
def disengcn_kernel(nid_ref, emb_ref, wp_ref, bp_ref, sn_ref, s_ref, g_ref,
                    bnsc_ref, bnsh_ref, w1_ref, b1_ref, w2_ref, b2_ref, o_ref,
                    *, caps_per_layer, routit, tau):
    f32 = jnp.float32
    inv_tau = 1.0 / float(tau)

    # one-hots shipped as bf16, cast once; feature math stays f32
    s_oh = s_ref[...].astype(f32)                                     # [m, n] src one-hot
    g_oh = g_ref[...].astype(f32)                                     # [m, n] trg one-hot

    # embedding lookup (one-hot matmul) -> pca linear -> ELU (dropout == identity)
    feats = jnp.dot(nid_ref[...].astype(f32), emb_ref[...], preferred_element_type=f32)
    h = jnp.dot(feats, wp_ref[...], preferred_element_type=f32) + bp_ref[...]
    h = _elu(h)

    d = h.shape[1]
    lane = lax.broadcasted_iota(jnp.int32, (1, d), 1)
    snorm = sn_ref[...]                                               # [n, 1]

    for i, k in enumerate(caps_per_layer):
        dd = d // k
        masks = [(lane >= c * dd) & (lane < (c + 1) * dd) for c in range(k)]
        h = _neib_rout(h, s_oh, g_oh, masks, routit, inv_tau)
        h = h * snorm                                                 # x * snorm_n
        h = h * bnsc_ref[i] + bnsh_ref[i]                             # BatchNorm1d (eval, folded)
        h = _elu(h)                                                   # ELU (+ dropout identity)

    # classifier1 -> ELU -> classifier2
    hid = _elu(jnp.dot(h, w1_ref[...], preferred_element_type=f32) + b1_ref[...])
    o_ref[...] = jnp.dot(hid, w2_ref[...], preferred_element_type=f32) + b2_ref[...]


# ---------------------------------------------------------------------------
# Wrapper
# ---------------------------------------------------------------------------
_VMEM = pl.BlockSpec(memory_space=pltpu.MemorySpace.VMEM)


def disengcn_sbm_forward(node_ids, src, trg, snorm_n, params, *,
                         ncaps, nlayer, routit, tau=1.0):
    n = node_ids.shape[0]
    m = src.shape[0]
    nvocab, nfeat = params["embed"].shape
    d = params["w_pca"].shape[1]
    ncls = params["w_clf2"].shape[1]

    # one-hot edge / node-id matrices (glue) shipped in bf16 (0/1 exact)
    nid_oh = jax.nn.one_hot(node_ids, nvocab, dtype=jnp.bfloat16)     # [n, nvocab]
    s_oh = jax.nn.one_hot(src, n, dtype=jnp.bfloat16)                 # [m, n]
    g_oh = jax.nn.one_hot(trg, n, dtype=jnp.bfloat16)                 # [m, n]

    # layer i >= 2 uses ncaps // 2 capsules (per DisenGCNSBMs.__init__)
    caps_per_layer = tuple(ncaps if i < 2 else ncaps // 2 for i in range(nlayer))

    # eval-mode BatchNorm1d folded into per-layer scale / shift
    bn_scale = params["bn_gamma"] / jnp.sqrt(params["bn_var"] + 1e-5)     # [nlayer, d]
    bn_shift = params["bn_beta"] - params["bn_mean"] * bn_scale
    bn_scale = bn_scale[:, None, :]                                       # [nlayer, 1, d]
    bn_shift = bn_shift[:, None, :]

    operands = (nid_oh, params["embed"], params["w_pca"], params["b_pca"], snorm_n,
                s_oh, g_oh, bn_scale, bn_shift,
                params["w_clf1"], params["b_clf1"], params["w_clf2"], params["b_clf2"])

    # cost estimate so XLA can schedule neighboring ops around the fused call
    flops = 2 * n * nvocab * nfeat + 2 * n * nfeat * d
    trans = n * d * (1 + nlayer) + n * (d // 2)                       # ELU exps
    for k in caps_per_layer:
        flops += 2 * m * n * d * (1 + 2 * routit)                     # gather + per-iter gather/scatter
        trans += routit * (m * k + m)                                 # softmax exps + reciprocal
        trans += (routit + 1) * n * k                                 # per-capsule rsqrt
    flops += 2 * n * d * (d // 2) + 2 * n * (d // 2) * ncls
    bytes_accessed = sum(int(a.size) * a.dtype.itemsize for a in operands) + n * ncls * 4
    cost = pl.CostEstimate(flops=int(flops), transcendentals=int(trans),
                           bytes_accessed=int(bytes_accessed))

    kernel = functools.partial(disengcn_kernel, caps_per_layer=caps_per_layer,
                               routit=routit, tau=tau)

    return pl.pallas_call(
        kernel,
        out_shape=jax.ShapeDtypeStruct((n, ncls), jnp.float32),
        in_specs=[_VMEM] * len(operands),
        out_specs=_VMEM,
        compiler_params=pltpu.CompilerParams(vmem_limit_bytes=32 * 1024 * 1024),
        cost_estimate=cost,
    )(*operands)


# ---------------------------------------------------------------------------
# Pure-JAX reference (for a tolerance check)
# ---------------------------------------------------------------------------
def _reference_forward(node_ids, src, trg, snorm_n, params, *, ncaps, nlayer, routit, tau=1.0):
    def elu(v):
        return jnp.where(v > 0, v, jnp.exp(jnp.minimum(v, 0.0)) - 1.0)

    x = params["embed"][node_ids]
    h = elu(x @ params["w_pca"] + params["b_pca"])
    n, d = h.shape
    bn_scale = params["bn_gamma"] / jnp.sqrt(params["bn_var"] + 1e-5)
    bn_shift = params["bn_beta"] - params["bn_mean"] * bn_scale
    for i in range(nlayer):
        k = ncaps if i < 2 else ncaps // 2
        dd = d // k

        def norm(v):
            v3 = v.reshape(n, k, dd)
            nrm = jnp.maximum(jnp.linalg.norm(v3, axis=2, keepdims=True), 1e-12)
            return (v3 / nrm).reshape(n, d)

        u0 = norm(h)
        z = u0[src].reshape(-1, k, dd)
        u = u0
        for _ in range(routit):
            p = jnp.sum(z * u[trg].reshape(-1, k, dd), axis=2)
            p = jax.nn.softmax(p / tau, axis=1)
            ssrc = (z * p[:, :, None]).reshape(-1, d)
            agg = jnp.zeros((n, d), jnp.float32).at[trg].add(ssrc)
            u = norm(agg + u0)
        h = elu(u * snorm_n * bn_scale[i] + bn_shift[i])
    hid = elu(h @ params["w_clf1"] + params["b_clf1"])
    return hid @ params["w_clf2"] + params["b_clf2"]


if __name__ == "__main__":
    # hyperpm
    nfeat, ncaps, nhidden = 64, 4, 32
    nlayer, routit, tau = 3, 3, 1.0
    n_cls = 2
    d = ncaps * nhidden            # 128
    n, m, nvocab = 16, 64, 200     # nodes, edges, embedding vocab

    key = jax.random.PRNGKey(0)
    ks = jax.random.split(key, 16)

    node_ids = jax.random.randint(ks[0], (n,), 0, nvocab)
    src = jax.random.randint(ks[1], (m,), 0, n)
    trg = jax.random.randint(ks[2], (m,), 0, n)
    snorm_n = jax.random.uniform(ks[3], (n, 1), jnp.float32, 0.5, 1.5)

    stdv = 1.0 / float(d) ** 0.5
    stdv2 = 1.0 / float(d // 2) ** 0.5
    params = {
        "embed": jax.random.normal(ks[4], (nvocab, nfeat), jnp.float32),
        "w_pca": jax.random.uniform(ks[5], (nfeat, d), jnp.float32, -stdv, stdv),
        "b_pca": jax.random.uniform(ks[6], (1, d), jnp.float32, -stdv, stdv),
        "bn_gamma": jax.random.uniform(ks[7], (nlayer, d), jnp.float32, 0.5, 1.5),
        "bn_beta": 0.1 * jax.random.normal(ks[8], (nlayer, d), jnp.float32),
        "bn_mean": 0.1 * jax.random.normal(ks[9], (nlayer, d), jnp.float32),
        "bn_var": jax.random.uniform(ks[10], (nlayer, d), jnp.float32, 0.5, 1.5),
        "w_clf1": jax.random.uniform(ks[11], (d, d // 2), jnp.float32, -stdv, stdv),
        "b_clf1": jax.random.uniform(ks[12], (1, d // 2), jnp.float32, -stdv, stdv),
        "w_clf2": jax.random.uniform(ks[13], (d // 2, n_cls), jnp.float32, -stdv2, stdv2),
        "b_clf2": jax.random.uniform(ks[14], (1, n_cls), jnp.float32, -stdv2, stdv2),
    }

    logits = disengcn_sbm_forward(node_ids, src, trg, snorm_n, params,
                                  ncaps=ncaps, nlayer=nlayer, routit=routit, tau=tau)
    jax.block_until_ready(logits)
    assert logits.shape == (n, n_cls) and logits.dtype == jnp.float32
    assert bool(jnp.all(jnp.isfinite(logits)))

    ref = _reference_forward(node_ids, src, trg, snorm_n, params,
                             ncaps=ncaps, nlayer=nlayer, routit=routit, tau=tau)
    assert bool(jnp.allclose(logits, ref, rtol=5e-2, atol=5e-2)), (
        "mismatch vs reference: max abs diff = %f" % float(jnp.max(jnp.abs(logits - ref))))

    print("KERNEL_OK")
</pallas_src>

<mosaic_0001>
module attributes {stable_mosaic.version = 11 : i64} {
  func.func @disengcn_kernel(%arg0: memref<16x200xbf16, #tpu.memory_space<vmem>>, %arg1: memref<200x64xf32, #tpu.memory_space<vmem>>, %arg2: memref<64x128xf32, #tpu.memory_space<vmem>>, %arg3: memref<1x128xf32, #tpu.memory_space<vmem>>, %arg4: memref<16x1xf32, #tpu.memory_space<vmem>>, %arg5: memref<64x16xbf16, #tpu.memory_space<vmem>>, %arg6: memref<64x16xbf16, #tpu.memory_space<vmem>>, %arg7: memref<3x1x128xf32, #tpu.memory_space<vmem>>, %arg8: memref<3x1x128xf32, #tpu.memory_space<vmem>>, %arg9: memref<128x64xf32, #tpu.memory_space<vmem>>, %arg10: memref<1x64xf32, #tpu.memory_space<vmem>>, %arg11: memref<64x2xf32, #tpu.memory_space<vmem>>, %arg12: memref<1x2xf32, #tpu.memory_space<vmem>>, %arg13: memref<16x2xf32, #tpu.memory_space<vmem>>) attributes {dimension_semantics = [], scalar_prefetch = 0 : i64, scratch_operands = 0 : i64, tpu.core_type = #tpu.core_type<tc>} {
    %c0 = arith.constant 0 : index
    %c0_0 = arith.constant 0 : index
    %0 = vector.load %arg5[%c0, %c0_0] : memref<64x16xbf16, #tpu.memory_space<vmem>>, vector<64x16xbf16>
    %1 = arith.extf %0 : vector<64x16xbf16> to vector<64x16xf32>
    %c0_1 = arith.constant 0 : index
    %c0_2 = arith.constant 0 : index
    %2 = vector.load %arg6[%c0_1, %c0_2] : memref<64x16xbf16, #tpu.memory_space<vmem>>, vector<64x16xbf16>
    %3 = arith.extf %2 : vector<64x16xbf16> to vector<64x16xf32>
    %c0_3 = arith.constant 0 : index
    %c0_4 = arith.constant 0 : index
    %4 = vector.load %arg0[%c0_3, %c0_4] : memref<16x200xbf16, #tpu.memory_space<vmem>>, vector<16x200xbf16>
    %5 = arith.extf %4 : vector<16x200xbf16> to vector<16x200xf32>
    %c0_5 = arith.constant 0 : index
    %c0_6 = arith.constant 0 : index
    %6 = vector.load %arg1[%c0_5, %c0_6] : memref<200x64xf32, #tpu.memory_space<vmem>>, vector<200x64xf32>
    %cst = arith.constant dense<0.000000e+00> : vector<16x64xf32>
    %7 = tpu.matmul %5, %6, %cst {dimension_numbers = #tpu.dot_dimension_numbers<[1], [0], [0], [1], [0, 0, 1, 1], [], []>} : vector<16x200xf32>, vector<200x64xf32>, vector<16x64xf32> -> vector<16x64xf32>
    %c0_7 = arith.constant 0 : index
    %c0_8 = arith.constant 0 : index
    %8 = vector.load %arg2[%c0_7, %c0_8] : memref<64x128xf32, #tpu.memory_space<vmem>>, vector<64x128xf32>
    %cst_9 = arith.constant dense<0.000000e+00> : vector<16x128xf32>
    %9 = tpu.matmul %7, %8, %cst_9 {dimension_numbers = #tpu.dot_dimension_numbers<[1], [0], [0], [1], [0, 0, 1, 1], [], []>} : vector<16x64xf32>, vector<64x128xf32>, vector<16x128xf32> -> vector<16x128xf32>
    %c0_10 = arith.constant 0 : index
    %c0_11 = arith.constant 0 : index
    %10 = vector.load %arg3[%c0_10, %c0_11] : memref<1x128xf32, #tpu.memory_space<vmem>>, vector<1x128xf32>
    %11 = vector.broadcast %10 : vector<1x128xf32> to vector<16x128xf32>
    %12 = arith.addf %9, %11 : vector<16x128xf32>
    %cst_12 = arith.constant 0.000000e+00 : f32
    %13 = vector.broadcast %cst_12 : f32 to vector<16x128xf32>
    %14 = arith.cmpf ogt, %12, %13 : vector<16x128xf32>
    %cst_13 = arith.constant 0.000000e+00 : f32
    %15 = vector.broadcast %cst_13 : f32 to vector<16x128xf32>
    %16 = arith.minimumf %12, %15 : vector<16x128xf32>
    %17 = math.exp %16 : vector<16x128xf32>
    %cst_14 = arith.constant 1.000000e+00 : f32
    %18 = vector.broadcast %cst_14 : f32 to vector<16x128xf32>
    %19 = arith.subf %17, %18 : vector<16x128xf32>
    %20 = arith.select %14, %12, %19 : vector<16x128xi1>, vector<16x128xf32>
    %21 = tpu.iota {dimensions = array<i32: 1>} : vector<1x128xi32>
    %c0_15 = arith.constant 0 : index
    %c0_16 = arith.constant 0 : index
    %22 = vector.load %arg4[%c0_15, %c0_16] : memref<16x1xf32, #tpu.memory_space<vmem>>, vector<16x1xf32>
    %c0_i32 = arith.constant 0 : i32
    %23 = vector.broadcast %c0_i32 : i32 to vector<1x128xi32>
    %24 = arith.cmpi sge, %21, %23 : vector<1x128xi32>
    %c32_i32 = arith.constant 32 : i32
    %25 = vector.broadcast %c32_i32 : i32 to vector<1x128xi32>
    %26 = arith.cmpi slt, %21, %25 : vector<1x128xi32>
    %27 = arith.andi %24, %26 : vector<1x128xi1>
    %c32_i32_17 = arith.constant 32 : i32
    %28 = vector.broadcast %c32_i32_17 : i32 to vector<1x128xi32>
    %29 = arith.cmpi sge, %21, %28 : vector<1x128xi32>
    %c64_i32 = arith.constant 64 : i32
    %30 = vector.broadcast %c64_i32 : i32 to vector<1x128xi32>
    %31 = arith.cmpi slt, %21, %30 : vector<1x128xi32>
    %32 = arith.andi %29, %31 : vector<1x128xi1>
    %c64_i32_18 = arith.constant 64 : i32
    %33 = vector.broadcast %c64_i32_18 : i32 to vector<1x128xi32>
    %34 = arith.cmpi sge, %21, %33 : vector<1x128xi32>
    %c96_i32 = arith.constant 96 : i32
    %35 = vector.broadcast %c96_i32 : i32 to vector<1x128xi32>
    %36 = arith.cmpi slt, %21, %35 : vector<1x128xi32>
    %37 = arith.andi %34, %36 : vector<1x128xi1>
    %c96_i32_19 = arith.constant 96 : i32
    %38 = vector.broadcast %c96_i32_19 : i32 to vector<1x128xi32>
    %39 = arith.cmpi sge, %21, %38 : vector<1x128xi32>
    %c128_i32 = arith.constant 128 : i32
    %40 = vector.broadcast %c128_i32 : i32 to vector<1x128xi32>
    %41 = arith.cmpi slt, %21, %40 : vector<1x128xi32>
    %42 = arith.andi %39, %41 : vector<1x128xi1>
    %43 = arith.mulf %20, %20 : vector<16x128xf32>
    %cst_20 = arith.constant 0.000000e+00 : f32
    %44 = vector.shape_cast %27 : vector<1x128xi1> to vector<1x128xi1>
    %45 = vector.broadcast %44 : vector<1x128xi1> to vector<16x128xi1>
    %46 = vector.broadcast %cst_20 : f32 to vector<16x128xf32>
    %47 = arith.select %45, %43, %46 : vector<16x128xi1>, vector<16x128xf32>
    %cst_21 = arith.constant dense<0.000000e+00> : vector<16xf32>
    %48 = vector.multi_reduction <add>, %47, %cst_21 [1] : vector<16x128xf32> to vector<16xf32>
    %49 = vector.shape_cast %48 : vector<16xf32> to vector<16x1xf32>
    %cst_22 = arith.constant 1.000000e-24 : f32
    %50 = vector.broadcast %cst_22 : f32 to vector<16x1xf32>
    %51 = arith.maximumf %49, %50 : vector<16x1xf32>
    %52 = math.rsqrt %51 : vector<16x1xf32>
    %cst_23 = arith.constant 0.000000e+00 : f32
    %53 = vector.shape_cast %27 : vector<1x128xi1> to vector<1x128xi1>
    %54 = vector.broadcast %53 : vector<1x128xi1> to vector<16x128xi1>
    %55 = vector.shape_cast %52 : vector<16x1xf32> to vector<16x1xf32>
    %56 = vector.broadcast %55 : vector<16x1xf32> to vector<16x128xf32>
    %57 = vector.broadcast %cst_23 : f32 to vector<16x128xf32>
    %58 = arith.select %54, %56, %57 : vector<16x128xi1>, vector<16x128xf32>
    %cst_24 = arith.constant 0.000000e+00 : f32
    %59 = vector.shape_cast %32 : vector<1x128xi1> to vector<1x128xi1>
    %60 = vector.broadcast %59 : vector<1x128xi1> to vector<16x128xi1>
    %61 = vector.broadcast %cst_24 : f32 to vector<16x128xf32>
    %62 = arith.select %60, %43, %61 : vector<16x128xi1>, vector<16x128xf32>
    %cst_25 = arith.constant dense<0.000000e+00> : vector<16xf32>
    %63 = vector.multi_reduction <add>, %62, %cst_25 [1] : vector<16x128xf32> to vector<16xf32>
    %64 = vector.shape_cast %63 : vector<16xf32> to vector<16x1xf32>
    %cst_26 = arith.constant 1.000000e-24 : f32
    %65 = vector.broadcast %cst_26 : f32 to vector<16x1xf32>
    %66 = arith.maximumf %64, %65 : vector<16x1xf32>
    %67 = math.rsqrt %66 : vector<16x1xf32>
    %cst_27 = arith.constant 0.000000e+00 : f32
    %68 = vector.shape_cast %32 : vector<1x128xi1> to vector<1x128xi1>
    %69 = vector.broadcast %68 : vector<1x128xi1> to vector<16x128xi1>
    %70 = vector.shape_cast %67 : vector<16x1xf32> to vector<16x1xf32>
    %71 = vector.broadcast %70 : vector<16x1xf32> to vector<16x128xf32>
    %72 = vector.broadcast %cst_27 : f32 to vector<16x128xf32>
    %73 = arith.select %69, %71, %72 : vector<16x128xi1>, vector<16x128xf32>
    %74 = arith.addf %58, %73 : vector<16x128xf32>
    %cst_28 = arith.constant 0.000000e+00 : f32
    %75 = vector.shape_cast %37 : vector<1x128xi1> to vector<1x128xi1>
    %76 = vector.broadcast %75 : vector<1x128xi1> to vector<16x128xi1>
    %77 = vector.broadcast %cst_28 : f32 to vector<16x128xf32>
    %78 = arith.select %76, %43, %77 : vector<16x128xi1>, vector<16x128xf32>
    %cst_29 = arith.constant dense<0.000000e+00> : vector<16xf32>
    %79 = vector.multi_reduction <add>, %78, %cst_29 [1] : vector<16x128xf32> to vector<16xf32>
    %80 = vector.shape_cast %79 : vector<16xf32> to vector<16x1xf32>
    %cst_30 = arith.constant 1.000000e-24 : f32
    %81 = vector.broadcast %cst_30 : f32 to vector<16x1xf32>
    %82 = arith.maximumf %80, %81 : vector<16x1xf32>
    %83 = math.rsqrt %82 : vector<16x1xf32>
    %cst_31 = arith.constant 0.000000e+00 : f32
    %84 = vector.shape_cast %37 : vector<1x128xi1> to vector<1x128xi1>
    %85 = vector.broadcast %84 : vector<1x128xi1> to vector<16x128xi1>
    %86 = vector.shape_cast %83 : vector<16x1xf32> to vector<16x1xf32>
    %87 = vector.broadcast %86 : vector<16x1xf32> to vector<16x128xf32>
    %88 = vector.broadcast %cst_31 : f32 to vector<16x128xf32>
    %89 = arith.select %85, %87, %88 : vector<16x128xi1>, vector<16x128xf32>
    %90 = arith.addf %74, %89 : vector<16x128xf32>
    %cst_32 = arith.constant 0.000000e+00 : f32
    %91 = vector.shape_cast %42 : vector<1x128xi1> to vector<1x128xi1>
    %92 = vector.broadcast %91 : vector<1x128xi1> to vector<16x128xi1>
    %93 = vector.broadcast %cst_32 : f32 to vector<16x128xf32>
    %94 = arith.select %92, %43, %93 : vector<16x128xi1>, vector<16x128xf32>
    %cst_33 = arith.constant dense<0.000000e+00> : vector<16xf32>
    %95 = vector.multi_reduction <add>, %94, %cst_33 [1] : vector<16x128xf32> to vector<16xf32>
    %96 = vector.shape_cast %95 : vector<16xf32> to vector<16x1xf32>
    %cst_34 = arith.constant 1.000000e-24 : f32
    %97 = vector.broadcast %cst_34 : f32 to vector<16x1xf32>
    %98 = arith.maximumf %96, %97 : vector<16x1xf32>
    %99 = math.rsqrt %98 : vector<16x1xf32>
    %cst_35 = arith.constant 0.000000e+00 : f32
    %100 = vector.shape_cast %42 : vector<1x128xi1> to vector<1x128xi1>
    %101 = vector.broadcast %100 : vector<1x128xi1> to vector<16x128xi1>
    %102 = vector.shape_cast %99 : vector<16x1xf32> to vector<16x1xf32>
    %103 = vector.broadcast %102 : vector<16x1xf32> to vector<16x128xf32>
    %104 = vector.broadcast %cst_35 : f32 to vector<16x128xf32>
    %105 = arith.select %101, %103, %104 : vector<16x128xi1>, vector<16x128xf32>
    %106 = arith.addf %90, %105 : vector<16x128xf32>
    %107 = arith.mulf %20, %106 : vector<16x128xf32>
    %cst_36 = arith.constant dense<0.000000e+00> : vector<64x128xf32>
    %108 = tpu.matmul %1, %107, %cst_36 {dimension_numbers = #tpu.dot_dimension_numbers<[1], [0], [0], [1], [0, 0, 1, 1], [], []>} : vector<64x16xf32>, vector<16x128xf32>, vector<64x128xf32> -> vector<64x128xf32>
    %cst_37 = arith.constant dense<0.000000e+00> : vector<64x128xf32>
    %109 = tpu.matmul %3, %107, %cst_37 {dimension_numbers = #tpu.dot_dimension_numbers<[1], [0], [0], [1], [0, 0, 1, 1], [], []>} : vector<64x16xf32>, vector<16x128xf32>, vector<64x128xf32> -> vector<64x128xf32>
    %110 = arith.mulf %108, %109 : vector<64x128xf32>
    %cst_38 = arith.constant 0.000000e+00 : f32
    %111 = vector.shape_cast %27 : vector<1x128xi1> to vector<1x128xi1>
    %112 = vector.broadcast %111 : vector<1x128xi1> to vector<64x128xi1>
    %113 = vector.broadcast %cst_38 : f32 to vector<64x128xf32>
    %114 = arith.select %112, %110, %113 : vector<64x128xi1>, vector<64x128xf32>
    %cst_39 = arith.constant dense<0.000000e+00> : vector<64xf32>
    %115 = vector.multi_reduction <add>, %114, %cst_39 [1] : vector<64x128xf32> to vector<64xf32>
    %116 = vector.shape_cast %115 : vector<64xf32> to vector<64x1xf32>
    %cst_40 = arith.constant 1.000000e+00 : f32
    %117 = vector.broadcast %cst_40 : f32 to vector<64x1xf32>
    %118 = arith.mulf %116, %117 : vector<64x1xf32>
    %cst_41 = arith.constant 0.000000e+00 : f32
    %119 = vector.shape_cast %32 : vector<1x128xi1> to vector<1x128xi1>
    %120 = vector.broadcast %119 : vector<1x128xi1> to vector<64x128xi1>
    %121 = vector.broadcast %cst_41 : f32 to vector<64x128xf32>
    %122 = arith.select %120, %110, %121 : vector<64x128xi1>, vector<64x128xf32>
    %cst_42 = arith.constant dense<0.000000e+00> : vector<64xf32>
    %123 = vector.multi_reduction <add>, %122, %cst_42 [1] : vector<64x128xf32> to vector<64xf32>
    %124 = vector.shape_cast %123 : vector<64xf32> to vector<64x1xf32>
    %cst_43 = arith.constant 1.000000e+00 : f32
    %125 = vector.broadcast %cst_43 : f32 to vector<64x1xf32>
    %126 = arith.mulf %124, %125 : vector<64x1xf32>
    %cst_44 = arith.constant 0.000000e+00 : f32
    %127 = vector.shape_cast %37 : vector<1x128xi1> to vector<1x128xi1>
    %128 = vector.broadcast %127 : vector<1x128xi1> to vector<64x128xi1>
    %129 = vector.broadcast %cst_44 : f32 to vector<64x128xf32>
    %130 = arith.select %128, %110, %129 : vector<64x128xi1>, vector<64x128xf32>
    %cst_45 = arith.constant dense<0.000000e+00> : vector<64xf32>
    %131 = vector.multi_reduction <add>, %130, %cst_45 [1] : vector<64x128xf32> to vector<64xf32>
    %132 = vector.shape_cast %131 : vector<64xf32> to vector<64x1xf32>
    %cst_46 = arith.constant 1.000000e+00 : f32
    %133 = vector.broadcast %cst_46 : f32 to vector<64x1xf32>
    %134 = arith.mulf %132, %133 : vector<64x1xf32>
    %cst_47 = arith.constant 0.000000e+00 : f32
    %135 = vector.shape_cast %42 : vector<1x128xi1> to vector<1x128xi1>
    %136 = vector.broadcast %135 : vector<1x128xi1> to vector<64x128xi1>
    %137 = vector.broadcast %cst_47 : f32 to vector<64x128xf32>
    %138 = arith.select %136, %110, %137 : vector<64x128xi1>, vector<64x128xf32>
    %cst_48 = arith.constant dense<0.000000e+00> : vector<64xf32>
    %139 = vector.multi_reduction <add>, %138, %cst_48 [1] : vector<64x128xf32> to vector<64xf32>
    %140 = vector.shape_cast %139 : vector<64xf32> to vector<64x1xf32>
    %cst_49 = arith.constant 1.000000e+00 : f32
    %141 = vector.broadcast %cst_49 : f32 to vector<64x1xf32>
    %142 = arith.mulf %140, %141 : vector<64x1xf32>
    %143 = arith.maximumf %118, %126 : vector<64x1xf32>
    %144 = arith.maximumf %143, %134 : vector<64x1xf32>
    %145 = arith.maximumf %144, %142 : vector<64x1xf32>
    %146 = arith.subf %118, %145 : vector<64x1xf32>
    %147 = math.exp %146 : vector<64x1xf32>
    %148 = arith.subf %126, %145 : vector<64x1xf32>
    %149 = math.exp %148 : vector<64x1xf32>
    %150 = arith.subf %134, %145 : vector<64x1xf32>
    %151 = math.exp %150 : vector<64x1xf32>
    %152 = arith.subf %142, %145 : vector<64x1xf32>
    %153 = math.exp %152 : vector<64x1xf32>
    %154 = arith.addf %147, %149 : vector<64x1xf32>
    %155 = arith.addf %154, %151 : vector<64x1xf32>
    %156 = arith.addf %155, %153 : vector<64x1xf32>
    %157 = tpu.reciprocal %156 {approx = true} : vector<64x1xf32> -> vector<64x1xf32>
    %158 = arith.mulf %147, %157 : vector<64x1xf32>
    %cst_50 = arith.constant 0.000000e+00 : f32
    %159 = vector.shape_cast %27 : vector<1x128xi1> to vector<1x128xi1>
    %160 = vector.broadcast %159 : vector<1x128xi1> to vector<64x128xi1>
    %161 = vector.shape_cast %158 : vector<64x1xf32> to vector<64x1xf32>
    %162 = vector.broadcast %161 : vector<64x1xf32> to vector<64x128xf32>
    %163 = vector.broadcast %cst_50 : f32 to vector<64x128xf32>
    %164 = arith.select %160, %162, %163 : vector<64x128xi1>, vector<64x128xf32>
    %165 = arith.mulf %149, %157 : vector<64x1xf32>
    %cst_51 = arith.constant 0.000000e+00 : f32
    %166 = vector.shape_cast %32 : vector<1x128xi1> to vector<1x128xi1>
    %167 = vector.broadcast %166 : vector<1x128xi1> to vector<64x128xi1>
    %168 = vector.shape_cast %165 : vector<64x1xf32> to vector<64x1xf32>
    %169 = vector.broadcast %168 : vector<64x1xf32> to vector<64x128xf32>
    %170 = vector.broadcast %cst_51 : f32 to vector<64x128xf32>
    %171 = arith.select %167, %169, %170 : vector<64x128xi1>, vector<64x128xf32>
    %172 = arith.addf %164, %171 : vector<64x128xf32>
    %173 = arith.mulf %151, %157 : vector<64x1xf32>
    %cst_52 = arith.constant 0.000000e+00 : f32
    %174 = vector.shape_cast %37 : vector<1x128xi1> to vector<1x128xi1>
    %175 = vector.broadcast %174 : vector<1x128xi1> to vector<64x128xi1>
    %176 = vector.shape_cast %173 : vector<64x1xf32> to vector<64x1xf32>
    %177 = vector.broadcast %176 : vector<64x1xf32> to vector<64x128xf32>
    %178 = vector.broadcast %cst_52 : f32 to vector<64x128xf32>
    %179 = arith.select %175, %177, %178 : vector<64x128xi1>, vector<64x128xf32>
    %180 = arith.addf %172, %179 : vector<64x128xf32>
    %181 = arith.mulf %153, %157 : vector<64x1xf32>
    %cst_53 = arith.constant 0.000000e+00 : f32
    %182 = vector.shape_cast %42 : vector<1x128xi1> to vector<1x128xi1>
    %183 = vector.broadcast %182 : vector<1x128xi1> to vector<64x128xi1>
    %184 = vector.shape_cast %181 : vector<64x1xf32> to vector<64x1xf32>
    %185 = vector.broadcast %184 : vector<64x1xf32> to vector<64x128xf32>
    %186 = vector.broadcast %cst_53 : f32 to vector<64x128xf32>
    %187 = arith.select %183, %185, %186 : vector<64x128xi1>, vector<64x128xf32>
    %188 = arith.addf %180, %187 : vector<64x128xf32>
    %189 = arith.mulf %108, %188 : vector<64x128xf32>
    %cst_54 = arith.constant dense<0.000000e+00> : vector<16x128xf32>
    %190 = tpu.matmul %3, %189, %cst_54 {dimension_numbers = #tpu.dot_dimension_numbers<[0], [0], [1], [1], [0, 1, 1, 1], [], []>} : vector<64x16xf32>, vector<64x128xf32>, vector<16x128xf32> -> vector<16x128xf32>
    %191 = arith.addf %190, %107 : vector<16x128xf32>
    %192 = arith.mulf %191, %191 : vector<16x128xf32>
    %cst_55 = arith.constant 0.000000e+00 : f32
    %193 = vector.shape_cast %27 : vector<1x128xi1> to vector<1x128xi1>
    %194 = vector.broadcast %193 : vector<1x128xi1> to vector<16x128xi1>
    %195 = vector.broadcast %cst_55 : f32 to vector<16x128xf32>
    %196 = arith.select %194, %192, %195 : vector<16x128xi1>, vector<16x128xf32>
    %cst_56 = arith.constant dense<0.000000e+00> : vector<16xf32>
    %197 = vector.multi_reduction <add>, %196, %cst_56 [1] : vector<16x128xf32> to vector<16xf32>
    %198 = vector.shape_cast %197 : vector<16xf32> to vector<16x1xf32>
    %cst_57 = arith.constant 1.000000e-24 : f32
    %199 = vector.broadcast %cst_57 : f32 to vector<16x1xf32>
    %200 = arith.maximumf %198, %199 : vector<16x1xf32>
    %201 = math.rsqrt %200 : vector<16x1xf32>
    %cst_58 = arith.constant 0.000000e+00 : f32
    %202 = vector.shape_cast %27 : vector<1x128xi1> to vector<1x128xi1>
    %203 = vector.broadcast %202 : vector<1x128xi1> to vector<16x128xi1>
    %204 = vector.shape_cast %201 : vector<16x1xf32> to vector<16x1xf32>
    %205 = vector.broadcast %204 : vector<16x1xf32> to vector<16x128xf32>
    %206 = vector.broadcast %cst_58 : f32 to vector<16x128xf32>
    %207 = arith.select %203, %205, %206 : vector<16x128xi1>, vector<16x128xf32>
    %cst_59 = arith.constant 0.000000e+00 : f32
    %208 = vector.shape_cast %32 : vector<1x128xi1> to vector<1x128xi1>
    %209 = vector.broadcast %208 : vector<1x128xi1> to vector<16x128xi1>
    %210 = vector.broadcast %cst_59 : f32 to vector<16x128xf32>
    %211 = arith.select %209, %192, %210 : vector<16x128xi1>, vector<16x128xf32>
    %cst_60 = arith.constant dense<0.000000e+00> : vector<16xf32>
    %212 = vector.multi_reduction <add>, %211, %cst_60 [1] : vector<16x128xf32> to vector<16xf32>
    %213 = vector.shape_cast %212 : vector<16xf32> to vector<16x1xf32>
    %cst_61 = arith.constant 1.000000e-24 : f32
    %214 = vector.broadcast %cst_61 : f32 to vector<16x1xf32>
    %215 = arith.maximumf %213, %214 : vector<16x1xf32>
    %216 = math.rsqrt %215 : vector<16x1xf32>
    %cst_62 = arith.constant 0.000000e+00 : f32
    %217 = vector.shape_cast %32 : vector<1x128xi1> to vector<1x128xi1>
    %218 = vector.broadcast %217 : vector<1x128xi1> to vector<16x128xi1>
    %219 = vector.shape_cast %216 : vector<16x1xf32> to vector<16x1xf32>
    %220 = vector.broadcast %219 : vector<16x1xf32> to vector<16x128xf32>
    %221 = vector.broadcast %cst_62 : f32 to vector<16x128xf32>
    %222 = arith.select %218, %220, %221 : vector<16x128xi1>, vector<16x128xf32>
    %223 = arith.addf %207, %222 : vector<16x128xf32>
    %cst_63 = arith.constant 0.000000e+00 : f32
    %224 = vector.shape_cast %37 : vector<1x128xi1> to vector<1x128xi1>
    %225 = vector.broadcast %224 : vector<1x128xi1> to vector<16x128xi1>
    %226 = vector.broadcast %cst_63 : f32 to vector<16x128xf32>
    %227 = arith.select %225, %192, %226 : vector<16x128xi1>, vector<16x128xf32>
    %cst_64 = arith.constant dense<0.000000e+00> : vector<16xf32>
    %228 = vector.multi_reduction <add>, %227, %cst_64 [1] : vector<16x128xf32> to vector<16xf32>
    %229 = vector.shape_cast %228 : vector<16xf32> to vector<16x1xf32>
    %cst_65 = arith.constant 1.000000e-24 : f32
    %230 = vector.broadcast %cst_65 : f32 to vector<16x1xf32>
    %231 = arith.maximumf %229, %230 : vector<16x1xf32>
    %232 = math.rsqrt %231 : vector<16x1xf32>
    %cst_66 = arith.constant 0.000000e+00 : f32
    %233 = vector.shape_cast %37 : vector<1x128xi1> to vector<1x128xi1>
    %234 = vector.broadcast %233 : vector<1x128xi1> to vector<16x128xi1>
    %235 = vector.shape_cast %232 : vector<16x1xf32> to vector<16x1xf32>
    %236 = vector.broadcast %235 : vector<16x1xf32> to vector<16x128xf32>
    %237 = vector.broadcast %cst_66 : f32 to vector<16x128xf32>
    %238 = arith.select %234, %236, %237 : vector<16x128xi1>, vector<16x128xf32>
    %239 = arith.addf %223, %238 : vector<16x128xf32>
    %cst_67 = arith.constant 0.000000e+00 : f32
    %240 = vector.shape_cast %42 : vector<1x128xi1> to vector<1x128xi1>
    %241 = vector.broadcast %240 : vector<1x128xi1> to vector<16x128xi1>
    %242 = vector.broadcast %cst_67 : f32 to vector<16x128xf32>
    %243 = arith.select %241, %192, %242 : vector<16x128xi1>, vector<16x128xf32>
    %cst_68 = arith.constant dense<0.000000e+00> : vector<16xf32>
    %244 = vector.multi_reduction <add>, %243, %cst_68 [1] : vector<16x128xf32> to vector<16xf32>
    %245 = vector.shape_cast %244 : vector<16xf32> to vector<16x1xf32>
    %cst_69 = arith.constant 1.000000e-24 : f32
    %246 = vector.broadcast %cst_69 : f32 to vector<16x1xf32>
    %247 = arith.maximumf %245, %246 : vector<16x1xf32>
    %248 = math.rsqrt %247 : vector<16x1xf32>
    %cst_70 = arith.constant 0.000000e+00 : f32
    %249 = vector.shape_cast %42 : vector<1x128xi1> to vector<1x128xi1>
    %250 = vector.broadcast %249 : vector<1x128xi1> to vector<16x128xi1>
    %251 = vector.shape_cast %248 : vector<16x1xf32> to vector<16x1xf32>
    %252 = vector.broadcast %251 : vector<16x1xf32> to vector<16x128xf32>
    %253 = vector.broadcast %cst_70 : f32 to vector<16x128xf32>
    %254 = arith.select %250, %252, %253 : vector<16x128xi1>, vector<16x128xf32>
    %255 = arith.addf %239, %254 : vector<16x128xf32>
    %256 = arith.mulf %191, %255 : vector<16x128xf32>
    %cst_71 = arith.constant dense<0.000000e+00> : vector<64x128xf32>
    %257 = tpu.matmul %3, %256, %cst_71 {dimension_numbers = #tpu.dot_dimension_numbers<[1], [0], [0], [1], [0, 0, 1, 1], [], []>} : vector<64x16xf32>, vector<16x128xf32>, vector<64x128xf32> -> vector<64x128xf32>
    %258 = arith.mulf %108, %257 : vector<64x128xf32>
    %cst_72 = arith.constant 0.000000e+00 : f32
    %259 = vector.shape_cast %27 : vector<1x128xi1> to vector<1x128xi1>
    %260 = vector.broadcast %259 : vector<1x128xi1> to vector<64x128xi1>
    %261 = vector.broadcast %cst_72 : f32 to vector<64x128xf32>
    %262 = arith.select %260, %258, %261 : vector<64x128xi1>, vector<64x128xf32>
    %cst_73 = arith.constant dense<0.000000e+00> : vector<64xf32>
    %263 = vector.multi_reduction <add>, %262, %cst_73 [1] : vector<64x128xf32> to vector<64xf32>
    %264 = vector.shape_cast %263 : vector<64xf32> to vector<64x1xf32>
    %cst_74 = arith.constant 1.000000e+00 : f32
    %265 = vector.broadcast %cst_74 : f32 to vector<64x1xf32>
    %266 = arith.mulf %264, %265 : vector<64x1xf32>
    %cst_75 = arith.constant 0.000000e+00 : f32
    %267 = vector.shape_cast %32 : vector<1x128xi1> to vector<1x128xi1>
    %268 = vector.broadcast %267 : vector<1x128xi1> to vector<64x128xi1>
    %269 = vector.broadcast %cst_75 : f32 to vector<64x128xf32>
    %270 = arith.select %268, %258, %269 : vector<64x128xi1>, vector<64x128xf32>
    %cst_76 = arith.constant dense<0.000000e+00> : vector<64xf32>
    %271 = vector.multi_reduction <add>, %270, %cst_76 [1] : vector<64x128xf32> to vector<64xf32>
    %272 = vector.shape_cast %271 : vector<64xf32> to vector<64x1xf32>
    %cst_77 = arith.constant 1.000000e+00 : f32
    %273 = vector.broadcast %cst_77 : f32 to vector<64x1xf32>
    %274 = arith.mulf %272, %273 : vector<64x1xf32>
    %cst_78 = arith.constant 0.000000e+00 : f32
    %275 = vector.shape_cast %37 : vector<1x128xi1> to vector<1x128xi1>
    %276 = vector.broadcast %275 : vector<1x128xi1> to vector<64x128xi1>
    %277 = vector.broadcast %cst_78 : f32 to vector<64x128xf32>
    %278 = arith.select %276, %258, %277 : vector<64x128xi1>, vector<64x128xf32>
    %cst_79 = arith.constant dense<0.000000e+00> : vector<64xf32>
    %279 = vector.multi_reduction <add>, %278, %cst_79 [1] : vector<64x128xf32> to vector<64xf32>
    %280 = vector.shape_cast %279 : vector<64xf32> to vector<64x1xf32>
    %cst_80 = arith.constant 1.000000e+00 : f32
    %281 = vector.broadcast %cst_80 : f32 to vector<64x1xf32>
    %282 = arith.mulf %280, %281 : vector<64x1xf32>
    %cst_81 = arith.constant 0.000000e+00 : f32
    %283 = vector.shape_cast %42 : vector<1x128xi1> to vector<1x128xi1>
    %284 = vector.broadcast %283 : vector<1x128xi1> to vector<64x128xi1>
    %285 = vector.broadcast %cst_81 : f32 to vector<64x128xf32>
    %286 = arith.select %284, %258, %285 : vector<64x128xi1>, vector<64x128xf32>
    %cst_82 = arith.constant dense<0.000000e+00> : vector<64xf32>
    %287 = vector.multi_reduction <add>, %286, %cst_82 [1] : vector<64x128xf32> to vector<64xf32>
    %288 = vector.shape_cast %287 : vector<64xf32> to vector<64x1xf32>
    %cst_83 = arith.constant 1.000000e+00 : f32
    %289 = vector.broadcast %cst_83 : f32 to vector<64x1xf32>
    %290 = arith.mulf %288, %289 : vector<64x1xf32>
    %291 = arith.maximumf %266, %274 : vector<64x1xf32>
    %292 = arith.maximumf %291, %282 : vector<64x1xf32>
    %293 = arith.maximumf %292, %290 : vector<64x1xf32>
    %294 = arith.subf %266, %293 : vector<64x1xf32>
    %295 = math.exp %294 : vector<64x1xf32>
    %296 = arith.subf %274, %293 : vector<64x1xf32>
    %297 = math.exp %296 : vector<64x1xf32>
    %298 = arith.subf %282, %293 : vector<64x1xf32>
    %299 = math.exp %298 : vector<64x1xf32>
    %300 = arith.subf %290, %293 : vector<64x1xf32>
    %301 = math.exp %300 : vector<64x1xf32>
    %302 = arith.addf %295, %297 : vector<64x1xf32>
    %303 = arith.addf %302, %299 : vector<64x1xf32>
    %304 = arith.addf %303, %301 : vector<64x1xf32>
    %305 = tpu.reciprocal %304 {approx = true} : vector<64x1xf32> -> vector<64x1xf32>
    %306 = arith.mulf %295, %305 : vector<64x1xf32>
    %cst_84 = arith.constant 0.000000e+00 : f32
    %307 = vector.shape_cast %27 : vector<1x128xi1> to vector<1x128xi1>
    %308 = vector.broadcast %307 : vector<1x128xi1> to vector<64x128xi1>
    %309 = vector.shape_cast %306 : vector<64x1xf32> to vector<64x1xf32>
    %310 = vector.broadcast %309 : vector<64x1xf32> to vector<64x128xf32>
    %311 = vector.broadcast %cst_84 : f32 to vector<64x128xf32>
    %312 = arith.select %308, %310, %311 : vector<64x128xi1>, vector<64x128xf32>
    %313 = arith.mulf %297, %305 : vector<64x1xf32>
    %cst_85 = arith.constant 0.000000e+00 : f32
    %314 = vector.shape_cast %32 : vector<1x128xi1> to vector<1x128xi1>
    %315 = vector.broadcast %314 : vector<1x128xi1> to vector<64x128xi1>
    %316 = vector.shape_cast %313 : vector<64x1xf32> to vector<64x1xf32>
    %317 = vector.broadcast %316 : vector<64x1xf32> to vector<64x128xf32>
    %318 = vector.broadcast %cst_85 : f32 to vector<64x128xf32>
    %319 = arith.select %315, %317, %318 : vector<64x128xi1>, vector<64x128xf32>
    %320 = arith.addf %312, %319 : vector<64x128xf32>
    %321 = arith.mulf %299, %305 : vector<64x1xf32>
    %cst_86 = arith.constant 0.000000e+00 : f32
    %322 = vector.shape_cast %37 : vector<1x128xi1> to vector<1x128xi1>
    %323 = vector.broadcast %322 : vector<1x128xi1> to vector<64x128xi1>
    %324 = vector.shape_cast %321 : vector<64x1xf32> to vector<64x1xf32>
    %325 = vector.broadcast %324 : vector<64x1xf32> to vector<64x128xf32>
    %326 = vector.broadcast %cst_86 : f32 to vector<64x128xf32>
    %327 = arith.select %323, %325, %326 : vector<64x128xi1>, vector<64x128xf32>
    %328 = arith.addf %320, %327 : vector<64x128xf32>
    %329 = arith.mulf %301, %305 : vector<64x1xf32>
    %cst_87 = arith.constant 0.000000e+00 : f32
    %330 = vector.shape_cast %42 : vector<1x128xi1> to vector<1x128xi1>
    %331 = vector.broadcast %330 : vector<1x128xi1> to vector<64x128xi1>
    %332 = vector.shape_cast %329 : vector<64x1xf32> to vector<64x1xf32>
    %333 = vector.broadcast %332 : vector<64x1xf32> to vector<64x128xf32>
    %334 = vector.broadcast %cst_87 : f32 to vector<64x128xf32>
    %335 = arith.select %331, %333, %334 : vector<64x128xi1>, vector<64x128xf32>
    %336 = arith.addf %328, %335 : vector<64x128xf32>
    %337 = arith.mulf %108, %336 : vector<64x128xf32>
    %cst_88 = arith.constant dense<0.000000e+00> : vector<16x128xf32>
    %338 = tpu.matmul %3, %337, %cst_88 {dimension_numbers = #tpu.dot_dimension_numbers<[0], [0], [1], [1], [0, 1, 1, 1], [], []>} : vector<64x16xf32>, vector<64x128xf32>, vector<16x128xf32> -> vector<16x128xf32>
    %339 = arith.addf %338, %107 : vector<16x128xf32>
    %340 = arith.mulf %339, %339 : vector<16x128xf32>
    %cst_89 = arith.constant 0.000000e+00 : f32
    %341 = vector.shape_cast %27 : vector<1x128xi1> to vector<1x128xi1>
    %342 = vector.broadcast %341 : vector<1x128xi1> to vector<16x128xi1>
    %343 = vector.broadcast %cst_89 : f32 to vector<16x128xf32>
    %344 = arith.select %342, %340, %343 : vector<16x128xi1>, vector<16x128xf32>
    %cst_90 = arith.constant dense<0.000000e+00> : vector<16xf32>
    %345 = vector.multi_reduction <add>, %344, %cst_90 [1] : vector<16x128xf32> to vector<16xf32>
    %346 = vector.shape_cast %345 : vector<16xf32> to vector<16x1xf32>
    %cst_91 = arith.constant 1.000000e-24 : f32
    %347 = vector.broadcast %cst_91 : f32 to vector<16x1xf32>
    %348 = arith.maximumf %346, %347 : vector<16x1xf32>
    %349 = math.rsqrt %348 : vector<16x1xf32>
    %cst_92 = arith.constant 0.000000e+00 : f32
    %350 = vector.shape_cast %27 : vector<1x128xi1> to vector<1x128xi1>
    %351 = vector.broadcast %350 : vector<1x128xi1> to vector<16x128xi1>
    %352 = vector.shape_cast %349 : vector<16x1xf32> to vector<16x1xf32>
    %353 = vector.broadcast %352 : vector<16x1xf32> to vector<16x128xf32>
    %354 = vector.broadcast %cst_92 : f32 to vector<16x128xf32>
    %355 = arith.select %351, %353, %354 : vector<16x128xi1>, vector<16x128xf32>
    %cst_93 = arith.constant 0.000000e+00 : f32
    %356 = vector.shape_cast %32 : vector<1x128xi1> to vector<1x128xi1>
    %357 = vector.broadcast %356 : vector<1x128xi1> to vector<16x128xi1>
    %358 = vector.broadcast %cst_93 : f32 to vector<16x128xf32>
    %359 = arith.select %357, %340, %358 : vector<16x128xi1>, vector<16x128xf32>
    %cst_94 = arith.constant dense<0.000000e+00> : vector<16xf32>
    %360 = vector.multi_reduction <add>, %359, %cst_94 [1] : vector<16x128xf32> to vector<16xf32>
    %361 = vector.shape_cast %360 : vector<16xf32> to vector<16x1xf32>
    %cst_95 = arith.constant 1.000000e-24 : f32
    %362 = vector.broadcast %cst_95 : f32 to vector<16x1xf32>
    %363 = arith.maximumf %361, %362 : vector<16x1xf32>
    %364 = math.rsqrt %363 : vector<16x1xf32>
    %cst_96 = arith.constant 0.000000e+00 : f32
    %365 = vector.shape_cast %32 : vector<1x128xi1> to vector<1x128xi1>
    %366 = vector.broadcast %365 : vector<1x128xi1> to vector<16x128xi1>
    %367 = vector.shape_cast %364 : vector<16x1xf32> to vector<16x1xf32>
    %368 = vector.broadcast %367 : vector<16x1xf32> to vector<16x128xf32>
    %369 = vector.broadcast %cst_96 : f32 to vector<16x128xf32>
    %370 = arith.select %366, %368, %369 : vector<16x128xi1>, vector<16x128xf32>
    %371 = arith.addf %355, %370 : vector<16x128xf32>
    %cst_97 = arith.constant 0.000000e+00 : f32
    %372 = vector.shape_cast %37 : vector<1x128xi1> to vector<1x128xi1>
    %373 = vector.broadcast %372 : vector<1x128xi1> to vector<16x128xi1>
    %374 = vector.broadcast %cst_97 : f32 to vector<16x128xf32>
    %375 = arith.select %373, %340, %374 : vector<16x128xi1>, vector<16x128xf32>
    %cst_98 = arith.constant dense<0.000000e+00> : vector<16xf32>
    %376 = vector.multi_reduction <add>, %375, %cst_98 [1] : vector<16x128xf32> to vector<16xf32>
    %377 = vector.shape_cast %376 : vector<16xf32> to vector<16x1xf32>
    %cst_99 = arith.constant 1.000000e-24 : f32
    %378 = vector.broadcast %cst_99 : f32 to vector<16x1xf32>
    %379 = arith.maximumf %377, %378 : vector<16x1xf32>
    %380 = math.rsqrt %379 : vector<16x1xf32>
    %cst_100 = arith.constant 0.000000e+00 : f32
    %381 = vector.shape_cast %37 : vector<1x128xi1> to vector<1x128xi1>
    %382 = vector.broadcast %381 : vector<1x128xi1> to vector<16x128xi1>
    %383 = vector.shape_cast %380 : vector<16x1xf32> to vector<16x1xf32>
    %384 = vector.broadcast %383 : vector<16x1xf32> to vector<16x128xf32>
    %385 = vector.broadcast %cst_100 : f32 to vector<16x128xf32>
    %386 = arith.select %382, %384, %385 : vector<16x128xi1>, vector<16x128xf32>
    %387 = arith.addf %371, %386 : vector<16x128xf32>
    %cst_101 = arith.constant 0.000000e+00 : f32
    %388 = vector.shape_cast %42 : vector<1x128xi1> to vector<1x128xi1>
    %389 = vector.broadcast %388 : vector<1x128xi1> to vector<16x128xi1>
    %390 = vector.broadcast %cst_101 : f32 to vector<16x128xf32>
    %391 = arith.select %389, %340, %390 : vector<16x128xi1>, vector<16x128xf32>
    %cst_102 = arith.constant dense<0.000000e+00> : vector<16xf32>
    %392 = vector.multi_reduction <add>, %391, %cst_102 [1] : vector<16x128xf32> to vector<16xf32>
    %393 = vector.shape_cast %392 : vector<16xf32> to vector<16x1xf32>
    %cst_103 = arith.constant 1.000000e-24 : f32
    %394 = vector.broadcast %cst_103 : f32 to vector<16x1xf32>
    %395 = arith.maximumf %393, %394 : vector<16x1xf32>
    %396 = math.rsqrt %395 : vector<16x1xf32>
    %cst_104 = arith.constant 0.000000e+00 : f32
    %397 = vector.shape_cast %42 : vector<1x128xi1> to vector<1x128xi1>
    %398 = vector.broadcast %397 : vector<1x128xi1> to vector<16x128xi1>
    %399 = vector.shape_cast %396 : vector<16x1xf32> to vector<16x1xf32>
    %400 = vector.broadcast %399 : vector<16x1xf32> to vector<16x128xf32>
    %401 = vector.broadcast %cst_104 : f32 to vector<16x128xf32>
    %402 = arith.select %398, %400, %401 : vector<16x128xi1>, vector<16x128xf32>
    %403 = arith.addf %387, %402 : vector<16x128xf32>
    %404 = arith.mulf %339, %403 : vector<16x128xf32>
    %cst_105 = arith.constant dense<0.000000e+00> : vector<64x128xf32>
    %405 = tpu.matmul %3, %404, %cst_105 {dimension_numbers = #tpu.dot_dimension_numbers<[1], [0], [0], [1], [0, 0, 1, 1], [], []>} : vector<64x16xf32>, vector<16x128xf32>, vector<64x128xf32> -> vector<64x128xf32>
    %406 = arith.mulf %108, %405 : vector<64x128xf32>
    %cst_106 = arith.constant 0.000000e+00 : f32
    %407 = vector.shape_cast %27 : vector<1x128xi1> to vector<1x128xi1>
    %408 = vector.broadcast %407 : vector<1x128xi1> to vector<64x128xi1>
    %409 = vector.broadcast %cst_106 : f32 to vector<64x128xf32>
    %410 = arith.select %408, %406, %409 : vector<64x128xi1>, vector<64x128xf32>
    %cst_107 = arith.constant dense<0.000000e+00> : vector<64xf32>
    %411 = vector.multi_reduction <add>, %410, %cst_107 [1] : vector<64x128xf32> to vector<64xf32>
    %412 = vector.shape_cast %411 : vector<64xf32> to vector<64x1xf32>
    %cst_108 = arith.constant 1.000000e+00 : f32
    %413 = vector.broadcast %cst_108 : f32 to vector<64x1xf32>
    %414 = arith.mulf %412, %413 : vector<64x1xf32>
    %cst_109 = arith.constant 0.000000e+00 : f32
    %415 = vector.shape_cast %32 : vector<1x128xi1> to vector<1x128xi1>
    %416 = vector.broadcast %415 : vector<1x128xi1> to vector<64x128xi1>
    %417 = vector.broadcast %cst_109 : f32 to vector<64x128xf32>
    %418 = arith.select %416, %406, %417 : vector<64x128xi1>, vector<64x128xf32>
    %cst_110 = arith.constant dense<0.000000e+00> : vector<64xf32>
    %419 = vector.multi_reduction <add>, %418, %cst_110 [1] : vector<64x128xf32> to vector<64xf32>
    %420 = vector.shape_cast %419 : vector<64xf32> to vector<64x1xf32>
    %cst_111 = arith.constant 1.000000e+00 : f32
    %421 = vector.broadcast %cst_111 : f32 to vector<64x1xf32>
    %422 = arith.mulf %420, %421 : vector<64x1xf32>
    %cst_112 = arith.constant 0.000000e+00 : f32
    %423 = vector.shape_cast %37 : vector<1x128xi1> to vector<1x128xi1>
    %424 = vector.broadcast %423 : vector<1x128xi1> to vector<64x128xi1>
    %425 = vector.broadcast %cst_112 : f32 to vector<64x128xf32>
    %426 = arith.select %424, %406, %425 : vector<64x128xi1>, vector<64x128xf32>
    %cst_113 = arith.constant dense<0.000000e+00> : vector<64xf32>
    %427 = vector.multi_reduction <add>, %426, %cst_113 [1] : vector<64x128xf32> to vector<64xf32>
    %428 = vector.shape_cast %427 : vector<64xf32> to vector<64x1xf32>
    %cst_114 = arith.constant 1.000000e+00 : f32
    %429 = vector.broadcast %cst_114 : f32 to vector<64x1xf32>
    %430 = arith.mulf %428, %429 : vector<64x1xf32>
    %cst_115 = arith.constant 0.000000e+00 : f32
    %431 = vector.shape_cast %42 : vector<1x128xi1> to vector<1x128xi1>
    %432 = vector.broadcast %431 : vector<1x128xi1> to vector<64x128xi1>
    %433 = vector.broadcast %cst_115 : f32 to vector<64x128xf32>
    %434 = arith.select %432, %406, %433 : vector<64x128xi1>, vector<64x128xf32>
    %cst_116 = arith.constant dense<0.000000e+00> : vector<64xf32>
    %435 = vector.multi_reduction <add>, %434, %cst_116 [1] : vector<64x128xf32> to vector<64xf32>
    %436 = vector.shape_cast %435 : vector<64xf32> to vector<64x1xf32>
    %cst_117 = arith.constant 1.000000e+00 : f32
    %437 = vector.broadcast %cst_117 : f32 to vector<64x1xf32>
    %438 = arith.mulf %436, %437 : vector<64x1xf32>
    %439 = arith.maximumf %414, %422 : vector<64x1xf32>
    %440 = arith.maximumf %439, %430 : vector<64x1xf32>
    %441 = arith.maximumf %440, %438 : vector<64x1xf32>
    %442 = arith.subf %414, %441 : vector<64x1xf32>
    %443 = math.exp %442 : vector<64x1xf32>
    %444 = arith.subf %422, %441 : vector<64x1xf32>
    %445 = math.exp %444 : vector<64x1xf32>
    %446 = arith.subf %430, %441 : vector<64x1xf32>
    %447 = math.exp %446 : vector<64x1xf32>
    %448 = arith.subf %438, %441 : vector<64x1xf32>
    %449 = math.exp %448 : vector<64x1xf32>
    %450 = arith.addf %443, %445 : vector<64x1xf32>
    %451 = arith.addf %450, %447 : vector<64x1xf32>
    %452 = arith.addf %451, %449 : vector<64x1xf32>
    %453 = tpu.reciprocal %452 {approx = true} : vector<64x1xf32> -> vector<64x1xf32>
    %454 = arith.mulf %443, %453 : vector<64x1xf32>
    %cst_118 = arith.constant 0.000000e+00 : f32
    %455 = vector.shape_cast %27 : vector<1x128xi1> to vector<1x128xi1>
    %456 = vector.broadcast %455 : vector<1x128xi1> to vector<64x128xi1>
    %457 = vector.shape_cast %454 : vector<64x1xf32> to vector<64x1xf32>
    %458 = vector.broadcast %457 : vector<64x1xf32> to vector<64x128xf32>
    %459 = vector.broadcast %cst_118 : f32 to vector<64x128xf32>
    %460 = arith.select %456, %458, %459 : vector<64x128xi1>, vector<64x128xf32>
    %461 = arith.mulf %445, %453 : vector<64x1xf32>
    %cst_119 = arith.constant 0.000000e+00 : f32
    %462 = vector.shape_cast %32 : vector<1x128xi1> to vector<1x128xi1>
    %463 = vector.broadcast %462 : vector<1x128xi1> to vector<64x128xi1>
    %464 = vector.shape_cast %461 : vector<64x1xf32> to vector<64x1xf32>
    %465 = vector.broadcast %464 : vector<64x1xf32> to vector<64x128xf32>
    %466 = vector.broadcast %cst_119 : f32 to vector<64x128xf32>
    %467 = arith.select %463, %465, %466 : vector<64x128xi1>, vector<64x128xf32>
    %468 = arith.addf %460, %467 : vector<64x128xf32>
    %469 = arith.mulf %447, %453 : vector<64x1xf32>
    %cst_120 = arith.constant 0.000000e+00 : f32
    %470 = vector.shape_cast %37 : vector<1x128xi1> to vector<1x128xi1>
    %471 = vector.broadcast %470 : vector<1x128xi1> to vector<64x128xi1>
    %472 = vector.shape_cast %469 : vector<64x1xf32> to vector<64x1xf32>
    %473 = vector.broadcast %472 : vector<64x1xf32> to vector<64x128xf32>
    %474 = vector.broadcast %cst_120 : f32 to vector<64x128xf32>
    %475 = arith.select %471, %473, %474 : vector<64x128xi1>, vector<64x128xf32>
    %476 = arith.addf %468, %475 : vector<64x128xf32>
    %477 = arith.mulf %449, %453 : vector<64x1xf32>
    %cst_121 = arith.constant 0.000000e+00 : f32
    %478 = vector.shape_cast %42 : vector<1x128xi1> to vector<1x128xi1>
    %479 = vector.broadcast %478 : vector<1x128xi1> to vector<64x128xi1>
    %480 = vector.shape_cast %477 : vector<64x1xf32> to vector<64x1xf32>
    %481 = vector.broadcast %480 : vector<64x1xf32> to vector<64x128xf32>
    %482 = vector.broadcast %cst_121 : f32 to vector<64x128xf32>
    %483 = arith.select %479, %481, %482 : vector<64x128xi1>, vector<64x128xf32>
    %484 = arith.addf %476, %483 : vector<64x128xf32>
    %485 = arith.mulf %108, %484 : vector<64x128xf32>
    %cst_122 = arith.constant dense<0.000000e+00> : vector<16x128xf32>
    %486 = tpu.matmul %3, %485, %cst_122 {dimension_numbers = #tpu.dot_dimension_numbers<[0], [0], [1], [1], [0, 1, 1, 1], [], []>} : vector<64x16xf32>, vector<64x128xf32>, vector<16x128xf32> -> vector<16x128xf32>
    %487 = arith.addf %486, %107 : vector<16x128xf32>
    %488 = arith.mulf %487, %487 : vector<16x128xf32>
    %cst_123 = arith.constant 0.000000e+00 : f32
    %489 = vector.shape_cast %27 : vector<1x128xi1> to vector<1x128xi1>
    %490 = vector.broadcast %489 : vector<1x128xi1> to vector<16x128xi1>
    %491 = vector.broadcast %cst_123 : f32 to vector<16x128xf32>
    %492 = arith.select %490, %488, %491 : vector<16x128xi1>, vector<16x128xf32>
    %cst_124 = arith.constant dense<0.000000e+00> : vector<16xf32>
    %493 = vector.multi_reduction <add>, %492, %cst_124 [1] : vector<16x128xf32> to vector<16xf32>
    %494 = vector.shape_cast %493 : vector<16xf32> to vector<16x1xf32>
    %cst_125 = arith.constant 1.000000e-24 : f32
    %495 = vector.broadcast %cst_125 : f32 to vector<16x1xf32>
    %496 = arith.maximumf %494, %495 : vector<16x1xf32>
    %497 = math.rsqrt %496 : vector<16x1xf32>
    %cst_126 = arith.constant 0.000000e+00 : f32
    %498 = vector.shape_cast %27 : vector<1x128xi1> to vector<1x128xi1>
    %499 = vector.broadcast %498 : vector<1x128xi1> to vector<16x128xi1>
    %500 = vector.shape_cast %497 : vector<16x1xf32> to vector<16x1xf32>
    %501 = vector.broadcast %500 : vector<16x1xf32> to vector<16x128xf32>
    %502 = vector.broadcast %cst_126 : f32 to vector<16x128xf32>
    %503 = arith.select %499, %501, %502 : vector<16x128xi1>, vector<16x128xf32>
    %cst_127 = arith.constant 0.000000e+00 : f32
    %504 = vector.shape_cast %32 : vector<1x128xi1> to vector<1x128xi1>
    %505 = vector.broadcast %504 : vector<1x128xi1> to vector<16x128xi1>
    %506 = vector.broadcast %cst_127 : f32 to vector<16x128xf32>
    %507 = arith.select %505, %488, %506 : vector<16x128xi1>, vector<16x128xf32>
    %cst_128 = arith.constant dense<0.000000e+00> : vector<16xf32>
    %508 = vector.multi_reduction <add>, %507, %cst_128 [1] : vector<16x128xf32> to vector<16xf32>
    %509 = vector.shape_cast %508 : vector<16xf32> to vector<16x1xf32>
    %cst_129 = arith.constant 1.000000e-24 : f32
    %510 = vector.broadcast %cst_129 : f32 to vector<16x1xf32>
    %511 = arith.maximumf %509, %510 : vector<16x1xf32>
    %512 = math.rsqrt %511 : vector<16x1xf32>
    %cst_130 = arith.constant 0.000000e+00 : f32
    %513 = vector.shape_cast %32 : vector<1x128xi1> to vector<1x128xi1>
    %514 = vector.broadcast %513 : vector<1x128xi1> to vector<16x128xi1>
    %515 = vector.shape_cast %512 : vector<16x1xf32> to vector<16x1xf32>
    %516 = vector.broadcast %515 : vector<16x1xf32> to vector<16x128xf32>
    %517 = vector.broadcast %cst_130 : f32 to vector<16x128xf32>
    %518 = arith.select %514, %516, %517 : vector<16x128xi1>, vector<16x128xf32>
    %519 = arith.addf %503, %518 : vector<16x128xf32>
    %cst_131 = arith.constant 0.000000e+00 : f32
    %520 = vector.shape_cast %37 : vector<1x128xi1> to vector<1x128xi1>
    %521 = vector.broadcast %520 : vector<1x128xi1> to vector<16x128xi1>
    %522 = vector.broadcast %cst_131 : f32 to vector<16x128xf32>
    %523 = arith.select %521, %488, %522 : vector<16x128xi1>, vector<16x128xf32>
    %cst_132 = arith.constant dense<0.000000e+00> : vector<16xf32>
    %524 = vector.multi_reduction <add>, %523, %cst_132 [1] : vector<16x128xf32> to vector<16xf32>
    %525 = vector.shape_cast %524 : vector<16xf32> to vector<16x1xf32>
    %cst_133 = arith.constant 1.000000e-24 : f32
    %526 = vector.broadcast %cst_133 : f32 to vector<16x1xf32>
    %527 = arith.maximumf %525, %526 : vector<16x1xf32>
    %528 = math.rsqrt %527 : vector<16x1xf32>
    %cst_134 = arith.constant 0.000000e+00 : f32
    %529 = vector.shape_cast %37 : vector<1x128xi1> to vector<1x128xi1>
    %530 = vector.broadcast %529 : vector<1x128xi1> to vector<16x128xi1>
    %531 = vector.shape_cast %528 : vector<16x1xf32> to vector<16x1xf32>
    %532 = vector.broadcast %531 : vector<16x1xf32> to vector<16x128xf32>
    %533 = vector.broadcast %cst_134 : f32 to vector<16x128xf32>
    %534 = arith.select %530, %532, %533 : vector<16x128xi1>, vector<16x128xf32>
    %535 = arith.addf %519, %534 : vector<16x128xf32>
    %cst_135 = arith.constant 0.000000e+00 : f32
    %536 = vector.shape_cast %42 : vector<1x128xi1> to vector<1x128xi1>
    %537 = vector.broadcast %536 : vector<1x128xi1> to vector<16x128xi1>
    %538 = vector.broadcast %cst_135 : f32 to vector<16x128xf32>
    %539 = arith.select %537, %488, %538 : vector<16x128xi1>, vector<16x128xf32>
    %cst_136 = arith.constant dense<0.000000e+00> : vector<16xf32>
    %540 = vector.multi_reduction <add>, %539, %cst_136 [1] : vector<16x128xf32> to vector<16xf32>
    %541 = vector.shape_cast %540 : vector<16xf32> to vector<16x1xf32>
    %cst_137 = arith.constant 1.000000e-24 : f32
    %542 = vector.broadcast %cst_137 : f32 to vector<16x1xf32>
    %543 = arith.maximumf %541, %542 : vector<16x1xf32>
    %544 = math.rsqrt %543 : vector<16x1xf32>
    %cst_138 = arith.constant 0.000000e+00 : f32
    %545 = vector.shape_cast %42 : vector<1x128xi1> to vector<1x128xi1>
    %546 = vector.broadcast %545 : vector<1x128xi1> to vector<16x128xi1>
    %547 = vector.shape_cast %544 : vector<16x1xf32> to vector<16x1xf32>
    %548 = vector.broadcast %547 : vector<16x1xf32> to vector<16x128xf32>
    %549 = vector.broadcast %cst_138 : f32 to vector<16x128xf32>
    %550 = arith.select %546, %548, %549 : vector<16x128xi1>, vector<16x128xf32>
    %551 = arith.addf %535, %550 : vector<16x128xf32>
    %552 = arith.mulf %487, %551 : vector<16x128xf32>
    %553 = vector.broadcast %22 : vector<16x1xf32> to vector<16x128xf32>
    %554 = arith.mulf %552, %553 : vector<16x128xf32>
    %c0_139 = arith.constant 0 : index
    %c0_140 = arith.constant 0 : index
    %c0_141 = arith.constant 0 : index
    %555 = vector.load %arg7[%c0_139, %c0_140, %c0_141] : memref<3x1x128xf32, #tpu.memory_space<vmem>>, vector<1x1x128xf32>
    %556 = vector.shape_cast %555 : vector<1x1x128xf32> to vector<1x128xf32>
    %557 = vector.broadcast %556 : vector<1x128xf32> to vector<16x128xf32>
    %558 = arith.mulf %554, %557 : vector<16x128xf32>
    %c0_142 = arith.constant 0 : index
    %c0_143 = arith.constant 0 : index
    %c0_144 = arith.constant 0 : index
    %559 = vector.load %arg8[%c0_142, %c0_143, %c0_144] : memref<3x1x128xf32, #tpu.memory_space<vmem>>, vector<1x1x128xf32>
    %560 = vector.shape_cast %559 : vector<1x1x128xf32> to vector<1x128xf32>
    %561 = vector.broadcast %560 : vector<1x128xf32> to vector<16x128xf32>
    %562 = arith.addf %558, %561 : vector<16x128xf32>
    %cst_145 = arith.constant 0.000000e+00 : f32
    %563 = vector.broadcast %cst_145 : f32 to vector<16x128xf32>
    %564 = arith.cmpf ogt, %562, %563 : vector<16x128xf32>
    %cst_146 = arith.constant 0.000000e+00 : f32
    %565 = vector.broadcast %cst_146 : f32 to vector<16x128xf32>
    %566 = arith.minimumf %562, %565 : vector<16x128xf32>
    %567 = math.exp %566 : vector<16x128xf32>
    %cst_147 = arith.constant 1.000000e+00 : f32
    %568 = vector.broadcast %cst_147 : f32 to vector<16x128xf32>
    %569 = arith.subf %567, %568 : vector<16x128xf32>
    %570 = arith.select %564, %562, %569 : vector<16x128xi1>, vector<16x128xf32>
    %c0_i32_148 = arith.constant 0 : i32
    %571 = vector.broadcast %c0_i32_148 : i32 to vector<1x128xi32>
    %572 = arith.cmpi sge, %21, %571 : vector<1x128xi32>
    %c32_i32_149 = arith.constant 32 : i32
    %573 = vector.broadcast %c32_i32_149 : i32 to vector<1x128xi32>
    %574 = arith.cmpi slt, %21, %573 : vector<1x128xi32>
    %575 = arith.andi %572, %574 : vector<1x128xi1>
    %c32_i32_150 = arith.constant 32 : i32
    %576 = vector.broadcast %c32_i32_150 : i32 to vector<1x128xi32>
    %577 = arith.cmpi sge, %21, %576 : vector<1x128xi32>
    %c64_i32_151 = arith.constant 64 : i32
    %578 = vector.broadcast %c64_i32_151 : i32 to vector<1x128xi32>
    %579 = arith.cmpi slt, %21, %578 : vector<1x128xi32>
    %580 = arith.andi %577, %579 : vector<1x128xi1>
    %c64_i32_152 = arith.constant 64 : i32
    %581 = vector.broadcast %c64_i32_152 : i32 to vector<1x128xi32>
    %582 = arith.cmpi sge, %21, %581 : vector<1x128xi32>
    %c96_i32_153 = arith.constant 96 : i32
    %583 = vector.broadcast %c96_i32_153 : i32 to vector<1x128xi32>
    %584 = arith.cmpi slt, %21, %583 : vector<1x128xi32>
    %585 = arith.andi %582, %584 : vector<1x128xi1>
    %c96_i32_154 = arith.constant 96 : i32
    %586 = vector.broadcast %c96_i32_154 : i32 to vector<1x128xi32>
    %587 = arith.cmpi sge, %21, %586 : vector<1x128xi32>
    %c128_i32_155 = arith.constant 128 : i32
    %588 = vector.broadcast %c128_i32_155 : i32 to vector<1x128xi32>
    %589 = arith.cmpi slt, %21, %588 : vector<1x128xi32>
    %590 = arith.andi %587, %589 : vector<1x128xi1>
    %591 = arith.mulf %570, %570 : vector<16x128xf32>
    %cst_156 = arith.constant 0.000000e+00 : f32
    %592 = vector.shape_cast %575 : vector<1x128xi1> to vector<1x128xi1>
    %593 = vector.broadcast %592 : vector<1x128xi1> to vector<16x128xi1>
    %594 = vector.broadcast %cst_156 : f32 to vector<16x128xf32>
    %595 = arith.select %593, %591, %594 : vector<16x128xi1>, vector<16x128xf32>
    %cst_157 = arith.constant dense<0.000000e+00> : vector<16xf32>
    %596 = vector.multi_reduction <add>, %595, %cst_157 [1] : vector<16x128xf32> to vector<16xf32>
    %597 = vector.shape_cast %596 : vector<16xf32> to vector<16x1xf32>
    %cst_158 = arith.constant 1.000000e-24 : f32
    %598 = vector.broadcast %cst_158 : f32 to vector<16x1xf32>
    %599 = arith.maximumf %597, %598 : vector<16x1xf32>
    %600 = math.rsqrt %599 : vector<16x1xf32>
    %cst_159 = arith.constant 0.000000e+00 : f32
    %601 = vector.shape_cast %575 : vector<1x128xi1> to vector<1x128xi1>
    %602 = vector.broadcast %601 : vector<1x128xi1> to vector<16x128xi1>
    %603 = vector.shape_cast %600 : vector<16x1xf32> to vector<16x1xf32>
    %604 = vector.broadcast %603 : vector<16x1xf32> to vector<16x128xf32>
    %605 = vector.broadcast %cst_159 : f32 to vector<16x128xf32>
    %606 = arith.select %602, %604, %605 : vector<16x128xi1>, vector<16x128xf32>
    %cst_160 = arith.constant 0.000000e+00 : f32
    %607 = vector.shape_cast %580 : vector<1x128xi1> to vector<1x128xi1>
    %608 = vector.broadcast %607 : vector<1x128xi1> to vector<16x128xi1>
    %609 = vector.broadcast %cst_160 : f32 to vector<16x128xf32>
    %610 = arith.select %608, %591, %609 : vector<16x128xi1>, vector<16x128xf32>
    %cst_161 = arith.constant dense<0.000000e+00> : vector<16xf32>
    %611 = vector.multi_reduction <add>, %610, %cst_161 [1] : vector<16x128xf32> to vector<16xf32>
    %612 = vector.shape_cast %611 : vector<16xf32> to vector<16x1xf32>
    %cst_162 = arith.constant 1.000000e-24 : f32
    %613 = vector.broadcast %cst_162 : f32 to vector<16x1xf32>
    %614 = arith.maximumf %612, %613 : vector<16x1xf32>
    %615 = math.rsqrt %614 : vector<16x1xf32>
    %cst_163 = arith.constant 0.000000e+00 : f32
    %616 = vector.shape_cast %580 : vector<1x128xi1> to vector<1x128xi1>
    %617 = vector.broadcast %616 : vector<1x128xi1> to vector<16x128xi1>
    %618 = vector.shape_cast %615 : vector<16x1xf32> to vector<16x1xf32>
    %619 = vector.broadcast %618 : vector<16x1xf32> to vector<16x128xf32>
    %620 = vector.broadcast %cst_163 : f32 to vector<16x128xf32>
    %621 = arith.select %617, %619, %620 : vector<16x128xi1>, vector<16x128xf32>
    %622 = arith.addf %606, %621 : vector<16x128xf32>
    %cst_164 = arith.constant 0.000000e+00 : f32
    %623 = vector.shape_cast %585 : vector<1x128xi1> to vector<1x128xi1>
    %624 = vector.broadcast %623 : vector<1x128xi1> to vector<16x128xi1>
    %625 = vector.broadcast %cst_164 : f32 to vector<16x128xf32>
    %626 = arith.select %624, %591, %625 : vector<16x128xi1>, vector<16x128xf32>
    %cst_165 = arith.constant dense<0.000000e+00> : vector<16xf32>
    %627 = vector.multi_reduction <add>, %626, %cst_165 [1] : vector<16x128xf32> to vector<16xf32>
    %628 = vector.shape_cast %627 : vector<16xf32> to vector<16x1xf32>
    %cst_166 = arith.constant 1.000000e-24 : f32
    %629 = vector.broadcast %cst_166 : f32 to vector<16x1xf32>
    %630 = arith.maximumf %628, %629 : vector<16x1xf32>
    %631 = math.rsqrt %630 : vector<16x1xf32>
    %cst_167 = arith.constant 0.000000e+00 : f32
    %632 = vector.shape_cast %585 : vector<1x128xi1> to vector<1x128xi1>
    %633 = vector.broadcast %632 : vector<1x128xi1> to vector<16x128xi1>
    %634 = vector.shape_cast %631 : vector<16x1xf32> to vector<16x1xf32>
    %635 = vector.broadcast %634 : vector<16x1xf32> to vector<16x128xf32>
    %636 = vector.broadcast %cst_167 : f32 to vector<16x128xf32>
    %637 = arith.select %633, %635, %636 : vector<16x128xi1>, vector<16x128xf32>
    %638 = arith.addf %622, %637 : vector<16x128xf32>
    %cst_168 = arith.constant 0.000000e+00 : f32
    %639 = vector.shape_cast %590 : vector<1x128xi1> to vector<1x128xi1>
    %640 = vector.broadcast %639 : vector<1x128xi1> to vector<16x128xi1>
    %641 = vector.broadcast %cst_168 : f32 to vector<16x128xf32>
    %642 = arith.select %640, %591, %641 : vector<16x128xi1>, vector<16x128xf32>
    %cst_169 = arith.constant dense<0.000000e+00> : vector<16xf32>
    %643 = vector.multi_reduction <add>, %642, %cst_169 [1] : vector<16x128xf32> to vector<16xf32>
    %644 = vector.shape_cast %643 : vector<16xf32> to vector<16x1xf32>
    %cst_170 = arith.constant 1.000000e-24 : f32
    %645 = vector.broadcast %cst_170 : f32 to vector<16x1xf32>
    %646 = arith.maximumf %644, %645 : vector<16x1xf32>
    %647 = math.rsqrt %646 : vector<16x1xf32>
    %cst_171 = arith.constant 0.000000e+00 : f32
    %648 = vector.shape_cast %590 : vector<1x128xi1> to vector<1x128xi1>
    %649 = vector.broadcast %648 : vector<1x128xi1> to vector<16x128xi1>
    %650 = vector.shape_cast %647 : vector<16x1xf32> to vector<16x1xf32>
    %651 = vector.broadcast %650 : vector<16x1xf32> to vector<16x128xf32>
    %652 = vector.broadcast %cst_171 : f32 to vector<16x128xf32>
    %653 = arith.select %649, %651, %652 : vector<16x128xi1>, vector<16x128xf32>
    %654 = arith.addf %638, %653 : vector<16x128xf32>
    %655 = arith.mulf %570, %654 : vector<16x128xf32>
    %cst_172 = arith.constant dense<0.000000e+00> : vector<64x128xf32>
    %656 = tpu.matmul %1, %655, %cst_172 {dimension_numbers = #tpu.dot_dimension_numbers<[1], [0], [0], [1], [0, 0, 1, 1], [], []>} : vector<64x16xf32>, vector<16x128xf32>, vector<64x128xf32> -> vector<64x128xf32>
    %cst_173 = arith.constant dense<0.000000e+00> : vector<64x128xf32>
    %657 = tpu.matmul %3, %655, %cst_173 {dimension_numbers = #tpu.dot_dimension_numbers<[1], [0], [0], [1], [0, 0, 1, 1], [], []>} : vector<64x16xf32>, vector<16x128xf32>, vector<64x128xf32> -> vector<64x128xf32>
    %658 = arith.mulf %656, %657 : vector<64x128xf32>
    %cst_174 = arith.constant 0.000000e+00 : f32
    %659 = vector.shape_cast %575 : vector<1x128xi1> to vector<1x128xi1>
    %660 = vector.broadcast %659 : vector<1x128xi1> to vector<64x128xi1>
    %661 = vector.broadcast %cst_174 : f32 to vector<64x128xf32>
    %662 = arith.select %660, %658, %661 : vector<64x128xi1>, vector<64x128xf32>
    %cst_175 = arith.constant dense<0.000000e+00> : vector<64xf32>
    %663 = vector.multi_reduction <add>, %662, %cst_175 [1] : vector<64x128xf32> to vector<64xf32>
    %664 = vector.shape_cast %663 : vector<64xf32> to vector<64x1xf32>
    %cst_176 = arith.constant 1.000000e+00 : f32
    %665 = vector.broadcast %cst_176 : f32 to vector<64x1xf32>
    %666 = arith.mulf %664, %665 : vector<64x1xf32>
    %cst_177 = arith.constant 0.000000e+00 : f32
    %667 = vector.shape_cast %580 : vector<1x128xi1> to vector<1x128xi1>
    %668 = vector.broadcast %667 : vector<1x128xi1> to vector<64x128xi1>
    %669 = vector.broadcast %cst_177 : f32 to vector<64x128xf32>
    %670 = arith.select %668, %658, %669 : vector<64x128xi1>, vector<64x128xf32>
    %cst_178 = arith.constant dense<0.000000e+00> : vector<64xf32>
    %671 = vector.multi_reduction <add>, %670, %cst_178 [1] : vector<64x128xf32> to vector<64xf32>
    %672 = vector.shape_cast %671 : vector<64xf32> to vector<64x1xf32>
    %cst_179 = arith.constant 1.000000e+00 : f32
    %673 = vector.broadcast %cst_179 : f32 to vector<64x1xf32>
    %674 = arith.mulf %672, %673 : vector<64x1xf32>
    %cst_180 = arith.constant 0.000000e+00 : f32
    %675 = vector.shape_cast %585 : vector<1x128xi1> to vector<1x128xi1>
    %676 = vector.broadcast %675 : vector<1x128xi1> to vector<64x128xi1>
    %677 = vector.broadcast %cst_180 : f32 to vector<64x128xf32>
    %678 = arith.select %676, %658, %677 : vector<64x128xi1>, vector<64x128xf32>
    %cst_181 = arith.constant dense<0.000000e+00> : vector<64xf32>
    %679 = vector.multi_reduction <add>, %678, %cst_181 [1] : vector<64x128xf32> to vector<64xf32>
    %680 = vector.shape_cast %679 : vector<64xf32> to vector<64x1xf32>
    %cst_182 = arith.constant 1.000000e+00 : f32
    %681 = vector.broadcast %cst_182 : f32 to vector<64x1xf32>
    %682 = arith.mulf %680, %681 : vector<64x1xf32>
    %cst_183 = arith.constant 0.000000e+00 : f32
    %683 = vector.shape_cast %590 : vector<1x128xi1> to vector<1x128xi1>
    %684 = vector.broadcast %683 : vector<1x128xi1> to vector<64x128xi1>
    %685 = vector.broadcast %cst_183 : f32 to vector<64x128xf32>
    %686 = arith.select %684, %658, %685 : vector<64x128xi1>, vector<64x128xf32>
    %cst_184 = arith.constant dense<0.000000e+00> : vector<64xf32>
    %687 = vector.multi_reduction <add>, %686, %cst_184 [1] : vector<64x128xf32> to vector<64xf32>
    %688 = vector.shape_cast %687 : vector<64xf32> to vector<64x1xf32>
    %cst_185 = arith.constant 1.000000e+00 : f32
    %689 = vector.broadcast %cst_185 : f32 to vector<64x1xf32>
    %690 = arith.mulf %688, %689 : vector<64x1xf32>
    %691 = arith.maximumf %666, %674 : vector<64x1xf32>
    %692 = arith.maximumf %691, %682 : vector<64x1xf32>
    %693 = arith.maximumf %692, %690 : vector<64x1xf32>
    %694 = arith.subf %666, %693 : vector<64x1xf32>
    %695 = math.exp %694 : vector<64x1xf32>
    %696 = arith.subf %674, %693 : vector<64x1xf32>
    %697 = math.exp %696 : vector<64x1xf32>
    %698 = arith.subf %682, %693 : vector<64x1xf32>
    %699 = math.exp %698 : vector<64x1xf32>
    %700 = arith.subf %690, %693 : vector<64x1xf32>
    %701 = math.exp %700 : vector<64x1xf32>
    %702 = arith.addf %695, %697 : vector<64x1xf32>
    %703 = arith.addf %702, %699 : vector<64x1xf32>
    %704 = arith.addf %703, %701 : vector<64x1xf32>
    %705 = tpu.reciprocal %704 {approx = true} : vector<64x1xf32> -> vector<64x1xf32>
    %706 = arith.mulf %695, %705 : vector<64x1xf32>
    %cst_186 = arith.constant 0.000000e+00 : f32
    %707 = vector.shape_cast %575 : vector<1x128xi1> to vector<1x128xi1>
    %708 = vector.broadcast %707 : vector<1x128xi1> to vector<64x128xi1>
    %709 = vector.shape_cast %706 : vector<64x1xf32> to vector<64x1xf32>
    %710 = vector.broadcast %709 : vector<64x1xf32> to vector<64x128xf32>
    %711 = vector.broadcast %cst_186 : f32 to vector<64x128xf32>
    %712 = arith.select %708, %710, %711 : vector<64x128xi1>, vector<64x128xf32>
    %713 = arith.mulf %697, %705 : vector<64x1xf32>
    %cst_187 = arith.constant 0.000000e+00 : f32
    %714 = vector.shape_cast %580 : vector<1x128xi1> to vector<1x128xi1>
    %715 = vector.broadcast %714 : vector<1x128xi1> to vector<64x128xi1>
    %716 = vector.shape_cast %713 : vector<64x1xf32> to vector<64x1xf32>
    %717 = vector.broadcast %716 : vector<64x1xf32> to vector<64x128xf32>
    %718 = vector.broadcast %cst_187 : f32 to vector<64x128xf32>
    %719 = arith.select %715, %717, %718 : vector<64x128xi1>, vector<64x128xf32>
    %720 = arith.addf %712, %719 : vector<64x128xf32>
    %721 = arith.mulf %699, %705 : vector<64x1xf32>
    %cst_188 = arith.constant 0.000000e+00 : f32
    %722 = vector.shape_cast %585 : vector<1x128xi1> to vector<1x128xi1>
    %723 = vector.broadcast %722 : vector<1x128xi1> to vector<64x128xi1>
    %724 = vector.shape_cast %721 : vector<64x1xf32> to vector<64x1xf32>
    %725 = vector.broadcast %724 : vector<64x1xf32> to vector<64x128xf32>
    %726 = vector.broadcast %cst_188 : f32 to vector<64x128xf32>
    %727 = arith.select %723, %725, %726 : vector<64x128xi1>, vector<64x128xf32>
    %728 = arith.addf %720, %727 : vector<64x128xf32>
    %729 = arith.mulf %701, %705 : vector<64x1xf32>
    %cst_189 = arith.constant 0.000000e+00 : f32
    %730 = vector.shape_cast %590 : vector<1x128xi1> to vector<1x128xi1>
    %731 = vector.broadcast %730 : vector<1x128xi1> to vector<64x128xi1>
    %732 = vector.shape_cast %729 : vector<64x1xf32> to vector<64x1xf32>
    %733 = vector.broadcast %732 : vector<64x1xf32> to vector<64x128xf32>
    %734 = vector.broadcast %cst_189 : f32 to vector<64x128xf32>
    %735 = arith.select %731, %733, %734 : vector<64x128xi1>, vector<64x128xf32>
    %736 = arith.addf %728, %735 : vector<64x128xf32>
    %737 = arith.mulf %656, %736 : vector<64x128xf32>
    %cst_190 = arith.constant dense<0.000000e+00> : vector<16x128xf32>
    %738 = tpu.matmul %3, %737, %cst_190 {dimension_numbers = #tpu.dot_dimension_numbers<[0], [0], [1], [1], [0, 1, 1, 1], [], []>} : vector<64x16xf32>, vector<64x128xf32>, vector<16x128xf32> -> vector<16x128xf32>
    %739 = arith.addf %738, %655 : vector<16x128xf32>
    %740 = arith.mulf %739, %739 : vector<16x128xf32>
    %cst_191 = arith.constant 0.000000e+00 : f32
    %741 = vector.shape_cast %575 : vector<1x128xi1> to vector<1x128xi1>
    %742 = vector.broadcast %741 : vector<1x128xi1> to vector<16x128xi1>
    %743 = vector.broadcast %cst_191 : f32 to vector<16x128xf32>
    %744 = arith.select %742, %740, %743 : vector<16x128xi1>, vector<16x128xf32>
    %cst_192 = arith.constant dense<0.000000e+00> : vector<16xf32>
    %745 = vector.multi_reduction <add>, %744, %cst_192 [1] : vector<16x128xf32> to vector<16xf32>
    %746 = vector.shape_cast %745 : vector<16xf32> to vector<16x1xf32>
    %cst_193 = arith.constant 1.000000e-24 : f32
    %747 = vector.broadcast %cst_193 : f32 to vector<16x1xf32>
    %748 = arith.maximumf %746, %747 : vector<16x1xf32>
    %749 = math.rsqrt %748 : vector<16x1xf32>
    %cst_194 = arith.constant 0.000000e+00 : f32
    %750 = vector.shape_cast %575 : vector<1x128xi1> to vector<1x128xi1>
    %751 = vector.broadcast %750 : vector<1x128xi1> to vector<16x128xi1>
    %752 = vector.shape_cast %749 : vector<16x1xf32> to vector<16x1xf32>
    %753 = vector.broadcast %752 : vector<16x1xf32> to vector<16x128xf32>
    %754 = vector.broadcast %cst_194 : f32 to vector<16x128xf32>
    %755 = arith.select %751, %753, %754 : vector<16x128xi1>, vector<16x128xf32>
    %cst_195 = arith.constant 0.000000e+00 : f32
    %756 = vector.shape_cast %580 : vector<1x128xi1> to vector<1x128xi1>
    %757 = vector.broadcast %756 : vector<1x128xi1> to vector<16x128xi1>
    %758 = vector.broadcast %cst_195 : f32 to vector<16x128xf32>
    %759 = arith.select %757, %740, %758 : vector<16x128xi1>, vector<16x128xf32>
    %cst_196 = arith.constant dense<0.000000e+00> : vector<16xf32>
    %760 = vector.multi_reduction <add>, %759, %cst_196 [1] : vector<16x128xf32> to vector<16xf32>
    %761 = vector.shape_cast %760 : vector<16xf32> to vector<16x1xf32>
    %cst_197 = arith.constant 1.000000e-24 : f32
    %762 = vector.broadcast %cst_197 : f32 to vector<16x1xf32>
    %763 = arith.maximumf %761, %762 : vector<16x1xf32>
    %764 = math.rsqrt %763 : vector<16x1xf32>
    %cst_198 = arith.constant 0.000000e+00 : f32
    %765 = vector.shape_cast %580 : vector<1x128xi1> to vector<1x128xi1>
    %766 = vector.broadcast %765 : vector<1x128xi1> to vector<16x128xi1>
    %767 = vector.shape_cast %764 : vector<16x1xf32> to vector<16x1xf32>
    %768 = vector.broadcast %767 : vector<16x1xf32> to vector<16x128xf32>
    %769 = vector.broadcast %cst_198 : f32 to vector<16x128xf32>
    %770 = arith.select %766, %768, %769 : vector<16x128xi1>, vector<16x128xf32>
    %771 = arith.addf %755, %770 : vector<16x128xf32>
    %cst_199 = arith.constant 0.000000e+00 : f32
    %772 = vector.shape_cast %585 : vector<1x128xi1> to vector<1x128xi1>
    %773 = vector.broadcast %772 : vector<1x128xi1> to vector<16x128xi1>
    %774 = vector.broadcast %cst_199 : f32 to vector<16x128xf32>
    %775 = arith.select %773, %740, %774 : vector<16x128xi1>, vector<16x128xf32>
    %cst_200 = arith.constant dense<0.000000e+00> : vector<16xf32>
    %776 = vector.multi_reduction <add>, %775, %cst_200 [1] : vector<16x128xf32> to vector<16xf32>
    %777 = vector.shape_cast %776 : vector<16xf32> to vector<16x1xf32>
    %cst_201 = arith.constant 1.000000e-24 : f32
    %778 = vector.broadcast %cst_201 : f32 to vector<16x1xf32>
    %779 = arith.maximumf %777, %778 : vector<16x1xf32>
    %780 = math.rsqrt %779 : vector<16x1xf32>
    %cst_202 = arith.constant 0.000000e+00 : f32
    %781 = vector.shape_cast %585 : vector<1x128xi1> to vector<1x128xi1>
    %782 = vector.broadcast %781 : vector<1x128xi1> to vector<16x128xi1>
    %783 = vector.shape_cast %780 : vector<16x1xf32> to vector<16x1xf32>
    %784 = vector.broadcast %783 : vector<16x1xf32> to vector<16x128xf32>
    %785 = vector.broadcast %cst_202 : f32 to vector<16x128xf32>
    %786 = arith.select %782, %784, %785 : vector<16x128xi1>, vector<16x128xf32>
    %787 = arith.addf %771, %786 : vector<16x128xf32>
    %cst_203 = arith.constant 0.000000e+00 : f32
    %788 = vector.shape_cast %590 : vector<1x128xi1> to vector<1x128xi1>
    %789 = vector.broadcast %788 : vector<1x128xi1> to vector<16x128xi1>
    %790 = vector.broadcast %cst_203 : f32 to vector<16x128xf32>
    %791 = arith.select %789, %740, %790 : vector<16x128xi1>, vector<16x128xf32>
    %cst_204 = arith.constant dense<0.000000e+00> : vector<16xf32>
    %792 = vector.multi_reduction <add>, %791, %cst_204 [1] : vector<16x128xf32> to vector<16xf32>
    %793 = vector.shape_cast %792 : vector<16xf32> to vector<16x1xf32>
    %cst_205 = arith.constant 1.000000e-24 : f32
    %794 = vector.broadcast %cst_205 : f32 to vector<16x1xf32>
    %795 = arith.maximumf %793, %794 : vector<16x1xf32>
    %796 = math.rsqrt %795 : vector<16x1xf32>
    %cst_206 = arith.constant 0.000000e+00 : f32
    %797 = vector.shape_cast %590 : vector<1x128xi1> to vector<1x128xi1>
    %798 = vector.broadcast %797 : vector<1x128xi1> to vector<16x128xi1>
    %799 = vector.shape_cast %796 : vector<16x1xf32> to vector<16x1xf32>
    %800 = vector.broadcast %799 : vector<16x1xf32> to vector<16x128xf32>
    %801 = vector.broadcast %cst_206 : f32 to vector<16x128xf32>
    %802 = arith.select %798, %800, %801 : vector<16x128xi1>, vector<16x128xf32>
    %803 = arith.addf %787, %802 : vector<16x128xf32>
    %804 = arith.mulf %739, %803 : vector<16x128xf32>
    %cst_207 = arith.constant dense<0.000000e+00> : vector<64x128xf32>
    %805 = tpu.matmul %3, %804, %cst_207 {dimension_numbers = #tpu.dot_dimension_numbers<[1], [0], [0], [1], [0, 0, 1, 1], [], []>} : vector<64x16xf32>, vector<16x128xf32>, vector<64x128xf32> -> vector<64x128xf32>
    %806 = arith.mulf %656, %805 : vector<64x128xf32>
    %cst_208 = arith.constant 0.000000e+00 : f32
    %807 = vector.shape_cast %575 : vector<1x128xi1> to vector<1x128xi1>
    %808 = vector.broadcast %807 : vector<1x128xi1> to vector<64x128xi1>
    %809 = vector.broadcast %cst_208 : f32 to vector<64x128xf32>
    %810 = arith.select %808, %806, %809 : vector<64x128xi1>, vector<64x128xf32>
    %cst_209 = arith.constant dense<0.000000e+00> : vector<64xf32>
    %811 = vector.multi_reduction <add>, %810, %cst_209 [1] : vector<64x128xf32> to vector<64xf32>
    %812 = vector.shape_cast %811 : vector<64xf32> to vector<64x1xf32>
    %cst_210 = arith.constant 1.000000e+00 : f32
    %813 = vector.broadcast %cst_210 : f32 to vector<64x1xf32>
    %814 = arith.mulf %812, %813 : vector<64x1xf32>
    %cst_211 = arith.constant 0.000000e+00 : f32
    %815 = vector.shape_cast %580 : vector<1x128xi1> to vector<1x128xi1>
    %816 = vector.broadcast %815 : vector<1x128xi1> to vector<64x128xi1>
    %817 = vector.broadcast %cst_211 : f32 to vector<64x128xf32>
    %818 = arith.select %816, %806, %817 : vector<64x128xi1>, vector<64x128xf32>
    %cst_212 = arith.constant dense<0.000000e+00> : vector<64xf32>
    %819 = vector.multi_reduction <add>, %818, %cst_212 [1] : vector<64x128xf32> to vector<64xf32>
    %820 = vector.shape_cast %819 : vector<64xf32> to vector<64x1xf32>
    %cst_213 = arith.constant 1.000000e+00 : f32
    %821 = vector.broadcast %cst_213 : f32 to vector<64x1xf32>
    %822 = arith.mulf %820, %821 : vector<64x1xf32>
    %cst_214 = arith.constant 0.000000e+00 : f32
    %823 = vector.shape_cast %585 : vector<1x128xi1> to vector<1x128xi1>
    %824 = vector.broadcast %823 : vector<1x128xi1> to vector<64x128xi1>
    %825 = vector.broadcast %cst_214 : f32 to vector<64x128xf32>
    %826 = arith.select %824, %806, %825 : vector<64x128xi1>, vector<64x128xf32>
    %cst_215 = arith.constant dense<0.000000e+00> : vector<64xf32>
    %827 = vector.multi_reduction <add>, %826, %cst_215 [1] : vector<64x128xf32> to vector<64xf32>
    %828 = vector.shape_cast %827 : vector<64xf32> to vector<64x1xf32>
    %cst_216 = arith.constant 1.000000e+00 : f32
    %829 = vector.broadcast %cst_216 : f32 to vector<64x1xf32>
    %830 = arith.mulf %828, %829 : vector<64x1xf32>
    %cst_217 = arith.constant 0.000000e+00 : f32
    %831 = vector.shape_cast %590 : vector<1x128xi1> to vector<1x128xi1>
    %832 = vector.broadcast %831 : vector<1x128xi1> to vector<64x128xi1>
    %833 = vector.broadcast %cst_217 : f32 to vector<64x128xf32>
    %834 = arith.select %832, %806, %833 : vector<64x128xi1>, vector<64x128xf32>
    %cst_218 = arith.constant dense<0.000000e+00> : vector<64xf32>
    %835 = vector.multi_reduction <add>, %834, %cst_218 [1] : vector<64x128xf32> to vector<64xf32>
    %836 = vector.shape_cast %835 : vector<64xf32> to vector<64x1xf32>
    %cst_219 = arith.constant 1.000000e+00 : f32
    %837 = vector.broadcast %cst_219 : f32 to vector<64x1xf32>
    %838 = arith.mulf %836, %837 : vector<64x1xf32>
    %839 = arith.maximumf %814, %822 : vector<64x1xf32>
    %840 = arith.maximumf %839, %830 : vector<64x1xf32>
    %841 = arith.maximumf %840, %838 : vector<64x1xf32>
    %842 = arith.subf %814, %841 : vector<64x1xf32>
    %843 = math.exp %842 : vector<64x1xf32>
    %844 = arith.subf %822, %841 : vector<64x1xf32>
    %845 = math.exp %844 : vector<64x1xf32>
    %846 = arith.subf %830, %841 : vector<64x1xf32>
    %847 = math.exp %846 : vector<64x1xf32>
    %848 = arith.subf %838, %841 : vector<64x1xf32>
    %849 = math.exp %848 : vector<64x1xf32>
    %850 = arith.addf %843, %845 : vector<64x1xf32>
    %851 = arith.addf %850, %847 : vector<64x1xf32>
    %852 = arith.addf %851, %849 : vector<64x1xf32>
    %853 = tpu.reciprocal %852 {approx = true} : vector<64x1xf32> -> vector<64x1xf32>
    %854 = arith.mulf %843, %853 : vector<64x1xf32>
    %cst_220 = arith.constant 0.000000e+00 : f32
    %855 = vector.shape_cast %575 : vector<1x128xi1> to vector<1x128xi1>
    %856 = vector.broadcast %855 : vector<1x128xi1> to vector<64x128xi1>
    %857 = vector.shape_cast %854 : vector<64x1xf32> to vector<64x1xf32>
    %858 = vector.broadcast %857 : vector<64x1xf32> to vector<64x128xf32>
    %859 = vector.broadcast %cst_220 : f32 to vector<64x128xf32>
    %860 = arith.select %856, %858, %859 : vector<64x128xi1>, vector<64x128xf32>
    %861 = arith.mulf %845, %853 : vector<64x1xf32>
    %cst_221 = arith.constant 0.000000e+00 : f32
    %862 = vector.shape_cast %580 : vector<1x128xi1> to vector<1x128xi1>
    %863 = vector.broadcast %862 : vector<1x128xi1> to vector<64x128xi1>
    %864 = vector.shape_cast %861 : vector<64x1xf32> to vector<64x1xf32>
    %865 = vector.broadcast %864 : vector<64x1xf32> to vector<64x128xf32>
    %866 = vector.broadcast %cst_221 : f32 to vector<64x128xf32>
    %867 = arith.select %863, %865, %866 : vector<64x128xi1>, vector<64x128xf32>
    %868 = arith.addf %860, %867 : vector<64x128xf32>
    %869 = arith.mulf %847, %853 : vector<64x1xf32>
    %cst_222 = arith.constant 0.000000e+00 : f32
    %870 = vector.shape_cast %585 : vector<1x128xi1> to vector<1x128xi1>
    %871 = vector.broadcast %870 : vector<1x128xi1> to vector<64x128xi1>
    %872 = vector.shape_cast %869 : vector<64x1xf32> to vector<64x1xf32>
    %873 = vector.broadcast %872 : vector<64x1xf32> to vector<64x128xf32>
    %874 = vector.broadcast %cst_222 : f32 to vector<64x128xf32>
    %875 = arith.select %871, %873, %874 : vector<64x128xi1>, vector<64x128xf32>
    %876 = arith.addf %868, %875 : vector<64x128xf32>
    %877 = arith.mulf %849, %853 : vector<64x1xf32>
    %cst_223 = arith.constant 0.000000e+00 : f32
    %878 = vector.shape_cast %590 : vector<1x128xi1> to vector<1x128xi1>
    %879 = vector.broadcast %878 : vector<1x128xi1> to vector<64x128xi1>
    %880 = vector.shape_cast %877 : vector<64x1xf32> to vector<64x1xf32>
    %881 = vector.broadcast %880 : vector<64x1xf32> to vector<64x128xf32>
    %882 = vector.broadcast %cst_223 : f32 to vector<64x128xf32>
    %883 = arith.select %879, %881, %882 : vector<64x128xi1>, vector<64x128xf32>
    %884 = arith.addf %876, %883 : vector<64x128xf32>
    %885 = arith.mulf %656, %884 : vector<64x128xf32>
    %cst_224 = arith.constant dense<0.000000e+00> : vector<16x128xf32>
    %886 = tpu.matmul %3, %885, %cst_224 {dimension_numbers = #tpu.dot_dimension_numbers<[0], [0], [1], [1], [0, 1, 1, 1], [], []>} : vector<64x16xf32>, vector<64x128xf32>, vector<16x128xf32> -> vector<16x128xf32>
    %887 = arith.addf %886, %655 : vector<16x128xf32>
    %888 = arith.mulf %887, %887 : vector<16x128xf32>
    %cst_225 = arith.constant 0.000000e+00 : f32
    %889 = vector.shape_cast %575 : vector<1x128xi1> to vector<1x128xi1>
    %890 = vector.broadcast %889 : vector<1x128xi1> to vector<16x128xi1>
    %891 = vector.broadcast %cst_225 : f32 to vector<16x128xf32>
    %892 = arith.select %890, %888, %891 : vector<16x128xi1>, vector<16x128xf32>
    %cst_226 = arith.constant dense<0.000000e+00> : vector<16xf32>
    %893 = vector.multi_reduction <add>, %892, %cst_226 [1] : vector<16x128xf32> to vector<16xf32>
    %894 = vector.shape_cast %893 : vector<16xf32> to vector<16x1xf32>
    %cst_227 = arith.constant 1.000000e-24 : f32
    %895 = vector.broadcast %cst_227 : f32 to vector<16x1xf32>
    %896 = arith.maximumf %894, %895 : vector<16x1xf32>
    %897 = math.rsqrt %896 : vector<16x1xf32>
    %cst_228 = arith.constant 0.000000e+00 : f32
    %898 = vector.shape_cast %575 : vector<1x128xi1> to vector<1x128xi1>
    %899 = vector.broadcast %898 : vector<1x128xi1> to vector<16x128xi1>
    %900 = vector.shape_cast %897 : vector<16x1xf32> to vector<16x1xf32>
    %901 = vector.broadcast %900 : vector<16x1xf32> to vector<16x128xf32>
    %902 = vector.broadcast %cst_228 : f32 to vector<16x128xf32>
    %903 = arith.select %899, %901, %902 : vector<16x128xi1>, vector<16x128xf32>
    %cst_229 = arith.constant 0.000000e+00 : f32
    %904 = vector.shape_cast %580 : vector<1x128xi1> to vector<1x128xi1>
    %905 = vector.broadcast %904 : vector<1x128xi1> to vector<16x128xi1>
    %906 = vector.broadcast %cst_229 : f32 to vector<16x128xf32>
    %907 = arith.select %905, %888, %906 : vector<16x128xi1>, vector<16x128xf32>
    %cst_230 = arith.constant dense<0.000000e+00> : vector<16xf32>
    %908 = vector.multi_reduction <add>, %907, %cst_230 [1] : vector<16x128xf32> to vector<16xf32>
    %909 = vector.shape_cast %908 : vector<16xf32> to vector<16x1xf32>
    %cst_231 = arith.constant 1.000000e-24 : f32
    %910 = vector.broadcast %cst_231 : f32 to vector<16x1xf32>
    %911 = arith.maximumf %909, %910 : vector<16x1xf32>
    %912 = math.rsqrt %911 : vector<16x1xf32>
    %cst_232 = arith.constant 0.000000e+00 : f32
    %913 = vector.shape_cast %580 : vector<1x128xi1> to vector<1x128xi1>
    %914 = vector.broadcast %913 : vector<1x128xi1> to vector<16x128xi1>
    %915 = vector.shape_cast %912 : vector<16x1xf32> to vector<16x1xf32>
    %916 = vector.broadcast %915 : vector<16x1xf32> to vector<16x128xf32>
    %917 = vector.broadcast %cst_232 : f32 to vector<16x128xf32>
    %918 = arith.select %914, %916, %917 : vector<16x128xi1>, vector<16x128xf32>
    %919 = arith.addf %903, %918 : vector<16x128xf32>
    %cst_233 = arith.constant 0.000000e+00 : f32
    %920 = vector.shape_cast %585 : vector<1x128xi1> to vector<1x128xi1>
    %921 = vector.broadcast %920 : vector<1x128xi1> to vector<16x128xi1>
    %922 = vector.broadcast %cst_233 : f32 to vector<16x128xf32>
    %923 = arith.select %921, %888, %922 : vector<16x128xi1>, vector<16x128xf32>
    %cst_234 = arith.constant dense<0.000000e+00> : vector<16xf32>
    %924 = vector.multi_reduction <add>, %923, %cst_234 [1] : vector<16x128xf32> to vector<16xf32>
    %925 = vector.shape_cast %924 : vector<16xf32> to vector<16x1xf32>
    %cst_235 = arith.constant 1.000000e-24 : f32
    %926 = vector.broadcast %cst_235 : f32 to vector<16x1xf32>
    %927 = arith.maximumf %925, %926 : vector<16x1xf32>
    %928 = math.rsqrt %927 : vector<16x1xf32>
    %cst_236 = arith.constant 0.000000e+00 : f32
    %929 = vector.shape_cast %585 : vector<1x128xi1> to vector<1x128xi1>
    %930 = vector.broadcast %929 : vector<1x128xi1> to vector<16x128xi1>
    %931 = vector.shape_cast %928 : vector<16x1xf32> to vector<16x1xf32>
    %932 = vector.broadcast %931 : vector<16x1xf32> to vector<16x128xf32>
    %933 = vector.broadcast %cst_236 : f32 to vector<16x128xf32>
    %934 = arith.select %930, %932, %933 : vector<16x128xi1>, vector<16x128xf32>
    %935 = arith.addf %919, %934 : vector<16x128xf32>
    %cst_237 = arith.constant 0.000000e+00 : f32
    %936 = vector.shape_cast %590 : vector<1x128xi1> to vector<1x128xi1>
    %937 = vector.broadcast %936 : vector<1x128xi1> to vector<16x128xi1>
    %938 = vector.broadcast %cst_237 : f32 to vector<16x128xf32>
    %939 = arith.select %937, %888, %938 : vector<16x128xi1>, vector<16x128xf32>
    %cst_238 = arith.constant dense<0.000000e+00> : vector<16xf32>
    %940 = vector.multi_reduction <add>, %939, %cst_238 [1] : vector<16x128xf32> to vector<16xf32>
    %941 = vector.shape_cast %940 : vector<16xf32> to vector<16x1xf32>
    %cst_239 = arith.constant 1.000000e-24 : f32
    %942 = vector.broadcast %cst_239 : f32 to vector<16x1xf32>
    %943 = arith.maximumf %941, %942 : vector<16x1xf32>
    %944 = math.rsqrt %943 : vector<16x1xf32>
    %cst_240 = arith.constant 0.000000e+00 : f32
    %945 = vector.shape_cast %590 : vector<1x128xi1> to vector<1x128xi1>
    %946 = vector.broadcast %945 : vector<1x128xi1> to vector<16x128xi1>
    %947 = vector.shape_cast %944 : vector<16x1xf32> to vector<16x1xf32>
    %948 = vector.broadcast %947 : vector<16x1xf32> to vector<16x128xf32>
    %949 = vector.broadcast %cst_240 : f32 to vector<16x128xf32>
    %950 = arith.select %946, %948, %949 : vector<16x128xi1>, vector<16x128xf32>
    %951 = arith.addf %935, %950 : vector<16x128xf32>
    %952 = arith.mulf %887, %951 : vector<16x128xf32>
    %cst_241 = arith.constant dense<0.000000e+00> : vector<64x128xf32>
    %953 = tpu.matmul %3, %952, %cst_241 {dimension_numbers = #tpu.dot_dimension_numbers<[1], [0], [0], [1], [0, 0, 1, 1], [], []>} : vector<64x16xf32>, vector<16x128xf32>, vector<64x128xf32> -> vector<64x128xf32>
    %954 = arith.mulf %656, %953 : vector<64x128xf32>
    %cst_242 = arith.constant 0.000000e+00 : f32
    %955 = vector.shape_cast %575 : vector<1x128xi1> to vector<1x128xi1>
    %956 = vector.broadcast %955 : vector<1x128xi1> to vector<64x128xi1>
    %957 = vector.broadcast %cst_242 : f32 to vector<64x128xf32>
    %958 = arith.select %956, %954, %957 : vector<64x128xi1>, vector<64x128xf32>
    %cst_243 = arith.constant dense<0.000000e+00> : vector<64xf32>
    %959 = vector.multi_reduction <add>, %958, %cst_243 [1] : vector<64x128xf32> to vector<64xf32>
    %960 = vector.shape_cast %959 : vector<64xf32> to vector<64x1xf32>
    %cst_244 = arith.constant 1.000000e+00 : f32
    %961 = vector.broadcast %cst_244 : f32 to vector<64x1xf32>
    %962 = arith.mulf %960, %961 : vector<64x1xf32>
    %cst_245 = arith.constant 0.000000e+00 : f32
    %963 = vector.shape_cast %580 : vector<1x128xi1> to vector<1x128xi1>
    %964 = vector.broadcast %963 : vector<1x128xi1> to vector<64x128xi1>
    %965 = vector.broadcast %cst_245 : f32 to vector<64x128xf32>
    %966 = arith.select %964, %954, %965 : vector<64x128xi1>, vector<64x128xf32>
    %cst_246 = arith.constant dense<0.000000e+00> : vector<64xf32>
    %967 = vector.multi_reduction <add>, %966, %cst_246 [1] : vector<64x128xf32> to vector<64xf32>
    %968 = vector.shape_cast %967 : vector<64xf32> to vector<64x1xf32>
    %cst_247 = arith.constant 1.000000e+00 : f32
    %969 = vector.broadcast %cst_247 : f32 to vector<64x1xf32>
    %970 = arith.mulf %968, %969 : vector<64x1xf32>
    %cst_248 = arith.constant 0.000000e+00 : f32
    %971 = vector.shape_cast %585 : vector<1x128xi1> to vector<1x128xi1>
    %972 = vector.broadcast %971 : vector<1x128xi1> to vector<64x128xi1>
    %973 = vector.broadcast %cst_248 : f32 to vector<64x128xf32>
    %974 = arith.select %972, %954, %973 : vector<64x128xi1>, vector<64x128xf32>
    %cst_249 = arith.constant dense<0.000000e+00> : vector<64xf32>
    %975 = vector.multi_reduction <add>, %974, %cst_249 [1] : vector<64x128xf32> to vector<64xf32>
    %976 = vector.shape_cast %975 : vector<64xf32> to vector<64x1xf32>
    %cst_250 = arith.constant 1.000000e+00 : f32
    %977 = vector.broadcast %cst_250 : f32 to vector<64x1xf32>
    %978 = arith.mulf %976, %977 : vector<64x1xf32>
    %cst_251 = arith.constant 0.000000e+00 : f32
    %979 = vector.shape_cast %590 : vector<1x128xi1> to vector<1x128xi1>
    %980 = vector.broadcast %979 : vector<1x128xi1> to vector<64x128xi1>
    %981 = vector.broadcast %cst_251 : f32 to vector<64x128xf32>
    %982 = arith.select %980, %954, %981 : vector<64x128xi1>, vector<64x128xf32>
    %cst_252 = arith.constant dense<0.000000e+00> : vector<64xf32>
    %983 = vector.multi_reduction <add>, %982, %cst_252 [1] : vector<64x128xf32> to vector<64xf32>
    %984 = vector.shape_cast %983 : vector<64xf32> to vector<64x1xf32>
    %cst_253 = arith.constant 1.000000e+00 : f32
    %985 = vector.broadcast %cst_253 : f32 to vector<64x1xf32>
    %986 = arith.mulf %984, %985 : vector<64x1xf32>
    %987 = arith.maximumf %962, %970 : vector<64x1xf32>
    %988 = arith.maximumf %987, %978 : vector<64x1xf32>
    %989 = arith.maximumf %988, %986 : vector<64x1xf32>
    %990 = arith.subf %962, %989 : vector<64x1xf32>
    %991 = math.exp %990 : vector<64x1xf32>
    %992 = arith.subf %970, %989 : vector<64x1xf32>
    %993 = math.exp %992 : vector<64x1xf32>
    %994 = arith.subf %978, %989 : vector<64x1xf32>
    %995 = math.exp %994 : vector<64x1xf32>
    %996 = arith.subf %986, %989 : vector<64x1xf32>
    %997 = math.exp %996 : vector<64x1xf32>
    %998 = arith.addf %991, %993 : vector<64x1xf32>
    %999 = arith.addf %998, %995 : vector<64x1xf32>
    %1000 = arith.addf %999, %997 : vector<64x1xf32>
    %1001 = tpu.reciprocal %1000 {approx = true} : vector<64x1xf32> -> vector<64x1xf32>
    %1002 = arith.mulf %991, %1001 : vector<64x1xf32>
    %cst_254 = arith.constant 0.000000e+00 : f32
    %1003 = vector.shape_cast %575 : vector<1x128xi1> to vector<1x128xi1>
    %1004 = vector.broadcast %1003 : vector<1x128xi1> to vector<64x128xi1>
    %1005 = vector.shape_cast %1002 : vector<64x1xf32> to vector<64x1xf32>
    %1006 = vector.broadcast %1005 : vector<64x1xf32> to vector<64x128xf32>
    %1007 = vector.broadcast %cst_254 : f32 to vector<64x128xf32>
    %1008 = arith.select %1004, %1006, %1007 : vector<64x128xi1>, vector<64x128xf32>
    %1009 = arith.mulf %993, %1001 : vector<64x1xf32>
    %cst_255 = arith.constant 0.000000e+00 : f32
    %1010 = vector.shape_cast %580 : vector<1x128xi1> to vector<1x128xi1>
    %1011 = vector.broadcast %1010 : vector<1x128xi1> to vector<64x128xi1>
    %1012 = vector.shape_cast %1009 : vector<64x1xf32> to vector<64x1xf32>
    %1013 = vector.broadcast %1012 : vector<64x1xf32> to vector<64x128xf32>
    %1014 = vector.broadcast %cst_255 : f32 to vector<64x128xf32>
    %1015 = arith.select %1011, %1013, %1014 : vector<64x128xi1>, vector<64x128xf32>
    %1016 = arith.addf %1008, %1015 : vector<64x128xf32>
    %1017 = arith.mulf %995, %1001 : vector<64x1xf32>
    %cst_256 = arith.constant 0.000000e+00 : f32
    %1018 = vector.shape_cast %585 : vector<1x128xi1> to vector<1x128xi1>
    %1019 = vector.broadcast %1018 : vector<1x128xi1> to vector<64x128xi1>
    %1020 = vector.shape_cast %1017 : vector<64x1xf32> to vector<64x1xf32>
    %1021 = vector.broadcast %1020 : vector<64x1xf32> to vector<64x128xf32>
    %1022 = vector.broadcast %cst_256 : f32 to vector<64x128xf32>
    %1023 = arith.select %1019, %1021, %1022 : vector<64x128xi1>, vector<64x128xf32>
    %1024 = arith.addf %1016, %1023 : vector<64x128xf32>
    %1025 = arith.mulf %997, %1001 : vector<64x1xf32>
    %cst_257 = arith.constant 0.000000e+00 : f32
    %1026 = vector.shape_cast %590 : vector<1x128xi1> to vector<1x128xi1>
    %1027 = vector.broadcast %1026 : vector<1x128xi1> to vector<64x128xi1>
    %1028 = vector.shape_cast %1025 : vector<64x1xf32> to vector<64x1xf32>
    %1029 = vector.broadcast %1028 : vector<64x1xf32> to vector<64x128xf32>
    %1030 = vector.broadcast %cst_257 : f32 to vector<64x128xf32>
    %1031 = arith.select %1027, %1029, %1030 : vector<64x128xi1>, vector<64x128xf32>
    %1032 = arith.addf %1024, %1031 : vector<64x128xf32>
    %1033 = arith.mulf %656, %1032 : vector<64x128xf32>
    %cst_258 = arith.constant dense<0.000000e+00> : vector<16x128xf32>
    %1034 = tpu.matmul %3, %1033, %cst_258 {dimension_numbers = #tpu.dot_dimension_numbers<[0], [0], [1], [1], [0, 1, 1, 1], [], []>} : vector<64x16xf32>, vector<64x128xf32>, vector<16x128xf32> -> vector<16x128xf32>
    %1035 = arith.addf %1034, %655 : vector<16x128xf32>
    %1036 = arith.mulf %1035, %1035 : vector<16x128xf32>
    %cst_259 = arith.constant 0.000000e+00 : f32
    %1037 = vector.shape_cast %575 : vector<1x128xi1> to vector<1x128xi1>
    %1038 = vector.broadcast %1037 : vector<1x128xi1> to vector<16x128xi1>
    %1039 = vector.broadcast %cst_259 : f32 to vector<16x128xf32>
    %1040 = arith.select %1038, %1036, %1039 : vector<16x128xi1>, vector<16x128xf32>
    %cst_260 = arith.constant dense<0.000000e+00> : vector<16xf32>
    %1041 = vector.multi_reduction <add>, %1040, %cst_260 [1] : vector<16x128xf32> to vector<16xf32>
    %1042 = vector.shape_cast %1041 : vector<16xf32> to vector<16x1xf32>
    %cst_261 = arith.constant 1.000000e-24 : f32
    %1043 = vector.broadcast %cst_261 : f32 to vector<16x1xf32>
    %1044 = arith.maximumf %1042, %1043 : vector<16x1xf32>
    %1045 = math.rsqrt %1044 : vector<16x1xf32>
    %cst_262 = arith.constant 0.000000e+00 : f32
    %1046 = vector.shape_cast %575 : vector<1x128xi1> to vector<1x128xi1>
    %1047 = vector.broadcast %1046 : vector<1x128xi1> to vector<16x128xi1>
    %1048 = vector.shape_cast %1045 : vector<16x1xf32> to vector<16x1xf32>
    %1049 = vector.broadcast %1048 : vector<16x1xf32> to vector<16x128xf32>
    %1050 = vector.broadcast %cst_262 : f32 to vector<16x128xf32>
    %1051 = arith.select %1047, %1049, %1050 : vector<16x128xi1>, vector<16x128xf32>
    %cst_263 = arith.constant 0.000000e+00 : f32
    %1052 = vector.shape_cast %580 : vector<1x128xi1> to vector<1x128xi1>
    %1053 = vector.broadcast %1052 : vector<1x128xi1> to vector<16x128xi1>
    %1054 = vector.broadcast %cst_263 : f32 to vector<16x128xf32>
    %1055 = arith.select %1053, %1036, %1054 : vector<16x128xi1>, vector<16x128xf32>
    %cst_264 = arith.constant dense<0.000000e+00> : vector<16xf32>
    %1056 = vector.multi_reduction <add>, %1055, %cst_264 [1] : vector<16x128xf32> to vector<16xf32>
    %1057 = vector.shape_cast %1056 : vector<16xf32> to vector<16x1xf32>
    %cst_265 = arith.constant 1.000000e-24 : f32
    %1058 = vector.broadcast %cst_265 : f32 to vector<16x1xf32>
    %1059 = arith.maximumf %1057, %1058 : vector<16x1xf32>
    %1060 = math.rsqrt %1059 : vector<16x1xf32>
    %cst_266 = arith.constant 0.000000e+00 : f32
    %1061 = vector.shape_cast %580 : vector<1x128xi1> to vector<1x128xi1>
    %1062 = vector.broadcast %1061 : vector<1x128xi1> to vector<16x128xi1>
    %1063 = vector.shape_cast %1060 : vector<16x1xf32> to vector<16x1xf32>
    %1064 = vector.broadcast %1063 : vector<16x1xf32> to vector<16x128xf32>
    %1065 = vector.broadcast %cst_266 : f32 to vector<16x128xf32>
    %1066 = arith.select %1062, %1064, %1065 : vector<16x128xi1>, vector<16x128xf32>
    %1067 = arith.addf %1051, %1066 : vector<16x128xf32>
    %cst_267 = arith.constant 0.000000e+00 : f32
    %1068 = vector.shape_cast %585 : vector<1x128xi1> to vector<1x128xi1>
    %1069 = vector.broadcast %1068 : vector<1x128xi1> to vector<16x128xi1>
    %1070 = vector.broadcast %cst_267 : f32 to vector<16x128xf32>
    %1071 = arith.select %1069, %1036, %1070 : vector<16x128xi1>, vector<16x128xf32>
    %cst_268 = arith.constant dense<0.000000e+00> : vector<16xf32>
    %1072 = vector.multi_reduction <add>, %1071, %cst_268 [1] : vector<16x128xf32> to vector<16xf32>
    %1073 = vector.shape_cast %1072 : vector<16xf32> to vector<16x1xf32>
    %cst_269 = arith.constant 1.000000e-24 : f32
    %1074 = vector.broadcast %cst_269 : f32 to vector<16x1xf32>
    %1075 = arith.maximumf %1073, %1074 : vector<16x1xf32>
    %1076 = math.rsqrt %1075 : vector<16x1xf32>
    %cst_270 = arith.constant 0.000000e+00 : f32
    %1077 = vector.shape_cast %585 : vector<1x128xi1> to vector<1x128xi1>
    %1078 = vector.broadcast %1077 : vector<1x128xi1> to vector<16x128xi1>
    %1079 = vector.shape_cast %1076 : vector<16x1xf32> to vector<16x1xf32>
    %1080 = vector.broadcast %1079 : vector<16x1xf32> to vector<16x128xf32>
    %1081 = vector.broadcast %cst_270 : f32 to vector<16x128xf32>
    %1082 = arith.select %1078, %1080, %1081 : vector<16x128xi1>, vector<16x128xf32>
    %1083 = arith.addf %1067, %1082 : vector<16x128xf32>
    %cst_271 = arith.constant 0.000000e+00 : f32
    %1084 = vector.shape_cast %590 : vector<1x128xi1> to vector<1x128xi1>
    %1085 = vector.broadcast %1084 : vector<1x128xi1> to vector<16x128xi1>
    %1086 = vector.broadcast %cst_271 : f32 to vector<16x128xf32>
    %1087 = arith.select %1085, %1036, %1086 : vector<16x128xi1>, vector<16x128xf32>
    %cst_272 = arith.constant dense<0.000000e+00> : vector<16xf32>
    %1088 = vector.multi_reduction <add>, %1087, %cst_272 [1] : vector<16x128xf32> to vector<16xf32>
    %1089 = vector.shape_cast %1088 : vector<16xf32> to vector<16x1xf32>
    %cst_273 = arith.constant 1.000000e-24 : f32
    %1090 = vector.broadcast %cst_273 : f32 to vector<16x1xf32>
    %1091 = arith.maximumf %1089, %1090 : vector<16x1xf32>
    %1092 = math.rsqrt %1091 : vector<16x1xf32>
    %cst_274 = arith.constant 0.000000e+00 : f32
    %1093 = vector.shape_cast %590 : vector<1x128xi1> to vector<1x128xi1>
    %1094 = vector.broadcast %1093 : vector<1x128xi1> to vector<16x128xi1>
    %1095 = vector.shape_cast %1092 : vector<16x1xf32> to vector<16x1xf32>
    %1096 = vector.broadcast %1095 : vector<16x1xf32> to vector<16x128xf32>
    %1097 = vector.broadcast %cst_274 : f32 to vector<16x128xf32>
    %1098 = arith.select %1094, %1096, %1097 : vector<16x128xi1>, vector<16x128xf32>
    %1099 = arith.addf %1083, %1098 : vector<16x128xf32>
    %1100 = arith.mulf %1035, %1099 : vector<16x128xf32>
    %1101 = vector.broadcast %22 : vector<16x1xf32> to vector<16x128xf32>
    %1102 = arith.mulf %1100, %1101 : vector<16x128xf32>
    %c1 = arith.constant 1 : index
    %c0_275 = arith.constant 0 : index
    %c0_276 = arith.constant 0 : index
    %1103 = vector.load %arg7[%c1, %c0_275, %c0_276] : memref<3x1x128xf32, #tpu.memory_space<vmem>>, vector<1x1x128xf32>
    %1104 = vector.shape_cast %1103 : vector<1x1x128xf32> to vector<1x128xf32>
    %1105 = vector.broadcast %1104 : vector<1x128xf32> to vector<16x128xf32>
    %1106 = arith.mulf %1102, %1105 : vector<16x128xf32>
    %c1_277 = arith.constant 1 : index
    %c0_278 = arith.constant 0 : index
    %c0_279 = arith.constant 0 : index
    %1107 = vector.load %arg8[%c1_277, %c0_278, %c0_279] : memref<3x1x128xf32, #tpu.memory_space<vmem>>, vector<1x1x128xf32>
    %1108 = vector.shape_cast %1107 : vector<1x1x128xf32> to vector<1x128xf32>
    %1109 = vector.broadcast %1108 : vector<1x128xf32> to vector<16x128xf32>
    %1110 = arith.addf %1106, %1109 : vector<16x128xf32>
    %cst_280 = arith.constant 0.000000e+00 : f32
    %1111 = vector.broadcast %cst_280 : f32 to vector<16x128xf32>
    %1112 = arith.cmpf ogt, %1110, %1111 : vector<16x128xf32>
    %cst_281 = arith.constant 0.000000e+00 : f32
    %1113 = vector.broadcast %cst_281 : f32 to vector<16x128xf32>
    %1114 = arith.minimumf %1110, %1113 : vector<16x128xf32>
    %1115 = math.exp %1114 : vector<16x128xf32>
    %cst_282 = arith.constant 1.000000e+00 : f32
    %1116 = vector.broadcast %cst_282 : f32 to vector<16x128xf32>
    %1117 = arith.subf %1115, %1116 : vector<16x128xf32>
    %1118 = arith.select %1112, %1110, %1117 : vector<16x128xi1>, vector<16x128xf32>
    %c0_i32_283 = arith.constant 0 : i32
    %1119 = vector.broadcast %c0_i32_283 : i32 to vector<1x128xi32>
    %1120 = arith.cmpi sge, %21, %1119 : vector<1x128xi32>
    %c64_i32_284 = arith.constant 64 : i32
    %1121 = vector.broadcast %c64_i32_284 : i32 to vector<1x128xi32>
    %1122 = arith.cmpi slt, %21, %1121 : vector<1x128xi32>
    %1123 = arith.andi %1120, %1122 : vector<1x128xi1>
    %c64_i32_285 = arith.constant 64 : i32
    %1124 = vector.broadcast %c64_i32_285 : i32 to vector<1x128xi32>
    %1125 = arith.cmpi sge, %21, %1124 : vector<1x128xi32>
    %c128_i32_286 = arith.constant 128 : i32
    %1126 = vector.broadcast %c128_i32_286 : i32 to vector<1x128xi32>
    %1127 = arith.cmpi slt, %21, %1126 : vector<1x128xi32>
    %1128 = arith.andi %1125, %1127 : vector<1x128xi1>
    %1129 = arith.mulf %1118, %1118 : vector<16x128xf32>
    %cst_287 = arith.constant 0.000000e+00 : f32
    %1130 = vector.shape_cast %1123 : vector<1x128xi1> to vector<1x128xi1>
    %1131 = vector.broadcast %1130 : vector<1x128xi1> to vector<16x128xi1>
    %1132 = vector.broadcast %cst_287 : f32 to vector<16x128xf32>
    %1133 = arith.select %1131, %1129, %1132 : vector<16x128xi1>, vector<16x128xf32>
    %cst_288 = arith.constant dense<0.000000e+00> : vector<16xf32>
    %1134 = vector.multi_reduction <add>, %1133, %cst_288 [1] : vector<16x128xf32> to vector<16xf32>
    %1135 = vector.shape_cast %1134 : vector<16xf32> to vector<16x1xf32>
    %cst_289 = arith.constant 1.000000e-24 : f32
    %1136 = vector.broadcast %cst_289 : f32 to vector<16x1xf32>
    %1137 = arith.maximumf %1135, %1136 : vector<16x1xf32>
    %1138 = math.rsqrt %1137 : vector<16x1xf32>
    %cst_290 = arith.constant 0.000000e+00 : f32
    %1139 = vector.shape_cast %1123 : vector<1x128xi1> to vector<1x128xi1>
    %1140 = vector.broadcast %1139 : vector<1x128xi1> to vector<16x128xi1>
    %1141 = vector.shape_cast %1138 : vector<16x1xf32> to vector<16x1xf32>
    %1142 = vector.broadcast %1141 : vector<16x1xf32> to vector<16x128xf32>
    %1143 = vector.broadcast %cst_290 : f32 to vector<16x128xf32>
    %1144 = arith.select %1140, %1142, %1143 : vector<16x128xi1>, vector<16x128xf32>
    %cst_291 = arith.constant 0.000000e+00 : f32
    %1145 = vector.shape_cast %1128 : vector<1x128xi1> to vector<1x128xi1>
    %1146 = vector.broadcast %1145 : vector<1x128xi1> to vector<16x128xi1>
    %1147 = vector.broadcast %cst_291 : f32 to vector<16x128xf32>
    %1148 = arith.select %1146, %1129, %1147 : vector<16x128xi1>, vector<16x128xf32>
    %cst_292 = arith.constant dense<0.000000e+00> : vector<16xf32>
    %1149 = vector.multi_reduction <add>, %1148, %cst_292 [1] : vector<16x128xf32> to vector<16xf32>
    %1150 = vector.shape_cast %1149 : vector<16xf32> to vector<16x1xf32>
    %cst_293 = arith.constant 1.000000e-24 : f32
    %1151 = vector.broadcast %cst_293 : f32 to vector<16x1xf32>
    %1152 = arith.maximumf %1150, %1151 : vector<16x1xf32>
    %1153 = math.rsqrt %1152 : vector<16x1xf32>
    %cst_294 = arith.constant 0.000000e+00 : f32
    %1154 = vector.shape_cast %1128 : vector<1x128xi1> to vector<1x128xi1>
    %1155 = vector.broadcast %1154 : vector<1x128xi1> to vector<16x128xi1>
    %1156 = vector.shape_cast %1153 : vector<16x1xf32> to vector<16x1xf32>
    %1157 = vector.broadcast %1156 : vector<16x1xf32> to vector<16x128xf32>
    %1158 = vector.broadcast %cst_294 : f32 to vector<16x128xf32>
    %1159 = arith.select %1155, %1157, %1158 : vector<16x128xi1>, vector<16x128xf32>
    %1160 = arith.addf %1144, %1159 : vector<16x128xf32>
    %1161 = arith.mulf %1118, %1160 : vector<16x128xf32>
    %cst_295 = arith.constant dense<0.000000e+00> : vector<64x128xf32>
    %1162 = tpu.matmul %1, %1161, %cst_295 {dimension_numbers = #tpu.dot_dimension_numbers<[1], [0], [0], [1], [0, 0, 1, 1], [], []>} : vector<64x16xf32>, vector<16x128xf32>, vector<64x128xf32> -> vector<64x128xf32>
    %cst_296 = arith.constant dense<0.000000e+00> : vector<64x128xf32>
    %1163 = tpu.matmul %3, %1161, %cst_296 {dimension_numbers = #tpu.dot_dimension_numbers<[1], [0], [0], [1], [0, 0, 1, 1], [], []>} : vector<64x16xf32>, vector<16x128xf32>, vector<64x128xf32> -> vector<64x128xf32>
    %1164 = arith.mulf %1162, %1163 : vector<64x128xf32>
    %cst_297 = arith.constant 0.000000e+00 : f32
    %1165 = vector.shape_cast %1123 : vector<1x128xi1> to vector<1x128xi1>
    %1166 = vector.broadcast %1165 : vector<1x128xi1> to vector<64x128xi1>
    %1167 = vector.broadcast %cst_297 : f32 to vector<64x128xf32>
    %1168 = arith.select %1166, %1164, %1167 : vector<64x128xi1>, vector<64x128xf32>
    %cst_298 = arith.constant dense<0.000000e+00> : vector<64xf32>
    %1169 = vector.multi_reduction <add>, %1168, %cst_298 [1] : vector<64x128xf32> to vector<64xf32>
    %1170 = vector.shape_cast %1169 : vector<64xf32> to vector<64x1xf32>
    %cst_299 = arith.constant 1.000000e+00 : f32
    %1171 = vector.broadcast %cst_299 : f32 to vector<64x1xf32>
    %1172 = arith.mulf %1170, %1171 : vector<64x1xf32>
    %cst_300 = arith.constant 0.000000e+00 : f32
    %1173 = vector.shape_cast %1128 : vector<1x128xi1> to vector<1x128xi1>
    %1174 = vector.broadcast %1173 : vector<1x128xi1> to vector<64x128xi1>
    %1175 = vector.broadcast %cst_300 : f32 to vector<64x128xf32>
    %1176 = arith.select %1174, %1164, %1175 : vector<64x128xi1>, vector<64x128xf32>
    %cst_301 = arith.constant dense<0.000000e+00> : vector<64xf32>
    %1177 = vector.multi_reduction <add>, %1176, %cst_301 [1] : vector<64x128xf32> to vector<64xf32>
    %1178 = vector.shape_cast %1177 : vector<64xf32> to vector<64x1xf32>
    %cst_302 = arith.constant 1.000000e+00 : f32
    %1179 = vector.broadcast %cst_302 : f32 to vector<64x1xf32>
    %1180 = arith.mulf %1178, %1179 : vector<64x1xf32>
    %1181 = arith.maximumf %1172, %1180 : vector<64x1xf32>
    %1182 = arith.subf %1172, %1181 : vector<64x1xf32>
    %1183 = math.exp %1182 : vector<64x1xf32>
    %1184 = arith.subf %1180, %1181 : vector<64x1xf32>
    %1185 = math.exp %1184 : vector<64x1xf32>
    %1186 = arith.addf %1183, %1185 : vector<64x1xf32>
    %1187 = tpu.reciprocal %1186 {approx = true} : vector<64x1xf32> -> vector<64x1xf32>
    %1188 = arith.mulf %1183, %1187 : vector<64x1xf32>
    %cst_303 = arith.constant 0.000000e+00 : f32
    %1189 = vector.shape_cast %1123 : vector<1x128xi1> to vector<1x128xi1>
    %1190 = vector.broadcast %1189 : vector<1x128xi1> to vector<64x128xi1>
    %1191 = vector.shape_cast %1188 : vector<64x1xf32> to vector<64x1xf32>
    %1192 = vector.broadcast %1191 : vector<64x1xf32> to vector<64x128xf32>
    %1193 = vector.broadcast %cst_303 : f32 to vector<64x128xf32>
    %1194 = arith.select %1190, %1192, %1193 : vector<64x128xi1>, vector<64x128xf32>
    %1195 = arith.mulf %1185, %1187 : vector<64x1xf32>
    %cst_304 = arith.constant 0.000000e+00 : f32
    %1196 = vector.shape_cast %1128 : vector<1x128xi1> to vector<1x128xi1>
    %1197 = vector.broadcast %1196 : vector<1x128xi1> to vector<64x128xi1>
    %1198 = vector.shape_cast %1195 : vector<64x1xf32> to vector<64x1xf32>
    %1199 = vector.broadcast %1198 : vector<64x1xf32> to vector<64x128xf32>
    %1200 = vector.broadcast %cst_304 : f32 to vector<64x128xf32>
    %1201 = arith.select %1197, %1199, %1200 : vector<64x128xi1>, vector<64x128xf32>
    %1202 = arith.addf %1194, %1201 : vector<64x128xf32>
    %1203 = arith.mulf %1162, %1202 : vector<64x128xf32>
    %cst_305 = arith.constant dense<0.000000e+00> : vector<16x128xf32>
    %1204 = tpu.matmul %3, %1203, %cst_305 {dimension_numbers = #tpu.dot_dimension_numbers<[0], [0], [1], [1], [0, 1, 1, 1], [], []>} : vector<64x16xf32>, vector<64x128xf32>, vector<16x128xf32> -> vector<16x128xf32>
    %1205 = arith.addf %1204, %1161 : vector<16x128xf32>
    %1206 = arith.mulf %1205, %1205 : vector<16x128xf32>
    %cst_306 = arith.constant 0.000000e+00 : f32
    %1207 = vector.shape_cast %1123 : vector<1x128xi1> to vector<1x128xi1>
    %1208 = vector.broadcast %1207 : vector<1x128xi1> to vector<16x128xi1>
    %1209 = vector.broadcast %cst_306 : f32 to vector<16x128xf32>
    %1210 = arith.select %1208, %1206, %1209 : vector<16x128xi1>, vector<16x128xf32>
    %cst_307 = arith.constant dense<0.000000e+00> : vector<16xf32>
    %1211 = vector.multi_reduction <add>, %1210, %cst_307 [1] : vector<16x128xf32> to vector<16xf32>
    %1212 = vector.shape_cast %1211 : vector<16xf32> to vector<16x1xf32>
    %cst_308 = arith.constant 1.000000e-24 : f32
    %1213 = vector.broadcast %cst_308 : f32 to vector<16x1xf32>
    %1214 = arith.maximumf %1212, %1213 : vector<16x1xf32>
    %1215 = math.rsqrt %1214 : vector<16x1xf32>
    %cst_309 = arith.constant 0.000000e+00 : f32
    %1216 = vector.shape_cast %1123 : vector<1x128xi1> to vector<1x128xi1>
    %1217 = vector.broadcast %1216 : vector<1x128xi1> to vector<16x128xi1>
    %1218 = vector.shape_cast %1215 : vector<16x1xf32> to vector<16x1xf32>
    %1219 = vector.broadcast %1218 : vector<16x1xf32> to vector<16x128xf32>
    %1220 = vector.broadcast %cst_309 : f32 to vector<16x128xf32>
    %1221 = arith.select %1217, %1219, %1220 : vector<16x128xi1>, vector<16x128xf32>
    %cst_310 = arith.constant 0.000000e+00 : f32
    %1222 = vector.shape_cast %1128 : vector<1x128xi1> to vector<1x128xi1>
    %1223 = vector.broadcast %1222 : vector<1x128xi1> to vector<16x128xi1>
    %1224 = vector.broadcast %cst_310 : f32 to vector<16x128xf32>
    %1225 = arith.select %1223, %1206, %1224 : vector<16x128xi1>, vector<16x128xf32>
    %cst_311 = arith.constant dense<0.000000e+00> : vector<16xf32>
    %1226 = vector.multi_reduction <add>, %1225, %cst_311 [1] : vector<16x128xf32> to vector<16xf32>
    %1227 = vector.shape_cast %1226 : vector<16xf32> to vector<16x1xf32>
    %cst_312 = arith.constant 1.000000e-24 : f32
    %1228 = vector.broadcast %cst_312 : f32 to vector<16x1xf32>
    %1229 = arith.maximumf %1227, %1228 : vector<16x1xf32>
    %1230 = math.rsqrt %1229 : vector<16x1xf32>
    %cst_313 = arith.constant 0.000000e+00 : f32
    %1231 = vector.shape_cast %1128 : vector<1x128xi1> to vector<1x128xi1>
    %1232 = vector.broadcast %1231 : vector<1x128xi1> to vector<16x128xi1>
    %1233 = vector.shape_cast %1230 : vector<16x1xf32> to vector<16x1xf32>
    %1234 = vector.broadcast %1233 : vector<16x1xf32> to vector<16x128xf32>
    %1235 = vector.broadcast %cst_313 : f32 to vector<16x128xf32>
    %1236 = arith.select %1232, %1234, %1235 : vector<16x128xi1>, vector<16x128xf32>
    %1237 = arith.addf %1221, %1236 : vector<16x128xf32>
    %1238 = arith.mulf %1205, %1237 : vector<16x128xf32>
    %cst_314 = arith.constant dense<0.000000e+00> : vector<64x128xf32>
    %1239 = tpu.matmul %3, %1238, %cst_314 {dimension_numbers = #tpu.dot_dimension_numbers<[1], [0], [0], [1], [0, 0, 1, 1], [], []>} : vector<64x16xf32>, vector<16x128xf32>, vector<64x128xf32> -> vector<64x128xf32>
    %1240 = arith.mulf %1162, %1239 : vector<64x128xf32>
    %cst_315 = arith.constant 0.000000e+00 : f32
    %1241 = vector.shape_cast %1123 : vector<1x128xi1> to vector<1x128xi1>
    %1242 = vector.broadcast %1241 : vector<1x128xi1> to vector<64x128xi1>
    %1243 = vector.broadcast %cst_315 : f32 to vector<64x128xf32>
    %1244 = arith.select %1242, %1240, %1243 : vector<64x128xi1>, vector<64x128xf32>
    %cst_316 = arith.constant dense<0.000000e+00> : vector<64xf32>
    %1245 = vector.multi_reduction <add>, %1244, %cst_316 [1] : vector<64x128xf32> to vector<64xf32>
    %1246 = vector.shape_cast %1245 : vector<64xf32> to vector<64x1xf32>
    %cst_317 = arith.constant 1.000000e+00 : f32
    %1247 = vector.broadcast %cst_317 : f32 to vector<64x1xf32>
    %1248 = arith.mulf %1246, %1247 : vector<64x1xf32>
    %cst_318 = arith.constant 0.000000e+00 : f32
    %1249 = vector.shape_cast %1128 : vector<1x128xi1> to vector<1x128xi1>
    %1250 = vector.broadcast %1249 : vector<1x128xi1> to vector<64x128xi1>
    %1251 = vector.broadcast %cst_318 : f32 to vector<64x128xf32>
    %1252 = arith.select %1250, %1240, %1251 : vector<64x128xi1>, vector<64x128xf32>
    %cst_319 = arith.constant dense<0.000000e+00> : vector<64xf32>
    %1253 = vector.multi_reduction <add>, %1252, %cst_319 [1] : vector<64x128xf32> to vector<64xf32>
    %1254 = vector.shape_cast %1253 : vector<64xf32> to vector<64x1xf32>
    %cst_320 = arith.constant 1.000000e+00 : f32
    %1255 = vector.broadcast %cst_320 : f32 to vector<64x1xf32>
    %1256 = arith.mulf %1254, %1255 : vector<64x1xf32>
    %1257 = arith.maximumf %1248, %1256 : vector<64x1xf32>
    %1258 = arith.subf %1248, %1257 : vector<64x1xf32>
    %1259 = math.exp %1258 : vector<64x1xf32>
    %1260 = arith.subf %1256, %1257 : vector<64x1xf32>
    %1261 = math.exp %1260 : vector<64x1xf32>
    %1262 = arith.addf %1259, %1261 : vector<64x1xf32>
    %1263 = tpu.reciprocal %1262 {approx = true} : vector<64x1xf32> -> vector<64x1xf32>
    %1264 = arith.mulf %1259, %1263 : vector<64x1xf32>
    %cst_321 = arith.constant 0.000000e+00 : f32
    %1265 = vector.shape_cast %1123 : vector<1x128xi1> to vector<1x128xi1>
    %1266 = vector.broadcast %1265 : vector<1x128xi1> to vector<64x128xi1>
    %1267 = vector.shape_cast %1264 : vector<64x1xf32> to vector<64x1xf32>
    %1268 = vector.broadcast %1267 : vector<64x1xf32> to vector<64x128xf32>
    %1269 = vector.broadcast %cst_321 : f32 to vector<64x128xf32>
    %1270 = arith.select %1266, %1268, %1269 : vector<64x128xi1>, vector<64x128xf32>
    %1271 = arith.mulf %1261, %1263 : vector<64x1xf32>
    %cst_322 = arith.constant 0.000000e+00 : f32
    %1272 = vector.shape_cast %1128 : vector<1x128xi1> to vector<1x128xi1>
    %1273 = vector.broadcast %1272 : vector<1x128xi1> to vector<64x128xi1>
    %1274 = vector.shape_cast %1271 : vector<64x1xf32> to vector<64x1xf32>
    %1275 = vector.broadcast %1274 : vector<64x1xf32> to vector<64x128xf32>
    %1276 = vector.broadcast %cst_322 : f32 to vector<64x128xf32>
    %1277 = arith.select %1273, %1275, %1276 : vector<64x128xi1>, vector<64x128xf32>
    %1278 = arith.addf %1270, %1277 : vector<64x128xf32>
    %1279 = arith.mulf %1162, %1278 : vector<64x128xf32>
    %cst_323 = arith.constant dense<0.000000e+00> : vector<16x128xf32>
    %1280 = tpu.matmul %3, %1279, %cst_323 {dimension_numbers = #tpu.dot_dimension_numbers<[0], [0], [1], [1], [0, 1, 1, 1], [], []>} : vector<64x16xf32>, vector<64x128xf32>, vector<16x128xf32> -> vector<16x128xf32>
    %1281 = arith.addf %1280, %1161 : vector<16x128xf32>
    %1282 = arith.mulf %1281, %1281 : vector<16x128xf32>
    %cst_324 = arith.constant 0.000000e+00 : f32
    %1283 = vector.shape_cast %1123 : vector<1x128xi1> to vector<1x128xi1>
    %1284 = vector.broadcast %1283 : vector<1x128xi1> to vector<16x128xi1>
    %1285 = vector.broadcast %cst_324 : f32 to vector<16x128xf32>
    %1286 = arith.select %1284, %1282, %1285 : vector<16x128xi1>, vector<16x128xf32>
    %cst_325 = arith.constant dense<0.000000e+00> : vector<16xf32>
    %1287 = vector.multi_reduction <add>, %1286, %cst_325 [1] : vector<16x128xf32> to vector<16xf32>
    %1288 = vector.shape_cast %1287 : vector<16xf32> to vector<16x1xf32>
    %cst_326 = arith.constant 1.000000e-24 : f32
    %1289 = vector.broadcast %cst_326 : f32 to vector<16x1xf32>
    %1290 = arith.maximumf %1288, %1289 : vector<16x1xf32>
    %1291 = math.rsqrt %1290 : vector<16x1xf32>
    %cst_327 = arith.constant 0.000000e+00 : f32
    %1292 = vector.shape_cast %1123 : vector<1x128xi1> to vector<1x128xi1>
    %1293 = vector.broadcast %1292 : vector<1x128xi1> to vector<16x128xi1>
    %1294 = vector.shape_cast %1291 : vector<16x1xf32> to vector<16x1xf32>
    %1295 = vector.broadcast %1294 : vector<16x1xf32> to vector<16x128xf32>
    %1296 = vector.broadcast %cst_327 : f32 to vector<16x128xf32>
    %1297 = arith.select %1293, %1295, %1296 : vector<16x128xi1>, vector<16x128xf32>
    %cst_328 = arith.constant 0.000000e+00 : f32
    %1298 = vector.shape_cast %1128 : vector<1x128xi1> to vector<1x128xi1>
    %1299 = vector.broadcast %1298 : vector<1x128xi1> to vector<16x128xi1>
    %1300 = vector.broadcast %cst_328 : f32 to vector<16x128xf32>
    %1301 = arith.select %1299, %1282, %1300 : vector<16x128xi1>, vector<16x128xf32>
    %cst_329 = arith.constant dense<0.000000e+00> : vector<16xf32>
    %1302 = vector.multi_reduction <add>, %1301, %cst_329 [1] : vector<16x128xf32> to vector<16xf32>
    %1303 = vector.shape_cast %1302 : vector<16xf32> to vector<16x1xf32>
    %cst_330 = arith.constant 1.000000e-24 : f32
    %1304 = vector.broadcast %cst_330 : f32 to vector<16x1xf32>
    %1305 = arith.maximumf %1303, %1304 : vector<16x1xf32>
    %1306 = math.rsqrt %1305 : vector<16x1xf32>
    %cst_331 = arith.constant 0.000000e+00 : f32
    %1307 = vector.shape_cast %1128 : vector<1x128xi1> to vector<1x128xi1>
    %1308 = vector.broadcast %1307 : vector<1x128xi1> to vector<16x128xi1>
    %1309 = vector.shape_cast %1306 : vector<16x1xf32> to vector<16x1xf32>
    %1310 = vector.broadcast %1309 : vector<16x1xf32> to vector<16x128xf32>
    %1311 = vector.broadcast %cst_331 : f32 to vector<16x128xf32>
    %1312 = arith.select %1308, %1310, %1311 : vector<16x128xi1>, vector<16x128xf32>
    %1313 = arith.addf %1297, %1312 : vector<16x128xf32>
    %1314 = arith.mulf %1281, %1313 : vector<16x128xf32>
    %cst_332 = arith.constant dense<0.000000e+00> : vector<64x128xf32>
    %1315 = tpu.matmul %3, %1314, %cst_332 {dimension_numbers = #tpu.dot_dimension_numbers<[1], [0], [0], [1], [0, 0, 1, 1], [], []>} : vector<64x16xf32>, vector<16x128xf32>, vector<64x128xf32> -> vector<64x128xf32>
    %1316 = arith.mulf %1162, %1315 : vector<64x128xf32>
    %cst_333 = arith.constant 0.000000e+00 : f32
    %1317 = vector.shape_cast %1123 : vector<1x128xi1> to vector<1x128xi1>
    %1318 = vector.broadcast %1317 : vector<1x128xi1> to vector<64x128xi1>
    %1319 = vector.broadcast %cst_333 : f32 to vector<64x128xf32>
    %1320 = arith.select %1318, %1316, %1319 : vector<64x128xi1>, vector<64x128xf32>
    %cst_334 = arith.constant dense<0.000000e+00> : vector<64xf32>
    %1321 = vector.multi_reduction <add>, %1320, %cst_334 [1] : vector<64x128xf32> to vector<64xf32>
    %1322 = vector.shape_cast %1321 : vector<64xf32> to vector<64x1xf32>
    %cst_335 = arith.constant 1.000000e+00 : f32
    %1323 = vector.broadcast %cst_335 : f32 to vector<64x1xf32>
    %1324 = arith.mulf %1322, %1323 : vector<64x1xf32>
    %cst_336 = arith.constant 0.000000e+00 : f32
    %1325 = vector.shape_cast %1128 : vector<1x128xi1> to vector<1x128xi1>
    %1326 = vector.broadcast %1325 : vector<1x128xi1> to vector<64x128xi1>
    %1327 = vector.broadcast %cst_336 : f32 to vector<64x128xf32>
    %1328 = arith.select %1326, %1316, %1327 : vector<64x128xi1>, vector<64x128xf32>
    %cst_337 = arith.constant dense<0.000000e+00> : vector<64xf32>
    %1329 = vector.multi_reduction <add>, %1328, %cst_337 [1] : vector<64x128xf32> to vector<64xf32>
    %1330 = vector.shape_cast %1329 : vector<64xf32> to vector<64x1xf32>
    %cst_338 = arith.constant 1.000000e+00 : f32
    %1331 = vector.broadcast %cst_338 : f32 to vector<64x1xf32>
    %1332 = arith.mulf %1330, %1331 : vector<64x1xf32>
    %1333 = arith.maximumf %1324, %1332 : vector<64x1xf32>
    %1334 = arith.subf %1324, %1333 : vector<64x1xf32>
    %1335 = math.exp %1334 : vector<64x1xf32>
    %1336 = arith.subf %1332, %1333 : vector<64x1xf32>
    %1337 = math.exp %1336 : vector<64x1xf32>
    %1338 = arith.addf %1335, %1337 : vector<64x1xf32>
    %1339 = tpu.reciprocal %1338 {approx = true} : vector<64x1xf32> -> vector<64x1xf32>
    %1340 = arith.mulf %1335, %1339 : vector<64x1xf32>
    %cst_339 = arith.constant 0.000000e+00 : f32
    %1341 = vector.shape_cast %1123 : vector<1x128xi1> to vector<1x128xi1>
    %1342 = vector.broadcast %1341 : vector<1x128xi1> to vector<64x128xi1>
    %1343 = vector.shape_cast %1340 : vector<64x1xf32> to vector<64x1xf32>
    %1344 = vector.broadcast %1343 : vector<64x1xf32> to vector<64x128xf32>
    %1345 = vector.broadcast %cst_339 : f32 to vector<64x128xf32>
    %1346 = arith.select %1342, %1344, %1345 : vector<64x128xi1>, vector<64x128xf32>
    %1347 = arith.mulf %1337, %1339 : vector<64x1xf32>
    %cst_340 = arith.constant 0.000000e+00 : f32
    %1348 = vector.shape_cast %1128 : vector<1x128xi1> to vector<1x128xi1>
    %1349 = vector.broadcast %1348 : vector<1x128xi1> to vector<64x128xi1>
    %1350 = vector.shape_cast %1347 : vector<64x1xf32> to vector<64x1xf32>
    %1351 = vector.broadcast %1350 : vector<64x1xf32> to vector<64x128xf32>
    %1352 = vector.broadcast %cst_340 : f32 to vector<64x128xf32>
    %1353 = arith.select %1349, %1351, %1352 : vector<64x128xi1>, vector<64x128xf32>
    %1354 = arith.addf %1346, %1353 : vector<64x128xf32>
    %1355 = arith.mulf %1162, %1354 : vector<64x128xf32>
    %cst_341 = arith.constant dense<0.000000e+00> : vector<16x128xf32>
    %1356 = tpu.matmul %3, %1355, %cst_341 {dimension_numbers = #tpu.dot_dimension_numbers<[0], [0], [1], [1], [0, 1, 1, 1], [], []>} : vector<64x16xf32>, vector<64x128xf32>, vector<16x128xf32> -> vector<16x128xf32>
    %1357 = arith.addf %1356, %1161 : vector<16x128xf32>
    %1358 = arith.mulf %1357, %1357 : vector<16x128xf32>
    %cst_342 = arith.constant 0.000000e+00 : f32
    %1359 = vector.shape_cast %1123 : vector<1x128xi1> to vector<1x128xi1>
    %1360 = vector.broadcast %1359 : vector<1x128xi1> to vector<16x128xi1>
    %1361 = vector.broadcast %cst_342 : f32 to vector<16x128xf32>
    %1362 = arith.select %1360, %1358, %1361 : vector<16x128xi1>, vector<16x128xf32>
    %cst_343 = arith.constant dense<0.000000e+00> : vector<16xf32>
    %1363 = vector.multi_reduction <add>, %1362, %cst_343 [1] : vector<16x128xf32> to vector<16xf32>
    %1364 = vector.shape_cast %1363 : vector<16xf32> to vector<16x1xf32>
    %cst_344 = arith.constant 1.000000e-24 : f32
    %1365 = vector.broadcast %cst_344 : f32 to vector<16x1xf32>
    %1366 = arith.maximumf %1364, %1365 : vector<16x1xf32>
    %1367 = math.rsqrt %1366 : vector<16x1xf32>
    %cst_345 = arith.constant 0.000000e+00 : f32
    %1368 = vector.shape_cast %1123 : vector<1x128xi1> to vector<1x128xi1>
    %1369 = vector.broadcast %1368 : vector<1x128xi1> to vector<16x128xi1>
    %1370 = vector.shape_cast %1367 : vector<16x1xf32> to vector<16x1xf32>
    %1371 = vector.broadcast %1370 : vector<16x1xf32> to vector<16x128xf32>
    %1372 = vector.broadcast %cst_345 : f32 to vector<16x128xf32>
    %1373 = arith.select %1369, %1371, %1372 : vector<16x128xi1>, vector<16x128xf32>
    %cst_346 = arith.constant 0.000000e+00 : f32
    %1374 = vector.shape_cast %1128 : vector<1x128xi1> to vector<1x128xi1>
    %1375 = vector.broadcast %1374 : vector<1x128xi1> to vector<16x128xi1>
    %1376 = vector.broadcast %cst_346 : f32 to vector<16x128xf32>
    %1377 = arith.select %1375, %1358, %1376 : vector<16x128xi1>, vector<16x128xf32>
    %cst_347 = arith.constant dense<0.000000e+00> : vector<16xf32>
    %1378 = vector.multi_reduction <add>, %1377, %cst_347 [1] : vector<16x128xf32> to vector<16xf32>
    %1379 = vector.shape_cast %1378 : vector<16xf32> to vector<16x1xf32>
    %cst_348 = arith.constant 1.000000e-24 : f32
    %1380 = vector.broadcast %cst_348 : f32 to vector<16x1xf32>
    %1381 = arith.maximumf %1379, %1380 : vector<16x1xf32>
    %1382 = math.rsqrt %1381 : vector<16x1xf32>
    %cst_349 = arith.constant 0.000000e+00 : f32
    %1383 = vector.shape_cast %1128 : vector<1x128xi1> to vector<1x128xi1>
    %1384 = vector.broadcast %1383 : vector<1x128xi1> to vector<16x128xi1>
    %1385 = vector.shape_cast %1382 : vector<16x1xf32> to vector<16x1xf32>
    %1386 = vector.broadcast %1385 : vector<16x1xf32> to vector<16x128xf32>
    %1387 = vector.broadcast %cst_349 : f32 to vector<16x128xf32>
    %1388 = arith.select %1384, %1386, %1387 : vector<16x128xi1>, vector<16x128xf32>
    %1389 = arith.addf %1373, %1388 : vector<16x128xf32>
    %1390 = arith.mulf %1357, %1389 : vector<16x128xf32>
    %1391 = vector.broadcast %22 : vector<16x1xf32> to vector<16x128xf32>
    %1392 = arith.mulf %1390, %1391 : vector<16x128xf32>
    %c2 = arith.constant 2 : index
    %c0_350 = arith.constant 0 : index
    %c0_351 = arith.constant 0 : index
    %1393 = vector.load %arg7[%c2, %c0_350, %c0_351] : memref<3x1x128xf32, #tpu.memory_space<vmem>>, vector<1x1x128xf32>
    %1394 = vector.shape_cast %1393 : vector<1x1x128xf32> to vector<1x128xf32>
    %1395 = vector.broadcast %1394 : vector<1x128xf32> to vector<16x128xf32>
    %1396 = arith.mulf %1392, %1395 : vector<16x128xf32>
    %c2_352 = arith.constant 2 : index
    %c0_353 = arith.constant 0 : index
    %c0_354 = arith.constant 0 : index
    %1397 = vector.load %arg8[%c2_352, %c0_353, %c0_354] : memref<3x1x128xf32, #tpu.memory_space<vmem>>, vector<1x1x128xf32>
    %1398 = vector.shape_cast %1397 : vector<1x1x128xf32> to vector<1x128xf32>
    %1399 = vector.broadcast %1398 : vector<1x128xf32> to vector<16x128xf32>
    %1400 = arith.addf %1396, %1399 : vector<16x128xf32>
    %cst_355 = arith.constant 0.000000e+00 : f32
    %1401 = vector.broadcast %cst_355 : f32 to vector<16x128xf32>
    %1402 = arith.cmpf ogt, %1400, %1401 : vector<16x128xf32>
    %cst_356 = arith.constant 0.000000e+00 : f32
    %1403 = vector.broadcast %cst_356 : f32 to vector<16x128xf32>
    %1404 = arith.minimumf %1400, %1403 : vector<16x128xf32>
    %1405 = math.exp %1404 : vector<16x128xf32>
    %cst_357 = arith.constant 1.000000e+00 : f32
    %1406 = vector.broadcast %cst_357 : f32 to vector<16x128xf32>
    %1407 = arith.subf %1405, %1406 : vector<16x128xf32>
    %1408 = arith.select %1402, %1400, %1407 : vector<16x128xi1>, vector<16x128xf32>
    %c0_358 = arith.constant 0 : index
    %c0_359 = arith.constant 0 : index
    %1409 = vector.load %arg9[%c0_358, %c0_359] : memref<128x64xf32, #tpu.memory_space<vmem>>, vector<128x64xf32>
    %cst_360 = arith.constant dense<0.000000e+00> : vector<16x64xf32>
    %1410 = tpu.matmul %1408, %1409, %cst_360 {dimension_numbers = #tpu.dot_dimension_numbers<[1], [0], [0], [1], [0, 0, 1, 1], [], []>} : vector<16x128xf32>, vector<128x64xf32>, vector<16x64xf32> -> vector<16x64xf32>
    %c0_361 = arith.constant 0 : index
    %c0_362 = arith.constant 0 : index
    %1411 = vector.load %arg10[%c0_361, %c0_362] : memref<1x64xf32, #tpu.memory_space<vmem>>, vector<1x64xf32>
    %1412 = vector.broadcast %1411 : vector<1x64xf32> to vector<16x64xf32>
    %1413 = arith.addf %1410, %1412 : vector<16x64xf32>
    %cst_363 = arith.constant 0.000000e+00 : f32
    %1414 = vector.broadcast %cst_363 : f32 to vector<16x64xf32>
    %1415 = arith.cmpf ogt, %1413, %1414 : vector<16x64xf32>
    %cst_364 = arith.constant 0.000000e+00 : f32
    %1416 = vector.broadcast %cst_364 : f32 to vector<16x64xf32>
    %1417 = arith.minimumf %1413, %1416 : vector<16x64xf32>
    %1418 = math.exp %1417 : vector<16x64xf32>
    %cst_365 = arith.constant 1.000000e+00 : f32
    %1419 = vector.broadcast %cst_365 : f32 to vector<16x64xf32>
    %1420 = arith.subf %1418, %1419 : vector<16x64xf32>
    %1421 = arith.select %1415, %1413, %1420 : vector<16x64xi1>, vector<16x64xf32>
    %c0_366 = arith.constant 0 : index
    %c0_367 = arith.constant 0 : index
    %1422 = vector.load %arg11[%c0_366, %c0_367] : memref<64x2xf32, #tpu.memory_space<vmem>>, vector<64x2xf32>
    %cst_368 = arith.constant dense<0.000000e+00> : vector<16x2xf32>
    %1423 = tpu.matmul %1421, %1422, %cst_368 {dimension_numbers = #tpu.dot_dimension_numbers<[1], [0], [0], [1], [0, 0, 1, 1], [], []>} : vector<16x64xf32>, vector<64x2xf32>, vector<16x2xf32> -> vector<16x2xf32>
    %c0_369 = arith.constant 0 : index
    %c0_370 = arith.constant 0 : index
    %1424 = vector.load %arg12[%c0_369, %c0_370] : memref<1x2xf32, #tpu.memory_space<vmem>>, vector<1x2xf32>
    %1425 = vector.broadcast %1424 : vector<1x2xf32> to vector<16x2xf32>
    %1426 = arith.addf %1423, %1425 : vector<16x2xf32>
    %c0_371 = arith.constant 0 : index
    %c0_372 = arith.constant 0 : index
    %1427 = vector.load %arg13[%c0_371, %c0_372] : memref<16x2xf32, #tpu.memory_space<vmem>>, vector<16x2xf32>
    tpu.vector_store %arg13[%c0_371, %c0_372], %1426 {strides = array<i32>} : memref<16x2xf32, #tpu.memory_space<vmem>>, vector<16x2xf32>,
    return
  }
}

</mosaic_0001>

<bundles_post_ra>
// kernel: tpu_custom_call.1
= control target key start
LH: loop header
LB: loop body
LE: loop exit
PB: predicated region body
PF: predicated region fallthrough
CT: control target
= control target key end

     0   :  { %vm107_vm0 = vcmask 588800   ;;  %vm10367_vm1 = vcmask 523264   ;;  %v214_v51 = vlaneseq  ;;  %s10331_s1 = inlined_call_operand.vmem [shape: f32[200,64], index: 1, kind: input, shape index: {}]   ;;  %s10332_s2 = inlined_call_operand.vmem [shape: f32[64,128], index: 2, kind: input, shape index: {}]   ;;  %s10333_s0 = inlined_call_operand.vmem [shape: bf16[16,200], index: 0, kind: input, shape index: {}]   ;;  %s10334_s3 = inlined_call_operand.vmem [shape: f32[1,128], index: 3, kind: input, shape index: {}]   ;;  %s10335_s5 = inlined_call_operand.vmem [shape: bf16[64,16], index: 5, kind: input, shape index: {}]   ;;  %s10336_s6 = inlined_call_operand.vmem [shape: bf16[64,16], index: 6, kind: input, shape index: {}]   ;;  %s10337_s4 = inlined_call_operand.vmem [shape: f32[16,1], index: 4, kind: input, shape index: {}]   ;;  %s10338_s7 = inlined_call_operand.vmem [shape: f32[3,1,128], index: 7, kind: input, shape index: {}]   ;;  %s10339_s8 = inlined_call_operand.vmem [shape: f32[3,1,128], index: 8, kind: input, shape index: {}]   ;;  %s10340_s10 = inlined_call_operand.vmem [shape: f32[1,64], index: 10, kind: input, shape index: {}]   ;;  %s10341_s9 = inlined_call_operand.vmem [shape: f32[128,64], index: 9, kind: input, shape index: {}]   ;;  %s10342_s12 = inlined_call_operand.vmem [shape: f32[1,2], index: 12, kind: input, shape index: {}]   ;;  %s10343_s11 = inlined_call_operand.vmem [shape: f32[64,2], index: 11, kind: input, shape index: {}]   ;;  %s10344_s13 = inlined_call_operand.vmem [shape: f32[16,2], index: 13, kind: output, shape index: {}]  }
   0x1   :  { %v97_v0 = vld [vmem:[%s10331_s1 + $0x78] sm:$0xff]  ;;  %v96_v1 = vld [vmem:[%s10331_s1 + $0x70] sm:$0xff]  ;;  %v95_v2 = vld [vmem:[%s10331_s1 + $0x68] sm:$0xff] }
   0x2   :  { %114 = vmatpush.msra.mxu0 %v97_v0  ;;  %v106_v3 = vld [vmem:[%s10331_s1 + $0xc0] sm:$0xff]  ;;  %v105_v4 = vld [vmem:[%s10331_s1 + $0xb8] sm:$0xff]  ;;  %v104_v6 = vld [vmem:[%s10331_s1 + $0xb0] sm:$0xff]  ;;  %v6341_v54 = vand.u32 127, %v214_v51 }
   0x3   :  { %144 = vmatpush.msra.mxu1 %v106_v3  ;;  %v94_v5 = vld [vmem:[%s10331_s1 + $0x60] sm:$0xff]  ;;  %v93_v7 = vld [vmem:[%s10331_s1 + $0x58] sm:$0xff]  ;;  %v103_v8 = vld [vmem:[%s10331_s1 + $0xa8] sm:$0xff] }
   0x4   :  { %115 = vmatpush.msra.mxu0 %v96_v1  ;;  %v92_v9 = vld [vmem:[%s10331_s1 + $0x50] sm:$0xff]  ;;  %v102_v10 = vld [vmem:[%s10331_s1 + $0xa0] sm:$0xff]  ;;  %v167_v11 = vld [vmem:[%s10332_s2 + $0x38] sm:$0xff]  ;;  %vm219_vm3 = vcmp.lt.s32.totalorder %v6341_v54, 32  ;;  %vm10345_vm4 = vcmp.lt.s32.totalorder %v6341_v54, 64  ;;  %vm221_vm5 = vcmp.ge.s32.totalorder %v6341_v54, 32 }
   0x5   :  { %145 = vmatpush.msra.mxu1 %v105_v4  ;;  %v166_v12 = vld [vmem:[%s10332_s2 + $0x30] sm:$0xff]  ;;  %v91_v13 = vld [vmem:[%s10331_s1 + $0x48] sm:$0xff]  ;;  %v101_v14 = vld [vmem:[%s10331_s1 + $0x98] sm:$0xff]  ;;  %187 = vmatpush.msra.mxu3 %v167_v11  ;;  %vm10346_vm7 = vcmp.ge.s32.totalorder %v6341_v54, 64  ;;  %vm225_vm8 = vcmp.lt.s32.totalorder %v6341_v54, 96  ;;  %vm227_vm11 = vcmp.ge.s32.totalorder %v6341_v54, 96 }
   0x6   :  { %116 = vmatpush.msra.mxu0 %v95_v2  ;;  %v165_v15 = vld [vmem:[%s10332_s2 + $0x28] sm:$0xff]  ;;  %v90_v16 = vld [vmem:[%s10331_s1 + $0x40] sm:$0xff]  ;;  %v100_v17 = vld [vmem:[%s10331_s1 + $0x90] sm:$0xff] }
   0x7   :  { %146 = vmatpush.msra.mxu1 %v104_v6  ;;  %188 = vmatpush.msra.mxu3 %v166_v12  ;;  %v76_v18 = vld [vmem:[%s10333_s0] sm:$0xff]  ;;  %v89_v20 = vld [vmem:[%s10331_s1 + $0x38] sm:$0xff]  ;;  %v99_v21 = vld [vmem:[%s10331_s1 + $0x88] sm:$0xff] }
   0x8   :  { %117 = vmatpush.msra.mxu0 %v94_v5  ;;  %v164_v19 = vld [vmem:[%s10332_s2 + $0x20] sm:$0xff]  ;;  %v163_v22 = vld [vmem:[%s10332_s2 + $0x18] sm:$0xff]  ;;  %v88_v23 = vld [vmem:[%s10331_s1 + $0x30] sm:$0xff]  ;;  %v79_v25 = vunpack.c.h.bf16 %v76_v18  ;;  %v78_v35 = vunpack.c.l.bf16 %v76_v18 }
   0x9   :  { %147 = vmatpush.msra.mxu1 %v103_v8  ;;  %189 = vmatpush.msra.mxu3 %v165_v15  ;;  %v98_v24 = vld [vmem:[%s10331_s1 + $0x80] sm:$0xff]  ;;  %v162_v26 = vld [vmem:[%s10332_s2 + $0x10] sm:$0xff]  ;;  %v87_v27 = vld [vmem:[%s10331_s1 + $0x28] sm:$0xff] }
   0xa   :  { %118 = vmatpush.msra.mxu0 %v93_v7  ;;  %v86_v28 = vld [vmem:[%s10331_s1 + $0x20] sm:$0xff]  ;;  %v77_v29 = vld [vmem:[%s10333_s0 + $0x8] sm:$0xff]  ;;  %v85_v30 = vld [vmem:[%s10331_s1 + $0x18] sm:$0xff] }
   0xb   :  { %148 = vmatpush.msra.mxu1 %v102_v10  ;;  %190 = vmatpush.msra.mxu3 %v164_v19  ;;  %v84_v31 = vld [vmem:[%s10331_s1 + $0x10] sm:$0xff]  ;;  %v81_v32 = vunpack.c.h.bf16 %v77_v29  ;;  %v83_v33 = vld [vmem:[%s10331_s1 + $0x8] sm:$0xff]  ;;  %v82_v34 = vld [vmem:[%s10331_s1] sm:$0xff]  ;;  %v80_v36 = vunpack.c.l.bf16 %v77_v29 }
   0xc   :  { %119 = vmatpush.msra.mxu0 %v92_v9  ;;  %v161_v37 = vld [vmem:[%s10332_s2 + $0x8] sm:$0xff]  ;;  %v160_v38 = vld [vmem:[%s10332_s2] sm:$0xff]  ;;  %vm6358_vm9 = vmand %vm221_vm5, %vm10345_vm4 }
   0xd   :  { %149 = vmatpush.msra.mxu1 %v101_v14  ;;  %191 = vmatpush.msra.mxu3 %v163_v22  ;;  %v5345_v45 = vld [vmem:[%s10334_s3] ss:$0 sm:$0xff]  ;;  %vm6366_vm10 = vmand %vm10346_vm7, %vm225_vm8 }
   0xe   :  { %120 = vmatpush.msra.mxu0 %v91_v13 }
   0xf   :  { %150 = vmatpush.msra.mxu1 %v100_v17  ;;  %192 = vmatpush.msra.mxu3 %v162_v26 }
  0x10   :  { %121 = vmatpush.msra.mxu0 %v90_v16 }
  0x11   :  { %151 = vmatpush.msra.mxu1 %v99_v21  ;;  %193 = vmatpush.msra.mxu3 %v161_v37 }
  0x12   :  { %122 = vmatpush.msra.mxu0 %v89_v20 }
  0x13   :  { %152 = vmatpush.msra.mxu1 %v98_v24  ;;  %194 = vmatpush.msra.mxu3 %v160_v38 }
  0x14   :  { %123 = vmatpush.msra.mxu0 %v88_v23  ;;  %5169 = vmatmul.msk.f32.vlgmr.msra.gmra.mxu1 %vm107_vm0, %v79_v25 }
  0x16   :  { %124 = vmatpush.msra.mxu0 %v87_v27 }
  0x18   :  { %125 = vmatpush.msra.mxu0 %v86_v28 }
  0x1a   :  { %126 = vmatpush.msra.mxu0 %v85_v30 }
  0x1c   :  { %127 = vmatpush.msra.mxu0 %v84_v31  ;;  %5170 = vmatmul.msk.f32.gmra.mxu1 %vm107_vm0, %v81_v32 }
  0x1e   :  { %128 = vmatpush.msra.mxu0 %v83_v33 }
  0x20   :  { %129 = vmatpush.msra.mxu0 %v82_v34 }
  0x21   :  { %130 = vmatmul.f32.vlgmr.msra.gmra.mxu0 %v78_v35 }
  0x29   :  { %133 = vmatmul.f32.gmra.mxu0 %v80_v36 }
  0x91   :  { %v154_v39 = vpop.f32.mrf.mxu1 }
  0x99   :  { %v157_v42 = vpop.f32.mrf.mxu1 }
  0x9e   :  { %v131_v40 = vpop.f32.mrf.mxu0 }
  0x9f   :  { %v155_v41 = vadd.f32 %v154_v39, %v131_v40 }
  0xa1   :  { %5171 = vmatmul.msk.f32.vlgmr.msra.gmra.mxu3 %vm10367_vm1, %v155_v41 }
  0xa6   :  { %v134_v43 = vpop.f32.mrf.mxu0 }
  0xa7   :  { %v158_v44 = vadd.f32 %v157_v42, %v134_v43 }
  0xa9   :  { %5172 = vmatmul.msk.f32.gmra.mxu3 %vm10367_vm1, %v158_v44 }
 0x124   :  { %v196_v46 = vpop.f32.mrf.mxu3 }
 0x125   :  { %v197_v47 = vadd.f32 %v5345_v45, %v196_v46 }
 0x127   :  { %v204_v48 = vmin.f32 %v197_v47, 0.0  ;;  %vm202_vm2 = vcmp.gt.f32.partialorder %v197_v47, 0.0 }
 0x129   :  { %v206_v49 = vmul.f32 1.442695, %v204_v48 }
 0x12b   :  { %5354 = vpow2.f32 %v206_v49 }
 0x12c   :  { %v199_v50 = vpop.f32.mrf.mxu3 }
 0x12d   :  { %v200_v52 = vadd.f32 %v5345_v45, %v199_v50 }
 0x12f   :  { %v205_v53 = vmin.f32 %v200_v52, 0.0  ;;  %vm203_vm6 = vcmp.gt.f32.partialorder %v200_v52, 0.0 }
 0x131   :  { %v5355_v55 = vpop.eup %5354  ;;  %v208_v56 = vmul.f32 1.442695, %v205_v53 }
 0x132   :  { %v5173_v57 = vadd.f32 -1.0, %v5355_v55 }
 0x133   :  { %5356 = vpow2.f32 %v208_v56 }
 0x134   :  { %v6343_v58 = vsel %vm202_vm2, %v197_v47, %v5173_v57 }
 0x135   :  { %v230_v59 = vmul.f32 %v6343_v58, %v6343_v58 }
 0x137   :  { %v234_v60 = vsel %vm219_vm3, %v230_v59, 0.0  ;;  %v266_v3 = vsel %vm6358_vm9, %v230_v59, 0.0  ;;  %v334_v6 = vsel %vm227_vm11, %v230_v59, 0.0  ;;  %v300_v7 = vsel %vm6366_vm10, %v230_v59, 0.0 }
 0x138   :  { %236 = vadd.xlane.f32.xlu1 %v234_v60 }
 0x139   :  { %v5357_v61 = vpop.eup %5356 }
 0x13a   :  { %v5174_v62 = vadd.f32 -1.0, %v5357_v61 }
 0x13c   :  { %v6354_v63 = vsel %vm203_vm6, %v200_v52, %v5174_v62 }
 0x13d   :  { %v231_v1 = vmul.f32 %v6354_v63, %v6354_v63 }
 0x13f   :  { %v301_v4 = vsel %vm6366_vm10, %v231_v1, 0.0  ;;  %v235_v5 = vsel %vm219_vm3, %v231_v1, 0.0  ;;  %v267_v8 = vsel %vm6358_vm9, %v231_v1, 0.0  ;;  %v335_v9 = vsel %vm227_vm11, %v231_v1, 0.0  ;;  %v5337_v1 = vld [vmem:[%s10335_s5 + $0x18] sm:$0xff]  }
 0x140   :  { %268 = vadd.xlane.f32.xlu1 %v266_v3  ;;  %304 = vadd.xlane.f32.xlu2 %v301_v4  ;;  %v6596_v4 = vunpack.c.l.bf16 %v5337_v1 }
 0x141   :  { %238 = vadd.xlane.f32.xlu0 %v235_v5 }
 0x142   :  { %10418 = vst [vmem:[#allocation14_spill] sm:$0xff] %v6596_v4 }
 0x148   :  { %336 = vadd.xlane.f32.xlu1 %v334_v6  ;;  %302 = vadd.xlane.f32.xlu2 %v300_v7 }
 0x149   :  { %270 = vadd.xlane.f32.xlu0 %v267_v8 }
 0x151   :  { %338 = vadd.xlane.f32.xlu0 %v335_v9 }
 0x1ab   :  { %v237_v10 = vpop.xlane.xlu1 %236 }
 0x1ac   :  { %v6385_v11 = vmax.f32 %v237_v10, 1e-24 }
 0x1ae   :  { %5358 = vrsqrt.f32 %v6385_v11  ;;  %vm248_vm13 = vweird.f32 %v6385_v11 }
 0x1b3   :  { %v269_v12 = vpop.xlane.xlu1 %268  ;;  %v305_v13 = vpop.xlane.xlu2 %304 }
 0x1b4   :  { %v6387_v14 = vmax.f32 %v269_v12, 1e-24  ;;  %v239_v15 = vpop.xlane.xlu0 %238  ;;  %v6393_v17 = vmax.f32 %v305_v13, 1e-24  ;;  %v6397_v18 = vpop.eup %5358 }
 0x1b5   :  { %v6390_v16 = vmax.f32 %v239_v15, 1e-24  ;;  %v243_v28 = vmul.f32 %v6397_v18, %v6385_v11  ;;  %vm249_vm12 = vweird.f32 %v6397_v18 }
 0x1b6   :  { %5360 = vrsqrt.f32 %v6387_v14  ;;  %vm280_vm14 = vweird.f32 %v6387_v14  ;;  %vm6442_vm2 = vmor %vm248_vm13, %vm249_vm12 }
 0x1b7   :  { %5362 = vrsqrt.f32 %v6390_v16  ;;  %v244_v32 = vmul.f32 %v6397_v18, %v243_v28  ;;  %vm258_vm12 = vweird.f32 %v6390_v16 }
 0x1b8   :  { %5364 = vrsqrt.f32 %v6393_v17 }
 0x1b9   :  { %v245_v41 = vmul.f32 0.5, %v244_v32 }
 0x1bb   :  { %v337_v19 = vpop.xlane.xlu1 %336  ;;  %v303_v20 = vpop.xlane.xlu2 %302  ;;  %v246_v51 = vsub.f32 1.5, %v245_v41 }
 0x1bc   :  { %v6399_v21 = vpop.eup %5360  ;;  %v6401_v22 = vmax.f32 %v337_v19, 1e-24  ;;  %v6403_v23 = vmax.f32 %v303_v20, 1e-24  ;;  %v271_v24 = vpop.xlane.xlu0 %270 }
 0x1bd   :  { %v275_v25 = vmul.f32 %v6399_v21, %v6387_v14  ;;  %v273_v26 = vmax.f32 %v271_v24, 1e-24  ;;  %v6407_v27 = vpop.eup %5362  ;;  %vm281_vm15 = vweird.f32 %v6399_v21  ;;  %v247_v62 = vmul.f32 %v6397_v18, %v246_v51 }
 0x1be   :  { %5366 = vrsqrt.f32 %v6401_v22  ;;  %v6412_v29 = vpop.eup %5364  ;;  %v253_v30 = vmul.f32 %v6407_v27, %v6390_v16  ;;  %vm259_vm5 = vweird.f32 %v6407_v27  ;;  %vm6447_vm8 = vmor %vm280_vm14, %vm281_vm15  ;;  %vm314_vm13 = vweird.f32 %v6403_v23 }
 0x1bf   :  { %5368 = vrsqrt.f32 %v6403_v23  ;;  %v276_v31 = vmul.f32 %v6399_v21, %v275_v25  ;;  %v319_v33 = vmul.f32 %v6412_v29, %v6393_v17  ;;  %vm290_vm6 = vweird.f32 %v273_v26  ;;  %vm6463_vm14 = vmor %vm258_vm12, %vm259_vm5 }
 0x1c0   :  { %5370 = vrsqrt.f32 %v273_v26  ;;  %v254_v35 = vmul.f32 %v6407_v27, %v253_v30  ;;  %vm325_vm15 = vweird.f32 %v6412_v29  ;;  %v251_v19 = vsel %vm6442_vm2, %v6397_v18, %v247_v62 }
 0x1c1   :  { %v277_v37 = vmul.f32 0.5, %v276_v31  ;;  %v320_v42 = vmul.f32 %v6412_v29, %v319_v33  ;;  %vm348_vm2 = vweird.f32 %v6401_v22  ;;  %v262_v28 = vsel %vm219_vm3, %v251_v19, 0.0 }
 0x1c2   :  { %v255_v45 = vmul.f32 0.5, %v254_v35 }
 0x1c3   :  { %v278_v47 = vsub.f32 1.5, %v277_v37  ;;  %v321_v52 = vmul.f32 0.5, %v320_v42 }
 0x1c4   :  { %v6421_v34 = vpop.eup %5366  ;;  %v339_v36 = vpop.xlane.xlu0 %338  ;;  %v256_v53 = vsub.f32 1.5, %v255_v45 }
 0x1c5   :  { %v6424_v38 = vpop.eup %5368  ;;  %v343_v39 = vmul.f32 %v6421_v34, %v6401_v22  ;;  %v6431_v44 = vmax.f32 %v339_v36, 1e-24  ;;  %v279_v57 = vmul.f32 %v6399_v21, %v278_v47  ;;  %v322_v3 = vsub.f32 1.5, %v321_v52 }
 0x1c6   :  { %v5371_v40 = vpop.eup %5370  ;;  %v309_v43 = vmul.f32 %v6424_v38, %v6403_v23  ;;  %v257_v5 = vmul.f32 %v6407_v27, %v256_v53  ;;  %vm315_vm4 = vweird.f32 %v6424_v38  ;;  %vm349_vm5 = vweird.f32 %v6421_v34 }
 0x1c7   :  { %v285_v46 = vmul.f32 %v5371_v40, %v273_v26  ;;  %v344_v48 = vmul.f32 %v6421_v34, %v343_v39  ;;  %5372 = vrsqrt.f32 %v6431_v44  ;;  %vm291_vm0 = vweird.f32 %v5371_v40 }
 0x1c8   :  { %v310_v49 = vmul.f32 %v6424_v38, %v309_v43  ;;  %vm6456_vm7 = vmor %vm290_vm6, %vm291_vm0  ;;  %v283_v10 = vsel %vm6447_vm8, %v6399_v21, %v279_v57  ;;  %v323_v15 = vmul.f32 %v6412_v29, %v322_v3  ;;  %v261_v20 = vsel %vm6463_vm14, %v6407_v27, %v257_v5  ;;  %v5339_v57 = vld [vmem:[%s10336_s6 + $0x10] sm:$0xff]   ;;  %v5340_v3 = vld [vmem:[%s10336_s6 + $0x18] sm:$0xff]  }
 0x1c9   :  { %v286_v50 = vmul.f32 %v5371_v40, %v285_v46  ;;  %v345_v59 = vmul.f32 0.5, %v344_v48  ;;  %vm6472_vm0 = vmor %vm314_vm13, %vm315_vm4  ;;  %v294_v24 = vsel %vm6358_vm9, %v283_v10, 0.0  ;;  %vm324_vm4 = vweird.f32 %v6393_v17 }
 0x1ca   :  { %v311_v55 = vmul.f32 0.5, %v310_v49  ;;  %v263_v30 = vsel %vm219_vm3, %v261_v20, 0.0  ;;  %v296_v32 = vadd.f32 %v294_v24, %v262_v28  ;;  %vm350_vm8 = vmor %vm348_vm2, %vm349_vm5  ;;  %vm358_vm12 = vweird.f32 %v6431_v44 }
 0x1cb   :  { %v287_v56 = vmul.f32 0.5, %v286_v50  ;;  %v346_v12 = vsub.f32 1.5, %v345_v59  ;;  %vm368_vm14 = vcmask 130048   ;;  %v5338_v50 = vld [vmem:[%s10336_s6 + $0x8] sm:$0xff]   ;;  %v6584_v62 = vunpack.c.h.bf16 %v5339_v57 }
 0x1cc   :  { %v312_v60 = vsub.f32 1.5, %v311_v55  ;;  %v6554_v52 = vunpack.c.l.bf16 %v5338_v50  ;;  %v6562_v55 = vunpack.c.h.bf16 %v5338_v50  ;;  %v6598_v5 = vunpack.c.l.bf16 %v5340_v3 }
 0x1cd   :  { %v288_v61 = vsub.f32 1.5, %v287_v56  ;;  %v5373_v8 = vpop.eup %5372  ;;  %v347_v18 = vmul.f32 %v6421_v34, %v346_v12  ;;  %v5336_v56 = vld [vmem:[%s10335_s5 + $0x10] sm:$0xff]   ;;  %10417 = vst [vmem:[#allocation13_spill] sm:$0xff] %v6584_v62 }
 0x1ce   :  { %v313_v6 = vmul.f32 %v6424_v38, %v312_v60  ;;  %v353_v14 = vmul.f32 %v5373_v8, %v6431_v44  ;;  %vm359_vm6 = vweird.f32 %v5373_v8  ;;  %v5320_v44 = vld [vmem:[%s10336_s6] sm:$0xff]   ;;  %10411 = vst [vmem:[#allocation7_spill] sm:$0xff] %v6554_v52  ;;  %v6574_v59 = vunpack.c.l.bf16 %v5336_v56 }
 0x1cf   :  { %v289_v7 = vmul.f32 %v5371_v40, %v288_v61  ;;  %v351_v22 = vsel %vm350_vm8, %v6421_v34, %v347_v18  ;;  %vm360_vm13 = vmor %vm358_vm12, %vm359_vm6  ;;  %v5304_v34 = vld [vmem:[%s10335_s5] sm:$0xff]   ;;  %v6525_v47 = vunpack.c.l.bf16 %v5320_v44  ;;  %v6540_v49 = vunpack.c.h.bf16 %v5320_v44  ;;  %10413 = vst [vmem:[#allocation9_spill] sm:$0xff] %v6562_v55 }
 0x1d0   :  { %v317_v21 = vsel %vm6472_vm0, %v6424_v38, %v313_v6  ;;  %v354_v23 = vmul.f32 %v5373_v8, %v353_v14  ;;  %v6523_v46 = vunpack.c.l.bf16 %v5304_v34  ;;  %10414 = vst [vmem:[#allocation10_spill] sm:$0xff] %v6574_v59  ;;  %v6576_v60 = vunpack.c.l.bf16 %v5339_v57 }
 0x1d1   :  { %v293_v13 = vsel %vm6456_vm7, %v5371_v40, %v289_v7  ;;  %vm6490_vm7 = vmor %vm324_vm4, %vm325_vm15  ;;  %v328_v31 = vsel %vm6366_vm10, %v317_v21, 0.0  ;;  %v362_v40 = vsel %vm227_vm11, %v351_v22, 0.0  ;;  %10407 = vst [vmem:[#allocation3_spill] sm:$0xff] %v6525_v47  ;;  %v6582_v61 = vunpack.c.h.bf16 %v5336_v56 }
 0x1d2   :  { %v295_v25 = vsel %vm6358_vm9, %v293_v13, 0.0  ;;  %v355_v27 = vmul.f32 0.5, %v354_v23  ;;  %v327_v17 = vsel %vm6490_vm7, %v6412_v29, %v323_v15  ;;  %v330_v36 = vadd.f32 %v328_v31, %v296_v32  ;;  %10406 = vst [vmem:[#allocation2_spill] sm:$0xff] %v6523_v46 }
 0x1d3   :  { %v297_v33 = vadd.f32 %v295_v25, %v263_v30  ;;  %v329_v29 = vsel %vm6366_vm10, %v327_v17, 0.0  ;;  %10409 = vst [vmem:[#allocation5_spill] sm:$0xff] %v6540_v49  ;;  %v6604_v6 = vunpack.c.h.bf16 %v5337_v1  ;;  %v6606_v7 = vunpack.c.h.bf16 %v5340_v3 }
 0x1d4   :  { %v356_v35 = vsub.f32 1.5, %v355_v27  ;;  %v364_v42 = vadd.f32 %v362_v40, %v330_v36  ;;  %10415 = vst [vmem:[#allocation11_spill] sm:$0xff] %v6576_v60 }
 0x1d5   :  { %v331_v38 = vadd.f32 %v329_v29, %v297_v33  ;;  %10416 = vst [vmem:[#allocation12_spill] sm:$0xff] %v6582_v61 }
 0x1d6   :  { %v357_v37 = vmul.f32 %v5373_v8, %v356_v35  ;;  %v6530_v48 = vmul.f32 %v364_v42, %v6343_v58  ;;  %v5335_v58 = vld [vmem:[%s10335_s5 + $0x8] sm:$0xff]   ;;  %10419 = vst [vmem:[#allocation15_spill] sm:$0xff] %v6598_v5 }
 0x1d7   :  { %v6552_v51 = vunpack.c.l.bf16 %v5335_v58  ;;  %v6560_v53 = vunpack.c.h.bf16 %v5335_v58  ;;  %10420 = vst [vmem:[#allocation16_spill] sm:$0xff] %v6604_v6 }
 0x1d8   :  { %v361_v39 = vsel %vm360_vm13, %v5373_v8, %v357_v37  ;;  %10421 = vst [vmem:[#allocation17_spill] sm:$0xff] %v6606_v7 }
 0x1d9   :  { %v363_v41 = vsel %vm227_vm11, %v361_v39, 0.0  ;;  %10410 = vst [vmem:[#allocation6_spill] sm:$0xff] %v6552_v51 }
 0x1da   :  { %v365_v43 = vadd.f32 %v363_v41, %v331_v38  ;;  %10412 = vst [vmem:[#allocation8_spill] sm:$0xff] %v6560_v53 }
 0x1dc   :  { %v6521_v45 = vmul.f32 %v365_v43, %v6354_v63  ;;  %v6538_v63 = vunpack.c.h.bf16 %v5304_v34 }
 0x1de   :  { %407 = vmatpush.msrb.mxu3 %v6521_v45  ;;  %472 = vmatpush.msra.mxu2 %v6521_v45  ;;  %10408 = vst [vmem:[#allocation4_spill] sm:$0xff] %v6538_v63 }
 0x1e0   :  { %408 = vmatpush.msrb.mxu3 %v6530_v48  ;;  %473 = vmatpush.msra.mxu2 %v6530_v48 }
 0x1e1   :  { %5175 = vmatmul.msk.f32.vlgmr.msrb.gmra.mxu3 %vm368_vm14, %v6523_v46  ;;  %5183 = vmatmul.msk.f32.vlgmr.msra.gmra.mxu2 %vm368_vm14, %v6525_v47 }
 0x1e9   :  { %5176 = vmatmul.msk.f32.gmra.mxu3 %vm368_vm14, %v6538_v63  ;;  %5184 = vmatmul.msk.f32.gmra.mxu2 %vm368_vm14, %v6540_v49 }
 0x1f1   :  { %5177 = vmatmul.msk.f32.gmra.mxu3 %vm368_vm14, %v6552_v51  ;;  %5185 = vmatmul.msk.f32.gmra.mxu2 %vm368_vm14, %v6554_v52 }
 0x1f9   :  { %5178 = vmatmul.msk.f32.gmra.mxu3 %vm368_vm14, %v6560_v53  ;;  %5186 = vmatmul.msk.f32.gmra.mxu2 %vm368_vm14, %v6562_v55 }
 0x201   :  { %5179 = vmatmul.msk.f32.gmra.mxu3 %vm368_vm14, %v6574_v59  ;;  %5187 = vmatmul.msk.f32.gmra.mxu2 %vm368_vm14, %v6576_v60 }
 0x209   :  { %5180 = vmatmul.msk.f32.gmra.mxu3 %vm368_vm14, %v6582_v61  ;;  %5188 = vmatmul.msk.f32.gmra.mxu2 %vm368_vm14, %v6584_v62 }
 0x211   :  { %5181 = vmatmul.msk.f32.gmra.mxu3 %vm368_vm14, %v6596_v4  ;;  %5189 = vmatmul.msk.f32.gmra.mxu2 %vm368_vm14, %v6598_v5 }
 0x219   :  { %5182 = vmatmul.msk.f32.gmra.mxu3 %vm368_vm14, %v6604_v6  ;;  %5190 = vmatmul.msk.f32.gmra.mxu2 %vm368_vm14, %v6606_v7 }
 0x264   :  { %v6612_v8 = vpop.f32.mrf.mxu3  ;;  %v475_v9 = vpop.f32.mrf.mxu2 }
 0x265   :  { %v6615_v10 = vmul.f32 %v475_v9, %v6612_v8 }
 0x267   :  { %v531_v11 = vsel %vm6358_vm9, %v6615_v10, 0.0  ;;  %v507_v12 = vsel %vm219_vm3, %v6615_v10, 0.0 }
 0x268   :  { %539 = vadd.xlane.f32.xlu1 %v531_v11  ;;  %515 = vadd.xlane.f32.xlu0 %v507_v12 }
 0x26c   :  { %v6623_v13 = vpop.f32.mrf.mxu3  ;;  %v478_v14 = vpop.f32.mrf.mxu2 }
 0x26d   :  { %v6626_v15 = vmul.f32 %v478_v14, %v6623_v13 }
 0x26f   :  { %v532_v16 = vsel %vm6358_vm9, %v6626_v15, 0.0  ;;  %v508_v19 = vsel %vm219_vm3, %v6626_v15, 0.0 }
 0x270   :  { %541 = vadd.xlane.f32.xlu0 %v532_v16  ;;  %517 = vadd.xlane.f32.xlu2 %v508_v19 }
 0x274   :  { %v6634_v20 = vpop.f32.mrf.mxu3  ;;  %v481_v21 = vpop.f32.mrf.mxu2 }
 0x275   :  { %v6637_v23 = vmul.f32 %v481_v21, %v6634_v20 }
 0x277   :  { %v533_v24 = vsel %vm6358_vm9, %v6637_v23, 0.0  ;;  %v509_v25 = vsel %vm219_vm3, %v6637_v23, 0.0  ;;  %v557_v28 = vsel %vm6366_vm10, %v6637_v23, 0.0 }
 0x278   :  { %543 = vadd.xlane.f32.xlu2 %v533_v24  ;;  %519 = vadd.xlane.f32.xlu1 %v509_v25  ;;  %v555_v24 = vsel %vm6366_vm10, %v6615_v10, 0.0 }
 0x27c   :  { %v6645_v26 = vpop.f32.mrf.mxu3  ;;  %v484_v18 = vpop.f32.mrf.mxu2 }
 0x27d   :  { %v502_v27 = vmul.f32 %v484_v18, %v6645_v26  ;;  %v556_v18 = vsel %vm6366_vm10, %v6626_v15, 0.0 }
 0x27f   :  { %v582_v17 = vsel %vm227_vm11, %v502_v27, 0.0  ;;  %v510_v30 = vsel %vm219_vm3, %v502_v27, 0.0  ;;  %v534_v35 = vsel %vm6358_vm9, %v502_v27, 0.0  ;;  %v558_v22 = vsel %vm6366_vm10, %v502_v27, 0.0 }
 0x280   :  { %567 = vadd.xlane.f32.xlu1 %v557_v28  ;;  %593 = vadd.xlane.f32.xlu2 %v582_v17  ;;  %v581_v27 = vsel %vm227_vm11, %v6637_v23, 0.0  ;;  %v580_v28 = vsel %vm227_vm11, %v6626_v15, 0.0  ;;  %v579_v17 = vsel %vm227_vm11, %v6615_v10, 0.0 }
 0x281   :  { %521 = vadd.xlane.f32.xlu0 %v510_v30 }
 0x284   :  { %v6655_v31 = vpop.f32.mrf.mxu3  ;;  %v487_v32 = vpop.f32.mrf.mxu2 }
 0x285   :  { %v503_v33 = vmul.f32 %v487_v32, %v6655_v31 }
 0x287   :  { %v511_v36 = vsel %vm219_vm3, %v503_v33, 0.0  ;;  %v583_v38 = vsel %vm227_vm11, %v503_v33, 0.0  ;;  %v559_v39 = vsel %vm6366_vm10, %v503_v33, 0.0  ;;  %v535_v40 = vsel %vm6358_vm9, %v503_v33, 0.0 }
 0x288   :  { %545 = vadd.xlane.f32.xlu1 %v534_v35  ;;  %523 = vadd.xlane.f32.xlu2 %v511_v36 }
 0x289   :  { %569 = vadd.xlane.f32.xlu0 %v558_v22 }
 0x28c   :  { %v6664_v37 = vpop.f32.mrf.mxu3  ;;  %v490_v29 = vpop.f32.mrf.mxu2 }
 0x28d   :  { %v504_v41 = vmul.f32 %v490_v29, %v6664_v37 }
 0x28f   :  { %v536_v42 = vsel %vm6358_vm9, %v504_v41, 0.0  ;;  %v512_v43 = vsel %vm219_vm3, %v504_v41, 0.0  ;;  %v584_v58 = vsel %vm227_vm11, %v504_v41, 0.0  ;;  %v560_v1 = vsel %vm6366_vm10, %v504_v41, 0.0 }
 0x290   :  { %595 = vadd.xlane.f32.xlu1 %v583_v38  ;;  %571 = vadd.xlane.f32.xlu2 %v559_v39 }
 0x291   :  { %547 = vadd.xlane.f32.xlu0 %v535_v40 }
 0x294   :  { %v6677_v34 = vpop.f32.mrf.mxu3  ;;  %v493_v44 = vpop.f32.mrf.mxu2 }
 0x295   :  { %v505_v50 = vmul.f32 %v493_v44, %v6677_v34 }
 0x297   :  { %v537_v56 = vsel %vm6358_vm9, %v505_v50, 0.0  ;;  %v561_v57 = vsel %vm6366_vm10, %v505_v50, 0.0  ;;  %v585_v12 = vsel %vm227_vm11, %v505_v50, 0.0  ;;  %v513_v14 = vsel %vm219_vm3, %v505_v50, 0.0 }
 0x298   :  { %549 = vadd.xlane.f32.xlu2 %v536_v42  ;;  %525 = vadd.xlane.f32.xlu1 %v512_v43 }
 0x299   :  { %597 = vadd.xlane.f32.xlu0 %v584_v58 }
 0x29c   :  { %v6688_v3 = vpop.f32.mrf.mxu3  ;;  %v496_v9 = vpop.f32.mrf.mxu2 }
 0x29d   :  { %v506_v11 = vmul.f32 %v496_v9, %v6688_v3 }
 0x29f   :  { %v538_v16 = vsel %vm6358_vm9, %v506_v11, 0.0  ;;  %v514_v19 = vsel %vm219_vm3, %v506_v11, 0.0  ;;  %v562_v21 = vsel %vm6366_vm10, %v506_v11, 0.0  ;;  %v586_v25 = vsel %vm227_vm11, %v506_v11, 0.0 }
 0x2a0   :  { %573 = vadd.xlane.f32.xlu1 %v560_v1  ;;  %551 = vadd.xlane.f32.xlu2 %v537_v56 }
 0x2a1   :  { %575 = vadd.xlane.f32.xlu0 %v561_v57 }
 0x2a8   :  { %599 = vadd.xlane.f32.xlu2 %v585_v12  ;;  %527 = vadd.xlane.f32.xlu1 %v513_v14 }
 0x2a9   :  { %553 = vadd.xlane.f32.xlu0 %v538_v16 }
 0x2b0   :  { %563 = vadd.xlane.f32.xlu1 %v555_v24  ;;  %529 = vadd.xlane.f32.xlu2 %v514_v19 }
 0x2b1   :  { %577 = vadd.xlane.f32.xlu0 %v562_v21 }
 0x2b8   :  { %601 = vadd.xlane.f32.xlu1 %v586_v25  ;;  %565 = vadd.xlane.f32.xlu2 %v556_v18 }
 0x2b9   :  { %591 = vadd.xlane.f32.xlu0 %v581_v27 }
 0x2c0   :  { %589 = vadd.xlane.f32.xlu2 %v580_v28 }
 0x2c1   :  { %587 = vadd.xlane.f32.xlu0 %v579_v17 }
 0x2db   :  { %v6718_v30 = vpop.xlane.xlu0 %515  ;;  %v6720_v32 = vpop.xlane.xlu1 %539 }
 0x2e3   :  { %v6722_v33 = vpop.xlane.xlu2 %517  ;;  %v6728_v22 = vpop.xlane.xlu0 %541 }
 0x2eb   :  { %v6724_v35 = vpop.xlane.xlu2 %543  ;;  %v6726_v23 = vpop.xlane.xlu1 %519 }
 0x2ec   :  { %v605_v53 = vmax.f32 %v6726_v23, %v6724_v35 }
 0x2f2   :  { %851 = vxpose.xlu1.b32.start [1/8] (short) (narrow) %v6525_v47, 16 }
 0x2f3   :  { %v6731_v15 = vpop.xlane.xlu1 %567  ;;  %v594_v36 = vpop.xlane.xlu2 %593 }
 0x2f4   :  { %v522_v10 = vpop.xlane.xlu0 %521 }
 0x2fa   :  { %852 = vxpose.xlu1.b32.cont [2/8] (short) (narrow) %v6540_v49, 16 }
 0x2fb   :  { %v546_v29 = vpop.xlane.xlu1 %545  ;;  %v524_v38 = vpop.xlane.xlu2 %523 }
 0x2fc   :  { %v570_v39 = vpop.xlane.xlu0 %569  ;;  %v606_v40 = vmax.f32 %v522_v10, %v546_v29 }
 0x2fe   :  { %v614_v41 = vmax.f32 %v606_v40, %v570_v39 }
 0x300   :  { %v622_v50 = vmax.f32 %v614_v41, %v594_v36 }
 0x302   :  { %853 = vxpose.xlu1.b32.cont [3/8] (short) (narrow) %v6554_v52, 16  ;;  %v630_v1 = vsub.f32 %v522_v10, %v622_v50  ;;  %v654_v12 = vsub.f32 %v546_v29, %v622_v50  ;;  %v678_v18 = vsub.f32 %v570_v39, %v622_v50 }
 0x303   :  { %v596_v42 = vpop.xlane.xlu1 %595  ;;  %v572_v43 = vpop.xlane.xlu2 %571 }
 0x304   :  { %v548_v44 = vpop.xlane.xlu0 %547  ;;  %v641_v21 = vmul.f32 1.442695, %v630_v1  ;;  %v665_v24 = vmul.f32 1.442695, %v654_v12  ;;  %v689_v29 = vmul.f32 1.442695, %v678_v18 }
 0x305   :  { %v607_v58 = vmax.f32 %v524_v38, %v548_v44 }
 0x306   :  { %5374 = vpow2.f32 %v641_v21 }
 0x307   :  { %v615_v56 = vmax.f32 %v607_v58, %v572_v43  ;;  %5376 = vpow2.f32 %v665_v24 }
 0x309   :  { %v623_v57 = vmax.f32 %v615_v56, %v596_v42 }
 0x30a   :  { %854 = vxpose.xlu1.b32.cont [4/8] (short) (narrow) %v6562_v55, 16 }
 0x30b   :  { %v550_v9 = vpop.xlane.xlu2 %549  ;;  %v526_v11 = vpop.xlane.xlu1 %525  ;;  %v631_v16 = vsub.f32 %v524_v38, %v623_v57  ;;  %v655_v19 = vsub.f32 %v548_v44, %v623_v57  ;;  %v679_v17 = vsub.f32 %v572_v43, %v623_v57  ;;  %v702_v44 = vsub.f32 %v594_v36, %v622_v50 }
 0x30c   :  { %v598_v14 = vpop.xlane.xlu0 %597  ;;  %v608_v28 = vmax.f32 %v526_v11, %v550_v9  ;;  %v703_v39 = vsub.f32 %v596_v42, %v623_v57 }
 0x30d   :  { %v643_v25 = vmul.f32 1.442695, %v631_v16  ;;  %v667_v27 = vmul.f32 1.442695, %v655_v19  ;;  %v691_v56 = vmul.f32 1.442695, %v679_v17  ;;  %v6741_v16 = vpop.eup %5374 }
 0x30e   :  { %v6743_v19 = vpop.eup %5376  ;;  %v713_v6 = vmul.f32 1.442695, %v702_v44  ;;  %v715_v42 = vmul.f32 1.442695, %v703_v39 }
 0x30f   :  { %5378 = vpow2.f32 %v643_v25 }
 0x310   :  { %5380 = vpow2.f32 %v667_v27 }
 0x311   :  { %5382 = vpow2.f32 %v689_v29 }
 0x312   :  { %855 = vxpose.xlu1.b32.cont [5/8] (short) (narrow) %v6576_v60, 16  ;;  %5384 = vpow2.f32 %v691_v56 }
 0x313   :  { %v574_v40 = vpop.xlane.xlu1 %573  ;;  %v6737_v41 = vpop.xlane.xlu2 %551 }
 0x314   :  { %v616_v10 = vmax.f32 %v608_v28, %v574_v40  ;;  %v6739_v58 = vpop.xlane.xlu0 %575 }
 0x315   :  { %v6745_v28 = vpop.eup %5378 }
 0x316   :  { %v624_v38 = vmax.f32 %v616_v10, %v598_v14  ;;  %v6748_v50 = vpop.eup %5380 }
 0x317   :  { %v6758_v10 = vpop.eup %5382 }
 0x318   :  { %v632_v1 = vsub.f32 %v526_v11, %v624_v38  ;;  %v656_v12 = vsub.f32 %v550_v9, %v624_v38  ;;  %v680_v24 = vsub.f32 %v574_v40, %v624_v38  ;;  %v726_v11 = vadd.f32 %v6743_v19, %v6741_v16  ;;  %v6760_v44 = vpop.eup %5384 }
 0x319   :  { %v704_v27 = vsub.f32 %v598_v14, %v624_v38  ;;  %v727_v40 = vadd.f32 %v6748_v50, %v6745_v28 }
 0x31a   :  { %v645_v43 = vmul.f32 1.442695, %v632_v1  ;;  %v669_v21 = vmul.f32 1.442695, %v656_v12  ;;  %856 = vxpose.xlu1.b32.cont [6/8] (short) (narrow) %v6584_v62, 16  ;;  %v734_v39 = vadd.f32 %v6758_v10, %v726_v11 }
 0x31b   :  { %v600_v25 = vpop.xlane.xlu2 %599  ;;  %v528_v36 = vpop.xlane.xlu1 %527  ;;  %v693_v18 = vmul.f32 1.442695, %v680_v24  ;;  %v717_v1 = vmul.f32 1.442695, %v704_v27  ;;  %v735_v14 = vadd.f32 %v6760_v44, %v727_v40 }
 0x31c   :  { %5386 = vpow2.f32 %v645_v43  ;;  %v609_v57 = vmax.f32 %v528_v36, %v6737_v41  ;;  %v6751_v9 = vpop.xlane.xlu0 %553 }
 0x31d   :  { %5388 = vpow2.f32 %v669_v21 }
 0x31e   :  { %v617_v17 = vmax.f32 %v609_v57, %v6739_v58  ;;  %5390 = vpow2.f32 %v713_v6 }
 0x31f   :  { %5392 = vpow2.f32 %v715_v42 }
 0x320   :  { %v625_v29 = vmax.f32 %v617_v17, %v600_v25  ;;  %5394 = vpow2.f32 %v693_v18 }
 0x321   :  { %5396 = vpow2.f32 %v717_v1 }
 0x322   :  { %v6762_v56 = vpop.eup %5386  ;;  %857 = vxpose.xlu1.b32.cont [7/8] (short) (narrow) %v6598_v5, 16  ;;  %v633_v43 = vsub.f32 %v528_v36, %v625_v29  ;;  %v657_v57 = vsub.f32 %v6737_v41, %v625_v29  ;;  %v681_v17 = vsub.f32 %v6739_v58, %v625_v29  ;;  %v705_v36 = vsub.f32 %v600_v25, %v625_v29 }
 0x323   :  { %v6767_v6 = vpop.xlane.xlu1 %563  ;;  %v530_v38 = vpop.xlane.xlu2 %529 }
 0x324   :  { %v6769_v12 = vpop.eup %5388  ;;  %v578_v21 = vpop.xlane.xlu0 %577  ;;  %v610_v11 = vmax.f32 %v530_v38, %v6751_v9  ;;  %v647_v61 = vmul.f32 1.442695, %v633_v43  ;;  %v671_v51 = vmul.f32 1.442695, %v657_v57  ;;  %v695_v63 = vmul.f32 1.442695, %v681_v17 }
 0x325   :  { %v6771_v24 = vpop.eup %5390  ;;  %v728_v42 = vadd.f32 %v6769_v12, %v6762_v56  ;;  %v719_v25 = vmul.f32 1.442695, %v705_v36 }
 0x326   :  { %v6777_v18 = vpop.eup %5392  ;;  %v742_v27 = vadd.f32 %v6771_v24, %v734_v39  ;;  %v618_v59 = vmax.f32 %v610_v11, %v578_v21  ;;  %v613_v39 = vmax.f32 %v605_v53, %v6731_v15 }
 0x327   :  { %v743_v40 = vadd.f32 %v6777_v18, %v735_v14  ;;  %v6782_v4 = vpop.eup %5394 }
 0x328   :  { %v736_v41 = vadd.f32 %v6782_v4, %v728_v42  ;;  %5398 = vrcp.f32 %v742_v27  ;;  %v6791_v29 = vpop.eup %5396  ;;  %v604_v42 = vmax.f32 %v6722_v33, %v6728_v22 }
 0x329   :  { %5400 = vrcp.f32 %v743_v40 }
 0x32a   :  { %858 = vxpose.xlu1.b32.end [8/8] (short) (narrow) %v6606_v7, 16  ;;  %5402 = vpow2.f32 %v647_v61  ;;  %v744_v57 = vadd.f32 %v6791_v29, %v736_v41 }
 0x32b   :  { %v602_v58 = vpop.xlane.xlu1 %601  ;;  %v6789_v1 = vpop.xlane.xlu2 %565  ;;  %5404 = vpow2.f32 %v671_v51 }
 0x32c   :  { %v626_v14 = vmax.f32 %v618_v59, %v602_v58  ;;  %v592_v43 = vpop.xlane.xlu0 %591  ;;  %5406 = vpow2.f32 %v695_v63  ;;  %v603_v63 = vmax.f32 %v6718_v30, %v6720_v32 }
 0x32d   :  { %v621_v11 = vmax.f32 %v613_v39, %v592_v43  ;;  %5408 = vpow2.f32 %v719_v25 }
 0x32e   :  { %v634_v53 = vsub.f32 %v530_v38, %v626_v14  ;;  %v658_v27 = vsub.f32 %v6751_v9, %v626_v14  ;;  %v682_v17 = vsub.f32 %v578_v21, %v626_v14  ;;  %v706_v40 = vsub.f32 %v602_v58, %v626_v14  ;;  %v6799_v59 = vpop.eup %5398 }
 0x32f   :  { %v629_v36 = vsub.f32 %v6726_v23, %v621_v11  ;;  %v653_v46 = vsub.f32 %v6724_v35, %v621_v11  ;;  %v677_v41 = vsub.f32 %v6731_v15, %v621_v11  ;;  %v6802_v51 = vpop.eup %5400  ;;  %5410 = vrcp.f32 %v744_v57 }
 0x330   :  { %v649_v61 = vmul.f32 1.442695, %v634_v53  ;;  %v673_v7 = vmul.f32 1.442695, %v658_v27  ;;  %v697_v5 = vmul.f32 1.442695, %v682_v17  ;;  %v701_v38 = vsub.f32 %v592_v43, %v621_v11  ;;  %v6806_v21 = vpop.eup %5402 }
 0x331   :  { %v721_v9 = vmul.f32 1.442695, %v706_v40  ;;  %v639_v35 = vmul.f32 1.442695, %v629_v36  ;;  %v612_v23 = vmax.f32 %v604_v42, %v6789_v1  ;;  %v6809_v39 = vpop.eup %5404  ;;  %v611_v58 = vmax.f32 %v603_v63, %v6767_v6 }
 0x332   :  { %5412 = vpow2.f32 %v649_v61  ;;  %v663_v15 = vmul.f32 1.442695, %v653_v46  ;;  %v6812_v14 = vpop.eup %5406  ;;  %v687_v53 = vmul.f32 1.442695, %v677_v41  ;;  %v711_v11 = vmul.f32 1.442695, %v701_v38 }
 0x333   :  { %5414 = vpow2.f32 %v673_v7  ;;  %v590_v25 = vpop.xlane.xlu2 %589  ;;  %v6814_v43 = vpop.eup %5408  ;;  %v729_v42 = vadd.f32 %v6809_v39, %v6806_v21 }
 0x334   :  { %5416 = vpow2.f32 %v697_v5  ;;  %v588_v57 = vpop.xlane.xlu0 %587  ;;  %v620_v27 = vmax.f32 %v612_v23, %v590_v25 }
 0x335   :  { %5418 = vpow2.f32 %v721_v9  ;;  %v619_v17 = vmax.f32 %v611_v58, %v588_v57  ;;  %v6820_v7 = vpop.eup %5410 }
 0x336   :  { %5420 = vpow2.f32 %v639_v35  ;;  %v628_v40 = vsub.f32 %v6722_v33, %v620_v27  ;;  %v652_v46 = vsub.f32 %v6728_v22, %v620_v27  ;;  %v676_v38 = vsub.f32 %v6789_v1, %v620_v27 }
 0x337   :  { %5422 = vpow2.f32 %v663_v15  ;;  %v627_v5 = vsub.f32 %v6718_v30, %v619_v17  ;;  %v651_v36 = vsub.f32 %v6720_v32, %v619_v17  ;;  %v675_v61 = vsub.f32 %v6767_v6, %v619_v17 }
 0x338   :  { %v6825_v41 = vpop.eup %5412  ;;  %5424 = vpow2.f32 %v687_v53  ;;  %v699_v63 = vsub.f32 %v588_v57, %v619_v17  ;;  %v637_v9 = vmul.f32 1.442695, %v628_v40  ;;  %v737_v15 = vadd.f32 %v6812_v14, %v729_v42 }
 0x339   :  { %v6828_v35 = vpop.eup %5414  ;;  %5426 = vpow2.f32 %v711_v11  ;;  %v635_v33 = vmul.f32 1.442695, %v627_v5  ;;  %v659_v22 = vmul.f32 1.442695, %v651_v36  ;;  %v683_v23 = vmul.f32 1.442695, %v675_v61 }
 0x33a   :  { %v6830_v58 = vpop.eup %5416  ;;  %v730_v30 = vadd.f32 %v6828_v35, %v6825_v41  ;;  %v707_v32 = vmul.f32 1.442695, %v699_v63  ;;  %5428 = vpow2.f32 %v637_v9  ;;  %v661_v53 = vmul.f32 1.442695, %v652_v46 }
 0x33b   :  { %v6834_v6 = vpop.eup %5418  ;;  %5430 = vpow2.f32 %v635_v33  ;;  %v700_v1 = vsub.f32 %v590_v25, %v620_v27  ;;  %v758_v17 = vmul.f32 %v6799_v59, %v6741_v16  ;;  %v685_v5 = vmul.f32 1.442695, %v676_v38 }
 0x33c   :  { %v6837_v57 = vpop.eup %5420  ;;  %v738_v11 = vadd.f32 %v6830_v58, %v730_v30  ;;  %5432 = vpow2.f32 %v659_v22  ;;  %v774_v36 = vmul.f32 %v6799_v59, %v6743_v19  ;;  %v745_v16 = vadd.f32 %v6814_v43, %v737_v15 }
 0x33d   :  { %v6842_v40 = vpop.eup %5422  ;;  %5434 = vpow2.f32 %v683_v23  ;;  %v709_v27 = vmul.f32 1.442695, %v700_v1  ;;  %v760_v63 = vmul.f32 %v6820_v7, %v6762_v56  ;;  %v776_v19 = vmul.f32 %v6820_v7, %v6769_v12 }
 0x33e   :  { %v6846_v61 = vpop.eup %5424  ;;  %v746_v42 = vadd.f32 %v6834_v6, %v738_v11  ;;  %v725_v25 = vadd.f32 %v6842_v40, %v6837_v57  ;;  %5436 = vpow2.f32 %v707_v32  ;;  %v766_v33 = vsel %vm219_vm3, %v758_v17, 0.0 }
 0x33f   :  { %v6851_v46 = vpop.eup %5426  ;;  %5438 = vpow2.f32 %v661_v53  ;;  %v6865_v22 = vmul.f32 %v6799_v59, %v6758_v10  ;;  %v759_v56 = vmul.f32 %v6802_v51, %v6745_v28  ;;  %v775_v12 = vmul.f32 %v6802_v51, %v6748_v50 }
 0x340   :  { %v6858_v9 = vpop.eup %5428  ;;  %5440 = vrcp.f32 %v746_v42  ;;  %v733_v38 = vadd.f32 %v6846_v61, %v725_v25  ;;  %v782_v30 = vsel %vm6358_vm9, %v774_v36, 0.0  ;;  %v799_v10 = vmul.f32 %v6802_v51, %v6760_v44 }
 0x341   :  { %v6867_v23 = vpop.eup %5430  ;;  %5442 = vpow2.f32 %v685_v5  ;;  %v768_v28 = vsel %vm219_vm3, %v760_v63, 0.0  ;;  %v784_v50 = vsel %vm6358_vm9, %v776_v19, 0.0  ;;  %v800_v17 = vmul.f32 %v6820_v7, %v6782_v4 }
 0x342   :  { %v6875_v32 = vpop.eup %5432  ;;  %v741_v15 = vadd.f32 %v6851_v46, %v733_v38  ;;  %5444 = vpow2.f32 %v709_v27  ;;  %v790_v5 = vadd.f32 %v782_v30, %v766_v33  ;;  %v6894_v44 = vmul.f32 %v6799_v59, %v6771_v24 }
 0x343   :  { %v6880_v53 = vpop.eup %5434  ;;  %v723_v1 = vadd.f32 %v6875_v32, %v6867_v23  ;;  %5446 = vrcp.f32 %v745_v16  ;;  %v767_v25 = vsel %vm219_vm3, %v759_v56, 0.0  ;;  %v783_v27 = vsel %vm6358_vm9, %v775_v12, 0.0 }
 0x344   :  { %v6888_v11 = vpop.eup %5436  ;;  %5448 = vrcp.f32 %v741_v15  ;;  %v806_v16 = vsel %vm6366_vm10, %v6865_v22, 0.0  ;;  %v792_v24 = vadd.f32 %v784_v50, %v768_v28  ;;  %v807_v59 = vsel %vm6366_vm10, %v799_v10, 0.0 }
 0x345   :  { %v6896_v36 = vpop.eup %5438  ;;  %v731_v42 = vadd.f32 %v6880_v53, %v723_v1  ;;  %v823_v19 = vmul.f32 %v6802_v51, %v6777_v18  ;;  %v808_v1 = vsel %vm6366_vm10, %v800_v17, 0.0  ;;  %v824_v10 = vmul.f32 %v6820_v7, %v6791_v29 }
 0x346   :  { %v5441_v4 = vpop.eup %5440  ;;  %v724_v63 = vadd.f32 %v6896_v36, %v6858_v9  ;;  %v791_v28 = vadd.f32 %v783_v27, %v767_v25  ;;  %v816_v17 = vadd.f32 %v808_v1, %v792_v24 }
 0x347   :  { %v5443_v38 = vpop.eup %5442  ;;  %v739_v33 = vadd.f32 %v6888_v11, %v731_v42  ;;  %v762_v56 = vmul.f32 %v5441_v4, %v6825_v41  ;;  %v778_v12 = vmul.f32 %v5441_v4, %v6828_v35  ;;  %v802_v22 = vmul.f32 %v5441_v4, %v6830_v58 }
 0x348   :  { %v5445_v30 = vpop.eup %5444  ;;  %v732_v15 = vadd.f32 %v5443_v38, %v724_v63  ;;  %v826_v41 = vmul.f32 %v5441_v4, %v6834_v6  ;;  %v832_v1 = vsel %vm227_vm11, %v824_v10, 0.0 }
 0x349   :  { %v5447_v50 = vpop.eup %5446  ;;  %5450 = vrcp.f32 %v739_v33  ;;  %v770_v18 = vsel %vm219_vm3, %v762_v56, 0.0  ;;  %v786_v51 = vsel %vm6358_vm9, %v778_v12, 0.0  ;;  %v810_v29 = vsel %vm6366_vm10, %v802_v22, 0.0 }
 0x34a   :  { %v5449_v35 = vpop.eup %5448  ;;  %v740_v58 = vadd.f32 %v5445_v30, %v732_v15  ;;  %v794_v42 = vadd.f32 %v786_v51, %v770_v18  ;;  %v761_v63 = vmul.f32 %v5447_v50, %v6806_v21  ;;  %v777_v7 = vmul.f32 %v5447_v50, %v6809_v39 }
 0x34b   :  { %v801_v25 = vmul.f32 %v5447_v50, %v6812_v14  ;;  %v757_v27 = vmul.f32 %v5449_v35, %v6837_v57  ;;  %v773_v4 = vmul.f32 %v5449_v35, %v6842_v40  ;;  %v834_v21 = vsel %vm227_vm11, %v826_v41, 0.0 }
 0x34c   :  { %5452 = vrcp.f32 %v740_v58  ;;  %v818_v33 = vadd.f32 %v810_v29, %v794_v42  ;;  %v769_v6 = vsel %vm219_vm3, %v761_v63, 0.0  ;;  %v785_v24 = vsel %vm6358_vm9, %v777_v7, 0.0 }
 0x34d   :  { %v825_v56 = vmul.f32 %v5447_v50, %v6814_v43  ;;  %v765_v39 = vsel %vm219_vm3, %v757_v27, 0.0  ;;  %v793_v57 = vadd.f32 %v785_v24, %v769_v6  ;;  %v781_v12 = vsel %vm6358_vm9, %v773_v4, 0.0 }
 0x34e   :  { %v842_v14 = vadd.f32 %v834_v21, %v818_v33  ;;  %v797_v22 = vmul.f32 %v5449_v35, %v6846_v61  ;;  %v809_v40 = vsel %vm6366_vm10, %v801_v25, 0.0  ;;  %v815_v18 = vadd.f32 %v807_v59, %v791_v28 }
 0x34f   :  { %v5451_v15 = vpop.eup %5450  ;;  %v814_v51 = vadd.f32 %v806_v16, %v790_v5  ;;  %v817_v50 = vadd.f32 %v809_v40, %v793_v57  ;;  %v789_v41 = vadd.f32 %v781_v12, %v765_v39  ;;  %v833_v42 = vsel %vm227_vm11, %v825_v56, 0.0 }
 0x350   :  { %v850_v43 = vmul.f32 %v842_v14, %v6688_v3  ;;  %v755_v58 = vmul.f32 %v5451_v15, %v6867_v23  ;;  %v840_v63 = vadd.f32 %v832_v1, %v816_v17  ;;  %v831_v61 = vsel %vm227_vm11, %v823_v19, 0.0 }
 0x351   :  { %v771_v29 = vmul.f32 %v5451_v15, %v6875_v32  ;;  %v841_v10 = vadd.f32 %v833_v42, %v817_v50  ;;  %v805_v5 = vsel %vm6366_vm10, %v797_v22, 0.0  ;;  %v821_v16 = vmul.f32 %v5449_v35, %v6851_v46 }
 0x352   :  { %v5453_v7 = vpop.eup %5452  ;;  %897 = vmatpush.msrb.mxu1 %v850_v43  ;;  %v795_v59 = vmul.f32 %v5451_v15, %v6880_v53  ;;  %v763_v19 = vsel %vm219_vm3, %v755_v58, 0.0  ;;  %v839_v25 = vadd.f32 %v831_v61, %v815_v18  ;;  %v813_v27 = vadd.f32 %v805_v5, %v789_v41 }
 0x353   :  { %v756_v23 = vmul.f32 %v5453_v7, %v6858_v9  ;;  %v772_v28 = vmul.f32 %v5453_v7, %v6896_v36  ;;  %v796_v17 = vmul.f32 %v5453_v7, %v5443_v38  ;;  %v849_v32 = vmul.f32 %v841_v10, %v6677_v34 }
 0x354   :  { %v779_v33 = vsel %vm6358_vm9, %v771_v29, 0.0  ;;  %v830_v46 = vsel %vm227_vm11, %v6894_v44, 0.0  ;;  %v820_v36 = vmul.f32 %v5453_v7, %v5445_v30  ;;  %v848_v38 = vmul.f32 %v840_v63, %v6664_v37 }
 0x355   :  { %v764_v9 = vsel %vm219_vm3, %v756_v23, 0.0  ;;  %v780_v53 = vsel %vm6358_vm9, %v772_v28, 0.0  ;;  %898 = vmatpush.msrb.mxu1 %v849_v32  ;;  %v838_v35 = vadd.f32 %v830_v46, %v814_v51  ;;  %v787_v4 = vadd.f32 %v779_v33, %v763_v19 }
 0x356   :  { %v788_v6 = vadd.f32 %v780_v53, %v764_v9  ;;  %v829_v21 = vsel %vm227_vm11, %v821_v16, 0.0  ;;  %v804_v24 = vsel %vm6366_vm10, %v796_v17, 0.0  ;;  %v803_v44 = vsel %vm6366_vm10, %v795_v59, 0.0 }
 0x357   :  { %v819_v56 = vmul.f32 %v5451_v15, %v6888_v11  ;;  %899 = vmatpush.msrb.mxu1 %v848_v38  ;;  %v847_v30 = vmul.f32 %v839_v25, %v6655_v31  ;;  %v837_v39 = vadd.f32 %v829_v21, %v813_v27  ;;  %v811_v57 = vadd.f32 %v803_v44, %v787_v4 }
 0x358   :  { %v812_v14 = vadd.f32 %v804_v24, %v788_v6  ;;  %v828_v12 = vsel %vm227_vm11, %v820_v36, 0.0  ;;  %v846_v22 = vmul.f32 %v838_v35, %v6645_v26 }
 0x359   :  { %900 = vmatpush.msrb.mxu1 %v847_v30  ;;  %v827_v1 = vsel %vm227_vm11, %v819_v56, 0.0  ;;  %v845_v18 = vmul.f32 %v837_v39, %v6634_v20 }
 0x35a   :  { %v836_v40 = vadd.f32 %v828_v12, %v812_v14  ;;  %v835_v11 = vadd.f32 %v827_v1, %v811_v57 }
 0x35b   :  { %901 = vmatpush.msrb.mxu1 %v846_v22 }
 0x35c   :  { %v844_v15 = vmul.f32 %v836_v40, %v6623_v13  ;;  %v843_v51 = vmul.f32 %v835_v11, %v6612_v8 }
 0x35d   :  { %902 = vmatpush.msrb.mxu1 %v845_v18 }
 0x35f   :  { %903 = vmatpush.msrb.mxu1 %v844_v15 }
 0x361   :  { %904 = vmatpush.msrb.mxu1 %v843_v51 }
 0x396   :  { %v6990_v43 = vpop.trf.xlu1 }
 0x397   :  { %5191 = vmatmul.msk.f32.vlgmr.msrb.gmra.mxu1 %vm10367_vm1, %v6990_v43 }
 0x39e   :  { %v6994_v50 = vpop.trf.xlu1 }
 0x39f   :  { %5192 = vmatmul.msk.f32.gmra.mxu1 %vm10367_vm1, %v6994_v50 }
 0x414   :  { %v906_v41 = vpop.f32.mrf.mxu1 }
 0x415   :  { %v6999_v58 = vadd.f32 %v906_v41, %v6530_v48 }
 0x417   :  { %v912_v42 = vmul.f32 %v6999_v58, %v6999_v58 }
 0x419   :  { %v944_v63 = vsel %vm6358_vm9, %v912_v42, 0.0  ;;  %v914_v61 = vsel %vm219_vm3, %v912_v42, 0.0  ;;  %v976_v5 = vsel %vm6366_vm10, %v912_v42, 0.0  ;;  %v1008_v28 = vsel %vm227_vm11, %v912_v42, 0.0 }
 0x41a   :  { %946 = vadd.xlane.f32.xlu0 %v944_v63  ;;  %916 = vadd.xlane.f32.xlu2 %v914_v61 }
 0x41c   :  { %v909_v29 = vpop.f32.mrf.mxu1 }
 0x41d   :  { %v7008_v7 = vadd.f32 %v909_v29, %v6521_v45 }
 0x41f   :  { %v913_v10 = vmul.f32 %v7008_v7, %v7008_v7 }
 0x421   :  { %v915_v16 = vsel %vm219_vm3, %v913_v10, 0.0  ;;  %v945_v59 = vsel %vm6358_vm9, %v913_v10, 0.0  ;;  %v977_v23 = vsel %vm6366_vm10, %v913_v10, 0.0  ;;  %v1009_v17 = vsel %vm227_vm11, %v913_v10, 0.0 }
 0x422   :  { %978 = vadd.xlane.f32.xlu0 %v976_v5  ;;  %918 = vadd.xlane.f32.xlu2 %v915_v16 }
 0x42a   :  { %948 = vadd.xlane.f32.xlu0 %v945_v59  ;;  %980 = vadd.xlane.f32.xlu2 %v977_v23 }
 0x432   :  { %1010 = vadd.xlane.f32.xlu0 %v1008_v28  ;;  %1012 = vadd.xlane.f32.xlu2 %v1009_v17 }
 0x48d   :  { %v947_v19 = vpop.xlane.xlu0 %946  ;;  %v917_v32 = vpop.xlane.xlu2 %916 }
 0x48e   :  { %v950_v25 = vmax.f32 %v947_v19, 1e-24  ;;  %v7024_v27 = vmax.f32 %v917_v32, 1e-24 }
 0x490   :  { %5454 = vrsqrt.f32 %v950_v25  ;;  %vm958_vm0 = vweird.f32 %v950_v25  ;;  %vm928_vm5 = vweird.f32 %v7024_v27 }
 0x491   :  { %5456 = vrsqrt.f32 %v7024_v27 }
 0x495   :  { %v979_v33 = vpop.xlane.xlu0 %978  ;;  %v919_v46 = vpop.xlane.xlu2 %918 }
 0x496   :  { %v7027_v9 = vmax.f32 %v979_v33, 1e-24  ;;  %v7029_v53 = vmax.f32 %v919_v46, 1e-24  ;;  %v7032_v36 = vpop.eup %5454 }
 0x497   :  { %v7035_v38 = vpop.eup %5456  ;;  %v953_v35 = vmul.f32 %v7032_v36, %v950_v25  ;;  %vm959_vm15 = vweird.f32 %v7032_v36 }
 0x498   :  { %5458 = vrsqrt.f32 %v7027_v9  ;;  %v923_v6 = vmul.f32 %v7035_v38, %v7024_v27  ;;  %vm929_vm4 = vweird.f32 %v7035_v38  ;;  %vm7070_vm2 = vmor %vm958_vm0, %vm959_vm15  ;;  %vm990_vm12 = vweird.f32 %v7027_v9 }
 0x499   :  { %5460 = vrsqrt.f32 %v7029_v53  ;;  %v954_v57 = vmul.f32 %v7032_v36, %v953_v35  ;;  %vm7077_vm8 = vmor %vm928_vm5, %vm929_vm4  ;;  %vm938_vm0 = vweird.f32 %v7029_v53 }
 0x49a   :  { %v924_v12 = vmul.f32 %v7035_v38, %v923_v6 }
 0x49b   :  { %v955_v1 = vmul.f32 0.5, %v954_v57 }
 0x49c   :  { %v925_v18 = vmul.f32 0.5, %v924_v12 }
 0x49d   :  { %v949_v4 = vpop.xlane.xlu0 %948  ;;  %v981_v21 = vpop.xlane.xlu2 %980  ;;  %v956_v16 = vsub.f32 1.5, %v955_v1 }
 0x49e   :  { %v7040_v24 = vpop.eup %5458  ;;  %v951_v44 = vmax.f32 %v949_v4, 1e-24  ;;  %v7042_v56 = vmax.f32 %v981_v21, 1e-24  ;;  %v926_v59 = vsub.f32 1.5, %v925_v18 }
 0x49f   :  { %v7044_v30 = vpop.eup %5460  ;;  %v985_v39 = vmul.f32 %v7040_v24, %v7027_v9  ;;  %v957_v46 = vmul.f32 %v7032_v36, %v956_v16  ;;  %vm991_vm15 = vweird.f32 %v7040_v24 }
 0x4a0   :  { %v933_v14 = vmul.f32 %v7044_v30, %v7029_v53  ;;  %5462 = vrsqrt.f32 %v951_v44  ;;  %v927_v35 = vmul.f32 %v7035_v38, %v926_v59  ;;  %vm939_vm6 = vweird.f32 %v7044_v30 }
 0x4a1   :  { %5464 = vrsqrt.f32 %v7042_v56  ;;  %v986_v40 = vmul.f32 %v7040_v24, %v985_v39  ;;  %vm968_vm13 = vweird.f32 %v951_v44  ;;  %vm7088_vm4 = vmor %vm938_vm0, %vm939_vm6 }
 0x4a2   :  { %v934_v22 = vmul.f32 %v7044_v30, %v933_v14 }
 0x4a3   :  { %v987_v10 = vmul.f32 0.5, %v986_v40 }
 0x4a4   :  { %v935_v41 = vmul.f32 0.5, %v934_v22 }
 0x4a5   :  { %v1011_v11 = vpop.xlane.xlu0 %1010  ;;  %v1013_v15 = vpop.xlane.xlu2 %1012  ;;  %v988_v32 = vsub.f32 1.5, %v987_v10 }
 0x4a6   :  { %v5463_v51 = vpop.eup %5462  ;;  %v7055_v42 = vmax.f32 %v1011_v11, 1e-24  ;;  %v7057_v63 = vmax.f32 %v1013_v15, 1e-24  ;;  %v936_v28 = vsub.f32 1.5, %v935_v41  ;;  %v961_v15 = vsel %vm7070_vm2, %v7032_v36, %v957_v46 }
 0x4a7   :  { %v7059_v61 = vpop.eup %5464  ;;  %v963_v29 = vmul.f32 %v5463_v51, %v951_v44  ;;  %vm969_vm7 = vweird.f32 %v5463_v51  ;;  %v989_v40 = vmul.f32 %v7040_v24, %v988_v32  ;;  %v931_v44 = vsel %vm7077_vm8, %v7035_v38, %v927_v35 }
 0x4a8   :  { %v995_v5 = vmul.f32 %v7059_v61, %v7042_v56  ;;  %5466 = vrsqrt.f32 %v7055_v42  ;;  %v937_v39 = vmul.f32 %v7044_v30, %v936_v28  ;;  %vm970_vm1 = vmor %vm968_vm13, %vm969_vm7  ;;  %vm1001_vm7 = vweird.f32 %v7059_v61 }
 0x4a9   :  { %v964_v23 = vmul.f32 %v5463_v51, %v963_v29  ;;  %5468 = vrsqrt.f32 %v7057_v63  ;;  %vm1000_vm2 = vweird.f32 %v7042_v56  ;;  %v972_v56 = vsel %vm6358_vm9, %v961_v15, 0.0 }
 0x4aa   :  { %v996_v17 = vmul.f32 %v7059_v61, %v995_v5  ;;  %v941_v29 = vsel %vm7088_vm4, %v7044_v30, %v937_v39  ;;  %v942_v5 = vsel %vm219_vm3, %v931_v44, 0.0  ;;  %vm7117_vm5 = vmor %vm1000_vm2, %vm1001_vm7  ;;  %vm10434_vm4 = vcmask 523264  }
 0x4ab   :  { %v965_v19 = vmul.f32 0.5, %v964_v23  ;;  %v943_v59 = vsel %vm219_vm3, %v941_v29, 0.0  ;;  %vm10435_vm7 = vmmov %vm10434_vm4 }
 0x4ac   :  { %v997_v33 = vmul.f32 0.5, %v996_v17 }
 0x4ad   :  { %v966_v6 = vsub.f32 1.5, %v965_v19 }
 0x4ae   :  { %v5467_v4 = vpop.eup %5466  ;;  %v998_v25 = vsub.f32 1.5, %v997_v33  ;;  %v974_v33 = vadd.f32 %v972_v56, %v942_v5 }
 0x4af   :  { %v5469_v14 = vpop.eup %5468  ;;  %v967_v12 = vmul.f32 %v5463_v51, %v966_v6  ;;  %v1017_v22 = vmul.f32 %v5467_v4, %v7055_v42  ;;  %vm1023_vm6 = vweird.f32 %v5467_v4 }
 0x4b0   :  { %v1027_v27 = vmul.f32 %v5469_v14, %v7057_v63  ;;  %v999_v53 = vmul.f32 %v7059_v61, %v998_v25  ;;  %vm1033_vm8 = vweird.f32 %v5469_v14 }
 0x4b1   :  { %v1018_v18 = vmul.f32 %v5467_v4, %v1017_v22  ;;  %v971_v11 = vsel %vm970_vm1, %v5463_v51, %v967_v12  ;;  %vm7105_vm1 = vmor %vm990_vm12, %vm991_vm15  ;;  %vm1022_vm12 = vweird.f32 %v7055_v42  ;;  %vm1032_vm15 = vweird.f32 %v7057_v63 }
 0x4b2   :  { %v1028_v41 = vmul.f32 %v5469_v14, %v1027_v27  ;;  %v973_v10 = vsel %vm6358_vm9, %v971_v11, 0.0  ;;  %v993_v30 = vsel %vm7105_vm1, %v7040_v24, %v989_v40  ;;  %v1003_v17 = vsel %vm7117_vm5, %v7059_v61, %v999_v53  ;;  %vm1024_vm13 = vmor %vm1022_vm12, %vm1023_vm6 }
 0x4b3   :  { %v1019_v38 = vmul.f32 0.5, %v1018_v18  ;;  %v975_v28 = vadd.f32 %v973_v10, %v943_v59  ;;  %v1004_v24 = vsel %vm6366_vm10, %v993_v30, 0.0  ;;  %vm1034_vm0 = vmor %vm1032_vm15, %vm1033_vm8  ;;  %v1005_v46 = vsel %vm6366_vm10, %v1003_v17, 0.0 }
 0x4b4   :  { %v1029_v36 = vmul.f32 0.5, %v1028_v41  ;;  %v1006_v39 = vadd.f32 %v1004_v24, %v974_v33 }
 0x4b5   :  { %v1020_v16 = vsub.f32 1.5, %v1019_v38  ;;  %v1007_v6 = vadd.f32 %v1005_v46, %v975_v28 }
 0x4b6   :  { %v1030_v23 = vsub.f32 1.5, %v1029_v36 }
 0x4b7   :  { %v1021_v19 = vmul.f32 %v5467_v4, %v1020_v16 }
 0x4b8   :  { %v1031_v32 = vmul.f32 %v5469_v14, %v1030_v23 }
 0x4b9   :  { %v1025_v35 = vsel %vm1024_vm13, %v5467_v4, %v1021_v19 }
 0x4ba   :  { %v1035_v21 = vsel %vm1034_vm0, %v5469_v14, %v1031_v32  ;;  %v1036_v42 = vsel %vm227_vm11, %v1025_v35, 0.0 }
 0x4bb   :  { %v1037_v61 = vsel %vm227_vm11, %v1035_v21, 0.0  ;;  %v1038_v57 = vadd.f32 %v1036_v42, %v1006_v39 }
 0x4bc   :  { %v1039_v25 = vadd.f32 %v1037_v61, %v1007_v6 }
 0x4bd   :  { %v1040_v12 = vmul.f32 %v1038_v57, %v6999_v58  ;;  %v10432_v58 = vld [vmem:[#allocation15_spill] sm:$0xff] }
 0x4be   :  { %v1041_v63 = vmul.f32 %v1039_v25, %v7008_v7  ;;  %v10433_v7 = vld [vmem:[#allocation17_spill] sm:$0xff] }
 0x4c0   :  { %1056 = vmatpush.msrb.mxu0 %v1041_v63 }
 0x4c2   :  { %1057 = vmatpush.msrb.mxu0 %v1040_v12 }
 0x4c3   :  { %5193 = vmatmul.msk.f32.vlgmr.msrb.gmra.mxu0 %vm368_vm14, %v6525_v47 }
 0x4cb   :  { %5194 = vmatmul.msk.f32.gmra.mxu0 %vm368_vm14, %v6540_v49 }
 0x4d3   :  { %5195 = vmatmul.msk.f32.gmra.mxu0 %vm368_vm14, %v6554_v52 }
 0x4db   :  { %5196 = vmatmul.msk.f32.gmra.mxu0 %vm368_vm14, %v6562_v55 }
 0x4e3   :  { %5197 = vmatmul.msk.f32.gmra.mxu0 %vm368_vm14, %v6576_v60 }
 0x4eb   :  { %5198 = vmatmul.msk.f32.gmra.mxu0 %vm368_vm14, %v6584_v62 }
 0x4f3   :  { %5199 = vmatmul.msk.f32.gmra.mxu0 %vm368_vm14, %v10432_v58 }
 0x4fb   :  { %5200 = vmatmul.msk.f32.gmra.mxu0 %vm368_vm14, %v10433_v7 }
 0x540   :  { %v1059_v4 = vpop.f32.mrf.mxu0 }
 0x541   :  { %v7157_v14 = vmul.f32 %v1059_v4, %v6612_v8 }
 0x543   :  { %v1115_v22 = vsel %vm6358_vm9, %v7157_v14, 0.0  ;;  %v1091_v40 = vsel %vm219_vm3, %v7157_v14, 0.0 }
 0x544   :  { %1123 = vadd.xlane.f32.xlu0 %v1115_v22  ;;  %1099 = vadd.xlane.f32.xlu2 %v1091_v40 }
 0x548   :  { %v1062_v27 = vpop.f32.mrf.mxu0 }
 0x549   :  { %v7166_v1 = vmul.f32 %v1062_v27, %v6623_v13 }
 0x54b   :  { %v1140_v18 = vsel %vm6366_vm10, %v7166_v1, 0.0  ;;  %v1116_v11 = vsel %vm6358_vm9, %v7166_v1, 0.0  ;;  %v1092_v44 = vsel %vm219_vm3, %v7166_v1, 0.0 }
 0x54c   :  { %1149 = vadd.xlane.f32.xlu2 %v1140_v18  ;;  %1125 = vadd.xlane.f32.xlu0 %v1116_v11  ;;  %v1164_v18 = vsel %vm227_vm11, %v7166_v1, 0.0  ;;  %v1139_v11 = vsel %vm6366_vm10, %v7157_v14, 0.0 }
 0x54d   :  { %1101 = vadd.xlane.f32.xlu1 %v1092_v44 }
 0x550   :  { %v1065_v15 = vpop.f32.mrf.mxu0 }
 0x551   :  { %v1085_v53 = vmul.f32 %v1065_v15, %v6634_v20 }
 0x553   :  { %v1117_v41 = vsel %vm6358_vm9, %v1085_v53, 0.0  ;;  %v1093_v29 = vsel %vm219_vm3, %v1085_v53, 0.0  ;;  %v1141_v10 = vsel %vm6366_vm10, %v1085_v53, 0.0  ;;  %v1165_v40 = vsel %vm227_vm11, %v1085_v53, 0.0 }
 0x554   :  { %1127 = vadd.xlane.f32.xlu2 %v1117_v41  ;;  %1103 = vadd.xlane.f32.xlu0 %v1093_v29  ;;  %v1163_v53 = vsel %vm227_vm11, %v7157_v14, 0.0 }
 0x558   :  { %v1068_v51 = vpop.f32.mrf.mxu0 }
 0x559   :  { %v1086_v38 = vmul.f32 %v1068_v51, %v6645_v26 }
 0x55b   :  { %v1094_v36 = vsel %vm219_vm3, %v1086_v38, 0.0  ;;  %v1118_v5 = vsel %vm6358_vm9, %v1086_v38, 0.0  ;;  %v1142_v30 = vsel %vm6366_vm10, %v1086_v38, 0.0  ;;  %v1166_v59 = vsel %vm227_vm11, %v1086_v38, 0.0 }
 0x55c   :  { %1151 = vadd.xlane.f32.xlu2 %v1141_v10  ;;  %1105 = vadd.xlane.f32.xlu0 %v1094_v36 }
 0x560   :  { %v1071_v9 = vpop.f32.mrf.mxu0 }
 0x561   :  { %v1087_v16 = vmul.f32 %v1071_v9, %v6655_v31 }
 0x563   :  { %v1119_v56 = vsel %vm6358_vm9, %v1087_v16, 0.0  ;;  %v1167_v23 = vsel %vm227_vm11, %v1087_v16, 0.0  ;;  %v1095_v28 = vsel %vm219_vm3, %v1087_v16, 0.0  ;;  %v1143_v19 = vsel %vm6366_vm10, %v1087_v16, 0.0 }
 0x564   :  { %1129 = vadd.xlane.f32.xlu2 %v1118_v5  ;;  %1153 = vadd.xlane.f32.xlu0 %v1142_v30 }
 0x568   :  { %v1074_v17 = vpop.f32.mrf.mxu0 }
 0x569   :  { %v1088_v24 = vmul.f32 %v1074_v17, %v6664_v37 }
 0x56b   :  { %v1120_v32 = vsel %vm6358_vm9, %v1088_v24, 0.0  ;;  %v1168_v33 = vsel %vm227_vm11, %v1088_v24, 0.0  ;;  %v1096_v46 = vsel %vm219_vm3, %v1088_v24, 0.0  ;;  %v1144_v21 = vsel %vm6366_vm10, %v1088_v24, 0.0 }
 0x56c   :  { %1177 = vadd.xlane.f32.xlu0 %v1166_v59  ;;  %1131 = vadd.xlane.f32.xlu2 %v1119_v56 }
 0x570   :  { %v1077_v35 = vpop.f32.mrf.mxu0 }
 0x571   :  { %v1089_v6 = vmul.f32 %v1077_v35, %v6677_v34 }
 0x573   :  { %v1097_v39 = vsel %vm219_vm3, %v1089_v6, 0.0  ;;  %v1121_v42 = vsel %vm6358_vm9, %v1089_v6, 0.0  ;;  %v1169_v61 = vsel %vm227_vm11, %v1089_v6, 0.0  ;;  %v1145_v63 = vsel %vm6366_vm10, %v1089_v6, 0.0 }
 0x574   :  { %1179 = vadd.xlane.f32.xlu2 %v1167_v23  ;;  %1107 = vadd.xlane.f32.xlu0 %v1095_v28 }
 0x578   :  { %v1080_v25 = vpop.f32.mrf.mxu0 }
 0x579   :  { %v1090_v57 = vmul.f32 %v1080_v25, %v6688_v3 }
 0x57b   :  { %v1098_v12 = vsel %vm219_vm3, %v1090_v57, 0.0  ;;  %v1122_v4 = vsel %vm6358_vm9, %v1090_v57, 0.0  ;;  %v1146_v22 = vsel %vm6366_vm10, %v1090_v57, 0.0  ;;  %v1170_v27 = vsel %vm227_vm11, %v1090_v57, 0.0 }
 0x57c   :  { %1155 = vadd.xlane.f32.xlu0 %v1143_v19  ;;  %1133 = vadd.xlane.f32.xlu2 %v1120_v32 }
 0x584   :  { %1181 = vadd.xlane.f32.xlu2 %v1168_v33  ;;  %1109 = vadd.xlane.f32.xlu0 %v1096_v46 }
 0x58c   :  { %1157 = vadd.xlane.f32.xlu0 %v1144_v21  ;;  %1111 = vadd.xlane.f32.xlu2 %v1097_v39 }
 0x594   :  { %1135 = vadd.xlane.f32.xlu0 %v1121_v42  ;;  %1183 = vadd.xlane.f32.xlu2 %v1169_v61 }
 0x59c   :  { %1159 = vadd.xlane.f32.xlu0 %v1145_v63  ;;  %1113 = vadd.xlane.f32.xlu2 %v1098_v12 }
 0x5a4   :  { %1137 = vadd.xlane.f32.xlu0 %v1122_v4  ;;  %1161 = vadd.xlane.f32.xlu2 %v1146_v22 }
 0x5ac   :  { %1175 = vadd.xlane.f32.xlu0 %v1165_v40  ;;  %1185 = vadd.xlane.f32.xlu2 %v1170_v27 }
 0x5b4   :  { %1173 = vadd.xlane.f32.xlu0 %v1164_v18  ;;  %1147 = vadd.xlane.f32.xlu2 %v1139_v11 }
 0x5b7   :  { %v7237_v44 = vpop.xlane.xlu0 %1123  ;;  %v7239_v15 = vpop.xlane.xlu2 %1099 }
 0x5bc   :  { %1171 = vadd.xlane.f32.xlu2 %v1163_v53 }
 0x5bf   :  { %v7244_v41 = vpop.xlane.xlu2 %1149  ;;  %v7246_v29 = vpop.xlane.xlu0 %1125 }
 0x5c7   :  { %v7248_v1 = vpop.xlane.xlu2 %1127  ;;  %v7250_v51 = vpop.xlane.xlu0 %1103 }
 0x5cf   :  { %v7252_v38 = vpop.xlane.xlu2 %1151  ;;  %v1106_v10 = vpop.xlane.xlu0 %1105 }
 0x5d7   :  { %v1130_v36 = vpop.xlane.xlu2 %1129  ;;  %v1154_v5 = vpop.xlane.xlu0 %1153 }
 0x5d8   :  { %v1190_v17 = vmax.f32 %v1106_v10, %v1130_v36 }
 0x5da   :  { %v1198_v19 = vmax.f32 %v1190_v17, %v1154_v5 }
 0x5df   :  { %v1178_v30 = vpop.xlane.xlu0 %1177  ;;  %v1132_v9 = vpop.xlane.xlu2 %1131 }
 0x5e0   :  { %v1206_v46 = vmax.f32 %v1198_v19, %v1178_v30 }
 0x5e2   :  { %v1214_v42 = vsub.f32 %v1106_v10, %v1206_v46  ;;  %v1238_v25 = vsub.f32 %v1130_v36, %v1206_v46  ;;  %v1262_v53 = vsub.f32 %v1154_v5, %v1206_v46  ;;  %v1286_v10 = vsub.f32 %v1178_v30, %v1206_v46 }
 0x5e4   :  { %v1225_v12 = vmul.f32 1.442695, %v1214_v42  ;;  %v1249_v27 = vmul.f32 1.442695, %v1238_v25  ;;  %v1297_v25 = vmul.f32 1.442695, %v1286_v10 }
 0x5e6   :  { %5470 = vpow2.f32 %v1225_v12 }
 0x5e7   :  { %v1180_v16 = vpop.xlane.xlu2 %1179  ;;  %v1108_v59 = vpop.xlane.xlu0 %1107  ;;  %5472 = vpow2.f32 %v1249_v27 }
 0x5e8   :  { %v1191_v24 = vmax.f32 %v1108_v59, %v1132_v9 }
 0x5ec   :  { %v7259_v42 = vpop.eup %5470 }
 0x5ef   :  { %v1156_v56 = vpop.xlane.xlu0 %1155  ;;  %v1134_v14 = vpop.xlane.xlu2 %1133 }
 0x5f0   :  { %v1199_v32 = vmax.f32 %v1191_v24, %v1156_v56 }
 0x5f2   :  { %v1207_v39 = vmax.f32 %v1199_v32, %v1180_v16 }
 0x5f4   :  { %v1215_v57 = vsub.f32 %v1108_v59, %v1207_v39  ;;  %v1239_v63 = vsub.f32 %v1132_v9, %v1207_v39  ;;  %v1263_v19 = vsub.f32 %v1156_v56, %v1207_v39  ;;  %v1287_v59 = vsub.f32 %v1180_v16, %v1207_v39 }
 0x5f6   :  { %v1227_v11 = vmul.f32 1.442695, %v1215_v57  ;;  %v1251_v17 = vmul.f32 1.442695, %v1239_v63  ;;  %v7261_v57 = vpop.eup %5472  ;;  %v1299_v16 = vmul.f32 1.442695, %v1287_v59 }
 0x5f7   :  { %v7254_v23 = vpop.xlane.xlu2 %1181  ;;  %v1110_v28 = vpop.xlane.xlu0 %1109 }
 0x5f8   :  { %v1192_v33 = vmax.f32 %v1110_v28, %v1134_v14  ;;  %5474 = vpow2.f32 %v1227_v11 }
 0x5f9   :  { %5476 = vpow2.f32 %v1251_v17 }
 0x5ff   :  { %v1158_v35 = vpop.xlane.xlu0 %1157  ;;  %v1112_v6 = vpop.xlane.xlu2 %1111 }
 0x600   :  { %v1200_v21 = vmax.f32 %v1192_v33, %v1158_v35  ;;  %v1273_v33 = vmul.f32 1.442695, %v1262_v53 }
 0x602   :  { %v1208_v61 = vmax.f32 %v1200_v21, %v7254_v23 }
 0x604   :  { %v1216_v4 = vsub.f32 %v1110_v28, %v1208_v61  ;;  %v1240_v18 = vsub.f32 %v1134_v14, %v1208_v61  ;;  %v1264_v36 = vsub.f32 %v1158_v35, %v1208_v61  ;;  %v1275_v14 = vmul.f32 1.442695, %v1263_v19  ;;  %v7264_v35 = vpop.eup %5474 }
 0x605   :  { %v1288_v56 = vsub.f32 %v7254_v23, %v1208_v61  ;;  %v7266_v39 = vpop.eup %5476 }
 0x606   :  { %v1229_v24 = vmul.f32 1.442695, %v1216_v4  ;;  %v1253_v32 = vmul.f32 1.442695, %v1240_v18  ;;  %v1277_v30 = vmul.f32 1.442695, %v1264_v36  ;;  %v1310_v18 = vadd.f32 %v7261_v57, %v7259_v42 }
 0x607   :  { %v1136_v22 = vpop.xlane.xlu0 %1135  ;;  %v1184_v40 = vpop.xlane.xlu2 %1183  ;;  %v1301_v23 = vmul.f32 1.442695, %v1288_v56 }
 0x608   :  { %v1193_v9 = vmax.f32 %v1112_v6, %v1136_v22  ;;  %5478 = vpow2.f32 %v1229_v24  ;;  %v1311_v24 = vadd.f32 %v7266_v39, %v7264_v35 }
 0x609   :  { %5480 = vpow2.f32 %v1253_v32 }
 0x60a   :  { %5482 = vpow2.f32 %v1273_v33 }
 0x60b   :  { %5484 = vpow2.f32 %v1275_v14 }
 0x60c   :  { %5486 = vpow2.f32 %v1297_v25 }
 0x60d   :  { %5488 = vpow2.f32 %v1277_v30 }
 0x60e   :  { %v7268_v27 = vpop.eup %5478  ;;  %5490 = vpow2.f32 %v1299_v16  ;;  %v1102_v16 = vpop.xlane.xlu1 %1101 }
 0x60f   :  { %v1160_v28 = vpop.xlane.xlu0 %1159  ;;  %v7257_v21 = vpop.xlane.xlu2 %1113 }
 0x610   :  { %v1201_v5 = vmax.f32 %v1193_v9, %v1160_v28  ;;  %v7272_v53 = vpop.eup %5480 }
 0x611   :  { %v7278_v32 = vpop.eup %5482 }
 0x612   :  { %v1209_v46 = vmax.f32 %v1201_v5, %v1184_v40  ;;  %v1318_v10 = vadd.f32 %v7278_v32, %v1310_v18  ;;  %v7283_v36 = vpop.eup %5484  ;;  %v1189_v5 = vmax.f32 %v7250_v51, %v7248_v1 }
 0x613   :  { %v7286_v59 = vpop.eup %5486 }
 0x614   :  { %v1217_v63 = vsub.f32 %v1112_v6, %v1209_v46  ;;  %v1241_v12 = vsub.f32 %v1136_v22, %v1209_v46  ;;  %v1265_v4 = vsub.f32 %v1160_v28, %v1209_v46  ;;  %v1289_v11 = vsub.f32 %v1184_v40, %v1209_v46  ;;  %v7289_v14 = vpop.eup %5488 }
 0x615   :  { %v1312_v40 = vadd.f32 %v7272_v53, %v7268_v27  ;;  %v1319_v28 = vadd.f32 %v7283_v36, %v1311_v24  ;;  %v7293_v25 = vpop.eup %5490  ;;  %v1326_v30 = vadd.f32 %v7286_v59, %v1318_v10 }
 0x616   :  { %v1231_v61 = vmul.f32 1.442695, %v1217_v63  ;;  %v1255_v17 = vmul.f32 1.442695, %v1241_v12  ;;  %v1279_v6 = vmul.f32 1.442695, %v1265_v4  ;;  %v1197_v63 = vmax.f32 %v1189_v5, %v7252_v38 }
 0x617   :  { %v1138_v22 = vpop.xlane.xlu0 %1137  ;;  %v7276_v19 = vpop.xlane.xlu2 %1161  ;;  %v1303_v33 = vmul.f32 1.442695, %v1289_v11  ;;  %v1320_v56 = vadd.f32 %v7289_v14, %v1312_v40  ;;  %v1327_v18 = vadd.f32 %v7293_v25, %v1319_v28  ;;  %v1188_v40 = vmax.f32 %v1102_v16, %v7246_v29 }
 0x618   :  { %5492 = vpow2.f32 %v1231_v61  ;;  %v1194_v9 = vmax.f32 %v7257_v21, %v1138_v22 }
 0x619   :  { %5494 = vpow2.f32 %v1255_v17 }
 0x61a   :  { %5496 = vpow2.f32 %v1301_v23  ;;  %v1202_v12 = vmax.f32 %v1194_v9, %v7276_v19 }
 0x61b   :  { %5498 = vpow2.f32 %v1279_v6 }
 0x61c   :  { %5500 = vpow2.f32 %v1303_v33 }
 0x61d   :  { %5502 = vrcp.f32 %v1326_v30 }
 0x61e   :  { %v7297_v46 = vpop.eup %5492  ;;  %5504 = vrcp.f32 %v1327_v18 }
 0x61f   :  { %v7301_v4 = vpop.eup %5494  ;;  %v1176_v11 = vpop.xlane.xlu0 %1175 }
 0x620   :  { %v1186_v23 = vpop.xlane.xlu2 %1185  ;;  %v7304_v61 = vpop.eup %5496  ;;  %v1313_v17 = vadd.f32 %v7301_v4, %v7297_v46  ;;  %v1205_v24 = vmax.f32 %v1197_v63, %v1176_v11 }
 0x621   :  { %v1210_v6 = vmax.f32 %v1202_v12, %v1186_v23  ;;  %v7308_v10 = vpop.eup %5498  ;;  %v1328_v33 = vadd.f32 %v7304_v61, %v1320_v56 }
 0x622   :  { %v1321_v9 = vadd.f32 %v7308_v10, %v1313_v17  ;;  %v1213_v28 = vsub.f32 %v7250_v51, %v1205_v24  ;;  %v1237_v5 = vsub.f32 %v7248_v1, %v1205_v24  ;;  %v1261_v7 = vsub.f32 %v7252_v38, %v1205_v24  ;;  %v7316_v58 = vpop.eup %5500 }
 0x623   :  { %v1285_v63 = vsub.f32 %v1176_v11, %v1205_v24  ;;  %v1218_v12 = vsub.f32 %v7257_v21, %v1210_v6  ;;  %v1242_v55 = vsub.f32 %v1138_v22, %v1210_v6  ;;  %5506 = vrcp.f32 %v1328_v33  ;;  %v7322_v52 = vpop.eup %5502 }
 0x624   :  { %v1329_v62 = vadd.f32 %v7316_v58, %v1321_v9  ;;  %v1223_v60 = vmul.f32 1.442695, %v1213_v28  ;;  %v1247_v30 = vmul.f32 1.442695, %v1237_v5  ;;  %v1271_v56 = vmul.f32 1.442695, %v1261_v7  ;;  %v7324_v28 = vpop.eup %5504 }
 0x625   :  { %v1266_v17 = vsub.f32 %v7276_v19, %v1210_v6  ;;  %v1290_v51 = vsub.f32 %v1186_v23, %v1210_v6  ;;  %v1295_v1 = vmul.f32 1.442695, %v1285_v63  ;;  %v1196_v38 = vmax.f32 %v1188_v40, %v7244_v41 }
 0x626   :  { %5508 = vrcp.f32 %v1329_v62  ;;  %v1233_v18 = vmul.f32 1.442695, %v1218_v12  ;;  %v1257_v24 = vmul.f32 1.442695, %v1242_v55 }
 0x627   :  { %5510 = vpow2.f32 %v1223_v60  ;;  %v1174_v11 = vpop.xlane.xlu0 %1173  ;;  %v1281_v7 = vmul.f32 1.442695, %v1266_v17  ;;  %v1305_v22 = vmul.f32 1.442695, %v1290_v51  ;;  %v1187_v60 = vmax.f32 %v7239_v15, %v7237_v44 }
 0x628   :  { %v1148_v21 = vpop.xlane.xlu2 %1147  ;;  %5512 = vpow2.f32 %v1247_v30  ;;  %v1204_v9 = vmax.f32 %v1196_v38, %v1174_v11 }
 0x629   :  { %5514 = vpow2.f32 %v1271_v56  ;;  %v7328_v6 = vpop.eup %5506 }
 0x62a   :  { %5516 = vpow2.f32 %v1295_v1  ;;  %v1212_v19 = vsub.f32 %v1102_v16, %v1204_v9  ;;  %v1236_v62 = vsub.f32 %v7246_v29, %v1204_v9  ;;  %v1260_v23 = vsub.f32 %v7244_v41, %v1204_v9 }
 0x62b   :  { %5518 = vpow2.f32 %v1233_v18  ;;  %v1284_v5 = vsub.f32 %v1174_v11, %v1204_v9  ;;  %v1195_v41 = vmax.f32 %v1187_v60, %v1148_v21  ;;  %v1342_v11 = vmul.f32 %v7322_v52, %v7259_v42 }
 0x62c   :  { %v7332_v40 = vpop.eup %5508  ;;  %5520 = vpow2.f32 %v1257_v24  ;;  %v1221_v55 = vmul.f32 1.442695, %v1212_v19  ;;  %v1245_v33 = vmul.f32 1.442695, %v1236_v62  ;;  %v1269_v29 = vmul.f32 1.442695, %v1260_v23 }
 0x62d   :  { %v7334_v63 = vpop.eup %5510  ;;  %5522 = vpow2.f32 %v1281_v7  ;;  %v1293_v51 = vmul.f32 1.442695, %v1284_v5  ;;  %v1358_v24 = vmul.f32 %v7322_v52, %v7261_v57  ;;  %v1343_v42 = vmul.f32 %v7324_v28, %v7264_v35 }
 0x62e   :  { %v7336_v16 = vpop.eup %5512  ;;  %5524 = vpow2.f32 %v1305_v22  ;;  %v1345_v35 = vmul.f32 %v7332_v40, %v7297_v46 }
 0x62f   :  { %v7338_v12 = vpop.eup %5514  ;;  %v1309_v30 = vadd.f32 %v7336_v16, %v7334_v63  ;;  %5526 = vpow2.f32 %v1221_v55  ;;  %v1366_v46 = vsel %vm6358_vm9, %v1358_v24, 0.0 }
 0x630   :  { %v1172_v56 = vpop.xlane.xlu2 %1171  ;;  %v7342_v17 = vpop.eup %5516  ;;  %5528 = vpow2.f32 %v1245_v33 }
 0x631   :  { %v1203_v1 = vmax.f32 %v1195_v41, %v1172_v56  ;;  %v7344_v38 = vpop.eup %5518  ;;  %v1317_v18 = vadd.f32 %v7338_v12, %v1309_v30  ;;  %5530 = vpow2.f32 %v1269_v29  ;;  %v1359_v41 = vmul.f32 %v7324_v28, %v7266_v39 }
 0x632   :  { %v7351_v9 = vpop.eup %5520  ;;  %5532 = vpow2.f32 %v1293_v51  ;;  %v1360_v51 = vmul.f32 %v7328_v6, %v7272_v53  ;;  %v1351_v53 = vsel %vm219_vm3, %v1343_v42, 0.0 }
 0x633   :  { %v1211_v7 = vsub.f32 %v7239_v15, %v1203_v1  ;;  %v1235_v22 = vsub.f32 %v7237_v44, %v1203_v1  ;;  %v1259_v19 = vsub.f32 %v1148_v21, %v1203_v1  ;;  %v7355_v62 = vpop.eup %5522  ;;  %v1325_v23 = vadd.f32 %v7342_v17, %v1317_v18 }
 0x634   :  { %v1314_v60 = vadd.f32 %v7351_v9, %v7344_v38  ;;  %v1283_v55 = vsub.f32 %v1172_v56, %v1203_v1  ;;  %v7362_v57 = vpop.eup %5524  ;;  %v1344_v21 = vmul.f32 %v7328_v6, %v7268_v27  ;;  %v1361_v56 = vmul.f32 %v7332_v40, %v7301_v4 }
 0x635   :  { %v1219_v33 = vmul.f32 1.442695, %v1211_v7  ;;  %v1243_v5 = vmul.f32 1.442695, %v1235_v22  ;;  %v1267_v15 = vmul.f32 1.442695, %v1259_v19  ;;  %v7364_v29 = vpop.eup %5526  ;;  %5534 = vrcp.f32 %v1325_v23 }
 0x636   :  { %v1322_v44 = vadd.f32 %v7355_v62, %v1314_v60  ;;  %v7371_v30 = vpop.eup %5528  ;;  %v1291_v18 = vmul.f32 1.442695, %v1283_v55  ;;  %v1350_v7 = vsel %vm219_vm3, %v1342_v11, 0.0  ;;  %v1383_v22 = vmul.f32 %v7324_v28, %v7283_v36 }
 0x637   :  { %5536 = vpow2.f32 %v1219_v33  ;;  %v1308_v27 = vadd.f32 %v7371_v30, %v7364_v29  ;;  %v7382_v39 = vpop.eup %5530  ;;  %v1353_v23 = vsel %vm219_vm3, %v1345_v35, 0.0  ;;  %v1369_v11 = vsel %vm6358_vm9, %v1361_v56, 0.0 }
 0x638   :  { %v1330_v1 = vadd.f32 %v7362_v57, %v1322_v44  ;;  %5538 = vpow2.f32 %v1243_v5  ;;  %v7393_v19 = vpop.eup %5532  ;;  %v1352_v24 = vsel %vm219_vm3, %v1344_v21, 0.0  ;;  %v1368_v60 = vsel %vm6358_vm9, %v1360_v51, 0.0 }
 0x639   :  { %5540 = vpow2.f32 %v1267_v15  ;;  %v1316_v4 = vadd.f32 %v7382_v39, %v1308_v27  ;;  %v1384_v36 = vmul.f32 %v7328_v6, %v7289_v14  ;;  %v1367_v33 = vsel %vm6358_vm9, %v1359_v41, 0.0 }
 0x63a   :  { %5542 = vrcp.f32 %v1330_v1  ;;  %v1385_v15 = vmul.f32 %v7332_v40, %v7308_v10  ;;  %v1382_v44 = vmul.f32 %v7322_v52, %v7278_v32  ;;  %v1377_v35 = vadd.f32 %v1369_v11, %v1353_v23 }
 0x63b   :  { %v7403_v55 = vpop.eup %5534  ;;  %v1324_v42 = vadd.f32 %v7393_v19, %v1316_v4  ;;  %5544 = vpow2.f32 %v1291_v18  ;;  %v1376_v56 = vadd.f32 %v1368_v60, %v1352_v24  ;;  %v1406_v51 = vmul.f32 %v7322_v52, %v7286_v59 }
 0x63c   :  { %v1375_v1 = vadd.f32 %v1367_v33, %v1351_v53  ;;  %v1391_v27 = vsel %vm6366_vm10, %v1383_v22, 0.0  ;;  %v1374_v10 = vadd.f32 %v1366_v46, %v1350_v7  ;;  %v1409_v32 = vmul.f32 %v7332_v40, %v7316_v58 }
 0x63d   :  { %v7410_v5 = vpop.eup %5536  ;;  %5546 = vrcp.f32 %v1324_v42  ;;  %v1392_v4 = vsel %vm6366_vm10, %v1384_v36, 0.0  ;;  %v1341_v23 = vmul.f32 %v7403_v55, %v7334_v63  ;;  %v1357_v52 = vmul.f32 %v7403_v55, %v7336_v16 }
 0x63e   :  { %v7416_v21 = vpop.eup %5538  ;;  %v1393_v7 = vsel %vm6366_vm10, %v1385_v15, 0.0  ;;  %v1400_v22 = vadd.f32 %v1392_v4, %v1376_v56  ;;  %v1408_v24 = vmul.f32 %v7328_v6, %v7304_v61  ;;  %v1417_v36 = vsel %vm227_vm11, %v1409_v32, 0.0 }
 0x63f   :  { %v5541_v14 = vpop.eup %5540  ;;  %v1307_v41 = vadd.f32 %v7416_v21, %v7410_v5  ;;  %v1401_v40 = vadd.f32 %v1393_v7, %v1377_v35  ;;  %v1365_v61 = vsel %vm6358_vm9, %v1357_v52, 0.0  ;;  %v1399_v56 = vadd.f32 %v1391_v27, %v1375_v1 }
 0x640   :  { %v5543_v18 = vpop.eup %5542  ;;  %v1381_v32 = vmul.f32 %v7403_v55, %v7338_v12  ;;  %v1390_v1 = vsel %vm6366_vm10, %v1382_v44, 0.0 }
 0x641   :  { %v1315_v59 = vadd.f32 %v5541_v14, %v1307_v41  ;;  %v1346_v53 = vmul.f32 %v5543_v18, %v7344_v38  ;;  %v1362_v11 = vmul.f32 %v5543_v18, %v7351_v9  ;;  %v5545_v46 = vpop.eup %5544  ;;  %v1386_v58 = vmul.f32 %v5543_v18, %v7355_v62 }
 0x642   :  { %v1410_v63 = vmul.f32 %v5543_v18, %v7362_v57  ;;  %v1349_v62 = vsel %vm219_vm3, %v1341_v23, 0.0  ;;  %v1425_v35 = vadd.f32 %v1417_v36, %v1401_v40  ;;  %v1407_v41 = vmul.f32 %v7324_v28, %v7293_v25 }
 0x643   :  { %v1323_v60 = vadd.f32 %v5545_v46, %v1315_v59  ;;  %v1354_v16 = vsel %vm219_vm3, %v1346_v53, 0.0  ;;  %v1370_v38 = vsel %vm6358_vm9, %v1362_v11, 0.0  ;;  %v5547_v9 = vpop.eup %5546  ;;  %v1394_v6 = vsel %vm6366_vm10, %v1386_v58, 0.0 }
 0x644   :  { %v1378_v42 = vadd.f32 %v1370_v38, %v1354_v16  ;;  %v1340_v57 = vmul.f32 %v5547_v9, %v7364_v29  ;;  %v1356_v33 = vmul.f32 %v5547_v9, %v7371_v30  ;;  %v1418_v18 = vsel %vm227_vm11, %v1410_v63, 0.0 }
 0x645   :  { %5548 = vrcp.f32 %v1323_v60  ;;  %v1416_v30 = vsel %vm227_vm11, %v1408_v24, 0.0  ;;  %v1373_v25 = vadd.f32 %v1365_v61, %v1349_v62  ;;  %v1398_v27 = vadd.f32 %v1390_v1, %v1374_v10 }
 0x646   :  { %v1402_v15 = vadd.f32 %v1394_v6, %v1378_v42  ;;  %v1348_v4 = vsel %vm219_vm3, %v1340_v57, 0.0  ;;  %v1364_v29 = vsel %vm6358_vm9, %v1356_v33, 0.0  ;;  %v1424_v28 = vadd.f32 %v1416_v30, %v1400_v22 }
 0x647   :  { %v1380_v52 = vmul.f32 %v5547_v9, %v7382_v39  ;;  %v1415_v59 = vsel %vm227_vm11, %v1407_v41, 0.0  ;;  %v1414_v53 = vsel %vm227_vm11, %v1406_v51, 0.0  ;;  %v1372_v11 = vadd.f32 %v1364_v29, %v1348_v4 }
 0x648   :  { %v1426_v23 = vadd.f32 %v1418_v18, %v1402_v15  ;;  %v1433_v58 = vmul.f32 %v1425_v35, %v6677_v34  ;;  %v1423_v40 = vadd.f32 %v1415_v59, %v1399_v56  ;;  %v1389_v44 = vsel %vm6366_vm10, %v1381_v32, 0.0 }
 0x649   :  { %v1405_v10 = vmul.f32 %v7403_v55, %v7342_v17  ;;  %v1397_v39 = vadd.f32 %v1389_v44, %v1373_v25  ;;  %v1432_v51 = vmul.f32 %v1424_v28, %v6664_v37  ;;  %v1422_v60 = vadd.f32 %v1414_v53, %v1398_v27 }
 0x64a   :  { %v1434_v12 = vmul.f32 %v1426_v23, %v6688_v3  ;;  %v1388_v16 = vsel %vm6366_vm10, %v1380_v52, 0.0  ;;  %v1404_v38 = vmul.f32 %v5547_v9, %v7393_v19  ;;  %v1431_v36 = vmul.f32 %v1423_v40, %v6655_v31 }
 0x64b   :  { %v5549_v7 = vpop.eup %5548  ;;  %v1396_v42 = vadd.f32 %v1388_v16, %v1372_v11  ;;  %v1430_v6 = vmul.f32 %v1422_v60, %v6645_v26 }
 0x64c   :  { %1443 = vmatpush.msra.mxu1 %v1434_v12  ;;  %v1339_v22 = vmul.f32 %v5549_v7, %v7410_v5  ;;  %v1355_v24 = vmul.f32 %v5549_v7, %v7416_v21  ;;  %v1379_v63 = vmul.f32 %v5549_v7, %v5541_v14  ;;  %v1403_v5 = vmul.f32 %v5549_v7, %v5545_v46 }
 0x64d   :  { %v1413_v21 = vsel %vm227_vm11, %v1405_v10, 0.0  ;;  %v1412_v9 = vsel %vm227_vm11, %v1404_v38, 0.0 }
 0x64e   :  { %1444 = vmatpush.msra.mxu1 %v1433_v58  ;;  %v1347_v17 = vsel %vm219_vm3, %v1339_v22, 0.0  ;;  %v1363_v55 = vsel %vm6358_vm9, %v1355_v24, 0.0  ;;  %v1421_v62 = vadd.f32 %v1413_v21, %v1397_v39  ;;  %v1387_v19 = vsel %vm6366_vm10, %v1379_v63, 0.0 }
 0x64f   :  { %v1371_v14 = vadd.f32 %v1363_v55, %v1347_v17  ;;  %v1420_v57 = vadd.f32 %v1412_v9, %v1396_v42  ;;  %v1411_v46 = vsel %vm227_vm11, %v1403_v5, 0.0 }
 0x650   :  { %1445 = vmatpush.msra.mxu1 %v1432_v51  ;;  %v1429_v15 = vmul.f32 %v1421_v62, %v6634_v20 }
 0x651   :  { %v1395_v61 = vadd.f32 %v1387_v19, %v1371_v14  ;;  %v1428_v35 = vmul.f32 %v1420_v57, %v6623_v13 }
 0x652   :  { %1446 = vmatpush.msra.mxu1 %v1431_v36 }
 0x653   :  { %v1419_v33 = vadd.f32 %v1411_v46, %v1395_v61 }
 0x654   :  { %1447 = vmatpush.msra.mxu1 %v1430_v6 }
 0x655   :  { %v1427_v56 = vmul.f32 %v1419_v33, %v6612_v8 }
 0x656   :  { %1448 = vmatpush.msra.mxu1 %v1429_v15 }
 0x658   :  { %1449 = vmatpush.msra.mxu1 %v1428_v35 }
 0x65a   :  { %1450 = vmatpush.msra.mxu1 %v1427_v56 }
 0x65b   :  { %5201 = vmatmul.msk.f32.vlgmr.msra.gmra.mxu1 %vm10434_vm4, %v6990_v43 }
 0x663   :  { %5202 = vmatmul.msk.f32.gmra.mxu1 %vm10435_vm7, %v6994_v50 }
 0x6d8   :  { %v1452_v41 = vpop.f32.mrf.mxu1 }
 0x6d9   :  { %v7507_v18 = vadd.f32 %v1452_v41, %v6530_v48 }
 0x6db   :  { %v1458_v32 = vmul.f32 %v7507_v18, %v7507_v18 }
 0x6dd   :  { %v1490_v4 = vsel %vm6358_vm9, %v1458_v32, 0.0  ;;  %v1460_v29 = vsel %vm219_vm3, %v1458_v32, 0.0  ;;  %v1522_v25 = vsel %vm6366_vm10, %v1458_v32, 0.0  ;;  %v1554_v12 = vsel %vm227_vm11, %v1458_v32, 0.0 }
 0x6de   :  { %1492 = vadd.xlane.f32.xlu2 %v1490_v4  ;;  %1462 = vadd.xlane.f32.xlu0 %v1460_v29 }
 0x6e0   :  { %v1455_v23 = vpop.f32.mrf.mxu1 }
 0x6e1   :  { %v7516_v30 = vadd.f32 %v1455_v23, %v6521_v45 }
 0x6e3   :  { %v1459_v1 = vmul.f32 %v7516_v30, %v7516_v30 }
 0x6e5   :  { %v1461_v28 = vsel %vm219_vm3, %v1459_v1, 0.0  ;;  %v1491_v27 = vsel %vm6358_vm9, %v1459_v1, 0.0  ;;  %v1523_v52 = vsel %vm6366_vm10, %v1459_v1, 0.0  ;;  %v1555_v59 = vsel %vm227_vm11, %v1459_v1, 0.0 }
 0x6e6   :  { %1524 = vadd.xlane.f32.xlu2 %v1522_v25  ;;  %1464 = vadd.xlane.f32.xlu0 %v1461_v28 }
 0x6ee   :  { %1494 = vadd.xlane.f32.xlu2 %v1491_v27  ;;  %1526 = vadd.xlane.f32.xlu0 %v1523_v52 }
 0x6f6   :  { %1556 = vadd.xlane.f32.xlu2 %v1554_v12  ;;  %1558 = vadd.xlane.f32.xlu0 %v1555_v59 }
 0x751   :  { %v1493_v53 = vpop.xlane.xlu2 %1492  ;;  %v1463_v11 = vpop.xlane.xlu0 %1462 }
 0x752   :  { %v1496_v7 = vmax.f32 %v1493_v53, 1e-24  ;;  %v7532_v58 = vmax.f32 %v1463_v11, 1e-24 }
 0x754   :  { %5550 = vrsqrt.f32 %v1496_v7  ;;  %vm1504_vm2 = vweird.f32 %v1496_v7  ;;  %vm1474_vm12 = vweird.f32 %v7532_v58 }
 0x755   :  { %5552 = vrsqrt.f32 %v7532_v58 }
 0x759   :  { %v1525_v40 = vpop.xlane.xlu2 %1524  ;;  %v1465_v44 = vpop.xlane.xlu0 %1464 }
 0x75a   :  { %v7535_v10 = vmax.f32 %v1525_v40, 1e-24  ;;  %v7537_v39 = vmax.f32 %v1465_v44, 1e-24  ;;  %v7540_v22 = vpop.eup %5550  ;;  %v10445_v44 = vld [vmem:[#allocation9_spill] sm:$0xff] }
 0x75b   :  { %v7543_v24 = vpop.eup %5552  ;;  %v1499_v63 = vmul.f32 %v7540_v22, %v1496_v7  ;;  %vm1505_vm1 = vweird.f32 %v7540_v22 }
 0x75c   :  { %5554 = vrsqrt.f32 %v7535_v10  ;;  %v1469_v51 = vmul.f32 %v7543_v24, %v7532_v58  ;;  %vm1475_vm5 = vweird.f32 %v7543_v24  ;;  %vm7578_vm8 = vmor %vm1504_vm2, %vm1505_vm1  ;;  %vm1536_vm0 = vweird.f32 %v7535_v10 }
 0x75d   :  { %5556 = vrsqrt.f32 %v7537_v39  ;;  %v1500_v14 = vmul.f32 %v7540_v22, %v1499_v63  ;;  %vm7585_vm15 = vmor %vm1474_vm12, %vm1475_vm5  ;;  %vm1484_vm1 = vweird.f32 %v7537_v39 }
 0x75e   :  { %v1470_v36 = vmul.f32 %v7543_v24, %v1469_v51 }
 0x75f   :  { %v1501_v9 = vmul.f32 0.5, %v1500_v14 }
 0x760   :  { %v1471_v61 = vmul.f32 0.5, %v1470_v36 }
 0x761   :  { %v1495_v60 = vpop.xlane.xlu2 %1494  ;;  %v1527_v16 = vpop.xlane.xlu0 %1526  ;;  %v1502_v29 = vsub.f32 1.5, %v1501_v9 }
 0x762   :  { %v7548_v38 = vpop.eup %5554  ;;  %v1497_v42 = vmax.f32 %v1495_v60, 1e-24  ;;  %v7550_v17 = vmax.f32 %v1527_v16, 1e-24  ;;  %v1472_v23 = vsub.f32 1.5, %v1471_v61 }
 0x763   :  { %v7552_v55 = vpop.eup %5556  ;;  %v1531_v5 = vmul.f32 %v7548_v38, %v7535_v10  ;;  %v1503_v59 = vmul.f32 %v7540_v22, %v1502_v29  ;;  %vm1537_vm7 = vweird.f32 %v7548_v38 }
 0x764   :  { %v1479_v21 = vmul.f32 %v7552_v55, %v7537_v39  ;;  %5558 = vrsqrt.f32 %v1497_v42  ;;  %v1473_v53 = vmul.f32 %v7543_v24, %v1472_v23  ;;  %vm1485_vm13 = vweird.f32 %v7552_v55 }
 0x765   :  { %5560 = vrsqrt.f32 %v7550_v17  ;;  %v1532_v19 = vmul.f32 %v7548_v38, %v1531_v5  ;;  %vm1514_vm4 = vweird.f32 %v1497_v42  ;;  %v1507_v14 = vsel %vm7578_vm8, %v7540_v22, %v1503_v59  ;;  %vm7604_vm5 = vmor %vm1484_vm1, %vm1485_vm13 }
 0x766   :  { %v1480_v62 = vmul.f32 %v7552_v55, %v1479_v21  ;;  %vm7615_vm8 = vmor %vm1536_vm0, %vm1537_vm7  ;;  %vm1546_vm12 = vweird.f32 %v7550_v17 }
 0x767   :  { %v1533_v32 = vmul.f32 0.5, %v1532_v19 }
 0x768   :  { %v1481_v33 = vmul.f32 0.5, %v1480_v62 }
 0x769   :  { %v1557_v6 = vpop.xlane.xlu2 %1556  ;;  %v1559_v57 = vpop.xlane.xlu0 %1558  ;;  %v1534_v52 = vsub.f32 1.5, %v1533_v32 }
 0x76a   :  { %v5559_v46 = vpop.eup %5558  ;;  %v7563_v15 = vmax.f32 %v1557_v6, 1e-24  ;;  %v7565_v35 = vmax.f32 %v1559_v57, 1e-24  ;;  %v1482_v25 = vsub.f32 1.5, %v1481_v33  ;;  %v1518_v57 = vsel %vm6358_vm9, %v1507_v14, 0.0 }
 0x76b   :  { %v7567_v56 = vpop.eup %5560  ;;  %v1509_v41 = vmul.f32 %v5559_v46, %v1497_v42  ;;  %vm1515_vm6 = vweird.f32 %v5559_v46  ;;  %v1535_v21 = vmul.f32 %v7548_v38, %v1534_v52  ;;  %v1477_v42 = vsel %vm7585_vm15, %v7543_v24, %v1473_v53 }
 0x76c   :  { %v1541_v4 = vmul.f32 %v7567_v56, %v7550_v17  ;;  %5562 = vrsqrt.f32 %v7563_v15  ;;  %v1483_v63 = vmul.f32 %v7552_v55, %v1482_v25  ;;  %vm1516_vm2 = vmor %vm1514_vm4, %vm1515_vm6  ;;  %vm1547_vm6 = vweird.f32 %v7567_v56 }
 0x76d   :  { %v1510_v1 = vmul.f32 %v5559_v46, %v1509_v41  ;;  %5564 = vrsqrt.f32 %v7565_v35  ;;  %v1488_v10 = vsel %vm219_vm3, %v1477_v42, 0.0  ;;  %vm1548_vm13 = vmor %vm1546_vm12, %vm1547_vm6  ;;  %vm1568_vm4 = vweird.f32 %v7563_v15 }
 0x76e   :  { %v1542_v28 = vmul.f32 %v7567_v56, %v1541_v4  ;;  %v1487_v19 = vsel %vm7604_vm5, %v7552_v55, %v1483_v63  ;;  %v1539_v55 = vsel %vm7615_vm8, %v7548_v38, %v1535_v21  ;;  %vm1578_vm1 = vweird.f32 %v7565_v35  ;;  %v10446_v63 = vld [vmem:[#allocation11_spill] sm:$0xff] }
 0x76f   :  { %v1511_v27 = vmul.f32 0.5, %v1510_v1  ;;  %v1489_v33 = vsel %vm219_vm3, %v1487_v19, 0.0  ;;  %v1550_v38 = vsel %vm6366_vm10, %v1539_v55, 0.0  ;;  %v1520_v1 = vadd.f32 %v1518_v57, %v1488_v10 }
 0x770   :  { %v1543_v12 = vmul.f32 0.5, %v1542_v28  ;;  %vm10450_vm5 = vcmask 523264  }
 0x771   :  { %v1512_v11 = vsub.f32 1.5, %v1511_v27  ;;  %v1552_v52 = vadd.f32 %v1550_v38, %v1520_v1  ;;  %vm10451_vm6 = vmmov %vm10450_vm5 }
 0x772   :  { %v5563_v40 = vpop.eup %5562  ;;  %v1544_v7 = vsub.f32 1.5, %v1543_v12 }
 0x773   :  { %v5565_v51 = vpop.eup %5564  ;;  %v1513_v16 = vmul.f32 %v5559_v46, %v1512_v11  ;;  %v1563_v5 = vmul.f32 %v5563_v40, %v7563_v15  ;;  %vm1569_vm15 = vweird.f32 %v5563_v40 }
 0x774   :  { %v1573_v58 = vmul.f32 %v5565_v51, %v7565_v35  ;;  %v1545_v9 = vmul.f32 %v7567_v56, %v1544_v7  ;;  %vm1579_vm0 = vweird.f32 %v5565_v51  ;;  %vm1570_vm7 = vmor %vm1568_vm4, %vm1569_vm15  ;;  %v10449_v7 = vld [vmem:[#allocation17_spill] sm:$0xff] }
 0x775   :  { %v1517_v62 = vsel %vm1516_vm2, %v5559_v46, %v1513_v16  ;;  %v1564_v39 = vmul.f32 %v5563_v40, %v1563_v5  ;;  %vm1580_vm2 = vmor %vm1578_vm1, %vm1579_vm0 }
 0x776   :  { %v1574_v22 = vmul.f32 %v5565_v51, %v1573_v58  ;;  %v1519_v61 = vsel %vm6358_vm9, %v1517_v62, 0.0  ;;  %v1549_v4 = vsel %vm1548_vm13, %v7567_v56, %v1545_v9 }
 0x777   :  { %v1565_v6 = vmul.f32 0.5, %v1564_v39  ;;  %v1521_v32 = vadd.f32 %v1519_v61, %v1489_v33  ;;  %v1551_v25 = vsel %vm6366_vm10, %v1549_v4, 0.0 }
 0x778   :  { %v1575_v46 = vmul.f32 0.5, %v1574_v22 }
 0x779   :  { %v1566_v41 = vsub.f32 1.5, %v1565_v6  ;;  %v1553_v56 = vadd.f32 %v1551_v25, %v1521_v32 }
 0x77a   :  { %v1576_v29 = vsub.f32 1.5, %v1575_v46 }
 0x77b   :  { %v1567_v23 = vmul.f32 %v5563_v40, %v1566_v41 }
 0x77c   :  { %v1577_v17 = vmul.f32 %v5565_v51, %v1576_v29 }
 0x77d   :  { %v1571_v28 = vsel %vm1570_vm7, %v5563_v40, %v1567_v23  ;;  %v10444_v40 = vld [vmem:[#allocation7_spill] sm:$0xff] }
 0x77e   :  { %v1581_v27 = vsel %vm1580_vm2, %v5565_v51, %v1577_v17  ;;  %v1582_v12 = vsel %vm227_vm11, %v1571_v28, 0.0 }
 0x77f   :  { %v1583_v15 = vsel %vm227_vm11, %v1581_v27, 0.0  ;;  %v1584_v53 = vadd.f32 %v1582_v12, %v1552_v52 }
 0x780   :  { %v1585_v59 = vadd.f32 %v1583_v15, %v1553_v56 }
 0x781   :  { %v1586_v35 = vmul.f32 %v1584_v53, %v7507_v18  ;;  %v10448_v18 = vld [vmem:[#allocation15_spill] sm:$0xff] }
 0x782   :  { %v1587_v11 = vmul.f32 %v1585_v59, %v7516_v30  ;;  %v10447_v30 = vld [vmem:[#allocation13_spill] sm:$0xff] }
 0x784   :  { %1602 = vmatpush.msrb.mxu1 %v1587_v11 }
 0x786   :  { %1603 = vmatpush.msrb.mxu1 %v1586_v35 }
 0x787   :  { %5203 = vmatmul.msk.f32.vlgmr.msrb.gmra.mxu1 %vm368_vm14, %v6525_v47 }
 0x78f   :  { %5204 = vmatmul.msk.f32.gmra.mxu1 %vm368_vm14, %v6540_v49 }
 0x797   :  { %5205 = vmatmul.msk.f32.gmra.mxu1 %vm368_vm14, %v10444_v40 }
 0x79f   :  { %5206 = vmatmul.msk.f32.gmra.mxu1 %vm368_vm14, %v10445_v44 }
 0x7a7   :  { %5207 = vmatmul.msk.f32.gmra.mxu1 %vm368_vm14, %v10446_v63 }
 0x7af   :  { %5208 = vmatmul.msk.f32.gmra.mxu1 %vm368_vm14, %v10447_v30 }
 0x7b7   :  { %5209 = vmatmul.msk.f32.gmra.mxu1 %vm368_vm14, %v10448_v18 }
 0x7bf   :  { %5210 = vmatmul.msk.f32.gmra.mxu1 %vm368_vm14, %v10449_v7 }
 0x804   :  { %v1605_v51 = vpop.f32.mrf.mxu1 }
 0x805   :  { %v7661_v60 = vmul.f32 %v1605_v51, %v6612_v8 }
 0x807   :  { %v1637_v16 = vsel %vm219_vm3, %v7661_v60, 0.0 }
 0x808   :  { %1645 = vadd.xlane.f32.xlu0 %v1637_v16 }
 0x80c   :  { %v1608_v5 = vpop.f32.mrf.mxu1 }
 0x80d   :  { %v1630_v21 = vmul.f32 %v1608_v5, %v6623_v13 }
 0x80f   :  { %v1662_v58 = vsel %vm6358_vm9, %v1630_v21, 0.0  ;;  %v1638_v14 = vsel %vm219_vm3, %v1630_v21, 0.0  ;;  %v1686_v52 = vsel %vm6366_vm10, %v1630_v21, 0.0  ;;  %v1710_v11 = vsel %vm227_vm11, %v1630_v21, 0.0 }
 0x810   :  { %1671 = vadd.xlane.f32.xlu0 %v1662_v58  ;;  %1647 = vadd.xlane.f32.xlu1 %v1638_v14  ;;  %v1661_v21 = vsel %vm6358_vm9, %v7661_v60, 0.0  ;;  %v1685_v14 = vsel %vm6366_vm10, %v7661_v60, 0.0 }
 0x814   :  { %v1611_v42 = vpop.f32.mrf.mxu1 }
 0x815   :  { %v7672_v36 = vmul.f32 %v1611_v42, %v6634_v20  ;;  %v1709_v42 = vsel %vm227_vm11, %v7661_v60, 0.0 }
 0x817   :  { %v1663_v62 = vsel %vm6358_vm9, %v7672_v36, 0.0  ;;  %v1639_v39 = vsel %vm219_vm3, %v7672_v36, 0.0  ;;  %v1687_v22 = vsel %vm6366_vm10, %v7672_v36, 0.0  ;;  %v1711_v58 = vsel %vm227_vm11, %v7672_v36, 0.0 }
 0x818   :  { %1673 = vadd.xlane.f32.xlu1 %v1663_v62  ;;  %1649 = vadd.xlane.f32.xlu2 %v1639_v39 }
 0x81c   :  { %v1614_v19 = vpop.f32.mrf.mxu1 }
 0x81d   :  { %v1632_v9 = vmul.f32 %v1614_v19, %v6645_v26 }
 0x81f   :  { %v1712_v24 = vsel %vm227_vm11, %v1632_v9, 0.0  ;;  %v1640_v61 = vsel %vm219_vm3, %v1632_v9, 0.0  ;;  %v1664_v55 = vsel %vm6358_vm9, %v1632_v9, 0.0  ;;  %v1688_v10 = vsel %vm6366_vm10, %v1632_v9, 0.0 }
 0x820   :  { %1697 = vadd.xlane.f32.xlu2 %v1687_v22  ;;  %1723 = vadd.xlane.f32.xlu1 %v1712_v24 }
 0x821   :  { %1651 = vadd.xlane.f32.xlu0 %v1640_v61 }
 0x824   :  { %v1617_v6 = vpop.f32.mrf.mxu1 }
 0x825   :  { %v1633_v57 = vmul.f32 %v1617_v6, %v6655_v31 }
 0x827   :  { %v1641_v46 = vsel %vm219_vm3, %v1633_v57, 0.0  ;;  %v1713_v41 = vsel %vm227_vm11, %v1633_v57, 0.0  ;;  %v1689_v32 = vsel %vm6366_vm10, %v1633_v57, 0.0  ;;  %v1665_v4 = vsel %vm6358_vm9, %v1633_v57, 0.0 }
 0x828   :  { %1675 = vadd.xlane.f32.xlu2 %v1664_v55  ;;  %1653 = vadd.xlane.f32.xlu1 %v1641_v46 }
 0x829   :  { %1699 = vadd.xlane.f32.xlu0 %v1688_v10 }
 0x82c   :  { %v1620_v33 = vpop.f32.mrf.mxu1 }
 0x82d   :  { %v1634_v29 = vmul.f32 %v1620_v33, %v6664_v37 }
 0x82f   :  { %v1666_v23 = vsel %vm6358_vm9, %v1634_v29, 0.0  ;;  %v1642_v38 = vsel %vm219_vm3, %v1634_v29, 0.0  ;;  %v1714_v1 = vsel %vm227_vm11, %v1634_v29, 0.0  ;;  %v1690_v28 = vsel %vm6366_vm10, %v1634_v29, 0.0 }
 0x830   :  { %1725 = vadd.xlane.f32.xlu2 %v1713_v41  ;;  %1701 = vadd.xlane.f32.xlu1 %v1689_v32 }
 0x831   :  { %1677 = vadd.xlane.f32.xlu0 %v1665_v4 }
 0x834   :  { %v1623_v17 = vpop.f32.mrf.mxu1 }
 0x835   :  { %v1635_v25 = vmul.f32 %v1623_v17, %v6677_v34 }
 0x837   :  { %v1715_v27 = vsel %vm227_vm11, %v1635_v25, 0.0  ;;  %v1643_v56 = vsel %vm219_vm3, %v1635_v25, 0.0  ;;  %v1667_v12 = vsel %vm6358_vm9, %v1635_v25, 0.0  ;;  %v1691_v59 = vsel %vm6366_vm10, %v1635_v25, 0.0 }
 0x838   :  { %1679 = vadd.xlane.f32.xlu1 %v1666_v23  ;;  %1655 = vadd.xlane.f32.xlu2 %v1642_v38 }
 0x839   :  { %1727 = vadd.xlane.f32.xlu0 %v1714_v1 }
 0x83c   :  { %v1626_v15 = vpop.f32.mrf.mxu1 }
 0x83d   :  { %v1636_v53 = vmul.f32 %v1626_v15, %v6688_v3 }
 0x83f   :  { %v1668_v35 = vsel %vm6358_vm9, %v1636_v53, 0.0  ;;  %v1644_v51 = vsel %vm219_vm3, %v1636_v53, 0.0  ;;  %v1716_v16 = vsel %vm227_vm11, %v1636_v53, 0.0  ;;  %v1692_v5 = vsel %vm6366_vm10, %v1636_v53, 0.0 }
 0x840   :  { %1703 = vadd.xlane.f32.xlu2 %v1690_v28  ;;  %1729 = vadd.xlane.f32.xlu1 %v1715_v27 }
 0x841   :  { %1657 = vadd.xlane.f32.xlu0 %v1643_v56 }
 0x848   :  { %1695 = vadd.xlane.f32.xlu1 %v1686_v52  ;;  %1681 = vadd.xlane.f32.xlu2 %v1667_v12 }
 0x849   :  { %1705 = vadd.xlane.f32.xlu0 %v1691_v59 }
 0x850   :  { %1719 = vadd.xlane.f32.xlu1 %v1710_v11  ;;  %1683 = vadd.xlane.f32.xlu2 %v1668_v35 }
 0x851   :  { %1659 = vadd.xlane.f32.xlu0 %v1644_v51 }
 0x858   :  { %1731 = vadd.xlane.f32.xlu2 %v1716_v16 }
 0x859   :  { %1707 = vadd.xlane.f32.xlu0 %v1692_v5 }
 0x860   :  { %1669 = vadd.xlane.f32.xlu2 %v1661_v21 }
 0x861   :  { %1721 = vadd.xlane.f32.xlu0 %v1711_v58 }
 0x868   :  { %1693 = vadd.xlane.f32.xlu2 %v1685_v14 }
 0x869   :  { %1717 = vadd.xlane.f32.xlu0 %v1709_v42 }
 0x87b   :  { %v7744_v62 = vpop.xlane.xlu0 %1645 }
 0x883   :  { %v7746_v39 = vpop.xlane.xlu1 %1647  ;;  %v7752_v36 = vpop.xlane.xlu0 %1671 }
 0x88b   :  { %v7748_v19 = vpop.xlane.xlu1 %1673  ;;  %v7750_v9 = vpop.xlane.xlu2 %1649 }
 0x893   :  { %v7754_v22 = vpop.xlane.xlu2 %1697  ;;  %v1724_v24 = vpop.xlane.xlu1 %1723 }
 0x894   :  { %v1652_v61 = vpop.xlane.xlu0 %1651 }
 0x89b   :  { %v1676_v6 = vpop.xlane.xlu2 %1675  ;;  %v1654_v57 = vpop.xlane.xlu1 %1653 }
 0x89c   :  { %v1700_v55 = vpop.xlane.xlu0 %1699  ;;  %v1736_v46 = vmax.f32 %v1652_v61, %v1676_v6 }
 0x89e   :  { %v1744_v41 = vmax.f32 %v1736_v46, %v1700_v55 }
 0x8a0   :  { %v1752_v4 = vmax.f32 %v1744_v41, %v1724_v24 }
 0x8a2   :  { %v1760_v1 = vsub.f32 %v1652_v61, %v1752_v4  ;;  %v1784_v25 = vsub.f32 %v1676_v6, %v1752_v4  ;;  %v1808_v59 = vsub.f32 %v1700_v55, %v1752_v4  ;;  %v1832_v21 = vsub.f32 %v1724_v24, %v1752_v4 }
 0x8a3   :  { %v1726_v60 = vpop.xlane.xlu2 %1725  ;;  %v1702_v10 = vpop.xlane.xlu1 %1701 }
 0x8a4   :  { %v1678_v33 = vpop.xlane.xlu0 %1677  ;;  %v1771_v27 = vmul.f32 1.442695, %v1760_v1  ;;  %v1795_v52 = vmul.f32 1.442695, %v1784_v25  ;;  %v1819_v5 = vmul.f32 1.442695, %v1808_v59 }
 0x8a5   :  { %v1737_v32 = vmax.f32 %v1654_v57, %v1678_v33  ;;  %v1843_v55 = vmul.f32 1.442695, %v1832_v21 }
 0x8a6   :  { %5566 = vpow2.f32 %v1771_v27 }
 0x8a7   :  { %v1745_v17 = vmax.f32 %v1737_v32, %v1702_v10  ;;  %5568 = vpow2.f32 %v1795_v52 }
 0x8a8   :  { %5570 = vpow2.f32 %v1819_v5 }
 0x8a9   :  { %v1753_v28 = vmax.f32 %v1745_v17, %v1726_v60 }
 0x8ab   :  { %v1680_v29 = vpop.xlane.xlu1 %1679  ;;  %v1656_v23 = vpop.xlane.xlu2 %1655  ;;  %v1761_v35 = vsub.f32 %v1654_v57, %v1753_v28  ;;  %v1785_v51 = vsub.f32 %v1678_v33, %v1753_v28  ;;  %v1809_v6 = vsub.f32 %v1702_v10, %v1753_v28  ;;  %v1833_v1 = vsub.f32 %v1726_v60, %v1753_v28 }
 0x8ac   :  { %v7756_v38 = vpop.xlane.xlu0 %1727  ;;  %v1738_v56 = vmax.f32 %v1656_v23, %v1680_v29  ;;  %v7763_v32 = vpop.eup %5566  ;;  %v1734_v10 = vmax.f32 %v7746_v39, %v7752_v36 }
 0x8ad   :  { %v1773_v58 = vmul.f32 1.442695, %v1761_v35  ;;  %v1797_v42 = vmul.f32 1.442695, %v1785_v51  ;;  %v7765_v33 = vpop.eup %5568  ;;  %v1845_v52 = vmul.f32 1.442695, %v1833_v1 }
 0x8ae   :  { %v7774_v28 = vpop.eup %5570 }
 0x8af   :  { %5572 = vpow2.f32 %v1773_v58 }
 0x8b0   :  { %5574 = vpow2.f32 %v1797_v42 }
 0x8b1   :  { %5576 = vpow2.f32 %v1843_v55 }
 0x8b3   :  { %v1704_v12 = vpop.xlane.xlu2 %1703  ;;  %v7758_v15 = vpop.xlane.xlu1 %1729 }
 0x8b4   :  { %v1746_v53 = vmax.f32 %v1738_v56, %v1704_v12  ;;  %v1658_v11 = vpop.xlane.xlu0 %1657 }
 0x8b5   :  { %v7776_v5 = vpop.eup %5572 }
 0x8b6   :  { %v1754_v16 = vmax.f32 %v1746_v53, %v7756_v38 }
 0x8b8   :  { %v1762_v14 = vsub.f32 %v1656_v23, %v1754_v16  ;;  %v1786_v61 = vsub.f32 %v1680_v29, %v1754_v16  ;;  %v1821_v29 = vmul.f32 1.442695, %v1809_v6  ;;  %v1856_v23 = vadd.f32 %v7765_v33, %v7763_v32 }
 0x8b9   :  { %v1810_v27 = vsub.f32 %v1704_v12, %v1754_v16  ;;  %v1834_v59 = vsub.f32 %v7756_v38, %v1754_v16  ;;  %v7780_v12 = vpop.eup %5574 }
 0x8ba   :  { %v1775_v25 = vmul.f32 1.442695, %v1762_v14  ;;  %v1799_v24 = vmul.f32 1.442695, %v1786_v61  ;;  %v1864_v6 = vadd.f32 %v7774_v28, %v1856_v23 }
 0x8bb   :  { %v7761_v46 = vpop.xlane.xlu1 %1695  ;;  %v1682_v41 = vpop.xlane.xlu2 %1681  ;;  %v1823_v14 = vmul.f32 1.442695, %v1810_v27  ;;  %v1847_v55 = vmul.f32 1.442695, %v1834_v59 }
 0x8bc   :  { %v1739_v57 = vmax.f32 %v1658_v11, %v1682_v41  ;;  %v1706_v17 = vpop.xlane.xlu0 %1705  ;;  %5578 = vpow2.f32 %v1775_v25  ;;  %v1742_v60 = vmax.f32 %v1734_v10, %v7761_v46 }
 0x8bd   :  { %5580 = vpow2.f32 %v1799_v24  ;;  %v1857_v24 = vadd.f32 %v7780_v12, %v7776_v5 }
 0x8be   :  { %v1747_v4 = vmax.f32 %v1739_v57, %v1706_v17  ;;  %5582 = vpow2.f32 %v1821_v29 }
 0x8bf   :  { %5584 = vpow2.f32 %v1845_v52 }
 0x8c0   :  { %v1755_v56 = vmax.f32 %v1747_v4, %v7758_v15 }
 0x8c2   :  { %v1763_v53 = vsub.f32 %v1658_v11, %v1755_v56  ;;  %v1787_v35 = vsub.f32 %v1682_v41, %v1755_v56  ;;  %v1811_v51 = vsub.f32 %v1706_v17, %v1755_v56  ;;  %v1835_v11 = vsub.f32 %v7758_v15, %v1755_v56  ;;  %v7784_v41 = vpop.eup %5576 }
 0x8c3   :  { %v1720_v21 = vpop.xlane.xlu1 %1719  ;;  %v7778_v58 = vpop.xlane.xlu2 %1683  ;;  %v1872_v23 = vadd.f32 %v7784_v41, %v1864_v6 }
 0x8c4   :  { %v1777_v42 = vmul.f32 1.442695, %v1763_v53  ;;  %v1801_v61 = vmul.f32 1.442695, %v1787_v35  ;;  %v1750_v38 = vmax.f32 %v1742_v60, %v1720_v21  ;;  %v1660_v16 = vpop.xlane.xlu0 %1659  ;;  %v1825_v57 = vmul.f32 1.442695, %v1811_v51  ;;  %v7788_v25 = vpop.eup %5578 }
 0x8c5   :  { %v7792_v4 = vpop.eup %5580  ;;  %v1740_v59 = vmax.f32 %v1660_v16, %v7778_v58 }
 0x8c6   :  { %5586 = vpow2.f32 %v1777_v42  ;;  %v1758_v17 = vsub.f32 %v7746_v39, %v1750_v38  ;;  %v1782_v1 = vsub.f32 %v7752_v36, %v1750_v38  ;;  %v7794_v15 = vpop.eup %5582  ;;  %v1849_v39 = vmul.f32 1.442695, %v1835_v11 }
 0x8c7   :  { %5588 = vpow2.f32 %v1801_v61  ;;  %v1806_v36 = vsub.f32 %v7761_v46, %v1750_v38  ;;  %v7798_v27 = vpop.eup %5584  ;;  %v1865_v56 = vadd.f32 %v7794_v15, %v1857_v24  ;;  %v1858_v52 = vadd.f32 %v7792_v4, %v7788_v25 }
 0x8c8   :  { %5590 = vpow2.f32 %v1823_v14  ;;  %v1767_v10 = vmul.f32 1.442695, %v1758_v17  ;;  %v1791_v29 = vmul.f32 1.442695, %v1782_v1  ;;  %v1830_v35 = vsub.f32 %v1720_v21, %v1750_v38 }
 0x8c9   :  { %5592 = vpow2.f32 %v1847_v55  ;;  %v1815_v6 = vmul.f32 1.442695, %v1806_v36  ;;  %v1873_v11 = vadd.f32 %v7798_v27, %v1865_v56  ;;  %v1735_v38 = vmax.f32 %v7750_v9, %v7748_v19 }
 0x8ca   :  { %5594 = vpow2.f32 %v1825_v57  ;;  %v1839_v1 = vmul.f32 1.442695, %v1830_v35 }
 0x8cb   :  { %5596 = vpow2.f32 %v1767_v10  ;;  %v1732_v60 = vpop.xlane.xlu2 %1731  ;;  %v1743_v56 = vmax.f32 %v1735_v38, %v7754_v22 }
 0x8cc   :  { %v7804_v53 = vpop.eup %5586  ;;  %5598 = vpow2.f32 %v1791_v29  ;;  %v1708_v51 = vpop.xlane.xlu0 %1707 }
 0x8cd   :  { %v7806_v14 = vpop.eup %5588  ;;  %5600 = vrcp.f32 %v1872_v23  ;;  %v1748_v46 = vmax.f32 %v1740_v59, %v1708_v51 }
 0x8ce   :  { %v7808_v42 = vpop.eup %5590  ;;  %5602 = vpow2.f32 %v1849_v39  ;;  %v1859_v61 = vadd.f32 %v7806_v14, %v7804_v53 }
 0x8cf   :  { %v7812_v55 = vpop.eup %5592  ;;  %v1866_v57 = vadd.f32 %v7808_v42, %v1858_v52  ;;  %v1756_v17 = vmax.f32 %v1748_v46, %v1732_v60  ;;  %5604 = vpow2.f32 %v1815_v6 }
 0x8d0   :  { %v7816_v21 = vpop.eup %5594  ;;  %5606 = vrcp.f32 %v1873_v11 }
 0x8d1   :  { %v7820_v24 = vpop.eup %5596  ;;  %v1867_v10 = vadd.f32 %v7816_v21, %v1859_v61  ;;  %v1764_v29 = vsub.f32 %v1660_v16, %v1756_v17  ;;  %v1788_v23 = vsub.f32 %v7778_v58, %v1756_v17  ;;  %v1812_v39 = vsub.f32 %v1708_v51, %v1756_v17 }
 0x8d2   :  { %v7824_v36 = vpop.eup %5598  ;;  %v1836_v52 = vsub.f32 %v1732_v60, %v1756_v17  ;;  %v1874_v46 = vadd.f32 %v7812_v55, %v1866_v57  ;;  %5608 = vpow2.f32 %v1839_v1 }
 0x8d3   :  { %v7827_v59 = vpop.eup %5600  ;;  %v1779_v35 = vmul.f32 1.442695, %v1764_v29  ;;  %v1803_v7 = vmul.f32 1.442695, %v1788_v23  ;;  %v7830_v18 = vpop.xlane.xlu2 %1669  ;;  %v1827_v58 = vmul.f32 1.442695, %v1812_v39  ;;  %v1854_v6 = vadd.f32 %v7824_v36, %v7820_v24 }
 0x8d4   :  { %v7832_v61 = vpop.eup %5602  ;;  %v1722_v16 = vpop.xlane.xlu0 %1721  ;;  %v1851_v11 = vmul.f32 1.442695, %v1836_v52  ;;  %v1888_v57 = vmul.f32 %v7827_v59, %v7763_v32  ;;  %v1904_v1 = vmul.f32 %v7827_v59, %v7765_v33 }
 0x8d5   :  { %v1875_v51 = vadd.f32 %v7832_v61, %v1867_v10  ;;  %5610 = vpow2.f32 %v1779_v35  ;;  %v1751_v60 = vmax.f32 %v1743_v56, %v1722_v16  ;;  %v7843_v29 = vpop.eup %5604 }
 0x8d6   :  { %5612 = vpow2.f32 %v1803_v7  ;;  %v7846_v39 = vpop.eup %5606  ;;  %v1862_v7 = vadd.f32 %v7843_v29, %v1854_v6  ;;  %v1896_v35 = vsel %vm219_vm3, %v1888_v57, 0.0  ;;  %v1928_v57 = vmul.f32 %v7827_v59, %v7774_v28 }
 0x8d7   :  { %5614 = vrcp.f32 %v1874_v46  ;;  %v1759_v17 = vsub.f32 %v7750_v9, %v1751_v60  ;;  %v1783_v38 = vsub.f32 %v7748_v19, %v1751_v60  ;;  %v1807_v10 = vsub.f32 %v7754_v22, %v1751_v60 }
 0x8d8   :  { %5616 = vpow2.f32 %v1827_v58  ;;  %v1831_v23 = vsub.f32 %v1722_v16, %v1751_v60  ;;  %v7849_v52 = vpop.eup %5608  ;;  %v1733_v19 = vmax.f32 %v7744_v62, %v7830_v18  ;;  %v1912_v58 = vsel %vm6358_vm9, %v1904_v1, 0.0 }
 0x8d9   :  { %5618 = vrcp.f32 %v1875_v51  ;;  %v1769_v32 = vmul.f32 1.442695, %v1759_v17  ;;  %v1793_v56 = vmul.f32 1.442695, %v1783_v38  ;;  %v1817_v9 = vmul.f32 1.442695, %v1807_v10 }
 0x8da   :  { %5620 = vpow2.f32 %v1851_v11  ;;  %v1841_v46 = vmul.f32 1.442695, %v1831_v23  ;;  %v1870_v60 = vadd.f32 %v7849_v52, %v1862_v7  ;;  %v1920_v23 = vadd.f32 %v1912_v58, %v1896_v35 }
 0x8db   :  { %v7853_v33 = vpop.eup %5610  ;;  %5622 = vpow2.f32 %v1769_v32  ;;  %v1694_v22 = vpop.xlane.xlu2 %1693  ;;  %v1905_v7 = vmul.f32 %v7846_v39, %v7780_v12 }
 0x8dc   :  { %v7859_v16 = vpop.eup %5612  ;;  %5624 = vpow2.f32 %v1793_v56  ;;  %v1741_v51 = vmax.f32 %v1733_v19, %v1694_v22  ;;  %v1718_v17 = vpop.xlane.xlu0 %1717  ;;  %v1889_v56 = vmul.f32 %v7846_v39, %v7776_v5 }
 0x8dd   :  { %v7861_v6 = vpop.eup %5614  ;;  %v1860_v11 = vadd.f32 %v7859_v16, %v7853_v33  ;;  %5626 = vpow2.f32 %v1817_v9 }
 0x8de   :  { %v5617_v38 = vpop.eup %5616  ;;  %v1749_v10 = vmax.f32 %v1741_v51, %v1718_v17  ;;  %5628 = vpow2.f32 %v1841_v46  ;;  %v1890_v46 = vmul.f32 %v7861_v6, %v7788_v25  ;;  %v1906_v5 = vmul.f32 %v7861_v6, %v7792_v4 }
 0x8df   :  { %v5619_v1 = vpop.eup %5618  ;;  %v1868_v32 = vadd.f32 %v5617_v38, %v1860_v11  ;;  %5630 = vrcp.f32 %v1870_v60  ;;  %v1913_v4 = vsel %vm6358_vm9, %v1905_v7, 0.0 }
 0x8e0   :  { %v5621_v19 = vpop.eup %5620  ;;  %v1757_v30 = vsub.f32 %v7744_v62, %v1749_v10  ;;  %v1781_v63 = vsub.f32 %v7830_v18, %v1749_v10  ;;  %v1805_v9 = vsub.f32 %v1694_v22, %v1749_v10  ;;  %v1829_v51 = vsub.f32 %v1718_v17, %v1749_v10 }
 0x8e1   :  { %v7874_v35 = vpop.eup %5622  ;;  %v1876_v28 = vadd.f32 %v5621_v19, %v1868_v32  ;;  %v1891_v62 = vmul.f32 %v5619_v1, %v7804_v53  ;;  %v1907_v18 = vmul.f32 %v5619_v1, %v7806_v14  ;;  %v1897_v17 = vsel %vm219_vm3, %v1889_v56, 0.0 }
 0x8e2   :  { %v7880_v58 = vpop.eup %5624  ;;  %v1765_v12 = vmul.f32 1.442695, %v1757_v30  ;;  %v1789_v11 = vmul.f32 1.442695, %v1781_v63  ;;  %v1813_v60 = vmul.f32 1.442695, %v1805_v9  ;;  %v1929_v63 = vmul.f32 %v7846_v39, %v7794_v15 }
 0x8e3   :  { %5632 = vrcp.f32 %v1876_v28  ;;  %v1855_v22 = vadd.f32 %v7880_v58, %v7874_v35  ;;  %v5627_v25 = vpop.eup %5626  ;;  %v1837_v10 = vmul.f32 1.442695, %v1829_v51  ;;  %v1936_v14 = vsel %vm6366_vm10, %v1928_v57, 0.0 }
 0x8e4   :  { %5634 = vpow2.f32 %v1765_v12  ;;  %v7892_v30 = vpop.eup %5628  ;;  %v7898_v32 = vmul.f32 %v7827_v59, %v7784_v41  ;;  %v1899_v56 = vsel %vm219_vm3, %v1891_v62, 0.0  ;;  %v1915_v7 = vsel %vm6358_vm9, %v1907_v18, 0.0 }
 0x8e5   :  { %v1863_v53 = vadd.f32 %v5627_v25, %v1855_v22  ;;  %5636 = vpow2.f32 %v1789_v11  ;;  %v1898_v15 = vsel %vm219_vm3, %v1890_v46, 0.0  ;;  %v1914_v9 = vsel %vm6358_vm9, %v1906_v5, 0.0  ;;  %v7908_v51 = vpop.eup %5630 }
 0x8e6   :  { %5638 = vpow2.f32 %v1813_v60  ;;  %v1921_v28 = vadd.f32 %v1913_v4, %v1897_v17  ;;  %v1944_v41 = vadd.f32 %v1936_v14, %v1920_v23  ;;  %v1931_v59 = vmul.f32 %v5619_v1, %v7816_v21 }
 0x8e7   :  { %v1871_v57 = vadd.f32 %v7892_v30, %v1863_v53  ;;  %5640 = vpow2.f32 %v1837_v10  ;;  %v1937_v12 = vsel %vm6366_vm10, %v1929_v63, 0.0  ;;  %v1953_v11 = vmul.f32 %v7846_v39, %v7798_v27 }
 0x8e8   :  { %v1923_v62 = vadd.f32 %v1915_v7, %v1899_v56  ;;  %v1922_v5 = vadd.f32 %v1914_v9, %v1898_v15  ;;  %v1930_v18 = vmul.f32 %v7861_v6, %v7808_v42  ;;  %v1955_v17 = vmul.f32 %v5619_v1, %v7832_v61 }
 0x8e9   :  { %v5633_v46 = vpop.eup %5632  ;;  %5642 = vrcp.f32 %v1871_v57  ;;  %v1945_v63 = vadd.f32 %v1937_v12, %v1921_v28  ;;  %v1886_v27 = vmul.f32 %v7908_v51, %v7820_v24  ;;  %v1902_v39 = vmul.f32 %v7908_v51, %v7824_v36 }
 0x8ea   :  { %v7918_v22 = vpop.eup %5634  ;;  %v1932_v60 = vmul.f32 %v5633_v46, %v5617_v38  ;;  %v1892_v23 = vmul.f32 %v5633_v46, %v7853_v33  ;;  %v1908_v21 = vmul.f32 %v5633_v46, %v7859_v16  ;;  %v1956_v4 = vmul.f32 %v5633_v46, %v5621_v19 }
 0x8eb   :  { %v5637_v10 = vpop.eup %5636  ;;  %v1939_v61 = vsel %vm6366_vm10, %v1931_v59, 0.0  ;;  %v1938_v24 = vsel %vm6366_vm10, %v1930_v18, 0.0  ;;  %v1954_v36 = vmul.f32 %v7861_v6, %v7812_v55  ;;  %v1963_v7 = vsel %vm227_vm11, %v1955_v17, 0.0 }
 0x8ec   :  { %v1853_v42 = vadd.f32 %v5637_v10, %v7918_v22  ;;  %v1900_v38 = vsel %vm219_vm3, %v1892_v23, 0.0  ;;  %v1916_v33 = vsel %vm6358_vm9, %v1908_v21, 0.0  ;;  %v5639_v16 = vpop.eup %5638  ;;  %v1947_v19 = vadd.f32 %v1939_v61, %v1923_v62 }
 0x8ed   :  { %v1924_v1 = vadd.f32 %v1916_v33, %v1900_v38  ;;  %v5641_v53 = vpop.eup %5640  ;;  %v1940_v56 = vsel %vm6366_vm10, %v1932_v60, 0.0  ;;  %v1946_v15 = vadd.f32 %v1938_v24, %v1922_v5  ;;  %v1964_v28 = vsel %vm227_vm11, %v1956_v4, 0.0 }
 0x8ee   :  { %v1861_v14 = vadd.f32 %v5639_v16, %v1853_v42  ;;  %v1894_v59 = vsel %vm219_vm3, %v1886_v27, 0.0  ;;  %v1910_v55 = vsel %vm6358_vm9, %v1902_v39, 0.0  ;;  %v1971_v60 = vadd.f32 %v1963_v7, %v1947_v19 }
 0x8ef   :  { %v5643_v9 = vpop.eup %5642  ;;  %v1948_v57 = vadd.f32 %v1940_v56, %v1924_v1  ;;  %v1962_v5 = vsel %vm227_vm11, %v1954_v36, 0.0  ;;  %v1961_v23 = vsel %vm227_vm11, %v1953_v11, 0.0  ;;  %v1918_v27 = vadd.f32 %v1910_v55, %v1894_v59 }
 0x8f0   :  { %v1869_v6 = vadd.f32 %v5641_v53, %v1861_v14  ;;  %v1887_v12 = vmul.f32 %v5643_v9, %v7874_v35  ;;  %v1903_v46 = vmul.f32 %v5643_v9, %v7880_v58  ;;  %v1927_v62 = vmul.f32 %v5643_v9, %v5627_v25 }
 0x8f1   :  { %v1972_v18 = vadd.f32 %v1964_v28, %v1948_v57  ;;  %v1926_v35 = vmul.f32 %v7908_v51, %v7843_v29  ;;  %v1970_v25 = vadd.f32 %v1962_v5, %v1946_v15  ;;  %v1969_v39 = vadd.f32 %v1961_v23, %v1945_v63  ;;  %v217_v23 = vld [vmem:[%s10337_s4 + $0x8] sm:$0xff] }
 0x8f2   :  { %5644 = vrcp.f32 %v1869_v6  ;;  %v1895_v21 = vsel %vm219_vm3, %v1887_v12, 0.0  ;;  %v1911_v17 = vsel %vm6358_vm9, %v1903_v46, 0.0  ;;  %v1935_v42 = vsel %vm6366_vm10, %v1927_v62, 0.0 }
 0x8f3   :  { %v1980_v58 = vmul.f32 %v1972_v18, %v6688_v3  ;;  %v1919_v4 = vadd.f32 %v1911_v17, %v1895_v21  ;;  %v1951_v11 = vmul.f32 %v5643_v9, %v7892_v30  ;;  %v1979_v38 = vmul.f32 %v1971_v60, %v6677_v34  ;;  %v216_v21 = vld [vmem:[%s10337_s4] sm:$0xff] }
 0x8f4   :  { %v1960_v33 = vsel %vm227_vm11, %v7898_v32, 0.0  ;;  %v1934_v3 = vsel %vm6366_vm10, %v1926_v35, 0.0  ;;  %v1950_v63 = vmul.f32 %v7908_v51, %v7849_v52  ;;  %v1978_v1 = vmul.f32 %v1970_v25, %v6664_v37 }
 0x8f5   :  { %1989 = vmatpush.msra.mxu3 %v1980_v58  ;;  %v1943_v61 = vadd.f32 %v1935_v42, %v1919_v4  ;;  %v1968_v29 = vadd.f32 %v1960_v33, %v1944_v41  ;;  %v1942_v19 = vadd.f32 %v1934_v3, %v1918_v27  ;;  %v1977_v24 = vmul.f32 %v1969_v39, %v6655_v31 }
 0x8f6   :  { %v1959_v34 = vsel %vm227_vm11, %v1951_v11, 0.0  ;;  %v1958_v52 = vsel %vm227_vm11, %v1950_v63, 0.0 }
 0x8f7   :  { %1990 = vmatpush.msra.mxu3 %v1979_v38  ;;  %v1967_v32 = vadd.f32 %v1959_v34, %v1943_v61  ;;  %v1976_v56 = vmul.f32 %v1968_v29, %v6645_v26  ;;  %v1966_v37 = vadd.f32 %v1958_v52, %v1942_v19 }
 0x8f8   :  { %v5645_v30 = vpop.eup %5644 }
 0x8f9   :  { %1991 = vmatpush.msra.mxu3 %v1978_v1  ;;  %v1885_v41 = vmul.f32 %v5645_v30, %v7918_v22  ;;  %v1901_v36 = vmul.f32 %v5645_v30, %v5637_v10  ;;  %v1925_v14 = vmul.f32 %v5645_v30, %v5639_v16  ;;  %v1949_v7 = vmul.f32 %v5645_v30, %v5641_v53 }
 0x8fa   :  { %v1975_v22 = vmul.f32 %v1967_v32, %v6634_v20  ;;  %v1974_v16 = vmul.f32 %v1966_v37, %v6623_v13  ;;  %v6158_v20 = vmov 0  }
 0x8fb   :  { %1992 = vmatpush.msra.mxu3 %v1977_v24  ;;  %v1893_v51 = vsel %vm219_vm3, %v1885_v41, 0.0  ;;  %v1909_v31 = vsel %vm6358_vm9, %v1901_v36, 0.0  ;;  %v1933_v10 = vsel %vm6366_vm10, %v1925_v14, 0.0  ;;  %v1957_v9 = vsel %vm227_vm11, %v1949_v7, 0.0  ;;  %5343 = vset.pattern.permute.xlu0 %v6158_v20 }
 0x8fc   :  { %v1917_v15 = vadd.f32 %v1909_v31, %v1893_v51  ;;  %5344 = vset.pattern.permute.xlu2 %v6158_v20 }
 0x8fd   :  { %1993 = vmatpush.msra.mxu3 %v1976_v56 }
 0x8fe   :  { %v1941_v26 = vadd.f32 %v1933_v10, %v1917_v15 }
 0x8ff   :  { %1994 = vmatpush.msra.mxu3 %v1975_v22 }
 0x900   :  { %v1965_v57 = vadd.f32 %v1957_v9, %v1941_v26 }
 0x901   :  { %1995 = vmatpush.msra.mxu3 %v1974_v16 }
 0x902   :  { %v1973_v28 = vmul.f32 %v1965_v57, %v6612_v8 }
 0x904   :  { %1996 = vmatpush.msra.mxu3 %v1973_v28 }
 0x905   :  { %5211 = vmatmul.msk.f32.vlgmr.msra.gmra.mxu3 %vm10450_vm5, %v6990_v43 }
 0x90d   :  { %5212 = vmatmul.msk.f32.gmra.mxu3 %vm10451_vm6, %v6994_v50 }
 0x988   :  { %v1998_v53 = vpop.f32.mrf.mxu3 }
 0x989   :  { %v7996_v13 = vadd.f32 %v1998_v53, %v6530_v48 }
 0x98b   :  { %v2004_v59 = vmul.f32 %v7996_v13, %v7996_v13 }
 0x98d   :  { %v2036_v8 = vsel %vm6358_vm9, %v2004_v59, 0.0  ;;  %v2006_v55 = vsel %vm219_vm3, %v2004_v59, 0.0  ;;  %v2068_v18 = vsel %vm6366_vm10, %v2004_v59, 0.0  ;;  %v2100_v5 = vsel %vm227_vm11, %v2004_v59, 0.0 }
 0x98e   :  { %2038 = vadd.xlane.f32.xlu2 %v2036_v8  ;;  %2008 = vadd.xlane.f32.xlu0 %v2006_v55 }
 0x990   :  { %v2001_v6 = vpop.f32.mrf.mxu3 }
 0x991   :  { %v8005_v12 = vadd.f32 %v2001_v6, %v6521_v45 }
 0x993   :  { %v2005_v46 = vmul.f32 %v8005_v12, %v8005_v12 }
 0x995   :  { %v2037_v48 = vsel %vm6358_vm9, %v2005_v46, 0.0  ;;  %v2007_v62 = vsel %vm219_vm3, %v2005_v46, 0.0  ;;  %v2069_v60 = vsel %vm6366_vm10, %v2005_v46, 0.0  ;;  %v2101_v45 = vsel %vm227_vm11, %v2005_v46, 0.0 }
 0x996   :  { %2040 = vadd.xlane.f32.xlu1 %v2037_v48  ;;  %2010 = vadd.xlane.f32.xlu2 %v2007_v62 }
 0x997   :  { %2070 = vadd.xlane.f32.xlu0 %v2068_v18 }
 0x99e   :  { %2072 = vadd.xlane.f32.xlu1 %v2069_v60  ;;  %2104 = vadd.xlane.f32.xlu2 %v2101_v45 }
 0x9a6   :  { %2102 = vadd.xlane.f32.xlu1 %v2100_v5 }
 0x9ab   :  { %2141 = vperm.xlu0 %5343, %v217_v23  }
 0x9b6   :  { %2136 = vperm.xlu2 %5344, %v216_v21  }
 0xa01   :  { %v2039_v17 = vpop.xlane.xlu2 %2038  ;;  %v2009_v35 = vpop.xlane.xlu0 %2008 }
 0xa02   :  { %v8027_v58 = vmax.f32 %v2039_v17, 1e-24  ;;  %v8029_v25 = vmax.f32 %v2009_v35, 1e-24 }
 0xa04   :  { %5646 = vrsqrt.f32 %v8027_v58  ;;  %vm2050_vm1 = vweird.f32 %v8027_v58  ;;  %vm2020_vm5 = vweird.f32 %v8029_v25 }
 0xa05   :  { %5648 = vrsqrt.f32 %v8029_v25 }
 0xa09   :  { %v2041_v4 = vpop.xlane.xlu1 %2040  ;;  %v2011_v27 = vpop.xlane.xlu2 %2010 }
 0xa0a   :  { %v2043_v39 = vmax.f32 %v2041_v4, 1e-24  ;;  %v2013_v42 = vmax.f32 %v2011_v27, 1e-24  ;;  %v2071_v11 = vpop.xlane.xlu0 %2070  ;;  %v8035_v33 = vpop.eup %5646 }
 0xa0b   :  { %v8033_v38 = vmax.f32 %v2071_v11, 1e-24  ;;  %v8037_v61 = vpop.eup %5648  ;;  %v2045_v29 = vmul.f32 %v8035_v33, %v8027_v58  ;;  %vm2051_vm4 = vweird.f32 %v8035_v33 }
 0xa0c   :  { %5650 = vrsqrt.f32 %v2043_v39  ;;  %v2015_v3 = vmul.f32 %v8037_v61, %v8029_v25  ;;  %vm2060_vm13 = vweird.f32 %v2043_v39  ;;  %vm2030_vm0 = vweird.f32 %v2013_v42 }
 0xa0d   :  { %5652 = vrsqrt.f32 %v2013_v42  ;;  %v2046_v36 = vmul.f32 %v8035_v33, %v2045_v29  ;;  %vm2021_vm2 = vweird.f32 %v8037_v61 }
 0xa0e   :  { %5654 = vrsqrt.f32 %v8033_v38  ;;  %v2016_v56 = vmul.f32 %v8037_v61, %v2015_v3 }
 0xa0f   :  { %v2047_v15 = vmul.f32 0.5, %v2046_v36 }
 0xa10   :  { %v2017_v10 = vmul.f32 0.5, %v2016_v56 }
 0xa11   :  { %v2073_v63 = vpop.xlane.xlu1 %2072  ;;  %v2105_v1 = vpop.xlane.xlu2 %2104  ;;  %v2048_v8 = vsub.f32 1.5, %v2047_v15 }
 0xa12   :  { %v5651_v19 = vpop.eup %5650  ;;  %v8044_v30 = vmax.f32 %v2073_v63, 1e-24  ;;  %v8046_v32 = vmax.f32 %v2105_v1, 1e-24  ;;  %v2018_v46 = vsub.f32 1.5, %v2017_v10 }
 0xa13   :  { %v5653_v24 = vpop.eup %5652  ;;  %v2055_v34 = vmul.f32 %v5651_v19, %v2043_v39  ;;  %vm2061_vm8 = vweird.f32 %v5651_v19  ;;  %v2049_v17 = vmul.f32 %v8035_v33, %v2048_v8 }
 0xa14   :  { %v8048_v41 = vpop.eup %5654  ;;  %v2025_v14 = vmul.f32 %v5653_v24, %v2013_v42  ;;  %5656 = vrsqrt.f32 %v8044_v30  ;;  %vm2031_vm12 = vweird.f32 %v5653_v24  ;;  %vm8061_vm15 = vmor %vm2060_vm13, %vm2061_vm8  ;;  %v2019_v4 = vmul.f32 %v8037_v61, %v2018_v46 }
 0xa15   :  { %v2056_v52 = vmul.f32 %v5651_v19, %v2055_v34  ;;  %v2077_v37 = vmul.f32 %v8048_v41, %v8033_v38  ;;  %5658 = vrsqrt.f32 %v8046_v32  ;;  %vm8066_vm7 = vmor %vm2030_vm0, %vm2031_vm12  ;;  %vm2083_vm12 = vweird.f32 %v8048_v41 }
 0xa16   :  { %v2026_v51 = vmul.f32 %v5653_v24, %v2025_v14  ;;  %vm8082_vm8 = vmor %vm2050_vm1, %vm2051_vm4  ;;  %vm2082_vm0 = vweird.f32 %v8033_v38 }
 0xa17   :  { %v2057_v31 = vmul.f32 0.5, %v2056_v52  ;;  %v2078_v7 = vmul.f32 %v8048_v41, %v2077_v37  ;;  %vm8091_vm13 = vmor %vm2020_vm5, %vm2021_vm2  ;;  %vm2124_vm2 = vweird.f32 %v8046_v32 }
 0xa18   :  { %v2027_v22 = vmul.f32 0.5, %v2026_v51  ;;  %v2023_v34 = vsel %vm8091_vm13, %v8037_v61, %v2019_v4  ;;  %vm2084_vm1 = vmor %vm2082_vm0, %vm2083_vm12 }
 0xa19   :  { %v2058_v26 = vsub.f32 1.5, %v2057_v31  ;;  %v2103_v16 = vpop.xlane.xlu1 %2102  ;;  %v2079_v53 = vmul.f32 0.5, %v2078_v7  ;;  %v2034_v51 = vsel %vm219_vm3, %v2023_v34, 0.0 }
 0xa1a   :  { %v5657_v9 = vpop.eup %5656  ;;  %v2028_v57 = vsub.f32 1.5, %v2027_v22  ;;  %v8057_v28 = vmax.f32 %v2103_v16, 1e-24 }
 0xa1b   :  { %v2059_v20 = vmul.f32 %v5651_v19, %v2058_v26  ;;  %v2087_v59 = vmul.f32 %v5657_v9, %v8044_v30  ;;  %v5659_v6 = vpop.eup %5658  ;;  %v2080_v23 = vsub.f32 1.5, %v2079_v53  ;;  %vm2093_vm6 = vweird.f32 %v5657_v9 }
 0xa1c   :  { %v2029_v55 = vmul.f32 %v5653_v24, %v2028_v57  ;;  %5660 = vrsqrt.f32 %v8057_v28  ;;  %v2119_v60 = vmul.f32 %v5659_v6, %v8046_v32 }
 0xa1d   :  { %v2088_v62 = vmul.f32 %v5657_v9, %v2087_v59  ;;  %v2063_v45 = vsel %vm8061_vm15, %v5651_v19, %v2059_v20  ;;  %v2081_v3 = vmul.f32 %v8048_v41, %v2080_v23  ;;  %vm2092_vm15 = vweird.f32 %v8044_v30  ;;  %v8120_v26 = vpop.permute.xlu0 %2141  ;;  %v5347_v59 = vld [vmem:[%s10339_s8] ss:$0 sm:$0xff] }
 0xa1e   :  { %v2033_v5 = vsel %vm8066_vm7, %v5653_v24, %v2029_v55  ;;  %v2120_v35 = vmul.f32 %v5659_v6, %v2119_v60  ;;  %v2065_v11 = vsel %vm6358_vm9, %v2063_v45, 0.0  ;;  %v2053_v19 = vsel %vm8082_vm8, %v8035_v33, %v2049_v17  ;;  %vm2094_vm4 = vmor %vm2092_vm15, %vm2093_vm6  ;;  %10460 = vst [vmem:[#allocation18_spill] sm:$0xff] %v8120_v26 }
 0xa1f   :  { %v2089_v21 = vmul.f32 0.5, %v2088_v62  ;;  %v2035_v58 = vsel %vm219_vm3, %v2033_v5, 0.0  ;;  %vm2125_vm7 = vweird.f32 %v5659_v6  ;;  %v2085_v38 = vsel %vm2084_vm1, %v8048_v41, %v2081_v3 }
 0xa20   :  { %v2121_v29 = vmul.f32 0.5, %v2120_v35  ;;  %v2067_v36 = vadd.f32 %v2065_v11, %v2035_v58  ;;  %vm2126_vm5 = vmor %vm2124_vm2, %vm2125_vm7  ;;  %v2064_v61 = vsel %vm6358_vm9, %v2053_v19, 0.0  ;;  %v2096_v32 = vsel %vm6366_vm10, %v2085_v38, 0.0 }
 0xa21   :  { %v2090_v27 = vsub.f32 1.5, %v2089_v21  ;;  %v2066_v41 = vadd.f32 %v2064_v61, %v2034_v51  ;;  %vm2114_vm8 = vweird.f32 %v8057_v28 }
 0xa22   :  { %v5661_v39 = vpop.eup %5660  ;;  %v2122_v24 = vsub.f32 1.5, %v2121_v29 }
 0xa23   :  { %v2091_v63 = vmul.f32 %v5657_v9, %v2090_v27  ;;  %v2109_v1 = vmul.f32 %v5661_v39, %v8057_v28  ;;  %vm2115_vm6 = vweird.f32 %v5661_v39  ;;  %v2098_v57 = vadd.f32 %v2096_v32, %v2066_v41 }
 0xa24   :  { %v2123_v52 = vmul.f32 %v5659_v6, %v2122_v24  ;;  %vm2116_vm12 = vmor %vm2114_vm8, %vm2115_vm6 }
 0xa25   :  { %v2095_v14 = vsel %vm2094_vm4, %v5657_v9, %v2091_v63  ;;  %v2110_v56 = vmul.f32 %v5661_v39, %v2109_v1  ;;  %v5346_v9 = vld [vmem:[%s10338_s7] ss:$0 sm:$0xff] }
 0xa26   :  { %v2097_v30 = vsel %vm6366_vm10, %v2095_v14, 0.0  ;;  %v2127_v31 = vsel %vm2126_vm5, %v5659_v6, %v2123_v52  ;;  %v8132_v6 = vpop.permute.xlu2 %2136 }
 0xa27   :  { %v2099_v33 = vadd.f32 %v2097_v30, %v2067_v36  ;;  %v2111_v37 = vmul.f32 0.5, %v2110_v56  ;;  %v2129_v7 = vsel %vm227_vm11, %v2127_v31, 0.0  ;;  %10461 = vst [vmem:[#allocation19_spill] sm:$0xff] %v8132_v6 }
 0xa29   :  { %v2112_v15 = vsub.f32 1.5, %v2111_v37  ;;  %v2131_v22 = vadd.f32 %v2129_v7, %v2099_v33 }
 0xa2b   :  { %v2113_v10 = vmul.f32 %v5661_v39, %v2112_v15  ;;  %v2133_v16 = vmul.f32 %v2131_v22, %v8005_v12 }
 0xa2d   :  { %v2117_v20 = vsel %vm2116_vm12, %v5661_v39, %v2113_v10  ;;  %v2145_v28 = vmul.f32 %v8120_v26, %v2133_v16 }
 0xa2e   :  { %v2128_v53 = vsel %vm227_vm11, %v2117_v20, 0.0 }
 0xa2f   :  { %v2130_v8 = vadd.f32 %v2128_v53, %v2098_v57  ;;  %v2151_v55 = vmul.f32 %v5346_v9, %v2145_v28 }
 0xa31   :  { %v2132_v12 = vmul.f32 %v2130_v8, %v7996_v13  ;;  %v2157_v46 = vadd.f32 %v5347_v59, %v2151_v55 }
 0xa33   :  { %v2144_v48 = vmul.f32 %v8132_v6, %v2132_v12  ;;  %v2161_v62 = vmin.f32 %v2157_v46, 0.0  ;;  %vm2159_vm13 = vcmp.gt.f32.partialorder %v2157_v46, 0.0 }
 0xa35   :  { %v2150_v18 = vmul.f32 %v5346_v9, %v2144_v48  ;;  %v2164_v60 = vmul.f32 1.442695, %v2161_v62 }
 0xa37   :  { %v2156_v45 = vadd.f32 %v5347_v59, %v2150_v18  ;;  %5662 = vpow2.f32 %v2164_v60 }
 0xa39   :  { %v2160_v5 = vmin.f32 %v2156_v45, 0.0  ;;  %vm2158_vm15 = vcmp.gt.f32.partialorder %v2156_v45, 0.0 }
 0xa3b   :  { %v2162_v23 = vmul.f32 1.442695, %v2160_v5 }
 0xa3d   :  { %5664 = vpow2.f32 %v2162_v23  ;;  %v5663_v21 = vpop.eup %5662 }
 0xa3e   :  { %v5214_v17 = vadd.f32 -1.0, %v5663_v21 }
 0xa40   :  { %v8136_v35 = vsel %vm2159_vm13, %v2157_v46, %v5214_v17 }
 0xa41   :  { %v2171_v4 = vmul.f32 %v8136_v35, %v8136_v35 }
 0xa43   :  { %v5665_v13 = vpop.eup %5664  ;;  %v2267_v27 = vsel %vm227_vm11, %v2171_v4, 0.0  ;;  %v2173_v3 = vsel %vm219_vm3, %v2171_v4, 0.0  ;;  %v2203_v63 = vsel %vm6358_vm9, %v2171_v4, 0.0  ;;  %v2235_v1 = vsel %vm6366_vm10, %v2171_v4, 0.0 }
 0xa44   :  { %v5213_v39 = vadd.f32 -1.0, %v5665_v13  ;;  %2270 = vadd.xlane.f32.xlu0 %v2267_v27 }
 0xa46   :  { %v8142_v42 = vsel %vm2158_vm15, %v2156_v45, %v5213_v39 }
 0xa47   :  { %v2170_v11 = vmul.f32 %v8142_v42, %v8142_v42 }
 0xa49   :  { %v2202_v58 = vsel %vm6358_vm9, %v2170_v11, 0.0  ;;  %v2172_v29 = vsel %vm219_vm3, %v2170_v11, 0.0  ;;  %v2234_v25 = vsel %vm6366_vm10, %v2170_v11, 0.0  ;;  %v2266_v19 = vsel %vm227_vm11, %v2170_v11, 0.0 }
 0xa4a   :  { %2204 = vadd.xlane.f32.xlu2 %v2202_v58  ;;  %2174 = vadd.xlane.f32.xlu1 %v2172_v29 }
 0xa52   :  { %2236 = vadd.xlane.f32.xlu1 %v2234_v25 }
 0xa5a   :  { %2176 = vadd.xlane.f32.xlu1 %v2173_v3 }
 0xa62   :  { %2206 = vadd.xlane.f32.xlu1 %v2203_v63 }
 0xa6a   :  { %2238 = vadd.xlane.f32.xlu1 %v2235_v1 }
 0xa72   :  { %2268 = vadd.xlane.f32.xlu1 %v2266_v19  ;;  %v10484_v19 = vld [vmem:[#allocation16_spill] sm:$0xff] }
 0xab7   :  { %v2271_v36 = vpop.xlane.xlu0 %2270 }
 0xab8   :  { %v8160_v56 = vmax.f32 %v2271_v36, 1e-24 }
 0xaba   :  { %vm2290_vm1 = vweird.f32 %v8160_v56 }
 0xabd   :  { %v2175_v24 = vpop.xlane.xlu1 %2174  ;;  %v2205_v14 = vpop.xlane.xlu2 %2204 }
 0xabe   :  { %v8162_v52 = vmax.f32 %v2205_v14, 1e-24  ;;  %v8166_v33 = vmax.f32 %v2175_v24, 1e-24 }
 0xac0   :  { %vm2216_vm12 = vweird.f32 %v8162_v52 }
 0xac5   :  { %v2237_v34 = vpop.xlane.xlu1 %2236 }
 0xac6   :  { %v8171_v37 = vmax.f32 %v2237_v34, 1e-24 }
 0xacd   :  { %v2177_v30 = vpop.xlane.xlu1 %2176 }
 0xace   :  { %v8164_v38 = vmax.f32 %v2177_v30, 1e-24 }
 0xad0   :  { %5666 = vrsqrt.f32 %v8164_v38  ;;  %vm2196_vm8 = vweird.f32 %v8164_v38 }
 0xad1   :  { %5668 = vrsqrt.f32 %v8160_v56 }
 0xad2   :  { %5670 = vrsqrt.f32 %v8162_v52 }
 0xad3   :  { %5672 = vrsqrt.f32 %v8166_v33 }
 0xad4   :  { %5674 = vrsqrt.f32 %v8171_v37 }
 0xad5   :  { %v2207_v61 = vpop.xlane.xlu1 %2206 }
 0xad6   :  { %v8174_v51 = vpop.eup %5666  ;;  %v2209_v31 = vmax.f32 %v2207_v61, 1e-24 }
 0xad7   :  { %v8177_v7 = vpop.eup %5668  ;;  %v2191_v22 = vmul.f32 %v8174_v51, %v8164_v38  ;;  %vm2197_vm4 = vweird.f32 %v8174_v51 }
 0xad8   :  { %v8179_v15 = vpop.eup %5670  ;;  %5676 = vrsqrt.f32 %v2209_v31  ;;  %v2285_v10 = vmul.f32 %v8177_v7, %v8160_v56  ;;  %vm2226_vm7 = vweird.f32 %v2209_v31  ;;  %vm2291_vm2 = vweird.f32 %v8177_v7  ;;  %vm8225_vm15 = vmor %vm2196_vm8, %vm2197_vm4 }
 0xad9   :  { %v8181_v32 = vpop.eup %5672  ;;  %v2211_v16 = vmul.f32 %v8179_v15, %v8162_v52  ;;  %v2192_v57 = vmul.f32 %v8174_v51, %v2191_v22  ;;  %vm2217_vm5 = vweird.f32 %v8179_v15  ;;  %vm2186_vm4 = vweird.f32 %v8166_v33 }
 0xada   :  { %v8185_v41 = vpop.eup %5674  ;;  %v2181_v9 = vmul.f32 %v8181_v32, %v8166_v33  ;;  %v2286_v55 = vmul.f32 %v8177_v7, %v2285_v10  ;;  %vm2187_vm13 = vweird.f32 %v8181_v32 }
 0xadb   :  { %v2243_v28 = vmul.f32 %v8185_v41, %v8171_v37  ;;  %v2212_v12 = vmul.f32 %v8179_v15, %v2211_v16  ;;  %v2193_v48 = vmul.f32 0.5, %v2192_v57 }
 0xadc   :  { %v2182_v46 = vmul.f32 %v8181_v32, %v2181_v9  ;;  %v2287_v45 = vmul.f32 0.5, %v2286_v55 }
 0xadd   :  { %v2239_v20 = vpop.xlane.xlu1 %2238  ;;  %v2244_v18 = vmul.f32 %v8185_v41, %v2243_v28  ;;  %v2213_v5 = vmul.f32 0.5, %v2212_v12  ;;  %v2194_v21 = vsub.f32 1.5, %v2193_v48 }
 0xade   :  { %v5677_v53 = vpop.eup %5676  ;;  %v8194_v59 = vmax.f32 %v2239_v20, 1e-24  ;;  %v2183_v23 = vmul.f32 0.5, %v2182_v46  ;;  %v2288_v29 = vsub.f32 1.5, %v2287_v45 }
 0xadf   :  { %v2221_v8 = vmul.f32 %v5677_v53, %v2209_v31  ;;  %v2245_v39 = vmul.f32 0.5, %v2244_v18  ;;  %vm2227_vm0 = vweird.f32 %v5677_v53  ;;  %v2214_v25 = vsub.f32 1.5, %v2213_v5 }
 0xae0   :  { %5678 = vrsqrt.f32 %v8194_v59  ;;  %v2184_v3 = vsub.f32 1.5, %v2183_v23  ;;  %v2195_v63 = vmul.f32 %v8174_v51, %v2194_v21  ;;  %vm8212_vm6 = vmor %vm2226_vm7, %vm2227_vm0  ;;  %v2289_v14 = vmul.f32 %v8177_v7, %v2288_v29  ;;  %v10479_v29 = vld [vmem:[#allocation11_spill] sm:$0xff] }
 0xae1   :  { %v2222_v62 = vmul.f32 %v5677_v53, %v2221_v8  ;;  %v2246_v24 = vsub.f32 1.5, %v2245_v39  ;;  %v2215_v30 = vmul.f32 %v8179_v15, %v2214_v25  ;;  %vm8229_vm0 = vmor %vm2290_vm1, %vm2291_vm2  ;;  %vm2249_vm1 = vweird.f32 %v8185_v41  ;;  %v10480_v25 = vld [vmem:[#allocation12_spill] sm:$0xff] }
 0xae2   :  { %v2185_v61 = vmul.f32 %v8181_v32, %v2184_v3  ;;  %v2199_v31 = vsel %vm8225_vm15, %v8174_v51, %v2195_v63  ;;  %vm8247_vm2 = vmor %vm2186_vm4, %vm2187_vm13  ;;  %vm2258_vm8 = vweird.f32 %v8194_v59  ;;  %v2293_v33 = vsel %vm8229_vm0, %v8177_v7, %v2289_v14  ;;  %v10481_v3 = vld [vmem:[#allocation13_spill] sm:$0xff]  ;;  %v10482_v63 = vld [vmem:[#allocation14_spill] sm:$0xff] }
 0xae3   :  { %v2223_v60 = vmul.f32 0.5, %v2222_v62  ;;  %v2247_v51 = vmul.f32 %v8185_v41, %v2246_v24  ;;  %v2201_v28 = vsel %vm219_vm3, %v2199_v31, 0.0  ;;  %v2295_v48 = vsel %vm227_vm11, %v2293_v33, 0.0  ;;  %v10485_v24 = vld [vmem:[#allocation17_spill] sm:$0xff] }
 0xae5   :  { %v2224_v17 = vsub.f32 1.5, %v2223_v60  ;;  %v2269_v4 = vpop.xlane.xlu1 %2268 }
 0xae6   :  { %v5679_v13 = vpop.eup %5678  ;;  %v8203_v27 = vmax.f32 %v2269_v4, 1e-24 }
 0xae7   :  { %v2225_v11 = vmul.f32 %v5677_v53, %v2224_v17  ;;  %v2253_v58 = vmul.f32 %v5679_v13, %v8194_v59  ;;  %vm2259_vm7 = vweird.f32 %v5679_v13  ;;  %v2189_v59 = vsel %vm8247_vm2, %v8181_v32, %v2185_v61 }
 0xae8   :  { %5680 = vrsqrt.f32 %v8203_v27  ;;  %v2200_v32 = vsel %vm219_vm3, %v2189_v59, 0.0  ;;  %vm2280_vm0 = vweird.f32 %v8203_v27 }
 0xae9   :  { %v2254_v1 = vmul.f32 %v5679_v13, %v2253_v58  ;;  %v2229_v34 = vsel %vm8212_vm6, %v5677_v53, %v2225_v11  ;;  %vm8239_vm6 = vmor %vm2216_vm12, %vm2217_vm5  ;;  %vm2248_vm5 = vweird.f32 %v8171_v37  ;;  %v10476_v11 = vld [vmem:[#allocation6_spill] sm:$0xff] }
 0xaea   :  { %v2231_v16 = vsel %vm6358_vm9, %v2229_v34, 0.0  ;;  %v2219_v53 = vsel %vm8239_vm6, %v8179_v15, %v2215_v30  ;;  %vm2260_vm12 = vmor %vm2258_vm8, %vm2259_vm7  ;;  %v10478_v58 = vld [vmem:[#allocation10_spill] sm:$0xff]  ;;  %vm10486_vm6 = vcmask 523264  }
 0xaeb   :  { %v2255_v36 = vmul.f32 0.5, %v2254_v1  ;;  %v2233_v8 = vadd.f32 %v2231_v16, %v2201_v28  ;;  %vm2250_vm13 = vmor %vm2248_vm5, %vm2249_vm1  ;;  %v2230_v62 = vsel %vm6358_vm9, %v2219_v53, 0.0  ;;  %v10483_v1 = vld [vmem:[#allocation15_spill] sm:$0xff] }
 0xaec   :  { %v2251_v37 = vsel %vm2250_vm13, %v8185_v41, %v2247_v51  ;;  %v2232_v5 = vadd.f32 %v2230_v62, %v2200_v32  ;;  %vm10487_vm4 = vmmov %vm10486_vm6 }
 0xaed   :  { %v2256_v22 = vsub.f32 1.5, %v2255_v36  ;;  %v2262_v45 = vsel %vm6366_vm10, %v2251_v37, 0.0 }
 0xaee   :  { %v5681_v52 = vpop.eup %5680  ;;  %v2264_v21 = vadd.f32 %v2262_v45, %v2232_v5 }
 0xaef   :  { %v2257_v57 = vmul.f32 %v5679_v13, %v2256_v22  ;;  %v2275_v20 = vmul.f32 %v5681_v52, %v8203_v27  ;;  %vm2281_vm15 = vweird.f32 %v5681_v52  ;;  %v10475_v27 = vld [vmem:[#allocation4_spill] sm:$0xff] }
 0xaf0   :  { %vm2282_vm7 = vmor %vm2280_vm0, %vm2281_vm15 }
 0xaf1   :  { %v2261_v55 = vsel %vm2260_vm12, %v5679_v13, %v2257_v57  ;;  %v2276_v12 = vmul.f32 %v5681_v52, %v2275_v20 }
 0xaf2   :  { %v2263_v7 = vsel %vm6366_vm10, %v2261_v55, 0.0 }
 0xaf3   :  { %v2265_v15 = vadd.f32 %v2263_v7, %v2233_v8  ;;  %v2277_v46 = vmul.f32 0.5, %v2276_v12 }
 0xaf5   :  { %v2297_v18 = vadd.f32 %v2295_v48, %v2265_v15  ;;  %v2278_v60 = vsub.f32 1.5, %v2277_v46 }
 0xaf7   :  { %v2279_v23 = vmul.f32 %v5681_v52, %v2278_v60  ;;  %v8282_v41 = vmul.f32 %v2297_v18, %v8136_v35  ;;  %v10474_v35 = vld [vmem:[#allocation2_spill] sm:$0xff] }
 0xaf9   :  { %10472 = vst [vmem:[#allocation20_spill] sm:$0xff] %v8282_v41  ;;  %v2283_v17 = vsel %vm2282_vm7, %v5681_v52, %v2279_v23  ;;  %2314 = vmatpush.msrb.mxu3 %v8282_v41  ;;  %2355 = vmatpush.msrb.mxu2 %v8282_v41 }
 0xafa   :  { %v2294_v4 = vsel %vm227_vm11, %v2283_v17, 0.0 }
 0xafb   :  { %v2296_v13 = vadd.f32 %v2294_v4, %v2264_v21 }
 0xafd   :  { %v8289_v39 = vmul.f32 %v2296_v13, %v8142_v42  ;;  %v10477_v42 = vld [vmem:[#allocation8_spill] sm:$0xff] }
 0xaff   :  { %10473 = vst [vmem:[#allocation21_spill] sm:$0xff] %v8289_v39  ;;  %2315 = vmatpush.msrb.mxu3 %v8289_v39  ;;  %2356 = vmatpush.msrb.mxu2 %v8289_v39 }
 0xb00   :  { %5215 = vmatmul.msk.f32.vlgmr.msrb.gmra.mxu3 %vm368_vm14, %v10474_v35  ;;  %5223 = vmatmul.msk.f32.vlgmr.msrb.gmra.mxu2 %vm368_vm14, %v6525_v47 }
 0xb08   :  { %5216 = vmatmul.msk.f32.gmra.mxu3 %vm368_vm14, %v10475_v27  ;;  %5224 = vmatmul.msk.f32.gmra.mxu2 %vm368_vm14, %v6540_v49 }
 0xb10   :  { %5217 = vmatmul.msk.f32.gmra.mxu3 %vm368_vm14, %v10476_v11  ;;  %5225 = vmatmul.msk.f32.gmra.mxu2 %vm368_vm14, %v10444_v40 }
 0xb18   :  { %5218 = vmatmul.msk.f32.gmra.mxu3 %vm368_vm14, %v10477_v42  ;;  %5226 = vmatmul.msk.f32.gmra.mxu2 %vm368_vm14, %v10445_v44 }
 0xb20   :  { %5219 = vmatmul.msk.f32.gmra.mxu3 %vm368_vm14, %v10478_v58  ;;  %5227 = vmatmul.msk.f32.gmra.mxu2 %vm368_vm14, %v10479_v29 }
 0xb28   :  { %5220 = vmatmul.msk.f32.gmra.mxu3 %vm368_vm14, %v10480_v25  ;;  %5228 = vmatmul.msk.f32.gmra.mxu2 %vm368_vm14, %v10481_v3 }
 0xb30   :  { %5221 = vmatmul.msk.f32.gmra.mxu3 %vm368_vm14, %v10482_v63  ;;  %5229 = vmatmul.msk.f32.gmra.mxu2 %vm368_vm14, %v10483_v1 }
 0xb38   :  { %5222 = vmatmul.msk.f32.gmra.mxu3 %vm368_vm14, %v10484_v19  ;;  %5230 = vmatmul.msk.f32.gmra.mxu2 %vm368_vm14, %v10485_v24 }
 0xb83   :  { %v8325_v34 = vpop.f32.mrf.mxu3  ;;  %v2358_v36 = vpop.f32.mrf.mxu2 }
 0xb84   :  { %v8328_v14 = vmul.f32 %v2358_v36, %v8325_v34 }
 0xb86   :  { %v2390_v30 = vsel %vm219_vm3, %v8328_v14, 0.0 }
 0xb87   :  { %2398 = vadd.xlane.f32.xlu0 %v2390_v30 }
 0xb8b   :  { %v8333_v56 = vpop.f32.mrf.mxu3  ;;  %v2361_v38 = vpop.f32.mrf.mxu2 }
 0xb8c   :  { %v8336_v61 = vmul.f32 %v2361_v38, %v8333_v56 }
 0xb8e   :  { %v2391_v31 = vsel %vm219_vm3, %v8336_v61, 0.0  ;;  %v2415_v22 = vsel %vm6358_vm9, %v8336_v61, 0.0 }
 0xb8f   :  { %2400 = vadd.xlane.f32.xlu2 %v2391_v31  ;;  %2424 = vadd.xlane.f32.xlu0 %v2415_v22 }
 0xb93   :  { %v8344_v52 = vpop.f32.mrf.mxu3  ;;  %v2364_v10 = vpop.f32.mrf.mxu2 }
 0xb94   :  { %v2384_v16 = vmul.f32 %v2364_v10, %v8344_v52 }
 0xb96   :  { %v2416_v9 = vsel %vm6358_vm9, %v2384_v16, 0.0  ;;  %v2392_v51 = vsel %vm219_vm3, %v2384_v16, 0.0  ;;  %v2440_v53 = vsel %vm6366_vm10, %v2384_v16, 0.0 }
 0xb97   :  { %2426 = vadd.xlane.f32.xlu2 %v2416_v9  ;;  %2402 = vadd.xlane.f32.xlu1 %v2392_v51  ;;  %v2464_v9 = vsel %vm227_vm11, %v2384_v16, 0.0  ;;  %v2439_v16 = vsel %vm6366_vm10, %v8336_v61, 0.0 }
 0xb9b   :  { %v8351_v57 = vpop.f32.mrf.mxu3  ;;  %v2367_v20 = vpop.f32.mrf.mxu2 }
 0xb9c   :  { %v2385_v33 = vmul.f32 %v2367_v20, %v8351_v57 }
 0xb9e   :  { %v2465_v28 = vsel %vm227_vm11, %v2385_v33, 0.0  ;;  %v2393_v59 = vsel %vm219_vm3, %v2385_v33, 0.0  ;;  %v2417_v7 = vsel %vm6358_vm9, %v2385_v33, 0.0  ;;  %v2441_v37 = vsel %vm6366_vm10, %v2385_v33, 0.0 }
 0xb9f   :  { %2450 = vadd.xlane.f32.xlu1 %v2440_v53  ;;  %2476 = vadd.xlane.f32.xlu2 %v2465_v28  ;;  %v2462_v53 = vsel %vm227_vm11, %v8328_v14, 0.0 }
 0xba0   :  { %2404 = vadd.xlane.f32.xlu0 %v2393_v59  ;;  %v2463_v59 = vsel %vm227_vm11, %v8336_v61, 0.0 }
 0xba3   :  { %v8360_v8 = vpop.f32.mrf.mxu3  ;;  %v2370_v55 = vpop.f32.mrf.mxu2 }
 0xba4   :  { %v2386_v12 = vmul.f32 %v2370_v55, %v8360_v8 }
 0xba6   :  { %v2394_v15 = vsel %vm219_vm3, %v2386_v12, 0.0  ;;  %v2466_v62 = vsel %vm227_vm11, %v2386_v12, 0.0  ;;  %v2442_v32 = vsel %vm6366_vm10, %v2386_v12, 0.0  ;;  %v2418_v18 = vsel %vm6358_vm9, %v2386_v12, 0.0 }
 0xba7   :  { %2428 = vadd.xlane.f32.xlu1 %v2417_v7  ;;  %2406 = vadd.xlane.f32.xlu2 %v2394_v15  ;;  %v2414_v12 = vsel %vm6358_vm9, %v8328_v14, 0.0  ;;  %v2438_v7 = vsel %vm6366_vm10, %v8328_v14, 0.0 }
 0xba8   :  { %2452 = vadd.xlane.f32.xlu0 %v2441_v37 }
 0xbab   :  { %v8369_v46 = vpop.f32.mrf.mxu3  ;;  %v2373_v48 = vpop.f32.mrf.mxu2 }
 0xbac   :  { %v2387_v60 = vmul.f32 %v2373_v48, %v8369_v46 }
 0xbae   :  { %v2419_v45 = vsel %vm6358_vm9, %v2387_v60, 0.0  ;;  %v2395_v5 = vsel %vm219_vm3, %v2387_v60, 0.0  ;;  %v2467_v23 = vsel %vm227_vm11, %v2387_v60, 0.0  ;;  %v2443_v30 = vsel %vm6366_vm10, %v2387_v60, 0.0 }
 0xbaf   :  { %2478 = vadd.xlane.f32.xlu1 %v2466_v62  ;;  %2454 = vadd.xlane.f32.xlu2 %v2442_v32 }
 0xbb0   :  { %2430 = vadd.xlane.f32.xlu0 %v2418_v18 }
 0xbb3   :  { %v8384_v21 = vpop.f32.mrf.mxu3  ;;  %v2376_v17 = vpop.f32.mrf.mxu2 }
 0xbb4   :  { %v2388_v4 = vmul.f32 %v2376_v17, %v8384_v21 }
 0xbb6   :  { %v2396_v13 = vsel %vm219_vm3, %v2388_v4, 0.0  ;;  %v2444_v36 = vsel %vm6366_vm10, %v2388_v4, 0.0  ;;  %v2420_v38 = vsel %vm6358_vm9, %v2388_v4, 0.0  ;;  %v2468_v31 = vsel %vm227_vm11, %v2388_v4, 0.0 }
 0xbb7   :  { %2432 = vadd.xlane.f32.xlu2 %v2419_v45  ;;  %2408 = vadd.xlane.f32.xlu1 %v2395_v5 }
 0xbb8   :  { %2480 = vadd.xlane.f32.xlu0 %v2467_v23 }
 0xbbb   :  { %v8397_v22 = vpop.f32.mrf.mxu3  ;;  %v2379_v10 = vpop.f32.mrf.mxu2 }
 0xbbc   :  { %v2389_v51 = vmul.f32 %v2379_v10, %v8397_v22 }
 0xbbe   :  { %v2445_v20 = vsel %vm6366_vm10, %v2389_v51, 0.0  ;;  %v2397_v33 = vsel %vm219_vm3, %v2389_v51, 0.0  ;;  %v2421_v28 = vsel %vm6358_vm9, %v2389_v51, 0.0  ;;  %v2469_v55 = vsel %vm227_vm11, %v2389_v51, 0.0 }
 0xbbf   :  { %2456 = vadd.xlane.f32.xlu1 %v2443_v30  ;;  %2410 = vadd.xlane.f32.xlu2 %v2396_v13 }
 0xbc0   :  { %2458 = vadd.xlane.f32.xlu0 %v2444_v36 }
 0xbc7   :  { %2434 = vadd.xlane.f32.xlu1 %v2420_v38  ;;  %2482 = vadd.xlane.f32.xlu2 %v2468_v31 }
 0xbc8   :  { %2474 = vadd.xlane.f32.xlu0 %v2464_v9 }
 0xbcf   :  { %2460 = vadd.xlane.f32.xlu2 %v2445_v20  ;;  %2412 = vadd.xlane.f32.xlu1 %v2397_v33 }
 0xbd0   :  { %2470 = vadd.xlane.f32.xlu0 %v2462_v53 }
 0xbd7   :  { %2448 = vadd.xlane.f32.xlu2 %v2439_v16  ;;  %2436 = vadd.xlane.f32.xlu1 %v2421_v28 }
 0xbdf   :  { %2472 = vadd.xlane.f32.xlu2 %v2463_v59  ;;  %2484 = vadd.xlane.f32.xlu1 %v2469_v55 }
 0xbe7   :  { %2422 = vadd.xlane.f32.xlu1 %v2414_v12 }
 0xbef   :  { %2446 = vadd.xlane.f32.xlu1 %v2438_v7 }
 0xbfa   :  { %v8425_v37 = vpop.xlane.xlu0 %2398 }
 0xc02   :  { %v8427_v15 = vpop.xlane.xlu2 %2400  ;;  %v8433_v62 = vpop.xlane.xlu0 %2424 }
 0xc0a   :  { %v8429_v61 = vpop.xlane.xlu2 %2426  ;;  %v8431_v48 = vpop.xlane.xlu1 %2402 }
 0xc12   :  { %v8435_v32 = vpop.xlane.xlu1 %2450  ;;  %v2477_v18 = vpop.xlane.xlu2 %2476 }
 0xc13   :  { %v2405_v60 = vpop.xlane.xlu0 %2404 }
 0xc1a   :  { %v2429_v45 = vpop.xlane.xlu1 %2428  ;;  %v2407_v5 = vpop.xlane.xlu2 %2406 }
 0xc1b   :  { %v2453_v23 = vpop.xlane.xlu0 %2452  ;;  %v2489_v4 = vmax.f32 %v2405_v60, %v2429_v45 }
 0xc1d   :  { %v2497_v30 = vmax.f32 %v2489_v4, %v2453_v23 }
 0xc1f   :  { %v2505_v9 = vmax.f32 %v2497_v30, %v2477_v18 }
 0xc21   :  { %v2513_v33 = vsub.f32 %v2405_v60, %v2505_v9  ;;  %v2537_v53 = vsub.f32 %v2429_v45, %v2505_v9  ;;  %v2561_v4 = vsub.f32 %v2453_v23, %v2505_v9 }
 0xc22   :  { %v2479_v17 = vpop.xlane.xlu1 %2478  ;;  %v2455_v14 = vpop.xlane.xlu2 %2454 }
 0xc23   :  { %v2431_v13 = vpop.xlane.xlu0 %2430  ;;  %v2524_v12 = vmul.f32 1.442695, %v2513_v33  ;;  %v2548_v19 = vmul.f32 1.442695, %v2537_v53 }
 0xc24   :  { %v2490_v36 = vmax.f32 %v2407_v5, %v2431_v13 }
 0xc25   :  { %5682 = vpow2.f32 %v2524_v12 }
 0xc26   :  { %v2498_v38 = vmax.f32 %v2490_v36, %v2455_v14  ;;  %5684 = vpow2.f32 %v2548_v19 }
 0xc28   :  { %v2506_v51 = vmax.f32 %v2498_v38, %v2479_v17  ;;  %v2585_v38 = vsub.f32 %v2477_v18, %v2505_v9 }
 0xc2a   :  { %v2433_v31 = vpop.xlane.xlu2 %2432  ;;  %v2409_v10 = vpop.xlane.xlu1 %2408  ;;  %v2514_v16 = vsub.f32 %v2407_v5, %v2506_v51  ;;  %v2538_v28 = vsub.f32 %v2431_v13, %v2506_v51  ;;  %v2562_v30 = vsub.f32 %v2455_v14, %v2506_v51  ;;  %v2572_v13 = vmul.f32 1.442695, %v2561_v4 }
 0xc2b   :  { %v8437_v20 = vpop.xlane.xlu0 %2480  ;;  %v2491_v7 = vmax.f32 %v2409_v10, %v2433_v31 }
 0xc2c   :  { %v2526_v63 = vmul.f32 1.442695, %v2514_v16  ;;  %v2550_v58 = vmul.f32 1.442695, %v2538_v28  ;;  %v2574_v53 = vmul.f32 1.442695, %v2562_v30  ;;  %v2586_v16 = vsub.f32 %v2479_v17, %v2506_v51 }
 0xc2d   :  { %v2488_v17 = vmax.f32 %v8431_v48, %v8429_v61 }
 0xc2e   :  { %5686 = vpow2.f32 %v2526_v63  ;;  %v2598_v18 = vmul.f32 1.442695, %v2586_v16 }
 0xc2f   :  { %5688 = vpow2.f32 %v2550_v58  ;;  %v2596_v58 = vmul.f32 1.442695, %v2585_v38  ;;  %v2496_v38 = vmax.f32 %v2488_v17, %v8435_v32 }
 0xc30   :  { %5690 = vpow2.f32 %v2572_v13 }
 0xc31   :  { %5692 = vpow2.f32 %v2574_v53 }
 0xc32   :  { %v2457_v59 = vpop.xlane.xlu1 %2456  ;;  %v2411_v55 = vpop.xlane.xlu2 %2410  ;;  %5694 = vpow2.f32 %v2596_v58 }
 0xc33   :  { %v2499_v25 = vmax.f32 %v2491_v7, %v2457_v59  ;;  %v8439_v36 = vpop.xlane.xlu0 %2458  ;;  %v8444_v7 = vpop.eup %5682  ;;  %5696 = vpow2.f32 %v2598_v18 }
 0xc34   :  { %v8447_v12 = vpop.eup %5684 }
 0xc35   :  { %v2507_v60 = vmax.f32 %v2499_v25, %v8437_v20  ;;  %v8449_v63 = vpop.eup %5686 }
 0xc36   :  { %v8454_v14 = vpop.eup %5688 }
 0xc37   :  { %v2515_v28 = vsub.f32 %v2409_v10, %v2507_v60  ;;  %v2539_v19 = vsub.f32 %v2433_v31, %v2507_v60  ;;  %v2609_v31 = vadd.f32 %v8447_v12, %v8444_v7  ;;  %v2563_v4 = vsub.f32 %v2457_v59, %v2507_v60 }
 0xc38   :  { %v2587_v11 = vsub.f32 %v8437_v20, %v2507_v60 }
 0xc39   :  { %v2528_v10 = vmul.f32 1.442695, %v2515_v28  ;;  %v2552_v51 = vmul.f32 1.442695, %v2539_v19  ;;  %v8471_v28 = vpop.eup %5690  ;;  %v2576_v17 = vmul.f32 1.442695, %v2563_v4 }
 0xc3a   :  { %v2435_v45 = vpop.xlane.xlu1 %2434  ;;  %v8442_v5 = vpop.xlane.xlu2 %2482  ;;  %v2617_v19 = vadd.f32 %v8471_v28, %v2609_v31 }
 0xc3b   :  { %v2492_v33 = vmax.f32 %v2411_v55, %v2435_v45  ;;  %v8458_v9 = vpop.xlane.xlu0 %2474  ;;  %5698 = vpow2.f32 %v2528_v10 }
 0xc3c   :  { %v2504_v59 = vmax.f32 %v2496_v38, %v8458_v9  ;;  %5700 = vpow2.f32 %v2552_v51 }
 0xc3d   :  { %v2500_v23 = vmax.f32 %v2492_v33, %v8439_v36  ;;  %v2610_v33 = vadd.f32 %v8454_v14, %v8449_v63  ;;  %5702 = vpow2.f32 %v2576_v17 }
 0xc3e   :  { %v2536_v20 = vsub.f32 %v8429_v61, %v2504_v59 }
 0xc3f   :  { %v8452_v25 = vmax.f32 %v2500_v23, %v8442_v5  ;;  %v8474_v23 = vpop.eup %5692 }
 0xc40   :  { %v2618_v58 = vadd.f32 %v8474_v23, %v2610_v33  ;;  %v8479_v18 = vpop.eup %5694  ;;  %v2546_v61 = vmul.f32 1.442695, %v2536_v20 }
 0xc41   :  { %v2516_v53 = vsub.f32 %v2411_v55, %v8452_v25  ;;  %v2540_v16 = vsub.f32 %v2435_v45, %v8452_v25  ;;  %v2512_v45 = vsub.f32 %v8431_v48, %v2504_v59  ;;  %v8482_v27 = vpop.eup %5696  ;;  %v2625_v10 = vadd.f32 %v8479_v18, %v2617_v19 }
 0xc42   :  { %v8462_v30 = vpop.xlane.xlu2 %2460  ;;  %v8464_v13 = vpop.xlane.xlu1 %2412  ;;  %v2564_v31 = vsub.f32 %v8439_v36, %v8452_v25  ;;  %v2626_v33 = vadd.f32 %v8482_v27, %v2618_v58  ;;  %v2600_v48 = vmul.f32 1.442695, %v2587_v11  ;;  %v2588_v17 = vsub.f32 %v8442_v5, %v8452_v25 }
 0xc43   :  { %v2530_v42 = vmul.f32 1.442695, %v2516_v53  ;;  %v2554_v55 = vmul.f32 1.442695, %v2540_v16  ;;  %v8487_v38 = vpop.eup %5698  ;;  %v2560_v53 = vsub.f32 %v8435_v32, %v2504_v59  ;;  %v2522_v16 = vmul.f32 1.442695, %v2512_v45 }
 0xc44   :  { %v8491_v60 = vpop.eup %5700  ;;  %v2578_v36 = vmul.f32 1.442695, %v2564_v31  ;;  %v2487_v58 = vmax.f32 %v8427_v15, %v8433_v62  ;;  %v2602_v31 = vmul.f32 1.442695, %v2588_v17 }
 0xc45   :  { %5704 = vpow2.f32 %v2530_v42  ;;  %v2611_v42 = vadd.f32 %v8491_v60, %v8487_v38  ;;  %v8501_v11 = vpop.eup %5702  ;;  %v2570_v32 = vmul.f32 1.442695, %v2560_v53 }
 0xc46   :  { %5706 = vpow2.f32 %v2554_v55  ;;  %v2584_v55 = vsub.f32 %v8458_v9, %v2504_v59 }
 0xc47   :  { %5708 = vrcp.f32 %v2625_v10  ;;  %v2619_v20 = vadd.f32 %v8501_v11, %v2611_v42 }
 0xc48   :  { %5710 = vrcp.f32 %v2626_v33  ;;  %v2594_v9 = vmul.f32 1.442695, %v2584_v55 }
 0xc49   :  { %5712 = vpow2.f32 %v2600_v48 }
 0xc4a   :  { %v2449_v51 = vpop.xlane.xlu2 %2448  ;;  %v2437_v4 = vpop.xlane.xlu1 %2436  ;;  %5714 = vpow2.f32 %v2522_v16 }
 0xc4b   :  { %v2493_v19 = vmax.f32 %v8464_v13, %v2437_v4  ;;  %v8504_v45 = vpop.eup %5704  ;;  %v2495_v10 = vmax.f32 %v2487_v58, %v2449_v51  ;;  %5716 = vpow2.f32 %v2578_v36 }
 0xc4c   :  { %v8507_v25 = vpop.eup %5706  ;;  %5718 = vpow2.f32 %v2546_v61 }
 0xc4d   :  { %v2501_v5 = vmax.f32 %v2493_v19, %v8462_v30  ;;  %v8510_v53 = vpop.eup %5708  ;;  %5720 = vpow2.f32 %v2570_v32  ;;  %v2612_v16 = vadd.f32 %v8507_v25, %v8504_v45 }
 0xc4e   :  { %v8512_v59 = vpop.eup %5710  ;;  %5722 = vpow2.f32 %v2602_v31 }
 0xc4f   :  { %v8518_v58 = vpop.eup %5712  ;;  %5724 = vpow2.f32 %v2594_v9 }
 0xc50   :  { %v2627_v32 = vadd.f32 %v8518_v58, %v2619_v20 }
 0xc52   :  { %v2473_v33 = vpop.xlane.xlu2 %2472  ;;  %v2485_v35 = vpop.xlane.xlu1 %2484 }
 0xc53   :  { %v2503_v6 = vmax.f32 %v2495_v10, %v2473_v33  ;;  %v2509_v48 = vmax.f32 %v2501_v5, %v2485_v35  ;;  %v8521_v10 = vpop.eup %5714 }
 0xc54   :  { %v8524_v24 = vpop.eup %5716 }
 0xc55   :  { %v2511_v19 = vsub.f32 %v8427_v15, %v2503_v6  ;;  %v2535_v36 = vsub.f32 %v8433_v62, %v2503_v6  ;;  %v2559_v17 = vsub.f32 %v2449_v51, %v2503_v6  ;;  %v2517_v42 = vsub.f32 %v8464_v13, %v2509_v48  ;;  %v8527_v51 = vpop.eup %5718 }
 0xc56   :  { %v2541_v61 = vsub.f32 %v2437_v4, %v2509_v48  ;;  %v2583_v26 = vsub.f32 %v2473_v33, %v2503_v6  ;;  %v2565_v62 = vsub.f32 %v8462_v30, %v2509_v48  ;;  %v2620_v31 = vadd.f32 %v8524_v24, %v2612_v16  ;;  %v8530_v4 = vpop.eup %5720 }
 0xc57   :  { %v2520_v55 = vmul.f32 1.442695, %v2511_v19  ;;  %v2544_v5 = vmul.f32 1.442695, %v2535_v36  ;;  %v2568_v15 = vmul.f32 1.442695, %v2559_v17  ;;  %v2589_v20 = vsub.f32 %v2485_v35, %v2509_v48  ;;  %v8532_v33 = vpop.eup %5722 }
 0xc58   :  { %v2532_v13 = vmul.f32 1.442695, %v2517_v42  ;;  %v2556_v1 = vmul.f32 1.442695, %v2541_v61  ;;  %v2592_v6 = vmul.f32 1.442695, %v2583_v26  ;;  %v2608_v9 = vadd.f32 %v8527_v51, %v8521_v10  ;;  %v8537_v16 = vpop.eup %5724 }
 0xc59   :  { %5726 = vpow2.f32 %v2520_v55  ;;  %v2580_v30 = vmul.f32 1.442695, %v2565_v62  ;;  %v2628_v36 = vadd.f32 %v8532_v33, %v2620_v31  ;;  %v2604_v17 = vmul.f32 1.442695, %v2589_v20 }
 0xc5a   :  { %5728 = vpow2.f32 %v2544_v5  ;;  %v2423_v19 = vpop.xlane.xlu1 %2422  ;;  %v2616_v26 = vadd.f32 %v8530_v4, %v2608_v9  ;;  %v2642_v31 = vmul.f32 %v8512_v59, %v8449_v63  ;;  %v2658_v9 = vmul.f32 %v8512_v59, %v8454_v14 }
 0xc5b   :  { %5730 = vrcp.f32 %v2627_v32  ;;  %v2486_v32 = vmax.f32 %v8425_v37, %v2423_v19  ;;  %v2657_v63 = vmul.f32 %v8510_v53, %v8447_v12 }
 0xc5c   :  { %5732 = vpow2.f32 %v2568_v15  ;;  %v2624_v20 = vadd.f32 %v8537_v16, %v2616_v26  ;;  %v2650_v14 = vsel %vm219_vm3, %v2642_v31, 0.0 }
 0xc5d   :  { %5734 = vpow2.f32 %v2532_v13 }
 0xc5e   :  { %5736 = vpow2.f32 %v2556_v1 }
 0xc5f   :  { %v8539_v42 = vpop.eup %5726  ;;  %5738 = vpow2.f32 %v2592_v6  ;;  %v2471_v6 = vpop.xlane.xlu0 %2470 }
 0xc60   :  { %v8541_v35 = vpop.eup %5728  ;;  %5740 = vpow2.f32 %v2580_v30 }
 0xc61   :  { %v8544_v48 = vpop.eup %5730  ;;  %5742 = vrcp.f32 %v2628_v36  ;;  %v2607_v61 = vadd.f32 %v8541_v35, %v8539_v42 }
 0xc62   :  { %v8549_v55 = vpop.eup %5732  ;;  %5744 = vpow2.f32 %v2604_v17  ;;  %v2447_v1 = vpop.xlane.xlu1 %2446  ;;  %v2659_v31 = vmul.f32 %v8544_v48, %v8491_v60 }
 0xc63   :  { %v8551_v5 = vpop.eup %5734  ;;  %v2615_v15 = vadd.f32 %v8549_v55, %v2607_v61  ;;  %v2494_v62 = vmax.f32 %v2486_v32, %v2447_v1  ;;  %v2641_v61 = vmul.f32 %v8510_v53, %v8444_v7  ;;  %5746 = vrcp.f32 %v2624_v20 }
 0xc64   :  { %v5737_v13 = vpop.eup %5736  ;;  %v2666_v7 = vsel %vm6358_vm9, %v2658_v9, 0.0 }
 0xc65   :  { %v8559_v30 = vpop.eup %5738  ;;  %v2613_v36 = vadd.f32 %v5737_v13, %v8551_v5  ;;  %v2502_v17 = vmax.f32 %v2494_v62, %v2471_v6  ;;  %v2674_v20 = vadd.f32 %v2666_v7, %v2650_v14 }
 0xc66   :  { %v5741_v3 = vpop.eup %5740  ;;  %v2623_v29 = vadd.f32 %v8559_v30, %v2615_v15  ;;  %v2643_v15 = vmul.f32 %v8544_v48, %v8487_v38  ;;  %v2682_v38 = vmul.f32 %v8512_v59, %v8474_v23 }
 0xc67   :  { %v5743_v32 = vpop.eup %5742  ;;  %v2621_v26 = vadd.f32 %v5741_v3, %v2613_v36  ;;  %v2510_v44 = vsub.f32 %v8425_v37, %v2502_v17  ;;  %v2534_v40 = vsub.f32 %v2423_v19, %v2502_v17  ;;  %v2558_v62 = vsub.f32 %v2447_v1, %v2502_v17 }
 0xc68   :  { %v5745_v49 = vpop.eup %5744  ;;  %v2582_v39 = vsub.f32 %v2471_v6, %v2502_v17  ;;  %5748 = vrcp.f32 %v2623_v29  ;;  %v2644_v37 = vmul.f32 %v5743_v32, %v8504_v45  ;;  %v2660_v19 = vmul.f32 %v5743_v32, %v8507_v25 }
 0xc69   :  { %v2629_v47 = vadd.f32 %v5745_v49, %v2621_v26  ;;  %v2518_v41 = vmul.f32 1.442695, %v2510_v44  ;;  %v2542_v12 = vmul.f32 1.442695, %v2534_v40  ;;  %v2566_v1 = vmul.f32 1.442695, %v2558_v62  ;;  %v8588_v60 = vpop.eup %5746 }
 0xc6a   :  { %v8582_v44 = vmul.f32 %v8510_v53, %v8471_v28  ;;  %v2590_v40 = vmul.f32 1.442695, %v2582_v39  ;;  %v2649_v29 = vsel %vm219_vm3, %v2641_v61, 0.0  ;;  %v2665_v45 = vsel %vm6358_vm9, %v2657_v63, 0.0 }
 0xc6b   :  { %5750 = vrcp.f32 %v2629_v47  ;;  %v2652_v47 = vsel %vm219_vm3, %v2644_v37, 0.0  ;;  %v2651_v28 = vsel %vm219_vm3, %v2643_v15, 0.0  ;;  %v2667_v39 = vsel %vm6358_vm9, %v2659_v31, 0.0 }
 0xc6c   :  { %5752 = vpow2.f32 %v2518_v41  ;;  %v2668_v41 = vsel %vm6358_vm9, %v2660_v19, 0.0  ;;  %v2684_v23 = vmul.f32 %v5743_v32, %v8524_v24  ;;  %v2690_v25 = vsel %vm6366_vm10, %v2682_v38, 0.0 }
 0xc6d   :  { %5754 = vpow2.f32 %v2542_v12  ;;  %v2705_v6 = vmul.f32 %v8510_v53, %v8479_v18  ;;  %v2683_v36 = vmul.f32 %v8544_v48, %v8501_v11  ;;  %v2698_v17 = vadd.f32 %v2690_v25, %v2674_v20 }
 0xc6e   :  { %5756 = vpow2.f32 %v2566_v1  ;;  %v8603_v9 = vpop.eup %5748  ;;  %v2706_v61 = vmul.f32 %v8512_v59, %v8482_v27  ;;  %v2673_v63 = vadd.f32 %v2665_v45, %v2649_v29  ;;  %v2676_v14 = vadd.f32 %v2668_v41, %v2652_v47 }
 0xc6f   :  { %5758 = vpow2.f32 %v2590_v40  ;;  %v2675_v24 = vadd.f32 %v2667_v39, %v2651_v28  ;;  %v2640_v62 = vmul.f32 %v8588_v60, %v8521_v10  ;;  %v2656_v11 = vmul.f32 %v8588_v60, %v8527_v51 }
 0xc70   :  { %v2692_v27 = vsel %vm6366_vm10, %v2684_v23, 0.0  ;;  %v2708_v59 = vmul.f32 %v5743_v32, %v8532_v33  ;;  %v2639_v37 = vmul.f32 %v8603_v9, %v8539_v42  ;;  %v2655_v10 = vmul.f32 %v8603_v9, %v8541_v35 }
 0xc71   :  { %v5751_v26 = vpop.eup %5750  ;;  %v2700_v1 = vadd.f32 %v2692_v27, %v2676_v14  ;;  %v2691_v33 = vsel %vm6366_vm10, %v2683_v36, 0.0  ;;  %v2707_v42 = vmul.f32 %v8544_v48, %v8518_v58  ;;  %v2648_v35 = vsel %vm219_vm3, %v2640_v62, 0.0 }
 0xc72   :  { %v5753_v15 = vpop.eup %5752  ;;  %v2645_v18 = vmul.f32 %v5751_v26, %v8551_v5  ;;  %v2661_v53 = vmul.f32 %v5751_v26, %v5737_v13  ;;  %v2685_v7 = vmul.f32 %v5751_v26, %v5741_v3  ;;  %v2709_v19 = vmul.f32 %v5751_v26, %v5745_v49 }
 0xc73   :  { %v5755_v12 = vpop.eup %5754  ;;  %v2664_v38 = vsel %vm6358_vm9, %v2656_v11, 0.0  ;;  %v2716_v29 = vsel %vm227_vm11, %v2708_v59, 0.0  ;;  %v2699_v45 = vadd.f32 %v2691_v33, %v2675_v24  ;;  %v2680_v47 = vmul.f32 %v8588_v60, %v8530_v4 }
 0xc74   :  { %v2606_v31 = vadd.f32 %v5755_v12, %v5753_v15  ;;  %v2653_v3 = vsel %vm219_vm3, %v2645_v18, 0.0  ;;  %v2669_v51 = vsel %vm6358_vm9, %v2661_v53, 0.0  ;;  %v5757_v5 = vpop.eup %5756  ;;  %v2693_v49 = vsel %vm6366_vm10, %v2685_v7, 0.0 }
 0xc75   :  { %v2677_v13 = vadd.f32 %v2669_v51, %v2653_v3  ;;  %v5759_v20 = vpop.eup %5758  ;;  %v2717_v48 = vsel %vm227_vm11, %v2709_v19, 0.0  ;;  %v2647_v41 = vsel %vm219_vm3, %v2639_v37, 0.0  ;;  %v2663_v28 = vsel %vm6358_vm9, %v2655_v10, 0.0 }
 0xc76   :  { %v2614_v32 = vadd.f32 %v5757_v5, %v2606_v31  ;;  %v2724_v23 = vadd.f32 %v2716_v29, %v2700_v1  ;;  %v2689_v25 = vsel %vm6366_vm10, %v8582_v44, 0.0  ;;  %v2672_v36 = vadd.f32 %v2664_v38, %v2648_v35  ;;  %v10488_v29 = vld [vmem:[#allocation21_spill] sm:$0xff] }
 0xc77   :  { %v2701_v40 = vadd.f32 %v2693_v49, %v2677_v13  ;;  %v2715_v4 = vsel %vm227_vm11, %v2707_v42, 0.0  ;;  %v2697_v26 = vadd.f32 %v2689_v25, %v2673_v63  ;;  %v2679_v14 = vmul.f32 %v8603_v9, %v8549_v55 }
 0xc78   :  { %v2622_v58 = vadd.f32 %v5759_v20, %v2614_v32  ;;  %v2723_v62 = vadd.f32 %v2715_v4, %v2699_v45  ;;  %v2714_v18 = vsel %vm227_vm11, %v2706_v61, 0.0  ;;  %v2671_v53 = vadd.f32 %v2663_v28, %v2647_v41  ;;  %v10489_v28 = vld [vmem:[#allocation20_spill] sm:$0xff] }
 0xc79   :  { %v2725_v39 = vadd.f32 %v2717_v48, %v2701_v40  ;;  %v2722_v7 = vadd.f32 %v2714_v18, %v2698_v17  ;;  %v2688_v44 = vsel %vm6366_vm10, %v2680_v47, 0.0  ;;  %v2704_v11 = vmul.f32 %v8588_v60, %v8537_v16 }
 0xc7a   :  { %5760 = vrcp.f32 %v2622_v58  ;;  %v2732_v63 = vmul.f32 %v2724_v23, %v8384_v21  ;;  %v2713_v55 = vsel %vm227_vm11, %v2705_v6, 0.0  ;;  %v2696_v27 = vadd.f32 %v2688_v44, %v2672_v36 }
 0xc7b   :  { %v2733_v24 = vmul.f32 %v2725_v39, %v8397_v22  ;;  %v2721_v59 = vadd.f32 %v2713_v55, %v2697_v26  ;;  %v2687_v37 = vsel %vm6366_vm10, %v2679_v14, 0.0  ;;  %v2703_v17 = vmul.f32 %v8603_v9, %v8559_v30 }
 0xc7c   :  { %v2731_v61 = vmul.f32 %v2723_v62, %v8369_v46  ;;  %v2695_v10 = vadd.f32 %v2687_v37, %v2671_v53  ;;  %v2730_v16 = vmul.f32 %v2722_v7, %v8360_v8  ;;  %v2712_v60 = vsel %vm227_vm11, %v2704_v11, 0.0 }
 0xc7d   :  { %2742 = vmatpush.msra.mxu0 %v2733_v24  ;;  %v2720_v6 = vadd.f32 %v2712_v60, %v2696_v27  ;;  %v2729_v13 = vmul.f32 %v2721_v59, %v8351_v57  ;;  %v2711_v30 = vsel %vm227_vm11, %v2703_v17, 0.0 }
 0xc7e   :  { %v2719_v9 = vadd.f32 %v2711_v30, %v2695_v10 }
 0xc7f   :  { %2743 = vmatpush.msra.mxu0 %v2732_v63 }
 0xc80   :  { %v5761_v19 = vpop.eup %5760  ;;  %v2727_v49 = vmul.f32 %v2719_v9, %v8333_v56 }
 0xc81   :  { %2744 = vmatpush.msra.mxu0 %v2731_v61  ;;  %v2638_v31 = vmul.f32 %v5761_v19, %v5753_v15  ;;  %v2654_v3 = vmul.f32 %v5761_v19, %v5755_v12  ;;  %v2678_v51 = vmul.f32 %v5761_v19, %v5757_v5  ;;  %v2702_v42 = vmul.f32 %v5761_v19, %v5759_v20 }
 0xc82   :  { %v2728_v15 = vmul.f32 %v2720_v6, %v8344_v52 }
 0xc83   :  { %2745 = vmatpush.msra.mxu0 %v2730_v16  ;;  %v2646_v1 = vsel %vm219_vm3, %v2638_v31, 0.0  ;;  %v2662_v33 = vsel %vm6358_vm9, %v2654_v3, 0.0  ;;  %v2686_v12 = vsel %vm6366_vm10, %v2678_v51, 0.0  ;;  %v2710_v35 = vsel %vm227_vm11, %v2702_v42, 0.0 }
 0xc84   :  { %v2670_v32 = vadd.f32 %v2662_v33, %v2646_v1 }
 0xc85   :  { %2746 = vmatpush.msra.mxu0 %v2729_v13 }
 0xc86   :  { %v2694_v5 = vadd.f32 %v2686_v12, %v2670_v32 }
 0xc87   :  { %2747 = vmatpush.msra.mxu0 %v2728_v15 }
 0xc88   :  { %v2718_v38 = vadd.f32 %v2710_v35, %v2694_v5 }
 0xc89   :  { %2748 = vmatpush.msra.mxu0 %v2727_v49 }
 0xc8a   :  { %v2726_v40 = vmul.f32 %v2718_v38, %v8325_v34 }
 0xc8c   :  { %2749 = vmatpush.msra.mxu0 %v2726_v40 }
 0xc8d   :  { %5231 = vmatmul.msk.f32.vlgmr.msra.gmra.mxu0 %vm10486_vm6, %v6990_v43 }
 0xc95   :  { %5232 = vmatmul.msk.f32.gmra.mxu0 %vm10487_vm4, %v6994_v50 }
 0xd0a   :  { %v2751_v20 = vpop.f32.mrf.mxu0 }
 0xd0b   :  { %v8689_v45 = vadd.f32 %v2751_v20, %v10488_v29 }
 0xd0d   :  { %v2757_v47 = vmul.f32 %v8689_v45, %v8689_v45 }
 0xd0f   :  { %v2789_v58 = vsel %vm6358_vm9, %v2757_v47, 0.0  ;;  %v2759_v48 = vsel %vm219_vm3, %v2757_v47, 0.0  ;;  %v2821_v4 = vsel %vm6366_vm10, %v2757_v47, 0.0  ;;  %v2853_v24 = vsel %vm227_vm11, %v2757_v47, 0.0 }
 0xd10   :  { %2791 = vadd.xlane.f32.xlu1 %v2789_v58  ;;  %2761 = vadd.xlane.f32.xlu0 %v2759_v48 }
 0xd12   :  { %v2754_v41 = vpop.f32.mrf.mxu0 }
 0xd13   :  { %v8698_v39 = vadd.f32 %v2754_v41, %v10489_v28 }
 0xd15   :  { %v2758_v23 = vmul.f32 %v8698_v39, %v8698_v39 }
 0xd17   :  { %v2790_v25 = vsel %vm6358_vm9, %v2758_v23, 0.0  ;;  %v2760_v36 = vsel %vm219_vm3, %v2758_v23, 0.0  ;;  %v2822_v26 = vsel %vm6366_vm10, %v2758_v23, 0.0  ;;  %v2854_v14 = vsel %vm227_vm11, %v2758_v23, 0.0 }
 0xd18   :  { %2793 = vadd.xlane.f32.xlu2 %v2790_v25  ;;  %2763 = vadd.xlane.f32.xlu1 %v2760_v36 }
 0xd19   :  { %2823 = vadd.xlane.f32.xlu0 %v2821_v4 }
 0xd20   :  { %2825 = vadd.xlane.f32.xlu2 %v2822_v26  ;;  %2857 = vadd.xlane.f32.xlu1 %v2854_v14 }
 0xd28   :  { %2855 = vadd.xlane.f32.xlu2 %v2853_v24 }
 0xd83   :  { %v2792_v62 = vpop.xlane.xlu1 %2791  ;;  %v2762_v18 = vpop.xlane.xlu0 %2761 }
 0xd84   :  { %v8714_v53 = vmax.f32 %v2792_v62, 1e-24  ;;  %v8716_v7 = vmax.f32 %v2762_v18, 1e-24  ;;  %v10500_v62 = vld [vmem:[#allocation3_spill] sm:$0xff] }
 0xd86   :  { %5762 = vrsqrt.f32 %v8714_v53  ;;  %vm2803_vm0 = vweird.f32 %v8714_v53  ;;  %vm2773_vm6 = vweird.f32 %v8716_v7 }
 0xd87   :  { %5764 = vrsqrt.f32 %v8716_v7 }
 0xd8b   :  { %v2794_v44 = vpop.xlane.xlu2 %2793  ;;  %v2764_v11 = vpop.xlane.xlu1 %2763 }
 0xd8c   :  { %v2796_v63 = vmax.f32 %v2794_v44, 1e-24  ;;  %v2766_v55 = vmax.f32 %v2764_v11, 1e-24  ;;  %v2824_v27 = vpop.xlane.xlu0 %2823  ;;  %v8722_v37 = vpop.eup %5762 }
 0xd8d   :  { %v8720_v59 = vmax.f32 %v2824_v27, 1e-24  ;;  %v8724_v17 = vpop.eup %5764  ;;  %v2798_v61 = vmul.f32 %v8722_v37, %v8714_v53  ;;  %vm2804_vm13 = vweird.f32 %v8722_v37 }
 0xd8e   :  { %5766 = vrsqrt.f32 %v2796_v63  ;;  %v2768_v10 = vmul.f32 %v8724_v17, %v8716_v7  ;;  %vm2813_vm8 = vweird.f32 %v2796_v63  ;;  %vm2783_vm12 = vweird.f32 %v2766_v55 }
 0xd8f   :  { %5768 = vrsqrt.f32 %v2766_v55  ;;  %v2799_v30 = vmul.f32 %v8722_v37, %v2798_v61  ;;  %vm2774_vm7 = vweird.f32 %v8724_v17 }
 0xd90   :  { %5770 = vrsqrt.f32 %v8720_v59  ;;  %v2769_v1 = vmul.f32 %v8724_v17, %v2768_v10 }
 0xd91   :  { %v2800_v5 = vmul.f32 0.5, %v2799_v30 }
 0xd92   :  { %v2770_v35 = vmul.f32 0.5, %v2769_v1 }
 0xd93   :  { %v2826_v19 = vpop.xlane.xlu2 %2825  ;;  %v2858_v16 = vpop.xlane.xlu1 %2857  ;;  %v2801_v25 = vsub.f32 1.5, %v2800_v5 }
 0xd94   :  { %v5767_v60 = vpop.eup %5766  ;;  %v8731_v6 = vmax.f32 %v2826_v19, 1e-24  ;;  %v8733_v51 = vmax.f32 %v2858_v16, 1e-24  ;;  %v2771_v26 = vsub.f32 1.5, %v2770_v35 }
 0xd95   :  { %v5769_v31 = vpop.eup %5768  ;;  %v2808_v3 = vmul.f32 %v5767_v60, %v2796_v63  ;;  %vm2814_vm1 = vweird.f32 %v5767_v60  ;;  %v2802_v61 = vmul.f32 %v8722_v37, %v2801_v25 }
 0xd96   :  { %v8735_v13 = vpop.eup %5770  ;;  %v2778_v9 = vmul.f32 %v5769_v31, %v2766_v55  ;;  %5772 = vrsqrt.f32 %v8731_v6  ;;  %vm2784_vm2 = vweird.f32 %v5769_v31  ;;  %vm8748_vm5 = vmor %vm2813_vm8, %vm2814_vm1  ;;  %v2772_v10 = vmul.f32 %v8724_v17, %v2771_v26 }
 0xd97   :  { %v2809_v33 = vmul.f32 %v5767_v60, %v2808_v3  ;;  %v2830_v42 = vmul.f32 %v8735_v13, %v8720_v59  ;;  %5774 = vrsqrt.f32 %v8733_v51  ;;  %vm8753_vm15 = vmor %vm2783_vm12, %vm2784_vm2  ;;  %vm2836_vm2 = vweird.f32 %v8735_v13 }
 0xd98   :  { %v2779_v32 = vmul.f32 %v5769_v31, %v2778_v9  ;;  %vm8769_vm1 = vmor %vm2803_vm0, %vm2804_vm13  ;;  %vm2835_vm12 = vweird.f32 %v8720_v59 }
 0xd99   :  { %v2810_v15 = vmul.f32 0.5, %v2809_v33  ;;  %v2831_v12 = vmul.f32 %v8735_v13, %v2830_v42  ;;  %vm8778_vm8 = vmor %vm2773_vm6, %vm2774_vm7  ;;  %v2806_v33 = vsel %vm8769_vm1, %v8722_v37, %v2802_v61  ;;  %vm2877_vm7 = vweird.f32 %v8733_v51 }
 0xd9a   :  { %v2780_v49 = vmul.f32 0.5, %v2779_v32  ;;  %v2776_v32 = vsel %vm8778_vm8, %v8724_v17, %v2772_v10  ;;  %vm8794_vm0 = vmor %vm2835_vm12, %vm2836_vm2  ;;  %vm10509_vm8 = vcmask 523264  }
 0xd9b   :  { %v2811_v38 = vsub.f32 1.5, %v2810_v15  ;;  %v2856_v40 = vpop.xlane.xlu2 %2855  ;;  %v2832_v41 = vmul.f32 0.5, %v2831_v12 }
 0xd9c   :  { %v5773_v20 = vpop.eup %5772  ;;  %v2781_v47 = vsub.f32 1.5, %v2780_v49  ;;  %v8744_v58 = vmax.f32 %v2856_v40, 1e-24  ;;  %v2787_v40 = vsel %vm219_vm3, %v2776_v32, 0.0 }
 0xd9d   :  { %v2812_v48 = vmul.f32 %v5767_v60, %v2811_v38  ;;  %v2840_v23 = vmul.f32 %v5773_v20, %v8731_v6  ;;  %v5775_v4 = vpop.eup %5774  ;;  %v2833_v63 = vsub.f32 1.5, %v2832_v41  ;;  %vm2846_vm4 = vweird.f32 %v5773_v20 }
 0xd9e   :  { %v2782_v36 = vmul.f32 %v5769_v31, %v2781_v47  ;;  %5776 = vrsqrt.f32 %v8744_v58  ;;  %v2872_v18 = vmul.f32 %v5775_v4, %v8733_v51  ;;  %v2817_v38 = vsel %vm6358_vm9, %v2806_v33, 0.0 }
 0xd9f   :  { %v2841_v24 = vmul.f32 %v5773_v20, %v2840_v23  ;;  %v2816_v44 = vsel %vm8748_vm5, %v5767_v60, %v2812_v48  ;;  %v2834_v30 = vmul.f32 %v8735_v13, %v2833_v63  ;;  %vm2845_vm5 = vweird.f32 %v8731_v6  ;;  %v10507_v63 = vld [vmem:[#allocation17_spill] sm:$0xff] }
 0xda0   :  { %v2786_v11 = vsel %vm8753_vm15, %v5769_v31, %v2782_v36  ;;  %v2873_v55 = vmul.f32 %v5775_v4, %v2872_v18  ;;  %v2818_v31 = vsel %vm6358_vm9, %v2816_v44, 0.0  ;;  %vm2847_vm13 = vmor %vm2845_vm5, %vm2846_vm4  ;;  %vm2878_vm15 = vweird.f32 %v5775_v4  ;;  %v10501_v18 = vld [vmem:[#allocation5_spill] sm:$0xff]  ;;  %v10504_v44 = vld [vmem:[#allocation11_spill] sm:$0xff] }
 0xda1   :  { %v2842_v27 = vmul.f32 0.5, %v2841_v24  ;;  %v2788_v53 = vsel %vm219_vm3, %v2786_v11, 0.0  ;;  %v2838_v49 = vsel %vm8794_vm0, %v8735_v13, %v2834_v30  ;;  %vm2879_vm6 = vmor %vm2877_vm7, %vm2878_vm15  ;;  %vm2867_vm1 = vweird.f32 %v8744_v58  ;;  %v10505_v11 = vld [vmem:[#allocation13_spill] sm:$0xff] }
 0xda2   :  { %v2874_v3 = vmul.f32 0.5, %v2873_v55  ;;  %v2820_v15 = vadd.f32 %v2818_v31, %v2788_v53  ;;  %v2849_v41 = vsel %vm6366_vm10, %v2838_v49, 0.0  ;;  %v2819_v23 = vadd.f32 %v2817_v38, %v2787_v40  ;;  %vm10510_vm5 = vmmov %vm10509_vm8 }
 0xda3   :  { %v2843_v19 = vsub.f32 1.5, %v2842_v27 }
 0xda4   :  { %v5777_v16 = vpop.eup %5776  ;;  %v2875_v42 = vsub.f32 1.5, %v2874_v3  ;;  %v2851_v36 = vadd.f32 %v2849_v41, %v2819_v23 }
 0xda5   :  { %v2844_v9 = vmul.f32 %v5773_v20, %v2843_v19  ;;  %v2862_v1 = vmul.f32 %v5777_v16, %v8744_v58  ;;  %vm2868_vm4 = vweird.f32 %v5777_v16  ;;  %v10502_v58 = vld [vmem:[#allocation7_spill] sm:$0xff] }
 0xda6   :  { %v2876_v59 = vmul.f32 %v5775_v4, %v2875_v42  ;;  %vm2869_vm2 = vmor %vm2867_vm1, %vm2868_vm4 }
 0xda7   :  { %v2848_v12 = vsel %vm2847_vm13, %v5773_v20, %v2844_v9  ;;  %v2863_v5 = vmul.f32 %v5777_v16, %v2862_v1 }
 0xda8   :  { %v2850_v37 = vsel %vm6366_vm10, %v2848_v12, 0.0  ;;  %v2880_v20 = vsel %vm2879_vm6, %v5775_v4, %v2876_v59 }
 0xda9   :  { %v2864_v17 = vmul.f32 0.5, %v2863_v5  ;;  %v2852_v35 = vadd.f32 %v2850_v37, %v2820_v15  ;;  %v2882_v47 = vsel %vm227_vm11, %v2880_v20, 0.0 }
 0xdab   :  { %v2865_v48 = vsub.f32 1.5, %v2864_v17  ;;  %v2884_v51 = vadd.f32 %v2882_v47, %v2852_v35 }
 0xdad   :  { %v2866_v13 = vmul.f32 %v5777_v16, %v2865_v48  ;;  %v2886_v25 = vmul.f32 %v2884_v51, %v8698_v39  ;;  %v10503_v39 = vld [vmem:[#allocation9_spill] sm:$0xff] }
 0xdaf   :  { %v2870_v26 = vsel %vm2869_vm2, %v5777_v16, %v2866_v13  ;;  %2901 = vmatpush.msrb.mxu0 %v2886_v25 }
 0xdb0   :  { %v2881_v4 = vsel %vm227_vm11, %v2870_v26, 0.0 }
 0xdb1   :  { %v2883_v14 = vadd.f32 %v2881_v4, %v2851_v36 }
 0xdb3   :  { %v2885_v24 = vmul.f32 %v2883_v14, %v8689_v45  ;;  %v10506_v45 = vld [vmem:[#allocation15_spill] sm:$0xff] }
 0xdb5   :  { %2902 = vmatpush.msrb.mxu0 %v2885_v24 }
 0xdb6   :  { %5233 = vmatmul.msk.f32.vlgmr.msrb.gmra.mxu0 %vm368_vm14, %v10500_v62 }
 0xdbe   :  { %5234 = vmatmul.msk.f32.gmra.mxu0 %vm368_vm14, %v10501_v18 }
 0xdc6   :  { %5235 = vmatmul.msk.f32.gmra.mxu0 %vm368_vm14, %v10502_v58 }
 0xdce   :  { %5236 = vmatmul.msk.f32.gmra.mxu0 %vm368_vm14, %v10503_v39 }
 0xdd6   :  { %5237 = vmatmul.msk.f32.gmra.mxu0 %vm368_vm14, %v10504_v44 }
 0xdde   :  { %5238 = vmatmul.msk.f32.gmra.mxu0 %vm368_vm14, %v10505_v11 }
 0xde6   :  { %5239 = vmatmul.msk.f32.gmra.mxu0 %vm368_vm14, %v10506_v45 }
 0xdee   :  { %5240 = vmatmul.msk.f32.gmra.mxu0 %vm368_vm14, %v10507_v63 }
 0xe33   :  { %v2904_v27 = vpop.f32.mrf.mxu0 }
 0xe34   :  { %v8834_v61 = vmul.f32 %v2904_v27, %v8325_v34 }
 0xe36   :  { %v2936_v55 = vsel %vm219_vm3, %v8834_v61, 0.0 }
 0xe37   :  { %2944 = vadd.xlane.f32.xlu1 %v2936_v55  ;;  %v2960_v55 = vsel %vm6358_vm9, %v8834_v61, 0.0 }
 0xe3b   :  { %v2907_v10 = vpop.f32.mrf.mxu0 }
 0xe3c   :  { %v8840_v19 = vmul.f32 %v2907_v10, %v8333_v56 }
 0xe3e   :  { %v2961_v16 = vsel %vm6358_vm9, %v8840_v19, 0.0  ;;  %v2937_v60 = vsel %vm219_vm3, %v8840_v19, 0.0  ;;  %v2985_v10 = vsel %vm6366_vm10, %v8840_v19, 0.0 }
 0xe3f   :  { %2970 = vadd.xlane.f32.xlu1 %v2961_v16  ;;  %2946 = vadd.xlane.f32.xlu0 %v2937_v60  ;;  %v2984_v60 = vsel %vm6366_vm10, %v8834_v61, 0.0 }
 0xe43   :  { %v2910_v31 = vpop.f32.mrf.mxu0 }
 0xe44   :  { %v2930_v53 = vmul.f32 %v2910_v31, %v8344_v52  ;;  %v3009_v31 = vsel %vm227_vm11, %v8840_v19, 0.0 }
 0xe46   :  { %v2962_v3 = vsel %vm6358_vm9, %v2930_v53, 0.0  ;;  %v2938_v7 = vsel %vm219_vm3, %v2930_v53, 0.0  ;;  %v2986_v1 = vsel %vm6366_vm10, %v2930_v53, 0.0  ;;  %v3010_v16 = vsel %vm227_vm11, %v2930_v53, 0.0 }
 0xe47   :  { %2972 = vadd.xlane.f32.xlu0 %v2962_v3  ;;  %2948 = vadd.xlane.f32.xlu2 %v2938_v7  ;;  %v3008_v3 = vsel %vm227_vm11, %v8834_v61, 0.0 }
 0xe4b   :  { %v2913_v30 = vpop.f32.mrf.mxu0 }
 0xe4c   :  { %v2931_v9 = vmul.f32 %v2913_v30, %v8351_v57 }
 0xe4e   :  { %v3011_v33 = vsel %vm227_vm11, %v2931_v9, 0.0  ;;  %v2939_v42 = vsel %vm219_vm3, %v2931_v9, 0.0  ;;  %v2963_v12 = vsel %vm6358_vm9, %v2931_v9, 0.0  ;;  %v2987_v6 = vsel %vm6366_vm10, %v2931_v9, 0.0 }
 0xe4f   :  { %2996 = vadd.xlane.f32.xlu2 %v2986_v1  ;;  %3022 = vadd.xlane.f32.xlu0 %v3011_v33 }
 0xe50   :  { %2950 = vadd.xlane.f32.xlu1 %v2939_v42 }
 0xe53   :  { %v2916_v32 = vpop.f32.mrf.mxu0 }
 0xe54   :  { %v2932_v15 = vmul.f32 %v2916_v32, %v8360_v8 }
 0xe56   :  { %v2940_v5 = vsel %vm219_vm3, %v2932_v15, 0.0  ;;  %v3012_v59 = vsel %vm227_vm11, %v2932_v15, 0.0  ;;  %v2988_v49 = vsel %vm6366_vm10, %v2932_v15, 0.0  ;;  %v2964_v17 = vsel %vm6358_vm9, %v2932_v15, 0.0 }
 0xe57   :  { %2974 = vadd.xlane.f32.xlu2 %v2963_v12  ;;  %2952 = vadd.xlane.f32.xlu0 %v2940_v5 }
 0xe58   :  { %2998 = vadd.xlane.f32.xlu1 %v2987_v6 }
 0xe5b   :  { %v2919_v37 = vpop.f32.mrf.mxu0 }
 0xe5c   :  { %v2933_v35 = vmul.f32 %v2919_v37, %v8369_v46 }
 0xe5e   :  { %v2965_v40 = vsel %vm6358_vm9, %v2933_v35, 0.0  ;;  %v2941_v20 = vsel %vm219_vm3, %v2933_v35, 0.0  ;;  %v3013_v47 = vsel %vm227_vm11, %v2933_v35, 0.0  ;;  %v2989_v51 = vsel %vm6366_vm10, %v2933_v35, 0.0 }
 0xe5f   :  { %3024 = vadd.xlane.f32.xlu2 %v3012_v59  ;;  %3000 = vadd.xlane.f32.xlu0 %v2988_v49 }
 0xe60   :  { %2976 = vadd.xlane.f32.xlu1 %v2964_v17 }
 0xe63   :  { %v2922_v38 = vpop.f32.mrf.mxu0 }
 0xe64   :  { %v2934_v48 = vmul.f32 %v2922_v38, %v8384_v21 }
 0xe66   :  { %v2966_v41 = vsel %vm6358_vm9, %v2934_v48, 0.0  ;;  %v2990_v13 = vsel %vm6366_vm10, %v2934_v48, 0.0  ;;  %v3014_v36 = vsel %vm227_vm11, %v2934_v48, 0.0  ;;  %v2942_v26 = vsel %vm219_vm3, %v2934_v48, 0.0 }
 0xe67   :  { %2978 = vadd.xlane.f32.xlu0 %v2965_v40  ;;  %2954 = vadd.xlane.f32.xlu2 %v2941_v20 }
 0xe68   :  { %3026 = vadd.xlane.f32.xlu1 %v3013_v47 }
 0xe6b   :  { %v2925_v23 = vpop.f32.mrf.mxu0 }
 0xe6c   :  { %v2935_v25 = vmul.f32 %v2925_v23, %v8397_v22 }
 0xe6e   :  { %v2967_v4 = vsel %vm6358_vm9, %v2935_v25, 0.0  ;;  %v3015_v14 = vsel %vm227_vm11, %v2935_v25, 0.0  ;;  %v2943_v24 = vsel %vm219_vm3, %v2935_v25, 0.0  ;;  %v2991_v27 = vsel %vm6366_vm10, %v2935_v25, 0.0 }
 0xe6f   :  { %3002 = vadd.xlane.f32.xlu2 %v2989_v51  ;;  %2980 = vadd.xlane.f32.xlu0 %v2966_v41 }
 0xe70   :  { %3004 = vadd.xlane.f32.xlu1 %v2990_v13 }
 0xe77   :  { %3028 = vadd.xlane.f32.xlu0 %v3014_v36  ;;  %2956 = vadd.xlane.f32.xlu2 %v2942_v26 }
 0xe78   :  { %2982 = vadd.xlane.f32.xlu1 %v2967_v4 }
 0xe7f   :  { %3030 = vadd.xlane.f32.xlu2 %v3015_v14  ;;  %2958 = vadd.xlane.f32.xlu0 %v2943_v24 }
 0xe80   :  { %3006 = vadd.xlane.f32.xlu1 %v2991_v27 }
 0xe87   :  { %2968 = vadd.xlane.f32.xlu2 %v2960_v55  ;;  %2994 = vadd.xlane.f32.xlu0 %v2985_v10 }
 0xe88   :  { %3020 = vadd.xlane.f32.xlu1 %v3010_v16 }
 0xe8f   :  { %2992 = vadd.xlane.f32.xlu2 %v2984_v60  ;;  %3018 = vadd.xlane.f32.xlu0 %v3009_v31 }
 0xe90   :  { %3016 = vadd.xlane.f32.xlu1 %v3008_v3 }
 0xeaa   :  { %v8917_v7 = vpop.xlane.xlu1 %2944 }
 0xeb2   :  { %v8919_v53 = vpop.xlane.xlu0 %2946  ;;  %v8925_v1 = vpop.xlane.xlu1 %2970 }
 0xeba   :  { %v8921_v30 = vpop.xlane.xlu0 %2972  ;;  %v8923_v9 = vpop.xlane.xlu2 %2948 }
 0xec2   :  { %v8927_v33 = vpop.xlane.xlu2 %2996  ;;  %v3023_v19 = vpop.xlane.xlu0 %3022 }
 0xec3   :  { %v2951_v42 = vpop.xlane.xlu1 %2950 }
 0xeca   :  { %v2975_v32 = vpop.xlane.xlu2 %2974  ;;  %v2953_v15 = vpop.xlane.xlu0 %2952 }
 0xecb   :  { %v3035_v12 = vmax.f32 %v2951_v42, %v2975_v32  ;;  %v2999_v61 = vpop.xlane.xlu1 %2998 }
 0xecd   :  { %v3043_v5 = vmax.f32 %v3035_v12, %v2999_v61 }
 0xecf   :  { %v3051_v6 = vmax.f32 %v3043_v5, %v3023_v19 }
 0xed1   :  { %v3059_v35 = vsub.f32 %v2951_v42, %v3051_v6  ;;  %v3083_v40 = vsub.f32 %v2975_v32, %v3051_v6  ;;  %v3107_v23 = vsub.f32 %v2999_v61, %v3051_v6  ;;  %v3131_v4 = vsub.f32 %v3023_v19, %v3051_v6 }
 0xed2   :  { %v3025_v37 = vpop.xlane.xlu2 %3024  ;;  %v3001_v59 = vpop.xlane.xlu0 %3000 }
 0xed3   :  { %v2977_v49 = vpop.xlane.xlu1 %2976  ;;  %v3070_v47 = vmul.f32 1.442695, %v3059_v35  ;;  %v3094_v41 = vmul.f32 1.442695, %v3083_v40  ;;  %v3118_v26 = vmul.f32 1.442695, %v3107_v23 }
 0xed4   :  { %v3036_v17 = vmax.f32 %v2953_v15, %v2977_v49  ;;  %v3142_v32 = vmul.f32 1.442695, %v3131_v4 }
 0xed5   :  { %5778 = vpow2.f32 %v3070_v47 }
 0xed6   :  { %v3044_v38 = vmax.f32 %v3036_v17, %v3001_v59  ;;  %5780 = vpow2.f32 %v3094_v41 }
 0xed7   :  { %5782 = vpow2.f32 %v3118_v26 }
 0xed8   :  { %v3052_v20 = vmax.f32 %v3044_v38, %v3025_v37 }
 0xeda   :  { %v2979_v48 = vpop.xlane.xlu0 %2978  ;;  %v2955_v51 = vpop.xlane.xlu2 %2954  ;;  %v3060_v25 = vsub.f32 %v2953_v15, %v3052_v20  ;;  %v3084_v36 = vsub.f32 %v2977_v49, %v3052_v20  ;;  %v3108_v3 = vsub.f32 %v3001_v59, %v3052_v20  ;;  %v3132_v49 = vsub.f32 %v3025_v37, %v3052_v20 }
 0xedb   :  { %v3027_v13 = vpop.xlane.xlu1 %3026  ;;  %v3037_v24 = vmax.f32 %v2955_v51, %v2979_v48  ;;  %v8929_v31 = vpop.eup %5778 }
 0xedc   :  { %v3072_v14 = vmul.f32 1.442695, %v3060_v25  ;;  %v3096_v27 = vmul.f32 1.442695, %v3084_v36  ;;  %v8931_v42 = vpop.eup %5780  ;;  %v3120_v6 = vmul.f32 1.442695, %v3108_v3 }
 0xedd   :  { %v3155_v5 = vadd.f32 %v8931_v42, %v8929_v31  ;;  %v8935_v38 = vpop.eup %5782  ;;  %v3144_v37 = vmul.f32 1.442695, %v3132_v49 }
 0xede   :  { %5784 = vpow2.f32 %v3072_v14 }
 0xedf   :  { %5786 = vpow2.f32 %v3096_v27  ;;  %v3163_v36 = vadd.f32 %v8935_v38, %v3155_v5 }
 0xee0   :  { %5788 = vpow2.f32 %v3142_v32 }
 0xee2   :  { %v3003_v55 = vpop.xlane.xlu2 %3002  ;;  %v2981_v10 = vpop.xlane.xlu0 %2980 }
 0xee3   :  { %v3045_v16 = vmax.f32 %v3037_v24, %v3003_v55  ;;  %v3005_v60 = vpop.xlane.xlu1 %3004 }
 0xee4   :  { %v8937_v41 = vpop.eup %5784 }
 0xee5   :  { %v3053_v15 = vmax.f32 %v3045_v16, %v3027_v13  ;;  %v8939_v25 = vpop.eup %5786 }
 0xee6   :  { %v8942_v4 = vpop.eup %5788 }
 0xee7   :  { %v3061_v12 = vsub.f32 %v2955_v51, %v3053_v15  ;;  %v3085_v61 = vsub.f32 %v2979_v48, %v3053_v15  ;;  %v3109_v19 = vsub.f32 %v3003_v55, %v3053_v15  ;;  %v3133_v59 = vsub.f32 %v3027_v13, %v3053_v15 }
 0xee8   :  { %v3156_v13 = vadd.f32 %v8939_v25, %v8937_v41  ;;  %v3171_v24 = vadd.f32 %v8942_v4, %v3163_v36  ;;  %v3034_v36 = vmax.f32 %v8923_v9, %v8921_v30 }
 0xee9   :  { %v3074_v17 = vmul.f32 1.442695, %v3061_v12  ;;  %v3098_v35 = vmul.f32 1.442695, %v3085_v61  ;;  %v3122_v23 = vmul.f32 1.442695, %v3109_v19 }
 0xeea   :  { %v3029_v40 = vpop.xlane.xlu0 %3028  ;;  %v2957_v47 = vpop.xlane.xlu2 %2956  ;;  %v3146_v26 = vmul.f32 1.442695, %v3133_v59 }
 0xeeb   :  { %5790 = vpow2.f32 %v3074_v17  ;;  %v3038_v51 = vmax.f32 %v2957_v47, %v2981_v10  ;;  %v2983_v48 = vpop.xlane.xlu1 %2982 }
 0xeec   :  { %5792 = vpow2.f32 %v3120_v6 }
 0xeed   :  { %5794 = vpow2.f32 %v3098_v35  ;;  %v3046_v20 = vmax.f32 %v3038_v51, %v3005_v60 }
 0xeee   :  { %5796 = vpow2.f32 %v3122_v23 }
 0xeef   :  { %v3054_v14 = vmax.f32 %v3046_v20, %v3029_v40  ;;  %5798 = vpow2.f32 %v3144_v37 }
 0xef0   :  { %5800 = vpow2.f32 %v3146_v26 }
 0xef1   :  { %v8947_v27 = vpop.eup %5790  ;;  %v3062_v55 = vsub.f32 %v2957_v47, %v3054_v14  ;;  %v3086_v16 = vsub.f32 %v2981_v10, %v3054_v14  ;;  %v3110_v3 = vsub.f32 %v3005_v60, %v3054_v14  ;;  %v3134_v15 = vsub.f32 %v3029_v40, %v3054_v14 }
 0xef2   :  { %v8949_v32 = vpop.eup %5792  ;;  %v3031_v12 = vpop.xlane.xlu2 %3030  ;;  %5802 = vrcp.f32 %v3171_v24 }
 0xef3   :  { %v2959_v61 = vpop.xlane.xlu0 %2958  ;;  %v8951_v19 = vpop.eup %5794  ;;  %v3164_v5 = vadd.f32 %v8949_v32, %v3156_v13  ;;  %v3076_v6 = vmul.f32 1.442695, %v3062_v55  ;;  %v3100_v49 = vmul.f32 1.442695, %v3086_v16  ;;  %v3124_v59 = vmul.f32 1.442695, %v3110_v3 }
 0xef4   :  { %v3007_v17 = vpop.xlane.xlu1 %3006  ;;  %v3157_v35 = vadd.f32 %v8951_v19, %v8947_v27  ;;  %v3039_v10 = vmax.f32 %v2959_v61, %v2983_v48  ;;  %v8956_v60 = vpop.eup %5796  ;;  %v3148_v23 = vmul.f32 1.442695, %v3134_v15  ;;  %v3042_v13 = vmax.f32 %v3034_v36, %v8927_v33 }
 0xef5   :  { %5804 = vpow2.f32 %v3076_v6  ;;  %v8958_v47 = vpop.eup %5798 }
 0xef6   :  { %v3165_v40 = vadd.f32 %v8956_v60, %v3157_v35  ;;  %5806 = vpow2.f32 %v3100_v49  ;;  %v3047_v51 = vmax.f32 %v3039_v10, %v3007_v17  ;;  %v3172_v37 = vadd.f32 %v8958_v47, %v3164_v5  ;;  %v8964_v20 = vpop.eup %5800 }
 0xef7   :  { %5808 = vpow2.f32 %v3124_v59  ;;  %v3033_v5 = vmax.f32 %v8919_v53, %v8925_v1 }
 0xef8   :  { %v3055_v26 = vmax.f32 %v3047_v51, %v3031_v12  ;;  %v3173_v14 = vadd.f32 %v8964_v20, %v3165_v40  ;;  %v5803_v24 = vpop.eup %5802  ;;  %5810 = vpow2.f32 %v3148_v23 }
 0xef9   :  { %5812 = vrcp.f32 %v3172_v37 }
 0xefa   :  { %v3063_v55 = vsub.f32 %v2959_v61, %v3055_v26  ;;  %v3087_v16 = vsub.f32 %v2983_v48, %v3055_v26  ;;  %v3111_v3 = vsub.f32 %v3007_v17, %v3055_v26  ;;  %v8968_v15 = vpop.xlane.xlu2 %2968  ;;  %v3135_v35 = vsub.f32 %v3031_v12, %v3055_v26 }
 0xefb   :  { %v8970_v6 = vpop.xlane.xlu0 %2994  ;;  %v8972_v49 = vpop.eup %5804  ;;  %v8979_v48 = vmul.f32 %v5803_v24, %v8935_v38  ;;  %5814 = vrcp.f32 %v3173_v14  ;;  %v3187_v38 = vmul.f32 %v5803_v24, %v8929_v31 }
 0xefc   :  { %v3021_v59 = vpop.xlane.xlu1 %3020  ;;  %v8976_v10 = vpop.eup %5806  ;;  %v3078_v40 = vmul.f32 1.442695, %v3063_v55  ;;  %v3102_v51 = vmul.f32 1.442695, %v3087_v16  ;;  %v3126_v23 = vmul.f32 1.442695, %v3111_v3 }
 0xefd   :  { %v3050_v61 = vmax.f32 %v3042_v13, %v3021_v59  ;;  %v3158_v17 = vadd.f32 %v8976_v10, %v8972_v49  ;;  %v3150_v36 = vmul.f32 1.442695, %v3135_v35  ;;  %v8983_v63 = vpop.eup %5808  ;;  %v8991_v13 = vmul.f32 %v5803_v24, %v8931_v42 }
 0xefe   :  { %5816 = vpow2.f32 %v3078_v40  ;;  %v8993_v14 = vpop.eup %5810 }
 0xeff   :  { %v3058_v12 = vsub.f32 %v8923_v9, %v3050_v61  ;;  %v3082_v37 = vsub.f32 %v8921_v30, %v3050_v61  ;;  %v3106_v26 = vsub.f32 %v8927_v33, %v3050_v61  ;;  %v3166_v55 = vadd.f32 %v8983_v63, %v3158_v17  ;;  %v8995_v40 = vpop.eup %5812 }
 0xf00   :  { %5818 = vpow2.f32 %v3102_v51  ;;  %v3130_v35 = vsub.f32 %v3021_v59, %v3050_v61  ;;  %v3032_v9 = vmax.f32 %v8917_v7, %v8968_v15  ;;  %v3041_v33 = vmax.f32 %v3033_v5, %v8970_v6 }
 0xf01   :  { %5820 = vpow2.f32 %v3126_v23  ;;  %v3068_v16 = vmul.f32 1.442695, %v3058_v12  ;;  %v3092_v3 = vmul.f32 1.442695, %v3082_v37  ;;  %v3174_v30 = vadd.f32 %v8993_v14, %v3166_v55  ;;  %v9003_v17 = vpop.eup %5814 }
 0xf02   :  { %5822 = vpow2.f32 %v3150_v36  ;;  %v3116_v31 = vmul.f32 1.442695, %v3106_v26  ;;  %v2993_v42 = vpop.xlane.xlu2 %2992  ;;  %v9007_v61 = vmul.f32 %v5803_v24, %v8942_v4  ;;  %v3140_v12 = vmul.f32 1.442695, %v3130_v35 }
 0xf03   :  { %5824 = vpow2.f32 %v3068_v16  ;;  %v9001_v51 = vpop.xlane.xlu0 %3018  ;;  %v3040_v23 = vmax.f32 %v3032_v9, %v2993_v42  ;;  %v9013_v5 = vsel %vm219_vm3, %v3187_v38, 0.0  ;;  %v3188_v4 = vmul.f32 %v8995_v40, %v8937_v41 }
 0xf04   :  { %5826 = vrcp.f32 %v3174_v30  ;;  %v3049_v59 = vmax.f32 %v3041_v33, %v9001_v51  ;;  %v9009_v36 = vpop.eup %5816  ;;  %v3017_v37 = vpop.xlane.xlu1 %3016  ;;  %v3211_v24 = vsel %vm6358_vm9, %v8991_v13, 0.0  ;;  %v3189_v35 = vmul.f32 %v9003_v17, %v8947_v27 }
 0xf05   :  { %5828 = vpow2.f32 %v3092_v3  ;;  %v3048_v16 = vmax.f32 %v3040_v23, %v3017_v37  ;;  %v3204_v9 = vmul.f32 %v8995_v40, %v8939_v25 }
 0xf06   :  { %v9018_v55 = vpop.eup %5818  ;;  %v3057_v30 = vsub.f32 %v8919_v53, %v3049_v59  ;;  %5830 = vpow2.f32 %v3116_v31  ;;  %v3081_v11 = vsub.f32 %v8925_v1, %v3049_v59  ;;  %v3105_v25 = vsub.f32 %v8970_v6, %v3049_v59 }
 0xf07   :  { %v9026_v3 = vpop.eup %5820  ;;  %v3159_v38 = vadd.f32 %v9018_v55, %v9009_v36  ;;  %v3056_v41 = vsub.f32 %v8917_v7, %v3048_v16  ;;  %v3080_v33 = vsub.f32 %v8968_v15, %v3048_v16  ;;  %v3104_v23 = vsub.f32 %v2993_v42, %v3048_v16 }
 0xf08   :  { %v9034_v53 = vpop.eup %5822  ;;  %v3128_v13 = vsub.f32 %v3017_v37, %v3048_v16  ;;  %5832 = vpow2.f32 %v3140_v12  ;;  %v3066_v31 = vmul.f32 1.442695, %v3057_v30  ;;  %v3205_v7 = vmul.f32 %v9003_v17, %v8951_v19 }
 0xf09   :  { %v9038_v26 = vpop.eup %5824  ;;  %v3167_v45 = vadd.f32 %v9026_v3, %v3159_v38  ;;  %v3064_v44 = vmul.f32 1.442695, %v3056_v41  ;;  %v3088_v39 = vmul.f32 1.442695, %v3080_v33  ;;  %v3112_v37 = vmul.f32 1.442695, %v3104_v23 }
 0xf0a   :  { %v5827_v27 = vpop.eup %5826  ;;  %5834 = vpow2.f32 %v3066_v31  ;;  %v3136_v1 = vmul.f32 1.442695, %v3128_v13  ;;  %v3228_v19 = vmul.f32 %v8995_v40, %v8949_v32  ;;  %v3090_v6 = vmul.f32 1.442695, %v3081_v11 }
 0xf0b   :  { %v9045_v58 = vpop.eup %5828  ;;  %v3190_v15 = vmul.f32 %v5827_v27, %v8972_v49  ;;  %v3175_v42 = vadd.f32 %v9034_v53, %v3167_v45  ;;  %5836 = vpow2.f32 %v3064_v44  ;;  %v3206_v16 = vmul.f32 %v5827_v27, %v8976_v10 }
 0xf0c   :  { %v3154_v12 = vadd.f32 %v9045_v58, %v9038_v26  ;;  %v9052_v30 = vpop.eup %5830  ;;  %v3129_v49 = vsub.f32 %v9001_v51, %v3049_v59  ;;  %v3196_v38 = vsel %vm219_vm3, %v3188_v4, 0.0  ;;  %v3212_v44 = vsel %vm6358_vm9, %v3204_v9, 0.0 }
 0xf0d   :  { %5838 = vrcp.f32 %v3175_v42  ;;  %v3114_v10 = vmul.f32 1.442695, %v3105_v25  ;;  %v3198_v32 = vsel %vm219_vm3, %v3190_v15, 0.0  ;;  %v3214_v11 = vsel %vm6358_vm9, %v3206_v16, 0.0 }
 0xf0e   :  { %v3162_v45 = vadd.f32 %v9052_v30, %v3154_v12  ;;  %5840 = vpow2.f32 %v3088_v39  ;;  %v9062_v41 = vpop.eup %5832  ;;  %v3197_v39 = vsel %vm219_vm3, %v3189_v35, 0.0  ;;  %v3213_v59 = vsel %vm6358_vm9, %v3205_v7, 0.0 }
 0xf0f   :  { %5842 = vpow2.f32 %v3112_v37  ;;  %v3138_v9 = vmul.f32 1.442695, %v3129_v49  ;;  %v3230_v33 = vmul.f32 %v5827_v27, %v8983_v63  ;;  %v3220_v23 = vadd.f32 %v3212_v44, %v3196_v38 }
 0xf10   :  { %v3170_v51 = vadd.f32 %v9062_v41, %v3162_v45  ;;  %5844 = vpow2.f32 %v3136_v1  ;;  %v9073_v4 = vpop.eup %5834  ;;  %v3222_v31 = vadd.f32 %v3214_v11, %v3198_v32  ;;  %v3236_v25 = vsel %vm6366_vm10, %v3228_v19, 0.0 }
 0xf11   :  { %5846 = vpow2.f32 %v3090_v6  ;;  %v9076_v13 = vpop.eup %5836  ;;  %v3219_v15 = vadd.f32 %v3211_v24, %v9013_v5  ;;  %v3229_v7 = vmul.f32 %v9003_v17, %v8956_v60  ;;  %v3221_v42 = vadd.f32 %v3213_v59, %v3197_v39 }
 0xf12   :  { %5848 = vrcp.f32 %v3170_v51  ;;  %v3252_v37 = vmul.f32 %v8995_v40, %v8958_v47  ;;  %v3254_v19 = vmul.f32 %v5827_v27, %v8993_v14  ;;  %v3238_v60 = vsel %vm6366_vm10, %v3230_v33, 0.0 }
 0xf13   :  { %v5839_v35 = vpop.eup %5838  ;;  %5850 = vpow2.f32 %v3114_v10  ;;  %v3244_v24 = vadd.f32 %v3236_v25, %v3220_v23  ;;  %v3237_v45 = vsel %vm6366_vm10, %v3229_v7, 0.0  ;;  %v3253_v38 = vmul.f32 %v9003_v17, %v8964_v20 }
 0xf14   :  { %v5841_v63 = vpop.eup %5840  ;;  %v3191_v12 = vmul.f32 %v5839_v35, %v9009_v36  ;;  %v3207_v1 = vmul.f32 %v5839_v35, %v9018_v55  ;;  %v3231_v16 = vmul.f32 %v5839_v35, %v9026_v3  ;;  %5852 = vpow2.f32 %v3138_v9 }
 0xf15   :  { %v5843_v6 = vpop.eup %5842  ;;  %v3152_v5 = vadd.f32 %v5841_v63, %v9076_v13  ;;  %v3255_v36 = vmul.f32 %v5839_v35, %v9034_v53  ;;  %v3246_v55 = vadd.f32 %v3238_v60, %v3222_v31  ;;  %v3262_v11 = vsel %vm227_vm11, %v3254_v19, 0.0 }
 0xf16   :  { %v9092_v49 = vpop.eup %5844  ;;  %v3199_v47 = vsel %vm219_vm3, %v3191_v12, 0.0  ;;  %v3215_v40 = vsel %vm6358_vm9, %v3207_v1, 0.0  ;;  %v3239_v32 = vsel %vm6366_vm10, %v3231_v16, 0.0  ;;  %v3245_v53 = vadd.f32 %v3237_v45, %v3221_v42 }
 0xf17   :  { %v5847_v14 = vpop.eup %5846  ;;  %v3223_v3 = vadd.f32 %v3215_v40, %v3199_v47  ;;  %v3160_v27 = vadd.f32 %v5843_v6, %v3152_v5  ;;  %v3263_v20 = vsel %vm227_vm11, %v3255_v36, 0.0  ;;  %v3270_v17 = vadd.f32 %v3262_v11, %v3246_v55 }
 0xf18   :  { %v5849_v44 = vpop.eup %5848  ;;  %v3153_v10 = vadd.f32 %v5847_v14, %v9073_v4  ;;  %v3260_v47 = vsel %vm227_vm11, %v3252_v37, 0.0 }
 0xf19   :  { %v5851_v51 = vpop.eup %5850  ;;  %v3168_v39 = vadd.f32 %v9092_v49, %v3160_v27  ;;  %v3247_v59 = vadd.f32 %v3239_v32, %v3223_v3  ;;  %v3186_v9 = vmul.f32 %v5849_v44, %v9038_v26  ;;  %v3202_v33 = vmul.f32 %v5849_v44, %v9045_v58 }
 0xf1a   :  { %v3161_v23 = vadd.f32 %v5851_v51, %v3153_v10  ;;  %v3226_v31 = vmul.f32 %v5849_v44, %v9052_v30  ;;  %v5853_v25 = vpop.eup %5852  ;;  %v3261_v58 = vsel %vm227_vm11, %v3253_v38, 0.0  ;;  %v10508_v26 = vsel %vm6366_vm10, %v8979_v48, 0.0 }
 0xf1b   :  { %5854 = vrcp.f32 %v3168_v39  ;;  %v3271_v35 = vadd.f32 %v3263_v20, %v3247_v59  ;;  %v3194_v7 = vsel %vm219_vm3, %v3186_v9, 0.0  ;;  %v3210_v42 = vsel %vm6358_vm9, %v3202_v33, 0.0 }
 0xf1c   :  { %v3169_v12 = vadd.f32 %v5853_v25, %v3161_v23  ;;  %v3243_v1 = vadd.f32 %v10508_v26, %v3219_v15  ;;  %v3218_v16 = vadd.f32 %v3210_v42, %v3194_v7  ;;  %v3269_v19 = vadd.f32 %v3261_v58, %v3245_v53 }
 0xf1d   :  { %v3279_v30 = vmul.f32 %v3271_v35, %v8397_v22  ;;  %v3234_v5 = vsel %vm6366_vm10, %v3226_v31, 0.0  ;;  %v3250_v60 = vmul.f32 %v5849_v44, %v9062_v41  ;;  %v3278_v36 = vmul.f32 %v3270_v17, %v8384_v21 }
 0xf1e   :  { %5856 = vrcp.f32 %v3169_v12  ;;  %v3242_v40 = vadd.f32 %v3234_v5, %v3218_v16  ;;  %v3268_v55 = vadd.f32 %v3260_v47, %v3244_v24  ;;  %v3259_v48 = vsel %vm227_vm11, %v9007_v61, 0.0 }
 0xf1f   :  { %3288 = vmatpush.msra.mxu1 %v3279_v30  ;;  %v3267_v15 = vadd.f32 %v3259_v48, %v3243_v1  ;;  %v3277_v27 = vmul.f32 %v3269_v19, %v8369_v46  ;;  %v3258_v41 = vsel %vm227_vm11, %v3250_v60, 0.0 }
 0xf20   :  { %v3266_v45 = vadd.f32 %v3258_v41, %v3242_v40  ;;  %v3276_v44 = vmul.f32 %v3268_v55, %v8360_v8 }
 0xf21   :  { %v5855_v3 = vpop.eup %5854  ;;  %3289 = vmatpush.msra.mxu1 %v3278_v36  ;;  %v3275_v32 = vmul.f32 %v3267_v15, %v8351_v57 }
 0xf22   :  { %v3184_v37 = vmul.f32 %v5855_v3, %v9076_v13  ;;  %v3200_v38 = vmul.f32 %v5855_v3, %v5841_v63  ;;  %v3224_v24 = vmul.f32 %v5855_v3, %v5843_v6  ;;  %v3248_v13 = vmul.f32 %v5855_v3, %v9092_v49 }
 0xf23   :  { %3290 = vmatpush.msra.mxu1 %v3277_v27  ;;  %v3274_v63 = vmul.f32 %v3266_v45, %v8344_v52 }
 0xf24   :  { %v5857_v10 = vpop.eup %5856  ;;  %v3192_v61 = vsel %vm219_vm3, %v3184_v37, 0.0  ;;  %v3208_v11 = vsel %vm6358_vm9, %v3200_v38, 0.0  ;;  %v3232_v20 = vsel %vm6366_vm10, %v3224_v24, 0.0 }
 0xf25   :  { %3291 = vmatpush.msra.mxu1 %v3276_v44  ;;  %v3185_v53 = vmul.f32 %v5857_v10, %v9073_v4  ;;  %v3201_v39 = vmul.f32 %v5857_v10, %v5847_v14  ;;  %v3225_v59 = vmul.f32 %v5857_v10, %v5851_v51  ;;  %v3216_v9 = vadd.f32 %v3208_v11, %v3192_v61 }
 0xf26   :  { %v3249_v23 = vmul.f32 %v5857_v10, %v5853_v25  ;;  %v3256_v14 = vsel %vm227_vm11, %v3248_v13, 0.0 }
 0xf27   :  { %3292 = vmatpush.msra.mxu1 %v3275_v32  ;;  %v3193_v6 = vsel %vm219_vm3, %v3185_v53, 0.0  ;;  %v3209_v33 = vsel %vm6358_vm9, %v3201_v39, 0.0  ;;  %v3240_v4 = vadd.f32 %v3232_v20, %v3216_v9  ;;  %v3233_v49 = vsel %vm6366_vm10, %v3225_v59, 0.0 }
 0xf28   :  { %v3217_v17 = vadd.f32 %v3209_v33, %v3193_v6  ;;  %v3257_v35 = vsel %vm227_vm11, %v3249_v23, 0.0 }
 0xf29   :  { %3293 = vmatpush.msra.mxu1 %v3274_v63  ;;  %v3264_v31 = vadd.f32 %v3256_v14, %v3240_v4 }
 0xf2a   :  { %v3241_v51 = vadd.f32 %v3233_v49, %v3217_v17 }
 0xf2b   :  { %v3272_v42 = vmul.f32 %v3264_v31, %v8325_v34 }
 0xf2c   :  { %v3265_v7 = vadd.f32 %v3257_v35, %v3241_v51 }
 0xf2e   :  { %v3273_v25 = vmul.f32 %v3265_v7, %v8333_v56 }
 0xf30   :  { %3294 = vmatpush.msra.mxu1 %v3273_v25 }
 0xf32   :  { %3295 = vmatpush.msra.mxu1 %v3272_v42 }
 0xf33   :  { %5241 = vmatmul.msk.f32.vlgmr.msra.gmra.mxu1 %vm10509_vm8, %v6990_v43 }
 0xf3b   :  { %5242 = vmatmul.msk.f32.gmra.mxu1 %vm10510_vm5, %v6994_v50 }
 0xfb0   :  { %v3297_v12 = vpop.f32.mrf.mxu1 }
 0xfb1   :  { %v9166_v58 = vadd.f32 %v3297_v12, %v10488_v29 }
 0xfb3   :  { %v3303_v26 = vmul.f32 %v9166_v58, %v9166_v58 }
 0xfb5   :  { %v3335_v1 = vsel %vm6358_vm9, %v3303_v26, 0.0  ;;  %v3305_v16 = vsel %vm219_vm3, %v3303_v26, 0.0  ;;  %v3367_v40 = vsel %vm6366_vm10, %v3303_v26, 0.0  ;;  %v3399_v48 = vsel %vm227_vm11, %v3303_v26, 0.0 }
 0xfb6   :  { %3337 = vadd.xlane.f32.xlu2 %v3335_v1  ;;  %3307 = vadd.xlane.f32.xlu1 %v3305_v16 }
 0xfb8   :  { %v3300_v30 = vpop.f32.mrf.mxu1 }
 0xfb9   :  { %v9175_v19 = vadd.f32 %v3300_v30, %v10489_v28 }
 0xfbb   :  { %v3304_v5 = vmul.f32 %v9175_v19, %v9175_v19 }
 0xfbd   :  { %v3336_v60 = vsel %vm6358_vm9, %v3304_v5, 0.0  ;;  %v3306_v47 = vsel %vm219_vm3, %v3304_v5, 0.0  ;;  %v3368_v36 = vsel %vm6366_vm10, %v3304_v5, 0.0  ;;  %v3400_v55 = vsel %vm227_vm11, %v3304_v5, 0.0 }
 0xfbe   :  { %3339 = vadd.xlane.f32.xlu0 %v3336_v60  ;;  %3309 = vadd.xlane.f32.xlu2 %v3306_v47 }
 0xfbf   :  { %3369 = vadd.xlane.f32.xlu1 %v3367_v40 }
 0xfc6   :  { %3371 = vadd.xlane.f32.xlu0 %v3368_v36  ;;  %3403 = vadd.xlane.f32.xlu2 %v3400_v55 }
 0xfce   :  { %3401 = vadd.xlane.f32.xlu0 %v3399_v48 }
0x1029   :  { %v3338_v15 = vpop.xlane.xlu2 %3337  ;;  %v3308_v3 = vpop.xlane.xlu1 %3307 }
0x102a   :  { %v9191_v27 = vmax.f32 %v3338_v15, 1e-24  ;;  %v9193_v41 = vmax.f32 %v3308_v3, 1e-24 }
0x102c   :  { %5858 = vrsqrt.f32 %v9191_v27  ;;  %vm3349_vm1 = vweird.f32 %v9191_v27  ;;  %vm3319_vm8 = vweird.f32 %v9193_v41 }
0x102d   :  { %5860 = vrsqrt.f32 %v9193_v41 }
0x1031   :  { %v3340_v45 = vpop.xlane.xlu0 %3339  ;;  %v3310_v37 = vpop.xlane.xlu2 %3309 }
0x1032   :  { %v3342_v38 = vmax.f32 %v3340_v45, 1e-24  ;;  %v3312_v44 = vmax.f32 %v3310_v37, 1e-24  ;;  %v3370_v24 = vpop.xlane.xlu1 %3369  ;;  %v9199_v32 = vpop.eup %5858 }
0x1033   :  { %v9197_v10 = vmax.f32 %v3370_v24, 1e-24  ;;  %v9201_v61 = vpop.eup %5860  ;;  %v3344_v11 = vmul.f32 %v9199_v32, %v9191_v27  ;;  %vm3350_vm6 = vweird.f32 %v9199_v32 }
0x1034   :  { %5862 = vrsqrt.f32 %v3342_v38  ;;  %v3314_v53 = vmul.f32 %v9201_v61, %v9193_v41  ;;  %vm3359_vm15 = vweird.f32 %v3342_v38  ;;  %vm3329_vm7 = vweird.f32 %v3312_v44 }
0x1035   :  { %5864 = vrsqrt.f32 %v3312_v44  ;;  %v3345_v20 = vmul.f32 %v9199_v32, %v3344_v11  ;;  %vm3320_vm2 = vweird.f32 %v9201_v61 }
0x1036   :  { %5866 = vrsqrt.f32 %v9197_v10  ;;  %v3315_v4 = vmul.f32 %v9201_v61, %v3314_v53 }
0x1037   :  { %v3346_v7 = vmul.f32 0.5, %v3345_v20 }
0x1038   :  { %v3316_v42 = vmul.f32 0.5, %v3315_v4 }
0x1039   :  { %v3372_v39 = vpop.xlane.xlu0 %3371  ;;  %v3404_v59 = vpop.xlane.xlu2 %3403  ;;  %v3347_v40 = vsub.f32 1.5, %v3346_v7 }
0x103a   :  { %v5863_v13 = vpop.eup %5862  ;;  %v9208_v63 = vmax.f32 %v3372_v39, 1e-24  ;;  %v9210_v33 = vmax.f32 %v3404_v59, 1e-24  ;;  %v3317_v48 = vsub.f32 1.5, %v3316_v42 }
0x103b   :  { %v5865_v9 = vpop.eup %5864  ;;  %v3354_v6 = vmul.f32 %v5863_v13, %v3342_v38  ;;  %vm3360_vm12 = vweird.f32 %v5863_v13  ;;  %v3348_v39 = vmul.f32 %v9199_v32, %v3347_v40 }
0x103c   :  { %v9212_v23 = vpop.eup %5866  ;;  %v3324_v17 = vmul.f32 %v5865_v9, %v3312_v44  ;;  %5868 = vrsqrt.f32 %v9208_v63  ;;  %vm3330_vm13 = vweird.f32 %v5865_v9  ;;  %vm9225_vm0 = vmor %vm3359_vm15, %vm3360_vm12  ;;  %v3318_v59 = vmul.f32 %v9201_v61, %v3317_v48 }
0x103d   :  { %v3355_v49 = vmul.f32 %v5863_v13, %v3354_v6  ;;  %v3376_v14 = vmul.f32 %v9212_v23, %v9197_v10  ;;  %5870 = vrsqrt.f32 %v9210_v33  ;;  %vm9230_vm4 = vmor %vm3329_vm7, %vm3330_vm13  ;;  %vm3382_vm13 = vweird.f32 %v9212_v23 }
0x103e   :  { %v3325_v51 = vmul.f32 %v5865_v9, %v3324_v17  ;;  %vm9246_vm12 = vmor %vm3349_vm1, %vm3350_vm6  ;;  %vm3381_vm7 = vweird.f32 %v9197_v10 }
0x103f   :  { %v3356_v31 = vmul.f32 0.5, %v3355_v49  ;;  %v3377_v35 = vmul.f32 %v9212_v23, %v3376_v14  ;;  %vm9255_vm15 = vmor %vm3319_vm8, %vm3320_vm2  ;;  %vm3423_vm2 = vweird.f32 %v9210_v33 }
0x1040   :  { %v3326_v25 = vmul.f32 0.5, %v3325_v51  ;;  %v3352_v51 = vsel %vm9246_vm12, %v9199_v32, %v3348_v39  ;;  %vm9271_vm1 = vmor %vm3381_vm7, %vm3382_vm13 }
0x1041   :  { %v3357_v12 = vsub.f32 1.5, %v3356_v31  ;;  %v3402_v26 = vpop.xlane.xlu0 %3401  ;;  %v3378_v60 = vmul.f32 0.5, %v3377_v35  ;;  %v3322_v35 = vsel %vm9255_vm15, %v9201_v61, %v3318_v59  ;;  %vm10528_vm15 = vcmask 523264  }
0x1042   :  { %v5869_v1 = vpop.eup %5868  ;;  %v3327_v16 = vsub.f32 1.5, %v3326_v25  ;;  %v9221_v30 = vmax.f32 %v3402_v26, 1e-24 }
0x1043   :  { %v3358_v5 = vmul.f32 %v5863_v13, %v3357_v12  ;;  %v3386_v47 = vmul.f32 %v5869_v1, %v9208_v63  ;;  %v5871_v55 = vpop.eup %5870  ;;  %v3379_v11 = vsub.f32 1.5, %v3378_v60  ;;  %vm3392_vm5 = vweird.f32 %v5869_v1 }
0x1044   :  { %v3328_v36 = vmul.f32 %v5865_v9, %v3327_v16  ;;  %5872 = vrsqrt.f32 %v9221_v30  ;;  %v3418_v37 = vmul.f32 %v5871_v55, %v9210_v33  ;;  %v3333_v16 = vsel %vm219_vm3, %v3322_v35, 0.0 }
0x1045   :  { %v3387_v3 = vmul.f32 %v5869_v1, %v3386_v47  ;;  %v3362_v38 = vsel %vm9225_vm0, %v5863_v13, %v3358_v5  ;;  %v3380_v4 = vmul.f32 %v9212_v23, %v3379_v11  ;;  %vm3391_vm0 = vweird.f32 %v9208_v63  ;;  %v10526_v11 = vld [vmem:[#allocation17_spill] sm:$0xff] }
0x1046   :  { %v3332_v24 = vsel %vm9230_vm4, %v5865_v9, %v3328_v36  ;;  %v3419_v44 = vmul.f32 %v5871_v55, %v3418_v37  ;;  %v3364_v9 = vsel %vm6358_vm9, %v3362_v38, 0.0  ;;  %vm3393_vm6 = vmor %vm3391_vm0, %vm3392_vm5  ;;  %vm3424_vm4 = vweird.f32 %v5871_v55  ;;  %v10523_v38 = vld [vmem:[#allocation11_spill] sm:$0xff] }
0x1047   :  { %v3388_v53 = vmul.f32 0.5, %v3387_v3  ;;  %v3334_v27 = vsel %vm219_vm3, %v3332_v24, 0.0  ;;  %v3384_v12 = vsel %vm9271_vm1, %v9212_v23, %v3380_v4  ;;  %vm3425_vm8 = vmor %vm3423_vm2, %vm3424_vm4  ;;  %vm3413_vm12 = vweird.f32 %v9221_v30  ;;  %v10524_v24 = vld [vmem:[#allocation13_spill] sm:$0xff] }
0x1048   :  { %v3420_v17 = vmul.f32 0.5, %v3419_v44  ;;  %v3366_v7 = vadd.f32 %v3364_v9, %v3334_v27  ;;  %v3395_v40 = vsel %vm6366_vm10, %v3384_v12, 0.0  ;;  %vm10529_vm0 = vmmov %vm10528_vm15 }
0x1049   :  { %v3389_v6 = vsub.f32 1.5, %v3388_v53 }
0x104a   :  { %v5873_v20 = vpop.eup %5872  ;;  %v3421_v31 = vsub.f32 1.5, %v3420_v17 }
0x104b   :  { %v3390_v49 = vmul.f32 %v5869_v1, %v3389_v6  ;;  %v3408_v14 = vmul.f32 %v5873_v20, %v9221_v30  ;;  %vm3414_vm5 = vweird.f32 %v5873_v20  ;;  %v10521_v30 = vld [vmem:[#allocation7_spill] sm:$0xff] }
0x104c   :  { %v3422_v10 = vmul.f32 %v5871_v55, %v3421_v31  ;;  %vm3415_vm13 = vmor %vm3413_vm12, %vm3414_vm5 }
0x104d   :  { %v3394_v25 = vsel %vm3393_vm6, %v5869_v1, %v3390_v49  ;;  %v3409_v42 = vmul.f32 %v5873_v20, %v3408_v14  ;;  %v3363_v1 = vsel %vm6358_vm9, %v3352_v51, 0.0 }
0x104e   :  { %v3396_v32 = vsel %vm6366_vm10, %v3394_v25, 0.0  ;;  %v3426_v5 = vsel %vm3425_vm8, %v5871_v55, %v3422_v10  ;;  %v3365_v36 = vadd.f32 %v3363_v1, %v3333_v16 }
0x104f   :  { %v3398_v61 = vadd.f32 %v3396_v32, %v3366_v7  ;;  %v3410_v26 = vmul.f32 0.5, %v3409_v42  ;;  %v3428_v60 = vsel %vm227_vm11, %v3426_v5, 0.0 }
0x1050   :  { %v3397_v15 = vadd.f32 %v3395_v40, %v3365_v36 }
0x1051   :  { %v3411_v47 = vsub.f32 1.5, %v3410_v26  ;;  %v3430_v33 = vadd.f32 %v3428_v60, %v3398_v61 }
0x1053   :  { %v3412_v23 = vmul.f32 %v5873_v20, %v3411_v47  ;;  %v3432_v48 = vmul.f32 %v3430_v33, %v9175_v19  ;;  %v10522_v19 = vld [vmem:[#allocation9_spill] sm:$0xff] }
0x1055   :  { %v3416_v3 = vsel %vm3415_vm13, %v5873_v20, %v3412_v23  ;;  %3447 = vmatpush.msrb.mxu1 %v3432_v48 }
0x1056   :  { %v3427_v55 = vsel %vm227_vm11, %v3416_v3, 0.0 }
0x1057   :  { %v3429_v45 = vadd.f32 %v3427_v55, %v3397_v15 }
0x1059   :  { %v3431_v37 = vmul.f32 %v3429_v45, %v9166_v58  ;;  %v10525_v58 = vld [vmem:[#allocation15_spill] sm:$0xff] }
0x105b   :  { %3448 = vmatpush.msrb.mxu1 %v3431_v37 }
0x105c   :  { %5243 = vmatmul.msk.f32.vlgmr.msrb.gmra.mxu1 %vm368_vm14, %v10500_v62 }
0x1064   :  { %5244 = vmatmul.msk.f32.gmra.mxu1 %vm368_vm14, %v10501_v18 }
0x106c   :  { %5245 = vmatmul.msk.f32.gmra.mxu1 %vm368_vm14, %v10521_v30 }
0x1074   :  { %5246 = vmatmul.msk.f32.gmra.mxu1 %vm368_vm14, %v10522_v19 }
0x107c   :  { %5247 = vmatmul.msk.f32.gmra.mxu1 %vm368_vm14, %v10523_v38 }
0x1084   :  { %5248 = vmatmul.msk.f32.gmra.mxu1 %vm368_vm14, %v10524_v24 }
0x108c   :  { %5249 = vmatmul.msk.f32.gmra.mxu1 %vm368_vm14, %v10525_v58 }
0x1094   :  { %5250 = vmatmul.msk.f32.gmra.mxu1 %vm368_vm14, %v10526_v11 }
0x10d9   :  { %v3450_v53 = vpop.f32.mrf.mxu1 }
0x10da   :  { %v9311_v39 = vmul.f32 %v3450_v53, %v8325_v34 }
0x10dc   :  { %v3482_v44 = vsel %vm219_vm3, %v9311_v39, 0.0 }
0x10dd   :  { %3490 = vadd.xlane.f32.xlu2 %v3482_v44  ;;  %v3506_v44 = vsel %vm6358_vm9, %v9311_v39, 0.0 }
0x10e1   :  { %v3453_v59 = vpop.f32.mrf.mxu1 }
0x10e2   :  { %v9317_v6 = vmul.f32 %v3453_v59, %v8333_v56 }
0x10e4   :  { %v3507_v20 = vsel %vm6358_vm9, %v9317_v6, 0.0  ;;  %v3483_v13 = vsel %vm219_vm3, %v9317_v6, 0.0  ;;  %v3531_v59 = vsel %vm6366_vm10, %v9317_v6, 0.0 }
0x10e5   :  { %3516 = vadd.xlane.f32.xlu2 %v3507_v20  ;;  %3492 = vadd.xlane.f32.xlu1 %v3483_v13  ;;  %v3530_v13 = vsel %vm6366_vm10, %v9311_v39, 0.0 }
0x10e9   :  { %v3456_v9 = vpop.f32.mrf.mxu1 }
0x10ea   :  { %v3476_v27 = vmul.f32 %v3456_v9, %v8344_v52  ;;  %v3555_v9 = vsel %vm227_vm11, %v9317_v6, 0.0 }
0x10ec   :  { %v3508_v17 = vsel %vm6358_vm9, %v3476_v27, 0.0  ;;  %v3484_v41 = vsel %vm219_vm3, %v3476_v27, 0.0  ;;  %v3532_v14 = vsel %vm6366_vm10, %v3476_v27, 0.0  ;;  %v3556_v20 = vsel %vm227_vm11, %v3476_v27, 0.0 }
0x10ed   :  { %3518 = vadd.xlane.f32.xlu1 %v3508_v17  ;;  %3494 = vadd.xlane.f32.xlu0 %v3484_v41  ;;  %v3554_v17 = vsel %vm227_vm11, %v9311_v39, 0.0 }
0x10f1   :  { %v3459_v4 = vpop.f32.mrf.mxu1 }
0x10f2   :  { %v3477_v49 = vmul.f32 %v3459_v4, %v8351_v57 }
0x10f4   :  { %v3557_v51 = vsel %vm227_vm11, %v3477_v49, 0.0  ;;  %v3485_v31 = vsel %vm219_vm3, %v3477_v49, 0.0  ;;  %v3509_v25 = vsel %vm6358_vm9, %v3477_v49, 0.0  ;;  %v3533_v63 = vsel %vm6366_vm10, %v3477_v49, 0.0 }
0x10f5   :  { %3542 = vadd.xlane.f32.xlu0 %v3532_v14  ;;  %3568 = vadd.xlane.f32.xlu1 %v3557_v51 }
0x10f6   :  { %3496 = vadd.xlane.f32.xlu2 %v3485_v31 }
0x10f9   :  { %v3462_v35 = vpop.f32.mrf.mxu1 }
0x10fa   :  { %v3478_v7 = vmul.f32 %v3462_v35, %v8360_v8 }
0x10fc   :  { %v3486_v42 = vsel %vm219_vm3, %v3478_v7, 0.0  ;;  %v3558_v10 = vsel %vm227_vm11, %v3478_v7, 0.0  ;;  %v3534_v12 = vsel %vm6366_vm10, %v3478_v7, 0.0  ;;  %v3510_v61 = vsel %vm6358_vm9, %v3478_v7, 0.0 }
0x10fd   :  { %3520 = vadd.xlane.f32.xlu0 %v3509_v25  ;;  %3498 = vadd.xlane.f32.xlu1 %v3486_v42 }
0x10fe   :  { %3544 = vadd.xlane.f32.xlu2 %v3533_v63 }
0x1101   :  { %v3465_v32 = vpop.f32.mrf.mxu1 }
0x1102   :  { %v3479_v26 = vmul.f32 %v3465_v32, %v8369_v46 }
0x1104   :  { %v3511_v16 = vsel %vm6358_vm9, %v3479_v26, 0.0  ;;  %v3487_v5 = vsel %vm219_vm3, %v3479_v26, 0.0  ;;  %v3559_v60 = vsel %vm227_vm11, %v3479_v26, 0.0  ;;  %v3535_v33 = vsel %vm6366_vm10, %v3479_v26, 0.0 }
0x1105   :  { %3570 = vadd.xlane.f32.xlu0 %v3558_v10  ;;  %3546 = vadd.xlane.f32.xlu1 %v3534_v12 }
0x1106   :  { %3522 = vadd.xlane.f32.xlu2 %v3510_v61 }
0x1109   :  { %v3468_v1 = vpop.f32.mrf.mxu1 }
0x110a   :  { %v3480_v47 = vmul.f32 %v3468_v1, %v8384_v21 }
0x110c   :  { %v3512_v40 = vsel %vm6358_vm9, %v3480_v47, 0.0  ;;  %v3536_v23 = vsel %vm6366_vm10, %v3480_v47, 0.0  ;;  %v3560_v15 = vsel %vm227_vm11, %v3480_v47, 0.0  ;;  %v3488_v3 = vsel %vm219_vm3, %v3480_v47, 0.0 }
0x110d   :  { %3524 = vadd.xlane.f32.xlu1 %v3511_v16  ;;  %3500 = vadd.xlane.f32.xlu0 %v3487_v5 }
0x110e   :  { %3572 = vadd.xlane.f32.xlu2 %v3559_v60 }
0x1111   :  { %v3471_v36 = vpop.f32.mrf.mxu1 }
0x1112   :  { %v3481_v48 = vmul.f32 %v3471_v36, %v8397_v22 }
0x1114   :  { %v3513_v55 = vsel %vm6358_vm9, %v3481_v48, 0.0  ;;  %v3561_v45 = vsel %vm227_vm11, %v3481_v48, 0.0  ;;  %v3489_v37 = vsel %vm219_vm3, %v3481_v48, 0.0  ;;  %v3537_v53 = vsel %vm6366_vm10, %v3481_v48, 0.0 }
0x1115   :  { %3548 = vadd.xlane.f32.xlu0 %v3535_v33  ;;  %3526 = vadd.xlane.f32.xlu1 %v3512_v40 }
0x1116   :  { %3550 = vadd.xlane.f32.xlu2 %v3536_v23 }
0x111d   :  { %3574 = vadd.xlane.f32.xlu1 %v3560_v15  ;;  %3502 = vadd.xlane.f32.xlu0 %v3488_v3 }
0x111e   :  { %3528 = vadd.xlane.f32.xlu2 %v3513_v55 }
0x1125   :  { %3576 = vadd.xlane.f32.xlu0 %v3561_v45  ;;  %3504 = vadd.xlane.f32.xlu1 %v3489_v37 }
0x1126   :  { %3552 = vadd.xlane.f32.xlu2 %v3537_v53 }
0x112d   :  { %3514 = vadd.xlane.f32.xlu0 %v3506_v44  ;;  %3540 = vadd.xlane.f32.xlu1 %v3531_v59 }
0x112e   :  { %3566 = vadd.xlane.f32.xlu2 %v3556_v20 }
0x1135   :  { %3538 = vadd.xlane.f32.xlu0 %v3530_v13  ;;  %3564 = vadd.xlane.f32.xlu1 %v3555_v9 }
0x1136   :  { %3562 = vadd.xlane.f32.xlu2 %v3554_v17 }
0x1150   :  { %v9394_v41 = vpop.xlane.xlu2 %3490 }
0x1158   :  { %v9396_v27 = vpop.xlane.xlu1 %3492  ;;  %v9402_v14 = vpop.xlane.xlu2 %3516 }
0x1160   :  { %v9398_v4 = vpop.xlane.xlu1 %3518  ;;  %v9400_v49 = vpop.xlane.xlu0 %3494 }
0x1168   :  { %v9404_v51 = vpop.xlane.xlu0 %3542  ;;  %v3569_v6 = vpop.xlane.xlu1 %3568 }
0x1169   :  { %v3497_v31 = vpop.xlane.xlu2 %3496 }
0x1170   :  { %v3521_v35 = vpop.xlane.xlu0 %3520  ;;  %v3499_v7 = vpop.xlane.xlu1 %3498 }
0x1171   :  { %v3581_v25 = vmax.f32 %v3497_v31, %v3521_v35  ;;  %v3545_v39 = vpop.xlane.xlu2 %3544 }
0x1173   :  { %v3589_v42 = vmax.f32 %v3581_v25, %v3545_v39 }
0x1175   :  { %v3597_v63 = vmax.f32 %v3589_v42, %v3569_v6 }
0x1177   :  { %v3605_v26 = vsub.f32 %v3497_v31, %v3597_v63  ;;  %v3629_v16 = vsub.f32 %v3521_v35, %v3597_v63  ;;  %v3653_v36 = vsub.f32 %v3545_v39, %v3597_v63  ;;  %v3677_v55 = vsub.f32 %v3569_v6, %v3597_v63 }
0x1178   :  { %v3571_v32 = vpop.xlane.xlu0 %3570  ;;  %v3547_v10 = vpop.xlane.xlu1 %3546 }
0x1179   :  { %v3523_v12 = vpop.xlane.xlu2 %3522  ;;  %v3616_v60 = vmul.f32 1.442695, %v3605_v26  ;;  %v3640_v40 = vmul.f32 1.442695, %v3629_v16  ;;  %v3664_v3 = vmul.f32 1.442695, %v3653_v36 }
0x117a   :  { %v3582_v61 = vmax.f32 %v3499_v7, %v3523_v12  ;;  %v3688_v35 = vmul.f32 1.442695, %v3677_v55 }
0x117b   :  { %5874 = vpow2.f32 %v3616_v60 }
0x117c   :  { %v3590_v1 = vmax.f32 %v3582_v61, %v3547_v10  ;;  %5876 = vpow2.f32 %v3640_v40 }
0x117d   :  { %5878 = vpow2.f32 %v3664_v3 }
0x117e   :  { %v3598_v5 = vmax.f32 %v3590_v1, %v3571_v32 }
0x1180   :  { %v3525_v47 = vpop.xlane.xlu1 %3524  ;;  %v3501_v33 = vpop.xlane.xlu0 %3500  ;;  %v3606_v48 = vsub.f32 %v3499_v7, %v3598_v5  ;;  %v3630_v15 = vsub.f32 %v3523_v12, %v3598_v5  ;;  %v3654_v17 = vsub.f32 %v3547_v10, %v3598_v5  ;;  %v3678_v12 = vsub.f32 %v3571_v32, %v3598_v5 }
0x1181   :  { %v3573_v23 = vpop.xlane.xlu2 %3572  ;;  %v3583_v37 = vmax.f32 %v3501_v33, %v3525_v47  ;;  %v9406_v9 = vpop.eup %5874 }
0x1182   :  { %v3618_v45 = vmul.f32 1.442695, %v3606_v48  ;;  %v3642_v53 = vmul.f32 1.442695, %v3630_v15  ;;  %v9408_v31 = vpop.eup %5876  ;;  %v3666_v63 = vmul.f32 1.442695, %v3654_v17 }
0x1183   :  { %v3701_v42 = vadd.f32 %v9408_v31, %v9406_v9  ;;  %v9412_v1 = vpop.eup %5878  ;;  %v3690_v32 = vmul.f32 1.442695, %v3678_v12 }
0x1184   :  { %5880 = vpow2.f32 %v3618_v45 }
0x1185   :  { %5882 = vpow2.f32 %v3642_v53  ;;  %v3709_v15 = vadd.f32 %v9412_v1, %v3701_v42 }
0x1186   :  { %5884 = vpow2.f32 %v3688_v35 }
0x1188   :  { %v3549_v44 = vpop.xlane.xlu0 %3548  ;;  %v3527_v59 = vpop.xlane.xlu1 %3526 }
0x1189   :  { %v3591_v20 = vmax.f32 %v3583_v37, %v3549_v44  ;;  %v3551_v13 = vpop.xlane.xlu2 %3550 }
0x118a   :  { %v9414_v40 = vpop.eup %5880 }
0x118b   :  { %v3599_v7 = vmax.f32 %v3591_v20, %v3573_v23  ;;  %v9416_v48 = vpop.eup %5882 }
0x118c   :  { %v9419_v55 = vpop.eup %5884 }
0x118d   :  { %v3607_v25 = vsub.f32 %v3501_v33, %v3599_v7  ;;  %v3631_v39 = vsub.f32 %v3525_v47, %v3599_v7  ;;  %v3655_v6 = vsub.f32 %v3549_v44, %v3599_v7  ;;  %v3679_v10 = vsub.f32 %v3573_v23, %v3599_v7 }
0x118e   :  { %v3702_v23 = vadd.f32 %v9416_v48, %v9414_v40  ;;  %v3717_v37 = vadd.f32 %v9419_v55, %v3709_v15  ;;  %v3580_v15 = vmax.f32 %v9400_v49, %v9398_v4 }
0x118f   :  { %v3620_v61 = vmul.f32 1.442695, %v3607_v25  ;;  %v3644_v26 = vmul.f32 1.442695, %v3631_v39  ;;  %v3668_v36 = vmul.f32 1.442695, %v3655_v6 }
0x1190   :  { %v3575_v16 = vpop.xlane.xlu1 %3574  ;;  %v3503_v60 = vpop.xlane.xlu0 %3502  ;;  %v3692_v3 = vmul.f32 1.442695, %v3679_v10 }
0x1191   :  { %5886 = vpow2.f32 %v3620_v61  ;;  %v3584_v33 = vmax.f32 %v3503_v60, %v3527_v59  ;;  %v3529_v47 = vpop.xlane.xlu2 %3528 }
0x1192   :  { %5888 = vpow2.f32 %v3666_v63 }
0x1193   :  { %5890 = vpow2.f32 %v3644_v26  ;;  %v3592_v5 = vmax.f32 %v3584_v33, %v3551_v13 }
0x1194   :  { %5892 = vpow2.f32 %v3668_v36 }
0x1195   :  { %v3600_v45 = vmax.f32 %v3592_v5, %v3575_v16  ;;  %5894 = vpow2.f32 %v3690_v32 }
0x1196   :  { %5896 = vpow2.f32 %v3692_v3 }
0x1197   :  { %v9424_v53 = vpop.eup %5886  ;;  %v3608_v44 = vsub.f32 %v3503_v60, %v3600_v45  ;;  %v3632_v20 = vsub.f32 %v3527_v59, %v3600_v45  ;;  %v3656_v17 = vsub.f32 %v3551_v13, %v3600_v45  ;;  %v3680_v7 = vsub.f32 %v3575_v16, %v3600_v45 }
0x1198   :  { %v9426_v35 = vpop.eup %5888  ;;  %v3577_v25 = vpop.xlane.xlu0 %3576  ;;  %5898 = vrcp.f32 %v3717_v37 }
0x1199   :  { %v3505_v39 = vpop.xlane.xlu1 %3504  ;;  %v9428_v6 = vpop.eup %5890  ;;  %v3710_v42 = vadd.f32 %v9426_v35, %v3702_v23  ;;  %v3622_v63 = vmul.f32 1.442695, %v3608_v44  ;;  %v3646_v12 = vmul.f32 1.442695, %v3632_v20  ;;  %v3670_v10 = vmul.f32 1.442695, %v3656_v17 }
0x119a   :  { %v3553_v61 = vpop.xlane.xlu2 %3552  ;;  %v3703_v26 = vadd.f32 %v9428_v6, %v9424_v53  ;;  %v3585_v59 = vmax.f32 %v3505_v39, %v3529_v47  ;;  %v9433_v13 = vpop.eup %5892  ;;  %v3694_v36 = vmul.f32 1.442695, %v3680_v7  ;;  %v3588_v23 = vmax.f32 %v3580_v15, %v9404_v51 }
0x119b   :  { %5900 = vpow2.f32 %v3622_v63  ;;  %v9435_v60 = vpop.eup %5894 }
0x119c   :  { %v3711_v16 = vadd.f32 %v9433_v13, %v3703_v26  ;;  %5902 = vpow2.f32 %v3646_v12  ;;  %v3593_v33 = vmax.f32 %v3585_v59, %v3553_v61  ;;  %v3718_v32 = vadd.f32 %v9435_v60, %v3710_v42  ;;  %v9441_v5 = vpop.eup %5896 }
0x119d   :  { %5904 = vpow2.f32 %v3670_v10  ;;  %v3579_v42 = vmax.f32 %v9396_v27, %v9402_v14 }
0x119e   :  { %v3601_v3 = vmax.f32 %v3593_v33, %v3577_v25  ;;  %v3719_v45 = vadd.f32 %v9441_v5, %v3711_v16  ;;  %v5899_v37 = vpop.eup %5898  ;;  %5906 = vpow2.f32 %v3694_v36 }
0x119f   :  { %5908 = vrcp.f32 %v3718_v32 }
0x11a0   :  { %v3609_v44 = vsub.f32 %v3505_v39, %v3601_v3  ;;  %v3633_v20 = vsub.f32 %v3529_v47, %v3601_v3  ;;  %v3657_v17 = vsub.f32 %v3553_v61, %v3601_v3  ;;  %v9445_v7 = vpop.xlane.xlu0 %3514  ;;  %v3681_v26 = vsub.f32 %v3577_v25, %v3601_v3 }
0x11a1   :  { %v9447_v63 = vpop.xlane.xlu1 %3540  ;;  %v9449_v12 = vpop.eup %5900  ;;  %v9456_v47 = vmul.f32 %v5899_v37, %v9412_v1  ;;  %5910 = vrcp.f32 %v3719_v45  ;;  %v3733_v1 = vmul.f32 %v5899_v37, %v9406_v9 }
0x11a2   :  { %v3567_v10 = vpop.xlane.xlu2 %3566  ;;  %v9453_v59 = vpop.eup %5902  ;;  %v3624_v16 = vmul.f32 1.442695, %v3609_v44  ;;  %v3648_v33 = vmul.f32 1.442695, %v3633_v20  ;;  %v3672_v36 = vmul.f32 1.442695, %v3657_v17 }
0x11a3   :  { %v3596_v39 = vmax.f32 %v3588_v23, %v3567_v10  ;;  %v3704_v61 = vadd.f32 %v9453_v59, %v9449_v12  ;;  %v3696_v15 = vmul.f32 1.442695, %v3681_v26  ;;  %v9460_v11 = vpop.eup %5904  ;;  %v9468_v23 = vmul.f32 %v5899_v37, %v9408_v31 }
0x11a4   :  { %5912 = vpow2.f32 %v3624_v16  ;;  %v9470_v45 = vpop.eup %5906 }
0x11a5   :  { %v3604_v25 = vsub.f32 %v9400_v49, %v3596_v39  ;;  %v3628_v32 = vsub.f32 %v9398_v4, %v3596_v39  ;;  %v3652_v3 = vsub.f32 %v9404_v51, %v3596_v39  ;;  %v3712_v44 = vadd.f32 %v9460_v11, %v3704_v61  ;;  %v9472_v16 = vpop.eup %5908 }
0x11a6   :  { %5914 = vpow2.f32 %v3648_v33  ;;  %v3676_v26 = vsub.f32 %v3567_v10, %v3596_v39  ;;  %v3578_v49 = vmax.f32 %v9394_v41, %v9445_v7  ;;  %v3587_v51 = vmax.f32 %v3579_v42, %v9447_v63 }
0x11a7   :  { %5916 = vpow2.f32 %v3672_v36  ;;  %v3614_v20 = vmul.f32 1.442695, %v3604_v25  ;;  %v3638_v17 = vmul.f32 1.442695, %v3628_v32  ;;  %v3720_v4 = vadd.f32 %v9470_v45, %v3712_v44  ;;  %v9480_v61 = vpop.eup %5910 }
0x11a8   :  { %5918 = vpow2.f32 %v3696_v15  ;;  %v3662_v9 = vmul.f32 1.442695, %v3652_v3  ;;  %v3539_v31 = vpop.xlane.xlu0 %3538  ;;  %v9484_v39 = vmul.f32 %v5899_v37, %v9419_v55  ;;  %v3686_v25 = vmul.f32 1.442695, %v3676_v26 }
0x11a9   :  { %5920 = vpow2.f32 %v3614_v20  ;;  %v9478_v33 = vpop.xlane.xlu1 %3564  ;;  %v3586_v36 = vmax.f32 %v3578_v49, %v3539_v31  ;;  %v9490_v42 = vsel %vm219_vm3, %v3733_v1, 0.0  ;;  %v3734_v55 = vmul.f32 %v9472_v16, %v9414_v40 }
0x11aa   :  { %5922 = vrcp.f32 %v3720_v4  ;;  %v3595_v10 = vmax.f32 %v3587_v51, %v9478_v33  ;;  %v9486_v15 = vpop.eup %5912  ;;  %v3563_v32 = vpop.xlane.xlu2 %3562  ;;  %v3757_v37 = vsel %vm6358_vm9, %v9468_v23, 0.0  ;;  %v3735_v26 = vmul.f32 %v9480_v61, %v9424_v53 }
0x11ab   :  { %5924 = vpow2.f32 %v3638_v17  ;;  %v3594_v20 = vmax.f32 %v3586_v36, %v3563_v32  ;;  %v3750_v49 = vmul.f32 %v9472_v16, %v9416_v48 }
0x11ac   :  { %v9495_v44 = vpop.eup %5914  ;;  %v3603_v4 = vsub.f32 %v9396_v27, %v3595_v10  ;;  %5926 = vpow2.f32 %v3662_v9  ;;  %v3627_v24 = vsub.f32 %v9402_v14, %v3595_v10  ;;  %v3651_v48 = vsub.f32 %v9447_v63, %v3595_v10 }
0x11ad   :  { %v9503_v17 = vpop.eup %5916  ;;  %v3705_v1 = vadd.f32 %v9495_v44, %v9486_v15  ;;  %v3602_v40 = vsub.f32 %v9394_v41, %v3594_v20  ;;  %v3626_v51 = vsub.f32 %v9445_v7, %v3594_v20  ;;  %v3650_v36 = vsub.f32 %v3539_v31, %v3594_v20 }
0x11ae   :  { %v9511_v27 = vpop.eup %5918  ;;  %v3674_v23 = vsub.f32 %v3563_v32, %v3594_v20  ;;  %5928 = vpow2.f32 %v3686_v25  ;;  %v3612_v9 = vmul.f32 1.442695, %v3603_v4  ;;  %v3751_v41 = vmul.f32 %v9480_v61, %v9428_v6 }
0x11af   :  { %v9515_v3 = vpop.eup %5920  ;;  %v3713_v58 = vadd.f32 %v9503_v17, %v3705_v1  ;;  %v3610_v38 = vmul.f32 1.442695, %v3602_v40  ;;  %v3634_v19 = vmul.f32 1.442695, %v3626_v51  ;;  %v3658_v32 = vmul.f32 1.442695, %v3650_v36 }
0x11b0   :  { %v5923_v53 = vpop.eup %5922  ;;  %5930 = vpow2.f32 %v3612_v9  ;;  %v3682_v14 = vmul.f32 1.442695, %v3674_v23  ;;  %v3774_v6 = vmul.f32 %v9472_v16, %v9426_v35  ;;  %v3636_v63 = vmul.f32 1.442695, %v3627_v24 }
0x11b1   :  { %v9522_v30 = vpop.eup %5924  ;;  %v3736_v7 = vmul.f32 %v5923_v53, %v9449_v12  ;;  %v3721_v31 = vadd.f32 %v9511_v27, %v3713_v58  ;;  %5932 = vpow2.f32 %v3610_v38  ;;  %v3752_v20 = vmul.f32 %v5923_v53, %v9453_v59 }
0x11b2   :  { %v3700_v25 = vadd.f32 %v9522_v30, %v9515_v3  ;;  %v9529_v4 = vpop.eup %5926  ;;  %v3675_v12 = vsub.f32 %v9478_v33, %v3595_v10  ;;  %v3742_v1 = vsel %vm219_vm3, %v3734_v55, 0.0  ;;  %v3758_v38 = vsel %vm6358_vm9, %v3750_v49, 0.0 }
0x11b3   :  { %5934 = vrcp.f32 %v3721_v31  ;;  %v3660_v59 = vmul.f32 1.442695, %v3651_v48  ;;  %v3744_v35 = vsel %vm219_vm3, %v3736_v7, 0.0  ;;  %v3760_v24 = vsel %vm6358_vm9, %v3752_v20, 0.0 }
0x11b4   :  { %v3708_v58 = vadd.f32 %v9529_v4, %v3700_v25  ;;  %5936 = vpow2.f32 %v3634_v19  ;;  %v9539_v40 = vpop.eup %5928  ;;  %v3743_v19 = vsel %vm219_vm3, %v3735_v26, 0.0  ;;  %v3759_v10 = vsel %vm6358_vm9, %v3751_v41, 0.0 }
0x11b5   :  { %5938 = vpow2.f32 %v3658_v32  ;;  %v3684_v49 = vmul.f32 1.442695, %v3675_v12  ;;  %v3776_v51 = vmul.f32 %v5923_v53, %v9460_v11  ;;  %v3766_v36 = vadd.f32 %v3758_v38, %v3742_v1 }
0x11b6   :  { %v3716_v33 = vadd.f32 %v9539_v40, %v3708_v58  ;;  %5940 = vpow2.f32 %v3682_v14  ;;  %v9550_v55 = vpop.eup %5930  ;;  %v3768_v9 = vadd.f32 %v3760_v24, %v3744_v35  ;;  %v3782_v48 = vsel %vm6366_vm10, %v3774_v6, 0.0 }
0x11b7   :  { %5942 = vpow2.f32 %v3636_v63  ;;  %v9553_v23 = vpop.eup %5932  ;;  %v3765_v7 = vadd.f32 %v3757_v37, %v9490_v42  ;;  %v3775_v41 = vmul.f32 %v9480_v61, %v9433_v13  ;;  %v3767_v31 = vadd.f32 %v3759_v10, %v3743_v19 }
0x11b8   :  { %5944 = vrcp.f32 %v3716_v33  ;;  %v3798_v32 = vmul.f32 %v9472_v16, %v9435_v60  ;;  %v3800_v6 = vmul.f32 %v5923_v53, %v9470_v45  ;;  %v3784_v13 = vsel %vm6366_vm10, %v3776_v51, 0.0 }
0x11b9   :  { %v5935_v26 = vpop.eup %5934  ;;  %5946 = vpow2.f32 %v3660_v59  ;;  %v3790_v37 = vadd.f32 %v3782_v48, %v3766_v36  ;;  %v3783_v58 = vsel %vm6366_vm10, %v3775_v41, 0.0  ;;  %v3799_v1 = vmul.f32 %v9480_v61, %v9441_v5 }
0x11ba   :  { %v5937_v11 = vpop.eup %5936  ;;  %v3737_v25 = vmul.f32 %v5935_v26, %v9486_v15  ;;  %v3753_v14 = vmul.f32 %v5935_v26, %v9495_v44  ;;  %v3777_v20 = vmul.f32 %v5935_v26, %v9503_v17  ;;  %5948 = vpow2.f32 %v3684_v49 }
0x11bb   :  { %v5939_v63 = vpop.eup %5938  ;;  %v3698_v42 = vadd.f32 %v5937_v11, %v9553_v23  ;;  %v3801_v15 = vmul.f32 %v5935_v26, %v9511_v27  ;;  %v3792_v44 = vadd.f32 %v3784_v13, %v3768_v9  ;;  %v3808_v24 = vsel %vm227_vm11, %v3800_v6, 0.0 }
0x11bc   :  { %v9569_v12 = vpop.eup %5940  ;;  %v3745_v60 = vsel %vm219_vm3, %v3737_v25, 0.0  ;;  %v3761_v16 = vsel %vm6358_vm9, %v3753_v14, 0.0  ;;  %v3785_v35 = vsel %vm6366_vm10, %v3777_v20, 0.0  ;;  %v3791_v27 = vadd.f32 %v3783_v58, %v3767_v31 }
0x11bd   :  { %v5943_v45 = vpop.eup %5942  ;;  %v3769_v17 = vadd.f32 %v3761_v16, %v3745_v60  ;;  %v3706_v53 = vadd.f32 %v5939_v63, %v3698_v42  ;;  %v3809_v5 = vsel %vm227_vm11, %v3801_v15, 0.0  ;;  %v3816_v61 = vadd.f32 %v3808_v24, %v3792_v44 }
0x11be   :  { %v5945_v38 = vpop.eup %5944  ;;  %v3699_v59 = vadd.f32 %v5943_v45, %v9550_v55  ;;  %v3806_v60 = vsel %vm227_vm11, %v3798_v32, 0.0 }
0x11bf   :  { %v5947_v33 = vpop.eup %5946  ;;  %v3714_v19 = vadd.f32 %v9569_v12, %v3706_v53  ;;  %v3793_v10 = vadd.f32 %v3785_v35, %v3769_v17  ;;  %v3732_v49 = vmul.f32 %v5945_v38, %v9515_v3  ;;  %v3748_v51 = vmul.f32 %v5945_v38, %v9522_v30 }
0x11c0   :  { %v3707_v36 = vadd.f32 %v5947_v33, %v3699_v59  ;;  %v3772_v9 = vmul.f32 %v5945_v38, %v9529_v4  ;;  %v5949_v48 = vpop.eup %5948  ;;  %v3807_v30 = vsel %vm227_vm11, %v3799_v1, 0.0  ;;  %v10527_v3 = vsel %vm6366_vm10, %v9456_v47, 0.0 }
0x11c1   :  { %5950 = vrcp.f32 %v3714_v19  ;;  %v3817_v26 = vadd.f32 %v3809_v5, %v3793_v10  ;;  %v3740_v41 = vsel %vm219_vm3, %v3732_v49, 0.0  ;;  %v3756_v31 = vsel %vm6358_vm9, %v3748_v51, 0.0 }
0x11c2   :  { %v3715_v25 = vadd.f32 %v5949_v48, %v3707_v36  ;;  %v3789_v14 = vadd.f32 %v10527_v3, %v3765_v7  ;;  %v3764_v20 = vadd.f32 %v3756_v31, %v3740_v41  ;;  %v3815_v6 = vadd.f32 %v3807_v30, %v3791_v27 }
0x11c3   :  { %v3825_v4 = vmul.f32 %v3817_v26, %v8397_v22  ;;  %v3780_v42 = vsel %vm6366_vm10, %v3772_v9, 0.0  ;;  %v3796_v13 = vmul.f32 %v5945_v38, %v9539_v40  ;;  %v3824_v15 = vmul.f32 %v3816_v61, %v8384_v21 }
0x11c4   :  { %5952 = vrcp.f32 %v3715_v25  ;;  %v3788_v16 = vadd.f32 %v3780_v42, %v3764_v20  ;;  %v3814_v44 = vadd.f32 %v3806_v60, %v3790_v37  ;;  %v3805_v47 = vsel %vm227_vm11, %v9484_v39, 0.0 }
0x11c5   :  { %3834 = vmatpush.msra.mxu3 %v3825_v4  ;;  %v3813_v22 = vadd.f32 %v3805_v47, %v3789_v14  ;;  %v3823_v17 = vmul.f32 %v3815_v6, %v8369_v46  ;;  %v3804_v40 = vsel %vm227_vm11, %v3796_v13, 0.0 }
0x11c6   :  { %v3812_v53 = vadd.f32 %v3804_v40, %v3788_v16  ;;  %v3822_v21 = vmul.f32 %v3814_v44, %v8360_v8 }
0x11c7   :  { %v5951_v7 = vpop.eup %5950  ;;  %3835 = vmatpush.msra.mxu3 %v3824_v15  ;;  %v3821_v38 = vmul.f32 %v3813_v22, %v8351_v57 }
0x11c8   :  { %v3730_v32 = vmul.f32 %v5951_v7, %v9553_v23  ;;  %v3746_v58 = vmul.f32 %v5951_v7, %v5937_v11  ;;  %v3770_v37 = vmul.f32 %v5951_v7, %v5939_v63  ;;  %v3794_v23 = vmul.f32 %v5951_v7, %v9569_v12 }
0x11c9   :  { %3836 = vmatpush.msra.mxu3 %v3823_v17  ;;  %v3820_v11 = vmul.f32 %v3812_v53, %v8344_v52 }
0x11ca   :  { %v5953_v1 = vpop.eup %5952  ;;  %v3738_v39 = vsel %vm219_vm3, %v3730_v32, 0.0  ;;  %v3754_v46 = vsel %vm6358_vm9, %v3746_v58, 0.0  ;;  %v3778_v19 = vsel %vm6366_vm10, %v3770_v37, 0.0  ;;  %v3802_v52 = vsel %vm227_vm11, %v3794_v23, 0.0 }
0x11cb   :  { %3837 = vmatpush.msra.mxu3 %v3822_v21  ;;  %v3731_v59 = vmul.f32 %v5953_v1, %v9550_v55  ;;  %v3747_v35 = vmul.f32 %v5953_v1, %v5943_v45  ;;  %v3771_v24 = vmul.f32 %v5953_v1, %v5947_v33  ;;  %v3762_v8 = vadd.f32 %v3754_v46, %v3738_v39 }
0x11cc   :  { %v3795_v27 = vmul.f32 %v5953_v1, %v5949_v48 }
0x11cd   :  { %3838 = vmatpush.msra.mxu3 %v3821_v38  ;;  %v3739_v57 = vsel %vm219_vm3, %v3731_v59, 0.0  ;;  %v3755_v63 = vsel %vm6358_vm9, %v3747_v35, 0.0  ;;  %v3786_v55 = vadd.f32 %v3778_v19, %v3762_v8  ;;  %v3779_v12 = vsel %vm6366_vm10, %v3771_v24, 0.0 }
0x11ce   :  { %v3763_v10 = vadd.f32 %v3755_v63, %v3739_v57  ;;  %v3803_v49 = vsel %vm227_vm11, %v3795_v27, 0.0 }
0x11cf   :  { %3839 = vmatpush.msra.mxu3 %v3820_v11  ;;  %v3810_v33 = vadd.f32 %v3802_v52, %v3786_v55 }
0x11d0   :  { %v3787_v45 = vadd.f32 %v3779_v12, %v3763_v10 }
0x11d1   :  { %v3818_v5 = vmul.f32 %v3810_v33, %v8325_v34 }
0x11d2   :  { %v3811_v51 = vadd.f32 %v3803_v49, %v3787_v45 }
0x11d4   :  { %v3819_v36 = vmul.f32 %v3811_v51, %v8333_v56 }
0x11d6   :  { %3840 = vmatpush.msra.mxu3 %v3819_v36 }
0x11d8   :  { %3841 = vmatpush.msra.mxu3 %v3818_v5 }
0x11d9   :  { %5251 = vmatmul.msk.f32.vlgmr.msra.gmra.mxu3 %vm10528_vm15, %v6990_v43 }
0x11e1   :  { %5252 = vmatmul.msk.f32.gmra.mxu3 %vm10529_vm0, %v6994_v50 }
0x125c   :  { %v3843_v61 = vpop.f32.mrf.mxu3 }
0x125d   :  { %v9643_v9 = vadd.f32 %v3843_v61, %v10488_v29 }
0x125f   :  { %v3849_v48 = vmul.f32 %v9643_v9, %v9643_v9 }
0x1261   :  { %v3881_v56 = vsel %vm6358_vm9, %v3849_v48, 0.0  ;;  %v3851_v34 = vsel %vm219_vm3, %v3849_v48, 0.0  ;;  %v3913_v30 = vsel %vm6366_vm10, %v3849_v48, 0.0  ;;  %v3945_v14 = vsel %vm227_vm11, %v3849_v48, 0.0 }
0x1262   :  { %3883 = vadd.xlane.f32.xlu0 %v3881_v56  ;;  %3853 = vadd.xlane.f32.xlu2 %v3851_v34 }
0x1264   :  { %v3846_v26 = vpop.f32.mrf.mxu3 }
0x1265   :  { %v9652_v41 = vadd.f32 %v3846_v26, %v10489_v28 }
0x1267   :  { %v3850_v31 = vmul.f32 %v9652_v41, %v9652_v41 }
0x1269   :  { %v3882_v29 = vsel %vm6358_vm9, %v3850_v31, 0.0  ;;  %v3852_v25 = vsel %vm219_vm3, %v3850_v31, 0.0  ;;  %v3914_v3 = vsel %vm6366_vm10, %v3850_v31, 0.0  ;;  %v3946_v28 = vsel %vm227_vm11, %v3850_v31, 0.0 }
0x126a   :  { %3885 = vadd.xlane.f32.xlu1 %v3882_v29  ;;  %3855 = vadd.xlane.f32.xlu0 %v3852_v25 }
0x126b   :  { %3915 = vadd.xlane.f32.xlu2 %v3913_v30 }
0x1272   :  { %3917 = vadd.xlane.f32.xlu1 %v3914_v3  ;;  %3949 = vadd.xlane.f32.xlu0 %v3946_v28 }
0x127a   :  { %3947 = vadd.xlane.f32.xlu1 %v3945_v14 }
0x12d5   :  { %v3884_v20 = vpop.xlane.xlu0 %3883  ;;  %v3854_v4 = vpop.xlane.xlu2 %3853 }
0x12d6   :  { %v9668_v6 = vmax.f32 %v3884_v20, 1e-24  ;;  %v9670_v42 = vmax.f32 %v3854_v4, 1e-24 }
0x12d8   :  { %5954 = vrsqrt.f32 %v9668_v6  ;;  %vm3895_vm12 = vweird.f32 %v9668_v6  ;;  %vm3865_vm15 = vweird.f32 %v9670_v42 }
0x12d9   :  { %5956 = vrsqrt.f32 %v9670_v42 }
0x12dd   :  { %v3886_v13 = vpop.xlane.xlu1 %3885  ;;  %v3856_v60 = vpop.xlane.xlu0 %3855 }
0x12de   :  { %v3888_v16 = vmax.f32 %v3886_v13, 1e-24  ;;  %v3858_v15 = vmax.f32 %v3856_v60, 1e-24  ;;  %v3916_v44 = vpop.xlane.xlu2 %3915  ;;  %v9676_v22 = vpop.eup %5954 }
0x12df   :  { %v9674_v47 = vmax.f32 %v3916_v44, 1e-24  ;;  %v9678_v7 = vpop.eup %5956  ;;  %v3890_v17 = vmul.f32 %v9676_v22, %v9668_v6  ;;  %vm3896_vm8 = vweird.f32 %v9676_v22 }
0x12e0   :  { %5958 = vrsqrt.f32 %v3888_v16  ;;  %v3860_v40 = vmul.f32 %v9678_v7, %v9670_v42  ;;  %vm3905_vm4 = vweird.f32 %v3888_v16  ;;  %vm3875_vm2 = vweird.f32 %v3858_v15 }
0x12e1   :  { %5960 = vrsqrt.f32 %v3858_v15  ;;  %v3891_v46 = vmul.f32 %v9676_v22, %v3890_v17  ;;  %vm3866_vm13 = vweird.f32 %v9678_v7 }
0x12e2   :  { %5962 = vrsqrt.f32 %v9674_v47  ;;  %v3861_v35 = vmul.f32 %v9678_v7, %v3860_v40 }
0x12e3   :  { %v3892_v63 = vmul.f32 0.5, %v3891_v46 }
0x12e4   :  { %v3862_v19 = vmul.f32 0.5, %v3861_v35 }
0x12e5   :  { %v3918_v53 = vpop.xlane.xlu1 %3917  ;;  %v3950_v32 = vpop.xlane.xlu0 %3949  ;;  %v3893_v36 = vsub.f32 1.5, %v3892_v63 }
0x12e6   :  { %v5959_v58 = vpop.eup %5958  ;;  %v9685_v21 = vmax.f32 %v3918_v53, 1e-24  ;;  %v9687_v38 = vmax.f32 %v3950_v32, 1e-24  ;;  %v3863_v48 = vsub.f32 1.5, %v3862_v19 }
0x12e7   :  { %v5961_v37 = vpop.eup %5960  ;;  %v3900_v1 = vmul.f32 %v5959_v58, %v3888_v16  ;;  %vm3906_vm7 = vweird.f32 %v5959_v58  ;;  %v3894_v28 = vmul.f32 %v9676_v22, %v3893_v36 }
0x12e8   :  { %v9689_v39 = vpop.eup %5962  ;;  %v3870_v59 = vmul.f32 %v5961_v37, %v3858_v15  ;;  %5964 = vrsqrt.f32 %v9685_v21  ;;  %vm3876_vm6 = vweird.f32 %v5961_v37  ;;  %vm9702_vm1 = vmor %vm3905_vm4, %vm3906_vm7  ;;  %v3864_v20 = vmul.f32 %v9678_v7, %v3863_v48 }
0x12e9   :  { %v3901_v24 = vmul.f32 %v5959_v58, %v3900_v1  ;;  %v3922_v23 = vmul.f32 %v9689_v39, %v9674_v47  ;;  %5966 = vrsqrt.f32 %v9687_v38  ;;  %vm9707_vm5 = vmor %vm3875_vm2, %vm3876_vm6  ;;  %vm3928_vm6 = vweird.f32 %v9689_v39 }
0x12ea   :  { %v3871_v11 = vmul.f32 %v5961_v37, %v3870_v59  ;;  %vm9723_vm7 = vmor %vm3895_vm12, %vm3896_vm8  ;;  %vm3927_vm2 = vweird.f32 %v9674_v47 }
0x12eb   :  { %v3902_v8 = vmul.f32 0.5, %v3901_v24  ;;  %v3923_v57 = vmul.f32 %v9689_v39, %v3922_v23  ;;  %vm9732_vm4 = vmor %vm3865_vm15, %vm3866_vm13  ;;  %v3898_v53 = vsel %vm9723_vm7, %v9676_v22, %v3894_v28  ;;  %vm3969_vm13 = vweird.f32 %v9687_v38 }
0x12ec   :  { %v3872_v27 = vmul.f32 0.5, %v3871_v11  ;;  %vm3929_vm12 = vmor %vm3927_vm2, %vm3928_vm6 }
0x12ed   :  { %v3903_v10 = vsub.f32 1.5, %v3902_v8  ;;  %v3948_v55 = vpop.xlane.xlu1 %3947  ;;  %v3924_v49 = vmul.f32 0.5, %v3923_v57 }
0x12ee   :  { %v5965_v12 = vpop.eup %5964  ;;  %v3873_v52 = vsub.f32 1.5, %v3872_v27  ;;  %v9698_v45 = vmax.f32 %v3948_v55, 1e-24  ;;  %v5348_v27 = vld [vmem:[%s10338_s7 + $0x1] ss:$0 sm:$0xff] }
0x12ef   :  { %v3904_v33 = vmul.f32 %v5959_v58, %v3903_v10  ;;  %v3932_v51 = vmul.f32 %v5965_v12, %v9685_v21  ;;  %v5967_v61 = vpop.eup %5966  ;;  %v3925_v30 = vsub.f32 1.5, %v3924_v49  ;;  %vm3938_vm0 = vweird.f32 %v5965_v12 }
0x12f0   :  { %v3874_v5 = vmul.f32 %v5961_v37, %v3873_v52  ;;  %5968 = vrsqrt.f32 %v9698_v45  ;;  %v3964_v31 = vmul.f32 %v5967_v61, %v9687_v38  ;;  %vm3959_vm7 = vweird.f32 %v9698_v45  ;;  %v5349_v52 = vld [vmem:[%s10339_s8 + $0x1] ss:$0 sm:$0xff] }
0x12f1   :  { %v3933_v34 = vmul.f32 %v5965_v12, %v3932_v51  ;;  %v3908_v29 = vsel %vm9702_vm1, %v5959_v58, %v3904_v33  ;;  %v3926_v44 = vmul.f32 %v9689_v39, %v3925_v30  ;;  %vm3937_vm1 = vweird.f32 %v9685_v21  ;;  %v10539_v51 = vld [vmem:[#allocation19_spill] sm:$0xff] }
0x12f2   :  { %v3878_v25 = vsel %vm9707_vm5, %v5961_v37, %v3874_v5  ;;  %v3965_v14 = vmul.f32 %v5967_v61, %v3964_v31  ;;  %v3910_v16 = vsel %vm6358_vm9, %v3908_v29, 0.0  ;;  %vm3939_vm8 = vmor %vm3937_vm1, %vm3938_vm0  ;;  %vm3970_vm5 = vweird.f32 %v5967_v61 }
0x12f3   :  { %v3934_v3 = vmul.f32 0.5, %v3933_v34  ;;  %v3880_v6 = vsel %vm219_vm3, %v3878_v25, 0.0  ;;  %v3868_v58 = vsel %vm9732_vm4, %v9678_v7, %v3864_v20  ;;  %v3930_v47 = vsel %vm3929_vm12, %v9689_v39, %v3926_v44  ;;  %vm3971_vm15 = vmor %vm3969_vm13, %vm3970_vm5 }
0x12f4   :  { %v3966_v15 = vmul.f32 0.5, %v3965_v14  ;;  %v3912_v37 = vadd.f32 %v3910_v16, %v3880_v6  ;;  %v3909_v7 = vsel %vm6358_vm9, %v3898_v53, 0.0  ;;  %v3879_v24 = vsel %vm219_vm3, %v3868_v58, 0.0 }
0x12f5   :  { %v3935_v4 = vsub.f32 1.5, %v3934_v3  ;;  %v3941_v38 = vsel %vm6366_vm10, %v3930_v47, 0.0  ;;  %v3911_v39 = vadd.f32 %v3909_v7, %v3879_v24 }
0x12f6   :  { %v5969_v13 = vpop.eup %5968  ;;  %v3967_v32 = vsub.f32 1.5, %v3966_v15 }
0x12f7   :  { %v3936_v17 = vmul.f32 %v5965_v12, %v3935_v4  ;;  %v3954_v40 = vmul.f32 %v5969_v13, %v9698_v45  ;;  %vm3960_vm0 = vweird.f32 %v5969_v13  ;;  %v3943_v19 = vadd.f32 %v3941_v38, %v3911_v39 }
0x12f8   :  { %v3968_v59 = vmul.f32 %v5967_v61, %v3967_v32  ;;  %vm3961_vm9 = vmor %vm3959_vm7, %vm3960_vm0 }
0x12f9   :  { %v3940_v1 = vsel %vm3939_vm8, %v5965_v12, %v3936_v17  ;;  %v3955_v46 = vmul.f32 %v5969_v13, %v3954_v40  ;;  %v10538_v12 = vld [vmem:[#allocation18_spill] sm:$0xff] }
0x12fa   :  { %v3942_v21 = vsel %vm6366_vm10, %v3940_v1, 0.0  ;;  %v3972_v23 = vsel %vm3971_vm15, %v5967_v61, %v3968_v59  ;;  %vm10540_vm10 = vcmp.ge.s32.totalorder %v6341_v54, 64 }
0x12fb   :  { %v3944_v22 = vadd.f32 %v3942_v21, %v3912_v37  ;;  %v3956_v35 = vmul.f32 0.5, %v3955_v46  ;;  %v3974_v11 = vsel %vm227_vm11, %v3972_v23, 0.0  ;;  %vm10543_vm1 = vmmov %vm10540_vm10 }
0x12fc   :  { %vm10544_vm0 = vmmov %vm10543_vm1 }
0x12fd   :  { %v3957_v8 = vsub.f32 1.5, %v3956_v35  ;;  %v3976_v57 = vadd.f32 %v3974_v11, %v3944_v22 }
0x12ff   :  { %v3958_v63 = vmul.f32 %v5969_v13, %v3957_v8  ;;  %v3978_v0 = vmul.f32 %v3976_v57, %v9652_v41 }
0x1301   :  { %v3962_v10 = vsel %vm3961_vm9, %v5969_v13, %v3958_v63  ;;  %v3980_v2 = vmul.f32 %v3978_v0, %v10538_v12 }
0x1302   :  { %v3973_v55 = vsel %vm227_vm11, %v3962_v10, 0.0  ;;  %vm10541_vm11 = vcmp.lt.s32.totalorder %v6341_v54, 64 }
0x1303   :  { %v3975_v33 = vadd.f32 %v3973_v55, %v3943_v19  ;;  %v3987_v45 = vmul.f32 %v5348_v27, %v3980_v2  ;;  %vm10542_vm4 = vmmov %vm10541_vm11 }
0x1304   :  { %vm10545_vm7 = vmmov %vm10542_vm4 }
0x1305   :  { %v3977_v41 = vmul.f32 %v3975_v33, %v9643_v9  ;;  %v3994_v49 = vadd.f32 %v5349_v52, %v3987_v45 }
0x1307   :  { %v3979_v36 = vmul.f32 %v3977_v41, %v10539_v51  ;;  %v3998_v5 = vmin.f32 %v3994_v49, 0.0  ;;  %vm3996_vm3 = vcmp.gt.f32.partialorder %v3994_v49, 0.0 }
0x1309   :  { %v3986_v61 = vmul.f32 %v5348_v27, %v3979_v36  ;;  %v4001_v48 = vmul.f32 1.442695, %v3998_v5 }
0x130b   :  { %v3993_v56 = vadd.f32 %v5349_v52, %v3986_v61  ;;  %5970 = vpow2.f32 %v4001_v48 }
0x130d   :  { %v3997_v34 = vmin.f32 %v3993_v56, 0.0  ;;  %vm3995_vm6 = vcmp.gt.f32.partialorder %v3993_v56, 0.0 }
0x130f   :  { %v3999_v26 = vmul.f32 1.442695, %v3997_v34 }
0x1311   :  { %5972 = vpow2.f32 %v3999_v26  ;;  %v5971_v31 = vpop.eup %5970  ;;  %v10548_v26 = vld [vmem:[#allocation2_spill] sm:$0xff] }
0x1312   :  { %v5256_v29 = vadd.f32 -1.0, %v5971_v31  ;;  %v10549_v31 = vld [vmem:[#allocation4_spill] sm:$0xff] }
0x1314   :  { %v9773_v25 = vsel %vm3996_vm3, %v3994_v49, %v5256_v29  ;;  %v10550_v29 = vld [vmem:[#allocation6_spill] sm:$0xff] }
0x1315   :  { %v4010_v30 = vmul.f32 %v9773_v25, %v9773_v25 }
0x1317   :  { %v5973_v9 = vpop.eup %5972  ;;  %v4046_v3 = vsel %vm10540_vm10, %v4010_v30, 0.0  ;;  %v4014_v28 = vsel %vm10541_vm11, %v4010_v30, 0.0  ;;  %v10552_v30 = vld [vmem:[#allocation8_spill] sm:$0xff] }
0x1318   :  { %v5255_v14 = vadd.f32 -1.0, %v5973_v9  ;;  %4049 = vadd.xlane.f32.xlu0 %v4046_v3  ;;  %4017 = vadd.xlane.f32.xlu2 %v4014_v28  ;;  %v10553_v9 = vld [vmem:[#allocation9_spill] sm:$0xff]  ;;  %v10554_v3 = vld [vmem:[#allocation10_spill] sm:$0xff]  ;;  %v10555_v28 = vld [vmem:[#allocation11_spill] sm:$0xff] }
0x131a   :  { %v9781_v20 = vsel %vm3995_vm6, %v3993_v56, %v5255_v14  ;;  %v10556_v14 = vld [vmem:[#allocation12_spill] sm:$0xff] }
0x131b   :  { %v4009_v4 = vmul.f32 %v9781_v20, %v9781_v20 }
0x131d   :  { %v4013_v13 = vsel %vm10542_vm4, %v4009_v4, 0.0  ;;  %v4045_v60 = vsel %vm10543_vm1, %v4009_v4, 0.0  ;;  %vm10546_vm1 = vmmov %vm10545_vm7  ;;  %v10558_v4 = vld [vmem:[#allocation14_spill] sm:$0xff] }
0x131e   :  { %4015 = vadd.xlane.f32.xlu1 %v4013_v13  ;;  %v10559_v13 = vld [vmem:[#allocation15_spill] sm:$0xff] }
0x1320   :  { %4047 = vadd.xlane.f32.xlu2 %v4045_v60  ;;  %v10560_v60 = vld [vmem:[#allocation16_spill] sm:$0xff] }
0x138b   :  { %v4050_v16 = vpop.xlane.xlu0 %4049  ;;  %v4018_v6 = vpop.xlane.xlu2 %4017 }
0x138c   :  { %v4052_v15 = vmax.f32 %v4050_v16, 1e-24  ;;  %v4020_v42 = vmax.f32 %v4018_v6, 1e-24  ;;  %v10561_v16 = vld [vmem:[#allocation17_spill] sm:$0xff] }
0x138e   :  { %5974 = vrsqrt.f32 %v4052_v15  ;;  %vm4069_vm5 = vweird.f32 %v4052_v15  ;;  %vm4037_vm13 = vweird.f32 %v4020_v42 }
0x138f   :  { %5976 = vrsqrt.f32 %v4020_v42 }
0x1391   :  { %v4016_v44 = vpop.xlane.xlu1 %4015 }
0x1392   :  { %v4019_v17 = vmax.f32 %v4016_v44, 1e-24 }
0x1393   :  { %v4048_v40 = vpop.xlane.xlu2 %4047 }
0x1394   :  { %5978 = vrsqrt.f32 %v4019_v17  ;;  %v5975_v53 = vpop.eup %5974  ;;  %v4051_v32 = vmax.f32 %v4048_v40, 1e-24  ;;  %vm4027_vm3 = vweird.f32 %v4019_v17 }
0x1395   :  { %v5977_v58 = vpop.eup %5976  ;;  %v4064_v37 = vmul.f32 %v5975_v53, %v4052_v15  ;;  %vm4070_vm2 = vweird.f32 %v5975_v53 }
0x1396   :  { %v4032_v1 = vmul.f32 %v5977_v58, %v4020_v42  ;;  %5980 = vrsqrt.f32 %v4051_v32  ;;  %vm4038_vm8 = vweird.f32 %v5977_v58  ;;  %vm4071_vm12 = vmor %vm4069_vm5, %vm4070_vm2  ;;  %vm4059_vm6 = vweird.f32 %v4051_v32 }
0x1397   :  { %v4065_v46 = vmul.f32 %v5975_v53, %v4064_v37  ;;  %vm4039_vm15 = vmor %vm4037_vm13, %vm4038_vm8 }
0x1398   :  { %v4033_v21 = vmul.f32 %v5977_v58, %v4032_v1  ;;  %vm10547_vm2 = vmmov %vm10544_vm0 }
0x1399   :  { %v4066_v47 = vmul.f32 0.5, %v4065_v46  ;;  %vm10562_vm8 = vmmov %vm10544_vm0 }
0x139a   :  { %v5979_v59 = vpop.eup %5978  ;;  %v4034_v22 = vmul.f32 0.5, %v4033_v21  ;;  %vm10563_vm5 = vmmov %vm10546_vm1 }
0x139b   :  { %v4022_v35 = vmul.f32 %v5979_v59, %v4019_v17  ;;  %v4067_v7 = vsub.f32 1.5, %v4066_v47  ;;  %vm4028_vm9 = vweird.f32 %v5979_v59  ;;  %vm10565_vm13 = vmmov %vm10546_vm1 }
0x139c   :  { %v5981_v24 = vpop.eup %5980  ;;  %v4035_v23 = vsub.f32 1.5, %v4034_v22  ;;  %vm4029_vm11 = vmor %vm4027_vm3, %vm4028_vm9 }
0x139d   :  { %v4023_v11 = vmul.f32 %v5979_v59, %v4022_v35  ;;  %v4068_v8 = vmul.f32 %v5975_v53, %v4067_v7  ;;  %v4054_v38 = vmul.f32 %v5981_v24, %v4051_v32  ;;  %vm4060_vm10 = vweird.f32 %v5981_v24  ;;  %vm10570_vm3 = vmmov %vm10547_vm2 }
0x139e   :  { %v4036_v57 = vmul.f32 %v5977_v58, %v4035_v23  ;;  %vm4061_vm4 = vmor %vm4059_vm6, %vm4060_vm10 }
0x139f   :  { %v4024_v39 = vmul.f32 0.5, %v4023_v11  ;;  %v4072_v63 = vsel %vm4071_vm12, %v5975_v53, %v4068_v8  ;;  %v4055_v0 = vmul.f32 %v5981_v24, %v4054_v38  ;;  %vm10564_vm12 = vmmov %vm10544_vm0 }
0x13a0   :  { %v4074_v27 = vsel %vm10544_vm0, %v4072_v63, 0.0  ;;  %v4040_v19 = vsel %vm4039_vm15, %v5977_v58, %v4036_v57  ;;  %vm10566_vm15 = vmmov %vm10544_vm0 }
0x13a1   :  { %v4025_v10 = vsub.f32 1.5, %v4024_v39  ;;  %v4042_v55 = vsel %vm10545_vm7, %v4040_v19, 0.0  ;;  %v4056_v2 = vmul.f32 0.5, %v4055_v0  ;;  %vm10567_vm0 = vmmov %vm10546_vm1 }
0x13a2   :  { %v4076_v52 = vadd.f32 %v4074_v27, %v4042_v55  ;;  %vm10568_vm7 = vmmov %vm10547_vm2 }
0x13a3   :  { %v4026_v33 = vmul.f32 %v5979_v59, %v4025_v10  ;;  %v4057_v45 = vsub.f32 1.5, %v4056_v2  ;;  %vm10569_vm9 = vmmov %vm10567_vm0 }
0x13a4   :  { %v9794_v41 = vmul.f32 %v4076_v52, %v9773_v25  ;;  %v10551_v25 = vld [vmem:[#allocation7_spill] sm:$0xff]  ;;  %vm10571_vm10 = vmmov %vm10547_vm2 }
0x13a5   :  { %v4030_v49 = vsel %vm4029_vm11, %v5979_v59, %v4026_v33  ;;  %v4058_v36 = vmul.f32 %v5981_v24, %v4057_v45  ;;  %vm10572_vm11 = vmmov %vm10567_vm0 }
0x13a6   :  { %4093 = vmatpush.msra.mxu2 %v9794_v41  ;;  %4134 = vmatpush.msrb.mxu3 %v9794_v41  ;;  %v4041_v61 = vsel %vm10546_vm1, %v4030_v49, 0.0  ;;  %vm10573_vm6 = vmmov %vm10567_vm0 }
0x13a7   :  { %v4062_v5 = vsel %vm4061_vm4, %v5981_v24, %v4058_v36  ;;  %vm10574_vm4 = vmmov %vm10567_vm0 }
0x13a8   :  { %v4073_v48 = vsel %vm10547_vm2, %v4062_v5, 0.0  ;;  %vm10575_vm1 = vmmov %vm10567_vm0 }
0x13a9   :  { %v4075_v56 = vadd.f32 %v4073_v48, %v4041_v61 }
0x13ab   :  { %v9803_v34 = vmul.f32 %v4075_v56, %v9781_v20  ;;  %v10557_v20 = vld [vmem:[#allocation13_spill] sm:$0xff] }
0x13ad   :  { %4094 = vmatpush.msra.mxu2 %v9803_v34  ;;  %4135 = vmatpush.msrb.mxu3 %v9803_v34 }
0x13ae   :  { %5257 = vmatmul.msk.f32.vlgmr.msra.gmra.mxu2 %vm368_vm14, %v10548_v26  ;;  %5265 = vmatmul.msk.f32.vlgmr.msrb.gmra.mxu3 %vm368_vm14, %v10500_v62 }
0x13b6   :  { %5258 = vmatmul.msk.f32.gmra.mxu2 %vm368_vm14, %v10549_v31  ;;  %5266 = vmatmul.msk.f32.gmra.mxu3 %vm368_vm14, %v10501_v18 }
0x13be   :  { %5259 = vmatmul.msk.f32.gmra.mxu2 %vm368_vm14, %v10550_v29  ;;  %5267 = vmatmul.msk.f32.gmra.mxu3 %vm368_vm14, %v10551_v25 }
0x13c6   :  { %5260 = vmatmul.msk.f32.gmra.mxu2 %vm368_vm14, %v10552_v30  ;;  %5268 = vmatmul.msk.f32.gmra.mxu3 %vm368_vm14, %v10553_v9 }
0x13ce   :  { %5261 = vmatmul.msk.f32.gmra.mxu2 %vm368_vm14, %v10554_v3  ;;  %5269 = vmatmul.msk.f32.gmra.mxu3 %vm368_vm14, %v10555_v28 }
0x13d6   :  { %5262 = vmatmul.msk.f32.gmra.mxu2 %vm368_vm14, %v10556_v14  ;;  %5270 = vmatmul.msk.f32.gmra.mxu3 %vm368_vm14, %v10557_v20 }
0x13de   :  { %5263 = vmatmul.msk.f32.gmra.mxu2 %vm368_vm14, %v10558_v4  ;;  %5271 = vmatmul.msk.f32.gmra.mxu3 %vm368_vm14, %v10559_v13 }
0x13e6   :  { %5264 = vmatmul.msk.f32.gmra.mxu2 %vm368_vm14, %v10560_v60  ;;  %5272 = vmatmul.msk.f32.gmra.mxu3 %vm368_vm14, %v10561_v16 }
0x1431   :  { %v9839_v6 = vpop.f32.mrf.mxu2  ;;  %v4137_v15 = vpop.f32.mrf.mxu3 }
0x1432   :  { %v4161_v33 = vmul.f32 %v4137_v15, %v9839_v6 }
0x1434   :  { %v4169_v49 = vsel %vm10573_vm6, %v4161_v33, 0.0  ;;  %vm10586_vm6 = vmmov %vm10567_vm0 }
0x1439   :  { %v9841_v42 = vpop.f32.mrf.mxu2  ;;  %v4140_v44 = vpop.f32.mrf.mxu3 }
0x143a   :  { %v4162_v45 = vmul.f32 %v4140_v44, %v9841_v42 }
0x143c   :  { %v4170_v5 = vsel %vm10575_vm1, %v4162_v45, 0.0  ;;  %v4194_v61 = vsel %vm10547_vm2, %v4162_v45, 0.0  ;;  %vm10588_vm1 = vmmov %vm10567_vm0 }
0x1441   :  { %v9843_v17 = vpop.f32.mrf.mxu2  ;;  %v4143_v40 = vpop.f32.mrf.mxu3 }
0x1442   :  { %v4163_v0 = vmul.f32 %v4143_v40, %v9843_v17 }
0x1444   :  { %v4195_v55 = vsel %vm10570_vm3, %v4163_v0, 0.0  ;;  %v4171_v36 = vsel %vm10574_vm4, %v4163_v0, 0.0  ;;  %vm10583_vm3 = vmmov %vm10547_vm2 }
0x1445   :  { %vm10587_vm4 = vmmov %vm10547_vm2 }
0x1449   :  { %v9845_v53 = vpop.f32.mrf.mxu2  ;;  %v4146_v32 = vpop.f32.mrf.mxu3 }
0x144a   :  { %v4164_v58 = vmul.f32 %v4146_v32, %v9845_v53 }
0x144c   :  { %v4196_v37 = vsel %vm10562_vm8, %v4164_v58, 0.0  ;;  %v4172_v1 = vsel %vm10563_vm5, %v4164_v58, 0.0  ;;  %vm10576_vm8 = vmmov %vm10547_vm2 }
0x144d   :  { %4207 = vadd.xlane.f32.xlu0 %v4196_v37  ;;  %4183 = vadd.xlane.f32.xlu2 %v4172_v1  ;;  %v4193_v48 = vsel %vm10576_vm8, %v4161_v33, 0.0  ;;  %vm10577_vm5 = vmmov %vm10567_vm0 }
0x144e   :  { %vm10589_vm8 = vmmov %vm10567_vm0 }
0x1451   :  { %v9852_v46 = vpop.f32.mrf.mxu2  ;;  %v4149_v21 = vpop.f32.mrf.mxu3 }
0x1452   :  { %v4165_v59 = vmul.f32 %v4149_v21, %v9852_v46 }
0x1454   :  { %v4197_v47 = vsel %vm10564_vm12, %v4165_v59, 0.0  ;;  %v4173_v22 = vsel %vm10565_vm13, %v4165_v59, 0.0  ;;  %vm10578_vm12 = vmmov %vm10547_vm2 }
0x1455   :  { %4209 = vadd.xlane.f32.xlu1 %v4197_v47  ;;  %4185 = vadd.xlane.f32.xlu0 %v4173_v22  ;;  %vm10579_vm13 = vmmov %vm10567_vm0 }
0x1459   :  { %v9859_v35 = vpop.f32.mrf.mxu2  ;;  %v4152_v7 = vpop.f32.mrf.mxu3 }
0x145a   :  { %v4166_v24 = vmul.f32 %v4152_v7, %v9859_v35 }
0x145c   :  { %v4198_v23 = vsel %vm10566_vm15, %v4166_v24, 0.0  ;;  %v4174_v11 = vsel %vm10567_vm0, %v4166_v24, 0.0  ;;  %vm10580_vm15 = vmmov %vm10547_vm2 }
0x145d   :  { %4211 = vadd.xlane.f32.xlu2 %v4198_v23  ;;  %4187 = vadd.xlane.f32.xlu1 %v4174_v11 }
0x1461   :  { %v9866_v8 = vpop.f32.mrf.mxu2  ;;  %v4155_v38 = vpop.f32.mrf.mxu3 }
0x1462   :  { %v4167_v57 = vmul.f32 %v4155_v38, %v9866_v8 }
0x1464   :  { %v4199_v39 = vsel %vm10568_vm7, %v4167_v57, 0.0  ;;  %v4175_v63 = vsel %vm10569_vm9, %v4167_v57, 0.0  ;;  %vm10581_vm7 = vmmov %vm10547_vm2 }
0x1465   :  { %4213 = vadd.xlane.f32.xlu0 %v4199_v39  ;;  %4189 = vadd.xlane.f32.xlu2 %v4175_v63  ;;  %vm10582_vm9 = vmmov %vm10567_vm0 }
0x1469   :  { %v9874_v27 = vpop.f32.mrf.mxu2  ;;  %v4158_v19 = vpop.f32.mrf.mxu3 }
0x146a   :  { %v4168_v10 = vmul.f32 %v4158_v19, %v9874_v27 }
0x146c   :  { %v4200_v2 = vsel %vm10571_vm10, %v4168_v10, 0.0  ;;  %v4176_v52 = vsel %vm10572_vm11, %v4168_v10, 0.0  ;;  %vm10584_vm10 = vmmov %vm10567_vm0 }
0x146d   :  { %4205 = vadd.xlane.f32.xlu2 %v4195_v55  ;;  %4215 = vadd.xlane.f32.xlu1 %v4200_v2  ;;  %vm10585_vm11 = vmmov %vm10547_vm2 }
0x146e   :  { %4191 = vadd.xlane.f32.xlu0 %v4176_v52 }
0x1475   :  { %4177 = vadd.xlane.f32.xlu2 %v4169_v49  ;;  %4181 = vadd.xlane.f32.xlu1 %v4171_v36 }
0x1476   :  { %4179 = vadd.xlane.f32.xlu0 %v4170_v5 }
0x147d   :  { %4203 = vadd.xlane.f32.xlu1 %v4194_v61 }
0x147e   :  { %4201 = vadd.xlane.f32.xlu0 %v4193_v48 }
0x14c0   :  { %v4208_v56 = vpop.xlane.xlu0 %4207  ;;  %v4184_v26 = vpop.xlane.xlu2 %4183 }
0x14c1   :  { %v4220_v40 = vmax.f32 %v4184_v26, %v4208_v56 }
0x14c3   :  { %v4228_v24 = vsub.f32 %v4184_v26, %v4220_v40  ;;  %v4252_v23 = vsub.f32 %v4208_v56, %v4220_v40 }
0x14c5   :  { %v4239_v39 = vmul.f32 1.442695, %v4228_v24  ;;  %v4263_v0 = vmul.f32 1.442695, %v4252_v23 }
0x14c8   :  { %v4210_v31 = vpop.xlane.xlu1 %4209  ;;  %v4186_v29 = vpop.xlane.xlu0 %4185 }
0x14c9   :  { %v4221_v30 = vmax.f32 %v4186_v29, %v4210_v31 }
0x14cb   :  { %v4229_v60 = vsub.f32 %v4186_v29, %v4221_v30  ;;  %v4253_v15 = vsub.f32 %v4210_v31, %v4221_v30 }
0x14cd   :  { %v4241_v32 = vmul.f32 1.442695, %v4229_v60  ;;  %v4265_v1 = vmul.f32 1.442695, %v4253_v15 }
0x14cf   :  { %5982 = vpow2.f32 %v4241_v32 }
0x14d0   :  { %v4212_v3 = vpop.xlane.xlu2 %4211  ;;  %v4188_v14 = vpop.xlane.xlu1 %4187  ;;  %5984 = vpow2.f32 %v4265_v1 }
0x14d1   :  { %v4222_v4 = vmax.f32 %v4188_v14, %v4212_v3 }
0x14d3   :  { %v4230_v44 = vsub.f32 %v4188_v14, %v4222_v4  ;;  %v4254_v21 = vsub.f32 %v4212_v3, %v4222_v4 }
0x14d5   :  { %v4243_v47 = vmul.f32 1.442695, %v4230_v44  ;;  %v4267_v11 = vmul.f32 1.442695, %v4254_v21  ;;  %v9895_v10 = vpop.eup %5982 }
0x14d6   :  { %v9897_v2 = vpop.eup %5984 }
0x14d7   :  { %5986 = vpow2.f32 %v4243_v47  ;;  %v4277_v29 = vadd.f32 %v9897_v2, %v9895_v10 }
0x14d8   :  { %v4214_v58 = vpop.xlane.xlu0 %4213  ;;  %v4190_v37 = vpop.xlane.xlu2 %4189 }
0x14d9   :  { %v4223_v59 = vmax.f32 %v4190_v37, %v4214_v58 }
0x14db   :  { %v4231_v22 = vsub.f32 %v4190_v37, %v4223_v59  ;;  %v4255_v7 = vsub.f32 %v4214_v58, %v4223_v59 }
0x14dd   :  { %v4245_v38 = vmul.f32 1.442695, %v4231_v22  ;;  %v4269_v57 = vmul.f32 1.442695, %v4255_v7  ;;  %v5987_v52 = vpop.eup %5986 }
0x14df   :  { %5988 = vpow2.f32 %v4245_v38 }
0x14e0   :  { %5990 = vpow2.f32 %v4269_v57  ;;  %v4216_v63 = vpop.xlane.xlu1 %4215  ;;  %v4206_v56 = vpop.xlane.xlu2 %4205 }
0x14e1   :  { %5992 = vpow2.f32 %v4267_v11  ;;  %v4192_v19 = vpop.xlane.xlu0 %4191 }
0x14e2   :  { %v4224_v55 = vmax.f32 %v4192_v19, %v4216_v63  ;;  %5994 = vpow2.f32 %v4239_v39 }
0x14e3   :  { %5996 = vpow2.f32 %v4263_v0 }
0x14e4   :  { %v4232_v33 = vsub.f32 %v4192_v19, %v4224_v55  ;;  %v4256_v45 = vsub.f32 %v4216_v63, %v4224_v55 }
0x14e5   :  { %v5989_v49 = vpop.eup %5988 }
0x14e6   :  { %v5991_v36 = vpop.eup %5990  ;;  %v4247_v5 = vmul.f32 1.442695, %v4232_v33  ;;  %v4271_v61 = vmul.f32 1.442695, %v4256_v45 }
0x14e7   :  { %v5993_v48 = vpop.eup %5992  ;;  %v4279_v26 = vadd.f32 %v5991_v36, %v5989_v49 }
0x14e8   :  { %5998 = vpow2.f32 %v4247_v5  ;;  %v4182_v31 = vpop.xlane.xlu1 %4181  ;;  %v5995_v14 = vpop.eup %5994  ;;  %v4278_v4 = vadd.f32 %v5993_v48, %v5987_v52 }
0x14e9   :  { %v4219_v30 = vmax.f32 %v4182_v31, %v4206_v56  ;;  %v4180_v3 = vpop.xlane.xlu0 %4179  ;;  %6000 = vpow2.f32 %v4271_v61  ;;  %v5997_v60 = vpop.eup %5996 }
0x14ea   :  { %6002 = vrcp.f32 %v4279_v26  ;;  %v4276_v37 = vadd.f32 %v5997_v60, %v5995_v14  ;;  %v4178_v47 = vpop.xlane.xlu2 %4177 }
0x14eb   :  { %v4227_v15 = vsub.f32 %v4182_v31, %v4219_v30  ;;  %v4251_v44 = vsub.f32 %v4206_v56, %v4219_v30  ;;  %6004 = vrcp.f32 %v4277_v29 }
0x14ec   :  { %6006 = vrcp.f32 %v4278_v4 }
0x14ed   :  { %v4237_v40 = vmul.f32 1.442695, %v4227_v15  ;;  %v4261_v32 = vmul.f32 1.442695, %v4251_v44 }
0x14ee   :  { %v5999_v58 = vpop.eup %5998 }
0x14ef   :  { %6008 = vpow2.f32 %v4237_v40  ;;  %v6001_v1 = vpop.eup %6000 }
0x14f0   :  { %6010 = vpow2.f32 %v4261_v32  ;;  %v4204_v21 = vpop.xlane.xlu1 %4203  ;;  %v4280_v59 = vadd.f32 %v6001_v1, %v5999_v58  ;;  %v6003_v24 = vpop.eup %6002 }
0x14f1   :  { %v4218_v22 = vmax.f32 %v4180_v3, %v4204_v21  ;;  %v4202_v7 = vpop.xlane.xlu0 %4201  ;;  %6012 = vrcp.f32 %v4276_v37  ;;  %v6005_v11 = vpop.eup %6004  ;;  %v4295_v45 = vmul.f32 %v6003_v24, %v5989_v49  ;;  %v4311_v56 = vmul.f32 %v6003_v24, %v5991_v36 }
0x14f2   :  { %v4217_v23 = vmax.f32 %v4178_v47, %v4202_v7  ;;  %6014 = vrcp.f32 %v4280_v59  ;;  %v6007_v39 = vpop.eup %6006  ;;  %v4293_v44 = vmul.f32 %v6005_v11, %v9895_v10  ;;  %v4309_v40 = vmul.f32 %v6005_v11, %v9897_v2 }
0x14f3   :  { %v4226_v38 = vsub.f32 %v4180_v3, %v4218_v22  ;;  %v4250_v57 = vsub.f32 %v4204_v21, %v4218_v22  ;;  %v4294_v30 = vmul.f32 %v6007_v39, %v5987_v52  ;;  %v4310_v4 = vmul.f32 %v6007_v39, %v5993_v48 }
0x14f4   :  { %v4225_v63 = vsub.f32 %v4178_v47, %v4217_v23  ;;  %v4249_v0 = vsub.f32 %v4202_v7, %v4217_v23  ;;  %v4303_v3 = vsel %vm10577_vm5, %v4295_v45, 0.0  ;;  %v4319_v36 = vsel %vm10578_vm12, %v4311_v56, 0.0  ;;  %vm10590_vm5 = vmmov %vm10547_vm2 }
0x14f5   :  { %v6009_v19 = vpop.eup %6008  ;;  %v4235_v55 = vmul.f32 1.442695, %v4226_v38  ;;  %v4259_v33 = vmul.f32 1.442695, %v4250_v57  ;;  %v4302_v10 = vsel %vm10567_vm0, %v4294_v30, 0.0  ;;  %v4318_v2 = vsel %vm10581_vm7, %v4310_v4, 0.0  ;;  %vm10595_vm7 = vmmov %vm10588_vm1 }
0x14f6   :  { %v6011_v5 = vpop.eup %6010  ;;  %v4233_v61 = vmul.f32 1.442695, %v4225_v63  ;;  %v4257_v31 = vmul.f32 1.442695, %v4249_v0  ;;  %v4327_v59 = vadd.f32 %v4319_v36, %v4303_v3  ;;  %v4326_v23 = vadd.f32 %v4318_v2, %v4302_v10 }
0x14f7   :  { %v4275_v26 = vadd.f32 %v6011_v5, %v6009_v19  ;;  %6016 = vpow2.f32 %v4235_v55  ;;  %v6013_v29 = vpop.eup %6012  ;;  %vm10591_vm12 = vcmask 523264  }
0x14f8   :  { %6018 = vpow2.f32 %v4259_v33  ;;  %v6015_v15 = vpop.eup %6014  ;;  %v4292_v37 = vmul.f32 %v6013_v29, %v5995_v14  ;;  %v4308_v21 = vmul.f32 %v6013_v29, %v5997_v60  ;;  %v4301_v14 = vsel %vm10582_vm9, %v4293_v44, 0.0 }
0x14f9   :  { %6020 = vrcp.f32 %v4275_v26  ;;  %v4296_v49 = vmul.f32 %v6015_v15, %v5999_v58  ;;  %v4312_v32 = vmul.f32 %v6015_v15, %v6001_v1  ;;  %v4317_v60 = vsel %vm10583_vm3, %v4309_v40, 0.0 }
0x14fa   :  { %6022 = vpow2.f32 %v4233_v61  ;;  %v4300_v38 = vsel %vm10584_vm10, %v4292_v37, 0.0  ;;  %v4316_v57 = vsel %vm10585_vm11, %v4308_v21, 0.0  ;;  %v4335_v55 = vmul.f32 %v4327_v59, %v9866_v8 }
0x14fb   :  { %6024 = vpow2.f32 %v4257_v31  ;;  %v4304_v52 = vsel %vm10579_vm13, %v4296_v49, 0.0  ;;  %v4320_v48 = vsel %vm10580_vm15, %v4312_v32, 0.0  ;;  %v4325_v33 = vadd.f32 %v4317_v60, %v4301_v14  ;;  %vm10592_vm13 = vmmov %vm10591_vm12 }
0x14fc   :  { %v4328_v1 = vadd.f32 %v4320_v48, %v4304_v52  ;;  %v4334_v26 = vmul.f32 %v4326_v23, %v9859_v35  ;;  %v4324_v31 = vadd.f32 %v4316_v57, %v4300_v38  ;;  %vm10593_vm15 = vmmov %vm10567_vm0 }
0x14fd   :  { %v6017_v58 = vpop.eup %6016  ;;  %vm10594_vm0 = vmmov %vm10547_vm2 }
0x14fe   :  { %v6019_v47 = vpop.eup %6018  ;;  %v4336_v24 = vmul.f32 %v4328_v1, %v9874_v27  ;;  %v4332_v30 = vmul.f32 %v4324_v31, %v9845_v53  ;;  %vm10596_vm9 = vmmov %vm10594_vm0 }
0x14ff   :  { %v6021_v22 = vpop.eup %6020  ;;  %v4274_v7 = vadd.f32 %v6019_v47, %v6017_v58 }
0x1500   :  { %v6023_v11 = vpop.eup %6022  ;;  %v4291_v39 = vmul.f32 %v6021_v22, %v6009_v19  ;;  %v4307_v63 = vmul.f32 %v6021_v22, %v6011_v5  ;;  %4345 = vmatpush.msra.mxu0 %v4336_v24  ;;  %v4333_v19 = vmul.f32 %v4325_v33, %v9852_v46 }
0x1501   :  { %v6025_v0 = vpop.eup %6024  ;;  %6026 = vrcp.f32 %v4274_v7 }
0x1502   :  { %v4273_v45 = vadd.f32 %v6025_v0, %v6023_v11  ;;  %v4299_v61 = vsel %vm10586_vm6, %v4291_v39, 0.0  ;;  %v4315_v56 = vsel %vm10587_vm4, %v4307_v63, 0.0  ;;  %4346 = vmatpush.msra.mxu0 %v4335_v55 }
0x1503   :  { %v4323_v5 = vadd.f32 %v4315_v56, %v4299_v61 }
0x1504   :  { %6028 = vrcp.f32 %v4273_v45  ;;  %4347 = vmatpush.msra.mxu0 %v4334_v26 }
0x1505   :  { %v4331_v3 = vmul.f32 %v4323_v5, %v9843_v17 }
0x1506   :  { %4348 = vmatpush.msra.mxu0 %v4333_v19 }
0x1507   :  { %v6027_v29 = vpop.eup %6026 }
0x1508   :  { %v4290_v4 = vmul.f32 %v6027_v29, %v6017_v58  ;;  %v4306_v15 = vmul.f32 %v6027_v29, %v6019_v47  ;;  %4349 = vmatpush.msra.mxu0 %v4332_v30 }
0x150a   :  { %v6029_v44 = vpop.eup %6028  ;;  %v4298_v40 = vsel %vm10588_vm1, %v4290_v4, 0.0  ;;  %v4314_v49 = vsel %vm10547_vm2, %v4306_v15, 0.0  ;;  %4350 = vmatpush.msra.mxu0 %v4331_v3  ;;  %vm10597_vm2 = vmmov %vm10594_vm0 }
0x150b   :  { %v4322_v32 = vadd.f32 %v4314_v49, %v4298_v40  ;;  %v4289_v36 = vmul.f32 %v6029_v44, %v6023_v11  ;;  %v4305_v37 = vmul.f32 %v6029_v44, %v6025_v0 }
0x150d   :  { %v4330_v21 = vmul.f32 %v4322_v32, %v9841_v42  ;;  %v4297_v52 = vsel %vm10589_vm8, %v4289_v36, 0.0  ;;  %v4313_v48 = vsel %vm10590_vm5, %v4305_v37, 0.0  ;;  %vm10598_vm5 = vmmov %vm10595_vm7 }
0x150e   :  { %v4321_v10 = vadd.f32 %v4313_v48, %v4297_v52 }
0x150f   :  { %4351 = vmatpush.msra.mxu0 %v4330_v21 }
0x1510   :  { %v4329_v2 = vmul.f32 %v4321_v10, %v9839_v6 }
0x1512   :  { %4352 = vmatpush.msra.mxu0 %v4329_v2 }
0x1513   :  { %5273 = vmatmul.msk.f32.vlgmr.msra.gmra.mxu0 %vm10591_vm12, %v6990_v43 }
0x151b   :  { %5274 = vmatmul.msk.f32.gmra.mxu0 %vm10592_vm13, %v6994_v50 }
0x1590   :  { %v4354_v58 = vpop.f32.mrf.mxu0 }
0x1591   :  { %v9948_v1 = vadd.f32 %v4354_v58, %v9803_v34 }
0x1593   :  { %v4360_v59 = vmul.f32 %v9948_v1, %v9948_v1 }
0x1595   :  { %v4362_v47 = vsel %vm10593_vm15, %v4360_v59, 0.0  ;;  %v4392_v23 = vsel %vm10596_vm9, %v4360_v59, 0.0  ;;  %vm10599_vm9 = vmmov %vm10598_vm5 }
0x1596   :  { %4364 = vadd.xlane.f32.xlu0 %v4362_v47 }
0x1598   :  { %v4357_v14 = vpop.f32.mrf.mxu0 }
0x1599   :  { %v4358_v60 = vadd.f32 %v4357_v14, %v9794_v41 }
0x159b   :  { %v4361_v22 = vmul.f32 %v4358_v60, %v4358_v60 }
0x159d   :  { %v4393_v7 = vsel %vm10594_vm0, %v4361_v22, 0.0  ;;  %v4363_v24 = vsel %vm10595_vm7, %v4361_v22, 0.0 }
0x159e   :  { %4396 = vadd.xlane.f32.xlu2 %v4393_v7  ;;  %4366 = vadd.xlane.f32.xlu1 %v4363_v24 }
0x15a6   :  { %4394 = vadd.xlane.f32.xlu1 %v4392_v23 }
0x1609   :  { %v4365_v11 = vpop.xlane.xlu0 %4364 }
0x160a   :  { %v4368_v38 = vmax.f32 %v4365_v11, 1e-24 }
0x160c   :  { %6030 = vrsqrt.f32 %v4368_v38  ;;  %vm4376_vm12 = vweird.f32 %v4368_v38 }
0x1611   :  { %v4397_v57 = vpop.xlane.xlu2 %4396  ;;  %v4367_v39 = vpop.xlane.xlu1 %4366 }
0x1612   :  { %v4399_v63 = vmax.f32 %v4397_v57, 1e-24  ;;  %v4369_v0 = vmax.f32 %v4367_v39, 1e-24  ;;  %v6031_v55 = vpop.eup %6030 }
0x1613   :  { %v4371_v33 = vmul.f32 %v6031_v55, %v4368_v38  ;;  %vm4377_vm8 = vweird.f32 %v6031_v55 }
0x1614   :  { %6032 = vrsqrt.f32 %v4399_v63  ;;  %vm4416_vm11 = vweird.f32 %v4399_v63  ;;  %vm4386_vm4 = vweird.f32 %v4369_v0  ;;  %vm4378_vm15 = vmor %vm4376_vm12, %vm4377_vm8 }
0x1615   :  { %6034 = vrsqrt.f32 %v4369_v0  ;;  %v4372_v31 = vmul.f32 %v6031_v55, %v4371_v33 }
0x1617   :  { %v4373_v4 = vmul.f32 0.5, %v4372_v31 }
0x1619   :  { %v4395_v45 = vpop.xlane.xlu1 %4394  ;;  %v4374_v32 = vsub.f32 1.5, %v4373_v4 }
0x161a   :  { %v6033_v61 = vpop.eup %6032  ;;  %v4398_v56 = vmax.f32 %v4395_v45, 1e-24 }
0x161b   :  { %v6035_v26 = vpop.eup %6034  ;;  %v4411_v19 = vmul.f32 %v6033_v61, %v4399_v63  ;;  %vm4417_vm3 = vweird.f32 %v6033_v61  ;;  %v4375_v58 = vmul.f32 %v6031_v55, %v4374_v32 }
0x161c   :  { %v4381_v5 = vmul.f32 %v6035_v26, %v4369_v0  ;;  %6036 = vrsqrt.f32 %v4398_v56  ;;  %vm4387_vm10 = vweird.f32 %v6035_v26  ;;  %vm4418_vm6 = vmor %vm4416_vm11, %vm4417_vm3  ;;  %vm4406_vm0 = vweird.f32 %v4398_v56 }
0x161d   :  { %v4412_v29 = vmul.f32 %v6033_v61, %v4411_v19  ;;  %vm4388_vm1 = vmor %vm4386_vm4, %vm4387_vm10  ;;  %v4379_v23 = vsel %vm4378_vm15, %v6031_v55, %v4375_v58 }
0x161e   :  { %v4382_v30 = vmul.f32 %v6035_v26, %v4381_v5  ;;  %v4390_v57 = vsel %vm10599_vm9, %v4379_v23, 0.0  ;;  %vm10600_vm3 = vmmov %vm10597_vm2 }
0x161f   :  { %v4413_v15 = vmul.f32 0.5, %v4412_v29  ;;  %vm10601_vm10 = vmmov %vm10597_vm2 }
0x1620   :  { %v4383_v3 = vmul.f32 0.5, %v4382_v30  ;;  %vm10602_vm11 = vmmov %vm10598_vm5 }
0x1621   :  { %v4414_v44 = vsub.f32 1.5, %v4413_v15  ;;  %vm10604_vm4 = vmmov %vm10598_vm5 }
0x1622   :  { %v6037_v40 = vpop.eup %6036  ;;  %v4384_v49 = vsub.f32 1.5, %v4383_v3 }
0x1623   :  { %v4415_v36 = vmul.f32 %v6033_v61, %v4414_v44  ;;  %v4401_v37 = vmul.f32 %v6037_v40, %v4398_v56  ;;  %vm4407_vm13 = vweird.f32 %v6037_v40 }
0x1624   :  { %v4385_v21 = vmul.f32 %v6035_v26, %v4384_v49  ;;  %vm4408_vm7 = vmor %vm4406_vm0, %vm4407_vm13 }
0x1625   :  { %v4419_v52 = vsel %vm4418_vm6, %v6033_v61, %v4415_v36  ;;  %v4402_v48 = vmul.f32 %v6037_v40, %v4401_v37  ;;  %vm10603_vm6 = vmmov %vm10597_vm2 }
0x1626   :  { %v4421_v10 = vsel %vm10597_vm2, %v4419_v52, 0.0  ;;  %v4389_v2 = vsel %vm4388_vm1, %v6035_v26, %v4385_v21  ;;  %vm10605_vm1 = vmmov %vm10597_vm2 }
0x1627   :  { %v4391_v59 = vsel %vm10598_vm5, %v4389_v2, 0.0  ;;  %v4403_v47 = vmul.f32 0.5, %v4402_v48  ;;  %vm10606_vm2 = vmmov %vm10604_vm4 }
0x1628   :  { %v4423_v14 = vadd.f32 %v4421_v10, %v4391_v59  ;;  %vm10607_vm8 = vmmov %vm10605_vm1 }
0x1629   :  { %v4404_v22 = vsub.f32 1.5, %v4403_v47  ;;  %vm10608_vm5 = vmmov %vm10606_vm2 }
0x162a   :  { %v4425_v7 = vmul.f32 %v4423_v14, %v4358_v60  ;;  %vm10609_vm12 = vmmov %vm10605_vm1 }
0x162b   :  { %v4405_v24 = vmul.f32 %v6037_v40, %v4404_v22  ;;  %vm10610_vm13 = vmmov %vm10605_vm1 }
0x162c   :  { %4440 = vmatpush.msrb.mxu0 %v4425_v7  ;;  %vm10611_vm15 = vmmov %vm10606_vm2 }
0x162d   :  { %v4409_v11 = vsel %vm4408_vm7, %v6037_v40, %v4405_v24  ;;  %vm10612_vm0 = vmmov %vm10606_vm2 }
0x162e   :  { %v4420_v39 = vsel %vm10600_vm3, %v4409_v11, 0.0  ;;  %vm10613_vm7 = vmmov %vm10612_vm0 }
0x162f   :  { %v4422_v63 = vadd.f32 %v4420_v39, %v4390_v57  ;;  %vm10614_vm9 = vmmov %vm10612_vm0 }
0x1630   :  { %vm10615_vm3 = vmmov %vm10605_vm1 }
0x1631   :  { %v4424_v0 = vmul.f32 %v4422_v63, %v9948_v1 }
0x1633   :  { %4441 = vmatpush.msrb.mxu0 %v4424_v0 }
0x1634   :  { %5275 = vmatmul.msk.f32.vlgmr.msrb.gmra.mxu0 %vm368_vm14, %v10500_v62 }
0x163c   :  { %5276 = vmatmul.msk.f32.gmra.mxu0 %vm368_vm14, %v10501_v18 }
0x1644   :  { %5277 = vmatmul.msk.f32.gmra.mxu0 %vm368_vm14, %v10551_v25 }
0x164c   :  { %5278 = vmatmul.msk.f32.gmra.mxu0 %vm368_vm14, %v10553_v9 }
0x1654   :  { %5279 = vmatmul.msk.f32.gmra.mxu0 %vm368_vm14, %v10555_v28 }
0x165c   :  { %5280 = vmatmul.msk.f32.gmra.mxu0 %vm368_vm14, %v10557_v20 }
0x1664   :  { %5281 = vmatmul.msk.f32.gmra.mxu0 %vm368_vm14, %v10559_v13 }
0x166c   :  { %5282 = vmatmul.msk.f32.gmra.mxu0 %vm368_vm14, %v10561_v16 }
0x16b1   :  { %v4443_v1 = vpop.f32.mrf.mxu0 }
0x16b2   :  { %v4467_v48 = vmul.f32 %v4443_v1, %v9839_v6 }
0x16b4   :  { %v4475_v2 = vsel %vm10612_vm0, %v4467_v48, 0.0 }
0x16b9   :  { %v4446_v60 = vpop.f32.mrf.mxu0 }
0x16ba   :  { %v4468_v10 = vmul.f32 %v4446_v60, %v9841_v42 }
0x16bc   :  { %v4476_v59 = vsel %vm10614_vm9, %v4468_v10, 0.0  ;;  %v4500_v47 = vsel %vm10615_vm3, %v4468_v10, 0.0  ;;  %vm10627_vm9 = vmmov %vm10612_vm0 }
0x16bd   :  { %vm10628_vm3 = vmmov %vm10605_vm1 }
0x16c1   :  { %v4449_v38 = vpop.f32.mrf.mxu0 }
0x16c2   :  { %v4469_v49 = vmul.f32 %v4449_v38, %v9843_v17 }
0x16c4   :  { %v4501_v37 = vsel %vm10609_vm12, %v4469_v49, 0.0  ;;  %v4477_v58 = vsel %vm10613_vm7, %v4469_v49, 0.0  ;;  %vm10623_vm12 = vmmov %vm10605_vm1 }
0x16c5   :  { %vm10626_vm7 = vmmov %vm10605_vm1 }
0x16c9   :  { %v4452_v55 = vpop.f32.mrf.mxu0 }
0x16ca   :  { %v4470_v33 = vmul.f32 %v4452_v55, %v9845_v53 }
0x16cc   :  { %v4502_v45 = vsel %vm10601_vm10, %v4470_v33, 0.0  ;;  %v4478_v61 = vsel %vm10602_vm11, %v4470_v33, 0.0  ;;  %vm10616_vm10 = vmmov %vm10605_vm1 }
0x16cd   :  { %4513 = vadd.xlane.f32.xlu2 %v4502_v45  ;;  %4489 = vadd.xlane.f32.xlu1 %v4478_v61  ;;  %v4499_v14 = vsel %vm10616_vm10, %v4467_v48, 0.0  ;;  %vm10617_vm11 = vmmov %vm10612_vm0 }
0x16ce   :  { %vm10629_vm10 = vmmov %vm10612_vm0 }
0x16d1   :  { %v4455_v56 = vpop.f32.mrf.mxu0 }
0x16d2   :  { %v4471_v26 = vmul.f32 %v4455_v56, %v9852_v46 }
0x16d4   :  { %v4503_v31 = vsel %vm10603_vm6, %v4471_v26, 0.0  ;;  %v4479_v19 = vsel %vm10604_vm4, %v4471_v26, 0.0  ;;  %vm10618_vm6 = vmmov %vm10605_vm1 }
0x16d5   :  { %4515 = vadd.xlane.f32.xlu0 %v4503_v31  ;;  %4491 = vadd.xlane.f32.xlu2 %v4479_v19  ;;  %vm10619_vm4 = vmmov %vm10612_vm0 }
0x16d9   :  { %v4458_v5 = vpop.f32.mrf.mxu0 }
0x16da   :  { %v4472_v29 = vmul.f32 %v4458_v5, %v9859_v35 }
0x16dc   :  { %v4504_v30 = vsel %vm10605_vm1, %v4472_v29, 0.0  ;;  %v4480_v4 = vsel %vm10606_vm2, %v4472_v29, 0.0  ;;  %vm10620_vm2 = vmmov %vm10612_vm0 }
0x16dd   :  { %4517 = vadd.xlane.f32.xlu1 %v4504_v30  ;;  %4493 = vadd.xlane.f32.xlu0 %v4480_v4 }
0x16e1   :  { %v4461_v15 = vpop.f32.mrf.mxu0 }
0x16e2   :  { %v4473_v3 = vmul.f32 %v4461_v15, %v9866_v8 }
0x16e4   :  { %v4505_v44 = vsel %vm10607_vm8, %v4473_v3, 0.0  ;;  %v4481_v40 = vsel %vm10608_vm5, %v4473_v3, 0.0  ;;  %vm10621_vm8 = vmmov %vm10605_vm1 }
0x16e5   :  { %4519 = vadd.xlane.f32.xlu2 %v4505_v44  ;;  %4495 = vadd.xlane.f32.xlu1 %v4481_v40  ;;  %vm10622_vm5 = vmmov %vm10612_vm0 }
0x16e9   :  { %v4464_v32 = vpop.f32.mrf.mxu0 }
0x16ea   :  { %v4474_v36 = vmul.f32 %v4464_v32, %v9874_v27 }
0x16ec   :  { %v4506_v21 = vsel %vm10610_vm13, %v4474_v36, 0.0  ;;  %v4482_v52 = vsel %vm10611_vm15, %v4474_v36, 0.0  ;;  %vm10624_vm13 = vmmov %vm10612_vm0 }
0x16ed   :  { %4511 = vadd.xlane.f32.xlu1 %v4501_v37  ;;  %4521 = vadd.xlane.f32.xlu0 %v4506_v21  ;;  %vm10625_vm15 = vmmov %vm10605_vm1 }
0x16ee   :  { %4497 = vadd.xlane.f32.xlu2 %v4482_v52 }
0x16f5   :  { %4483 = vadd.xlane.f32.xlu1 %v4475_v2  ;;  %4487 = vadd.xlane.f32.xlu0 %v4477_v58 }
0x16f6   :  { %4485 = vadd.xlane.f32.xlu2 %v4476_v59 }
0x16fd   :  { %4509 = vadd.xlane.f32.xlu0 %v4500_v47 }
0x16fe   :  { %4507 = vadd.xlane.f32.xlu2 %v4499_v14 }
0x1740   :  { %v4514_v22 = vpop.xlane.xlu2 %4513  ;;  %v4490_v7 = vpop.xlane.xlu1 %4489 }
0x1741   :  { %v4526_v38 = vmax.f32 %v4490_v7, %v4514_v22 }
0x1743   :  { %v4534_v29 = vsub.f32 %v4490_v7, %v4526_v38  ;;  %v4558_v30 = vsub.f32 %v4514_v22, %v4526_v38 }
0x1745   :  { %v4545_v44 = vmul.f32 1.442695, %v4534_v29  ;;  %v4569_v49 = vmul.f32 1.442695, %v4558_v30 }
0x1748   :  { %v4516_v24 = vpop.xlane.xlu0 %4515  ;;  %v4492_v23 = vpop.xlane.xlu2 %4491 }
0x1749   :  { %v4527_v11 = vmax.f32 %v4492_v23, %v4516_v24 }
0x174b   :  { %v4535_v0 = vsub.f32 %v4492_v23, %v4527_v11  ;;  %v4559_v1 = vsub.f32 %v4516_v24, %v4527_v11 }
0x174d   :  { %v4547_v55 = vmul.f32 1.442695, %v4535_v0  ;;  %v4571_v61 = vmul.f32 1.442695, %v4559_v1 }
0x174f   :  { %6038 = vpow2.f32 %v4547_v55 }
0x1750   :  { %v4518_v57 = vpop.xlane.xlu1 %4517  ;;  %v4494_v39 = vpop.xlane.xlu0 %4493  ;;  %6040 = vpow2.f32 %v4571_v61 }
0x1751   :  { %v4528_v63 = vmax.f32 %v4494_v39, %v4518_v57 }
0x1753   :  { %v4536_v60 = vsub.f32 %v4494_v39, %v4528_v63  ;;  %v4560_v56 = vsub.f32 %v4518_v57, %v4528_v63 }
0x1755   :  { %v4549_v31 = vmul.f32 1.442695, %v4536_v60  ;;  %v4573_v4 = vmul.f32 1.442695, %v4560_v56  ;;  %v10026_v36 = vpop.eup %6038 }
0x1756   :  { %v10028_v21 = vpop.eup %6040 }
0x1757   :  { %6042 = vpow2.f32 %v4549_v31  ;;  %v4583_v23 = vadd.f32 %v10028_v21, %v10026_v36 }
0x1758   :  { %v4520_v33 = vpop.xlane.xlu2 %4519  ;;  %v4496_v45 = vpop.xlane.xlu1 %4495 }
0x1759   :  { %v4529_v26 = vmax.f32 %v4496_v45, %v4520_v33 }
0x175b   :  { %v4537_v19 = vsub.f32 %v4496_v45, %v4529_v26  ;;  %v4561_v5 = vsub.f32 %v4520_v33, %v4529_v26 }
0x175d   :  { %v4551_v15 = vmul.f32 1.442695, %v4537_v19  ;;  %v4575_v3 = vmul.f32 1.442695, %v4561_v5  ;;  %v6043_v52 = vpop.eup %6042 }
0x175f   :  { %6044 = vpow2.f32 %v4551_v15 }
0x1760   :  { %6046 = vpow2.f32 %v4575_v3  ;;  %v4522_v40 = vpop.xlane.xlu0 %4521  ;;  %v4512_v22 = vpop.xlane.xlu1 %4511 }
0x1761   :  { %6048 = vpow2.f32 %v4573_v4  ;;  %v4498_v32 = vpop.xlane.xlu2 %4497 }
0x1762   :  { %v4530_v37 = vmax.f32 %v4498_v32, %v4522_v40  ;;  %6050 = vpow2.f32 %v4545_v44 }
0x1763   :  { %6052 = vpow2.f32 %v4569_v49 }
0x1764   :  { %v4538_v48 = vsub.f32 %v4498_v32, %v4530_v37  ;;  %v4562_v10 = vsub.f32 %v4522_v40, %v4530_v37 }
0x1765   :  { %v6045_v2 = vpop.eup %6044 }
0x1766   :  { %v6047_v58 = vpop.eup %6046  ;;  %v4553_v59 = vmul.f32 1.442695, %v4538_v48  ;;  %v4577_v47 = vmul.f32 1.442695, %v4562_v10 }
0x1767   :  { %v6049_v14 = vpop.eup %6048  ;;  %v4585_v7 = vadd.f32 %v6047_v58, %v6045_v2 }
0x1768   :  { %6054 = vpow2.f32 %v4553_v59  ;;  %v4488_v24 = vpop.xlane.xlu0 %4487  ;;  %v6051_v39 = vpop.eup %6050  ;;  %v4584_v63 = vadd.f32 %v6049_v14, %v6043_v52 }
0x1769   :  { %v4525_v11 = vmax.f32 %v4488_v24, %v4512_v22  ;;  %v4486_v57 = vpop.xlane.xlu2 %4485  ;;  %6056 = vpow2.f32 %v4577_v47  ;;  %v6053_v0 = vpop.eup %6052 }
0x176a   :  { %6058 = vrcp.f32 %v4585_v7  ;;  %v4582_v45 = vadd.f32 %v6053_v0, %v6051_v39  ;;  %v4484_v31 = vpop.xlane.xlu1 %4483 }
0x176b   :  { %v4533_v1 = vsub.f32 %v4488_v24, %v4525_v11  ;;  %v4557_v60 = vsub.f32 %v4512_v22, %v4525_v11  ;;  %6060 = vrcp.f32 %v4583_v23 }
0x176c   :  { %6062 = vrcp.f32 %v4584_v63 }
0x176d   :  { %v4543_v38 = vmul.f32 1.442695, %v4533_v1  ;;  %v4567_v55 = vmul.f32 1.442695, %v4557_v60 }
0x176e   :  { %v6055_v33 = vpop.eup %6054 }
0x176f   :  { %6064 = vpow2.f32 %v4543_v38  ;;  %v6057_v61 = vpop.eup %6056 }
0x1770   :  { %6066 = vpow2.f32 %v4567_v55  ;;  %v4510_v56 = vpop.xlane.xlu0 %4509  ;;  %v4586_v26 = vadd.f32 %v6057_v61, %v6055_v33  ;;  %v6059_v29 = vpop.eup %6058 }
0x1771   :  { %v4524_v19 = vmax.f32 %v4486_v57, %v4510_v56  ;;  %v4508_v5 = vpop.xlane.xlu2 %4507  ;;  %6068 = vrcp.f32 %v4582_v45  ;;  %v6061_v4 = vpop.eup %6060  ;;  %v4601_v10 = vmul.f32 %v6059_v29, %v6045_v2  ;;  %v4617_v22 = vmul.f32 %v6059_v29, %v6047_v58 }
0x1772   :  { %v4523_v30 = vmax.f32 %v4484_v31, %v4508_v5  ;;  %6070 = vrcp.f32 %v4586_v26  ;;  %v6063_v44 = vpop.eup %6062  ;;  %v4599_v60 = vmul.f32 %v6061_v4, %v10026_v36  ;;  %v4615_v38 = vmul.f32 %v6061_v4, %v10028_v21 }
0x1773   :  { %v4532_v15 = vsub.f32 %v4486_v57, %v4524_v19  ;;  %v4556_v3 = vsub.f32 %v4510_v56, %v4524_v19  ;;  %v4600_v11 = vmul.f32 %v6063_v44, %v6043_v52  ;;  %v4616_v63 = vmul.f32 %v6063_v44, %v6049_v14 }
0x1774   :  { %v4531_v40 = vsub.f32 %v4484_v31, %v4523_v30  ;;  %v4555_v49 = vsub.f32 %v4508_v5, %v4523_v30  ;;  %v4609_v57 = vsel %vm10617_vm11, %v4601_v10, 0.0  ;;  %v4625_v58 = vsel %vm10618_vm6, %v4617_v22, 0.0  ;;  %vm10630_vm11 = vmmov %vm10605_vm1 }
0x1775   :  { %v6065_v32 = vpop.eup %6064  ;;  %v4541_v37 = vmul.f32 1.442695, %v4532_v15  ;;  %v4565_v48 = vmul.f32 1.442695, %v4556_v3  ;;  %v4608_v36 = vsel %vm10620_vm2, %v4600_v11, 0.0  ;;  %v4624_v21 = vsel %vm10621_vm8, %v4616_v63, 0.0  ;;  %vm10634_vm2 = vmmov %vm10628_vm3 }
0x1776   :  { %v6067_v59 = vpop.eup %6066  ;;  %v4539_v47 = vmul.f32 1.442695, %v4531_v40  ;;  %v4563_v24 = vmul.f32 1.442695, %v4555_v49  ;;  %v4633_v26 = vadd.f32 %v4625_v58, %v4609_v57  ;;  %v4632_v30 = vadd.f32 %v4624_v21, %v4608_v36  ;;  %vm10635_vm8 = vmmov %vm10612_vm0 }
0x1777   :  { %v4581_v7 = vadd.f32 %v6067_v59, %v6065_v32  ;;  %6072 = vpow2.f32 %v4541_v37  ;;  %v6069_v23 = vpop.eup %6068  ;;  %vm10631_vm6 = vcmask 523264  }
0x1778   :  { %6074 = vpow2.f32 %v4565_v48  ;;  %v6071_v1 = vpop.eup %6070  ;;  %v4598_v45 = vmul.f32 %v6069_v23, %v6051_v39  ;;  %v4614_v56 = vmul.f32 %v6069_v23, %v6053_v0  ;;  %v4607_v39 = vsel %vm10622_vm5, %v4599_v60, 0.0  ;;  %vm10636_vm5 = vmmov %vm10634_vm2 }
0x1779   :  { %6076 = vrcp.f32 %v4581_v7  ;;  %v4602_v2 = vmul.f32 %v6071_v1, %v6055_v33  ;;  %v4618_v55 = vmul.f32 %v6071_v1, %v6057_v61  ;;  %v4623_v0 = vsel %vm10623_vm12, %v4615_v38, 0.0 }
0x177a   :  { %6078 = vpow2.f32 %v4539_v47  ;;  %v4606_v15 = vsel %vm10624_vm13, %v4598_v45, 0.0  ;;  %v4622_v3 = vsel %vm10625_vm15, %v4614_v56, 0.0  ;;  %v4641_v37 = vmul.f32 %v4633_v26, %v9866_v8 }
0x177b   :  { %6080 = vpow2.f32 %v4563_v24  ;;  %v4610_v52 = vsel %vm10619_vm4, %v4602_v2, 0.0  ;;  %v4626_v14 = vsel %vm10605_vm1, %v4618_v55, 0.0  ;;  %v4631_v48 = vadd.f32 %v4623_v0, %v4607_v39  ;;  %vm10632_vm4 = vmmov %vm10631_vm6 }
0x177c   :  { %v4634_v61 = vadd.f32 %v4626_v14, %v4610_v52  ;;  %v4640_v7 = vmul.f32 %v4632_v30, %v9859_v35  ;;  %v4630_v24 = vadd.f32 %v4622_v3, %v4606_v15  ;;  %vm10633_vm1 = vmmov %vm10612_vm0 }
0x177d   :  { %v6073_v33 = vpop.eup %6072 }
0x177e   :  { %v6075_v31 = vpop.eup %6074  ;;  %v4642_v29 = vmul.f32 %v4634_v61, %v9874_v27  ;;  %v4638_v11 = vmul.f32 %v4630_v24, %v9845_v53 }
0x177f   :  { %v6077_v19 = vpop.eup %6076  ;;  %v4580_v5 = vadd.f32 %v6075_v31, %v6073_v33 }
0x1780   :  { %v6079_v4 = vpop.eup %6078  ;;  %v4597_v44 = vmul.f32 %v6077_v19, %v6065_v32  ;;  %v4613_v40 = vmul.f32 %v6077_v19, %v6067_v59  ;;  %4651 = vmatpush.msra.mxu1 %v4642_v29  ;;  %v4639_v32 = vmul.f32 %v4631_v48, %v9852_v46 }
0x1781   :  { %v6081_v49 = vpop.eup %6080  ;;  %6082 = vrcp.f32 %v4580_v5 }
0x1782   :  { %v4579_v10 = vadd.f32 %v6081_v49, %v6079_v4  ;;  %v4605_v47 = vsel %vm10612_vm0, %v4597_v44, 0.0  ;;  %v4621_v22 = vsel %vm10626_vm7, %v4613_v40, 0.0  ;;  %4652 = vmatpush.msra.mxu1 %v4641_v37 }
0x1783   :  { %v4629_v59 = vadd.f32 %v4621_v22, %v4605_v47 }
0x1784   :  { %6084 = vrcp.f32 %v4579_v10  ;;  %4653 = vmatpush.msra.mxu1 %v4640_v7 }
0x1785   :  { %v4637_v57 = vmul.f32 %v4629_v59, %v9843_v17 }
0x1786   :  { %4654 = vmatpush.msra.mxu1 %v4639_v32 }
0x1787   :  { %v6083_v23 = vpop.eup %6082 }
0x1788   :  { %v4596_v63 = vmul.f32 %v6083_v23, %v6073_v33  ;;  %v4612_v1 = vmul.f32 %v6083_v23, %v6075_v31  ;;  %4655 = vmatpush.msra.mxu1 %v4638_v11 }
0x178a   :  { %v6085_v60 = vpop.eup %6084  ;;  %v4604_v38 = vsel %vm10627_vm9, %v4596_v63, 0.0  ;;  %v4620_v2 = vsel %vm10628_vm3, %v4612_v1, 0.0  ;;  %4656 = vmatpush.msra.mxu1 %v4637_v57  ;;  %vm10637_vm3 = vmmov %vm10634_vm2 }
0x178b   :  { %v4628_v55 = vadd.f32 %v4620_v2, %v4604_v38  ;;  %v4595_v58 = vmul.f32 %v6085_v60, %v6079_v4  ;;  %v4611_v45 = vmul.f32 %v6085_v60, %v6081_v49 }
0x178d   :  { %v4636_v56 = vmul.f32 %v4628_v55, %v9841_v42  ;;  %v4603_v52 = vsel %vm10629_vm10, %v4595_v58, 0.0  ;;  %v4619_v14 = vsel %vm10630_vm11, %v4611_v45, 0.0  ;;  %vm10638_vm11 = vmmov %vm10633_vm1 }
0x178e   :  { %v4627_v36 = vadd.f32 %v4619_v14, %v4603_v52 }
0x178f   :  { %4657 = vmatpush.msra.mxu1 %v4636_v56 }
0x1790   :  { %v4635_v21 = vmul.f32 %v4627_v36, %v9839_v6 }
0x1792   :  { %4658 = vmatpush.msra.mxu1 %v4635_v21 }
0x1793   :  { %5283 = vmatmul.msk.f32.vlgmr.msra.gmra.mxu1 %vm10631_vm6, %v6990_v43 }
0x179b   :  { %5284 = vmatmul.msk.f32.gmra.mxu1 %vm10632_vm4, %v6994_v50 }
0x1810   :  { %v4660_v33 = vpop.f32.mrf.mxu1 }
0x1811   :  { %v10079_v61 = vadd.f32 %v4660_v33, %v9803_v34 }
0x1813   :  { %v4666_v26 = vmul.f32 %v10079_v61, %v10079_v61 }
0x1815   :  { %v4668_v31 = vsel %vm10633_vm1, %v4666_v26, 0.0  ;;  %v4698_v30 = vsel %vm10636_vm5, %v4666_v26, 0.0  ;;  %vm10639_vm5 = vmmov %vm10638_vm11 }
0x1816   :  { %4670 = vadd.xlane.f32.xlu2 %v4668_v31 }
0x1818   :  { %v4663_v39 = vpop.f32.mrf.mxu1 }
0x1819   :  { %v4664_v0 = vadd.f32 %v4663_v39, %v9794_v41 }
0x181b   :  { %v4667_v19 = vmul.f32 %v4664_v0, %v4664_v0 }
0x181d   :  { %v4699_v5 = vsel %vm10634_vm2, %v4667_v19, 0.0  ;;  %v4669_v29 = vsel %vm10635_vm8, %v4667_v19, 0.0 }
0x181e   :  { %4702 = vadd.xlane.f32.xlu1 %v4699_v5  ;;  %4672 = vadd.xlane.f32.xlu0 %v4669_v29 }
0x1826   :  { %4700 = vadd.xlane.f32.xlu0 %v4698_v30 }
0x1889   :  { %v4671_v4 = vpop.xlane.xlu2 %4670 }
0x188a   :  { %v4674_v15 = vmax.f32 %v4671_v4, 1e-24 }
0x188c   :  { %6086 = vrsqrt.f32 %v4674_v15  ;;  %vm4682_vm6 = vweird.f32 %v4674_v15 }
0x1891   :  { %v4703_v3 = vpop.xlane.xlu1 %4702  ;;  %v4673_v44 = vpop.xlane.xlu0 %4672 }
0x1892   :  { %v4705_v40 = vmax.f32 %v4703_v3, 1e-24  ;;  %v4675_v49 = vmax.f32 %v4673_v44, 1e-24  ;;  %v6087_v37 = vpop.eup %6086 }
0x1893   :  { %v4677_v48 = vmul.f32 %v6087_v37, %v4674_v15  ;;  %vm4683_vm10 = vweird.f32 %v6087_v37 }
0x1894   :  { %6088 = vrsqrt.f32 %v4705_v40  ;;  %vm4722_vm15 = vweird.f32 %v4705_v40  ;;  %vm4692_vm7 = vweird.f32 %v4675_v49  ;;  %vm4684_vm1 = vmor %vm4682_vm6, %vm4683_vm10 }
0x1895   :  { %6090 = vrsqrt.f32 %v4675_v49  ;;  %v4678_v24 = vmul.f32 %v6087_v37, %v4677_v48  ;;  %vm10648_vm10 = vmmov %vm10639_vm5 }
0x1897   :  { %v4679_v63 = vmul.f32 0.5, %v4678_v24 }
0x1899   :  { %v4701_v10 = vpop.xlane.xlu0 %4700  ;;  %v4680_v55 = vsub.f32 1.5, %v4679_v63 }
0x189a   :  { %v6089_v47 = vpop.eup %6088  ;;  %v4704_v22 = vmax.f32 %v4701_v10, 1e-24 }
0x189b   :  { %v6091_v7 = vpop.eup %6090  ;;  %v4717_v32 = vmul.f32 %v6089_v47, %v4705_v40  ;;  %vm4723_vm12 = vweird.f32 %v6089_v47  ;;  %v4681_v33 = vmul.f32 %v6087_v37, %v4680_v55 }
0x189c   :  { %v4687_v59 = vmul.f32 %v6091_v7, %v4675_v49  ;;  %6092 = vrsqrt.f32 %v4704_v22  ;;  %vm4693_vm13 = vweird.f32 %v6091_v7  ;;  %vm4724_vm0 = vmor %vm4722_vm15, %vm4723_vm12  ;;  %vm4712_vm2 = vweird.f32 %v4704_v22 }
0x189d   :  { %v4718_v23 = vmul.f32 %v6089_v47, %v4717_v32  ;;  %vm4694_vm9 = vmor %vm4692_vm7, %vm4693_vm13  ;;  %v4685_v30 = vsel %vm4684_vm1, %v6087_v37, %v4681_v33 }
0x189e   :  { %v4688_v11 = vmul.f32 %v6091_v7, %v4687_v59  ;;  %v4696_v3 = vsel %vm10639_vm5, %v4685_v30, 0.0  ;;  %vm10640_vm12 = vmmov %vm10637_vm3 }
0x189f   :  { %v4719_v1 = vmul.f32 0.5, %v4718_v23  ;;  %vm10641_vm13 = vmmov %vm10637_vm3 }
0x18a0   :  { %v4689_v57 = vmul.f32 0.5, %v4688_v11  ;;  %vm10642_vm15 = vmmov %vm10639_vm5 }
0x18a1   :  { %v4720_v60 = vsub.f32 1.5, %v4719_v1 }
0x18a2   :  { %v6093_v38 = vpop.eup %6092  ;;  %v4690_v2 = vsub.f32 1.5, %v4689_v57 }
0x18a3   :  { %v4721_v58 = vmul.f32 %v6089_v47, %v4720_v60  ;;  %v4707_v45 = vmul.f32 %v6093_v38, %v4704_v22  ;;  %vm4713_vm4 = vweird.f32 %v6093_v38 }
0x18a4   :  { %v4691_v56 = vmul.f32 %v6091_v7, %v4690_v2  ;;  %vm4714_vm8 = vmor %vm4712_vm2, %vm4713_vm4 }
0x18a5   :  { %v4725_v52 = vsel %vm4724_vm0, %v6089_v47, %v4721_v58  ;;  %v4708_v14 = vmul.f32 %v6093_v38, %v4707_v45  ;;  %vm10643_vm0 = vmmov %vm10637_vm3 }
0x18a6   :  { %v4727_v36 = vsel %vm10637_vm3, %v4725_v52, 0.0  ;;  %v4695_v21 = vsel %vm4694_vm9, %v6091_v7, %v4691_v56  ;;  %vm10645_vm7 = vmmov %vm10643_vm0 }
0x18a7   :  { %v4697_v26 = vsel %vm10638_vm11, %v4695_v21, 0.0  ;;  %v4709_v31 = vmul.f32 0.5, %v4708_v14  ;;  %vm10646_vm9 = vmmov %vm10639_vm5 }
0x18a8   :  { %v4729_v39 = vadd.f32 %v4727_v36, %v4697_v26  ;;  %vm10647_vm3 = vmmov %vm10643_vm0 }
0x18a9   :  { %v4710_v19 = vsub.f32 1.5, %v4709_v31  ;;  %vm10649_vm11 = vmmov %vm10643_vm0 }
0x18aa   :  { %v4731_v5 = vmul.f32 %v4729_v39, %v4664_v0  ;;  %vm10650_vm6 = vmmov %vm10643_vm0 }
0x18ab   :  { %v4711_v29 = vmul.f32 %v6093_v38, %v4710_v19  ;;  %vm10651_vm4 = vmmov %vm10639_vm5 }
0x18ac   :  { %4746 = vmatpush.msrb.mxu2 %v4731_v5  ;;  %vm10652_vm1 = vmmov %vm10651_vm4 }
0x18ad   :  { %v4715_v4 = vsel %vm4714_vm8, %v6093_v38, %v4711_v29  ;;  %vm10653_vm2 = vmmov %vm10652_vm1 }
0x18ae   :  { %v4726_v44 = vsel %vm10640_vm12, %v4715_v4, 0.0  ;;  %vm10654_vm8 = vmmov %vm10652_vm1 }
0x18af   :  { %v4728_v40 = vadd.f32 %v4726_v44, %v4696_v3  ;;  %vm10656_vm12 = vmmov %vm10643_vm0 }
0x18b1   :  { %v4730_v49 = vmul.f32 %v4728_v40, %v10079_v61 }
0x18b3   :  { %4747 = vmatpush.msrb.mxu2 %v4730_v49 }
0x18b4   :  { %5285 = vmatmul.msk.f32.vlgmr.msrb.gmra.mxu2 %vm368_vm14, %v10500_v62 }
0x18bc   :  { %5286 = vmatmul.msk.f32.gmra.mxu2 %vm368_vm14, %v10501_v18 }
0x18c4   :  { %5287 = vmatmul.msk.f32.gmra.mxu2 %vm368_vm14, %v10551_v25 }
0x18cc   :  { %5288 = vmatmul.msk.f32.gmra.mxu2 %vm368_vm14, %v10553_v9 }
0x18d4   :  { %5289 = vmatmul.msk.f32.gmra.mxu2 %vm368_vm14, %v10555_v28 }
0x18dc   :  { %5290 = vmatmul.msk.f32.gmra.mxu2 %vm368_vm14, %v10557_v20 }
0x18e4   :  { %5291 = vmatmul.msk.f32.gmra.mxu2 %vm368_vm14, %v10559_v13 }
0x18ec   :  { %5292 = vmatmul.msk.f32.gmra.mxu2 %vm368_vm14, %v10561_v16  ;;  %vm10644_vm14 = vmmov %vm10639_vm5 }
0x18ed   :  { %vm10655_vm5 = vmmov %vm10643_vm0 }
0x1937   :  { %v4749_v62 = vpop.f32.mrf.mxu2 }
0x1938   :  { %v4773_v60 = vmul.f32 %v4749_v62, %v9839_v6 }
0x193a   :  { %v4781_v2 = vsel %vm10652_vm1, %v4773_v60, 0.0  ;;  %v4805_v56 = vsel %vm10656_vm12, %v4773_v60, 0.0 }
0x193f   :  { %v4752_v18 = vpop.f32.mrf.mxu2 }
0x1940   :  { %v4774_v38 = vmul.f32 %v4752_v18, %v9841_v42 }
0x1942   :  { %v4782_v58 = vsel %vm10654_vm8, %v4774_v38, 0.0  ;;  %v4806_v45 = vsel %vm10655_vm5, %v4774_v38, 0.0 }
0x1947   :  { %v4755_v61 = vpop.f32.mrf.mxu2 }
0x1948   :  { %v4775_v59 = vmul.f32 %v4755_v61, %v9843_v17 }
0x194a   :  { %v4807_v63 = vsel %vm10649_vm11, %v4775_v59, 0.0  ;;  %v4783_v55 = vsel %vm10653_vm2, %v4775_v59, 0.0 }
0x194f   :  { %v4758_v0 = vpop.f32.mrf.mxu2 }
0x1950   :  { %v4776_v25 = vmul.f32 %v4758_v0, %v9845_v53 }
0x1952   :  { %v4808_v9 = vsel %vm10641_vm13, %v4776_v25, 0.0  ;;  %v4784_v28 = vsel %vm10642_vm15, %v4776_v25, 0.0  ;;  %vm10657_vm13 = vmmov %vm10652_vm1 }
0x1953   :  { %4819 = vadd.xlane.f32.xlu1 %v4808_v9  ;;  %4795 = vadd.xlane.f32.xlu0 %v4784_v28  ;;  %vm10658_vm15 = vmmov %vm10643_vm0 }
0x1957   :  { %v4761_v20 = vpop.f32.mrf.mxu2 }
0x1958   :  { %v4777_v13 = vmul.f32 %v4761_v20, %v9852_v46 }
0x195a   :  { %v4809_v16 = vsel %vm10643_vm0, %v4777_v13, 0.0  ;;  %v4785_v15 = vsel %vm10644_vm14, %v4777_v13, 0.0  ;;  %vm10659_vm0 = vmmov %vm10652_vm1 }
0x195b   :  { %4821 = vadd.xlane.f32.xlu2 %v4809_v16  ;;  %4797 = vadd.xlane.f32.xlu1 %v4785_v15  ;;  %vm10660_vm14 = vmmov %vm10647_vm3 }
0x195c   :  { %vm10665_vm11 = vmmov %vm10659_vm0 }
0x195d   :  { %vm10668_vm1 = vmmov %vm10655_vm5 }
0x195e   :  { %vm10669_vm2 = vmmov %vm10659_vm0 }
0x195f   :  { %v4764_v37 = vpop.f32.mrf.mxu2  ;;  %vm10670_vm8 = vmmov %vm10668_vm1 }
0x1960   :  { %v4778_v48 = vmul.f32 %v4764_v37, %v9859_v35  ;;  %vm10672_vm12 = vmmov %vm10668_vm1 }
0x1962   :  { %v4810_v10 = vsel %vm10645_vm7, %v4778_v48, 0.0  ;;  %v4786_v47 = vsel %vm10646_vm9, %v4778_v48, 0.0  ;;  %vm10661_vm7 = vmmov %vm10659_vm0 }
0x1963   :  { %4823 = vadd.xlane.f32.xlu0 %v4810_v10  ;;  %4799 = vadd.xlane.f32.xlu2 %v4786_v47  ;;  %vm10662_vm9 = vmmov %vm10647_vm3 }
0x1967   :  { %v4767_v22 = vpop.f32.mrf.mxu2 }
0x1968   :  { %v4779_v7 = vmul.f32 %v4767_v22, %v9866_v8 }
0x196a   :  { %v4811_v24 = vsel %vm10647_vm3, %v4779_v7, 0.0  ;;  %v4787_v32 = vsel %vm10648_vm10, %v4779_v7, 0.0  ;;  %vm10663_vm3 = vmmov %vm10659_vm0 }
0x196b   :  { %4825 = vadd.xlane.f32.xlu1 %v4811_v24  ;;  %4801 = vadd.xlane.f32.xlu0 %v4787_v32  ;;  %vm10664_vm10 = vmmov %vm10655_vm5 }
0x196f   :  { %v4770_v23 = vpop.f32.mrf.mxu2 }
0x1970   :  { %v4780_v11 = vmul.f32 %v4770_v23, %v9874_v27 }
0x1972   :  { %v4812_v1 = vsel %vm10650_vm6, %v4780_v11, 0.0  ;;  %v4788_v57 = vsel %vm10651_vm4, %v4780_v11, 0.0  ;;  %vm10666_vm6 = vmmov %vm10655_vm5 }
0x1973   :  { %4817 = vadd.xlane.f32.xlu0 %v4807_v63  ;;  %4827 = vadd.xlane.f32.xlu2 %v4812_v1  ;;  %vm10667_vm4 = vmmov %vm10659_vm0 }
0x1974   :  { %4803 = vadd.xlane.f32.xlu1 %v4788_v57  ;;  %vm10671_vm5 = vmmov %vm10659_vm0 }
0x197b   :  { %4789 = vadd.xlane.f32.xlu0 %v4781_v2  ;;  %4793 = vadd.xlane.f32.xlu2 %v4783_v55 }
0x197c   :  { %4791 = vadd.xlane.f32.xlu1 %v4782_v58 }
0x1983   :  { %4815 = vadd.xlane.f32.xlu2 %v4806_v45 }
0x1984   :  { %4813 = vadd.xlane.f32.xlu1 %v4805_v56 }
0x19c6   :  { %v4820_v52 = vpop.xlane.xlu1 %4819  ;;  %v4796_v14 = vpop.xlane.xlu0 %4795 }
0x19c7   :  { %v4832_v30 = vmax.f32 %v4796_v14, %v4820_v52 }
0x19c9   :  { %v4840_v25 = vsub.f32 %v4796_v14, %v4832_v30  ;;  %v4864_v9 = vsub.f32 %v4820_v52, %v4832_v30 }
0x19cb   :  { %v4851_v16 = vmul.f32 1.442695, %v4840_v25  ;;  %v4875_v37 = vmul.f32 1.442695, %v4864_v9 }
0x19ce   :  { %v4822_v36 = vpop.xlane.xlu2 %4821  ;;  %v4798_v21 = vpop.xlane.xlu1 %4797 }
0x19cf   :  { %v4833_v33 = vmax.f32 %v4798_v21, %v4822_v36 }
0x19d1   :  { %v4841_v19 = vsub.f32 %v4798_v21, %v4833_v33  ;;  %v4865_v5 = vsub.f32 %v4822_v36, %v4833_v33 }
0x19d3   :  { %v4853_v4 = vmul.f32 1.442695, %v4841_v19  ;;  %v4877_v40 = vmul.f32 1.442695, %v4865_v5 }
0x19d5   :  { %6094 = vpow2.f32 %v4853_v4 }
0x19d6   :  { %v4824_v26 = vpop.xlane.xlu0 %4823  ;;  %v4800_v31 = vpop.xlane.xlu2 %4799  ;;  %6096 = vpow2.f32 %v4877_v40 }
0x19d7   :  { %v4834_v39 = vmax.f32 %v4800_v31, %v4824_v26 }
0x19d9   :  { %v4842_v29 = vsub.f32 %v4800_v31, %v4834_v39  ;;  %v4866_v49 = vsub.f32 %v4824_v26, %v4834_v39 }
0x19db   :  { %v4855_v18 = vmul.f32 1.442695, %v4842_v29  ;;  %v4879_v28 = vmul.f32 1.442695, %v4866_v49  ;;  %v10157_v10 = vpop.eup %6094 }
0x19dc   :  { %v10159_v22 = vpop.eup %6096 }
0x19dd   :  { %6098 = vpow2.f32 %v4855_v18  ;;  %v4889_v2 = vadd.f32 %v10159_v22, %v10157_v10 }
0x19de   :  { %v4826_v3 = vpop.xlane.xlu1 %4825  ;;  %v4802_v44 = vpop.xlane.xlu0 %4801 }
0x19df   :  { %v4835_v62 = vmax.f32 %v4802_v44, %v4826_v3 }
0x19e1   :  { %v4843_v61 = vsub.f32 %v4802_v44, %v4835_v62  ;;  %v4867_v0 = vsub.f32 %v4826_v3, %v4835_v62 }
0x19e3   :  { %v4857_v20 = vmul.f32 1.442695, %v4843_v61  ;;  %v4881_v13 = vmul.f32 1.442695, %v4867_v0  ;;  %v6099_v7 = vpop.eup %6098 }
0x19e5   :  { %6100 = vpow2.f32 %v4857_v20 }
0x19e6   :  { %6102 = vpow2.f32 %v4881_v13  ;;  %v4828_v15 = vpop.xlane.xlu2 %4827  ;;  %v4818_v57 = vpop.xlane.xlu0 %4817 }
0x19e7   :  { %6104 = vpow2.f32 %v4879_v28  ;;  %v4804_v48 = vpop.xlane.xlu1 %4803 }
0x19e8   :  { %v4836_v47 = vmax.f32 %v4804_v48, %v4828_v15  ;;  %6106 = vpow2.f32 %v4851_v16 }
0x19e9   :  { %6108 = vpow2.f32 %v4875_v37 }
0x19ea   :  { %v4844_v24 = vsub.f32 %v4804_v48, %v4836_v47  ;;  %v4868_v32 = vsub.f32 %v4828_v15, %v4836_v47 }
0x19eb   :  { %v6101_v59 = vpop.eup %6100 }
0x19ec   :  { %v6103_v23 = vpop.eup %6102  ;;  %v4859_v11 = vmul.f32 1.442695, %v4844_v24  ;;  %v4883_v63 = vmul.f32 1.442695, %v4868_v32 }
0x19ed   :  { %v6105_v1 = vpop.eup %6104  ;;  %v4891_v60 = vadd.f32 %v6103_v23, %v6101_v59 }
0x19ee   :  { %6110 = vpow2.f32 %v4859_v11  ;;  %v4794_v38 = vpop.xlane.xlu2 %4793  ;;  %v6107_v45 = vpop.eup %6106  ;;  %v4890_v56 = vadd.f32 %v6105_v1, %v6099_v7 }
0x19ef   :  { %v4831_v55 = vmax.f32 %v4794_v38, %v4818_v57  ;;  %v4792_v58 = vpop.xlane.xlu1 %4791  ;;  %6112 = vpow2.f32 %v4883_v63  ;;  %v6109_v52 = vpop.eup %6108 }
0x19f0   :  { %6114 = vrcp.f32 %v4891_v60  ;;  %v4888_v31 = vadd.f32 %v6109_v52, %v6107_v45  ;;  %v4790_v29 = vpop.xlane.xlu0 %4789 }
0x19f1   :  { %v4839_v14 = vsub.f32 %v4794_v38, %v4831_v55  ;;  %v4863_v36 = vsub.f32 %v4818_v57, %v4831_v55  ;;  %6116 = vrcp.f32 %v4889_v2 }
0x19f2   :  { %6118 = vrcp.f32 %v4890_v56 }
0x19f3   :  { %v4849_v21 = vmul.f32 1.442695, %v4839_v14  ;;  %v4873_v33 = vmul.f32 1.442695, %v4863_v36 }
0x19f4   :  { %v6111_v26 = vpop.eup %6110 }
0x19f5   :  { %6120 = vpow2.f32 %v4849_v21  ;;  %v6113_v39 = vpop.eup %6112 }
0x19f6   :  { %6122 = vpow2.f32 %v4873_v33  ;;  %v4816_v19 = vpop.xlane.xlu2 %4815  ;;  %v4892_v5 = vadd.f32 %v6113_v39, %v6111_v26  ;;  %v6115_v3 = vpop.eup %6114 }
0x19f7   :  { %v4830_v30 = vmax.f32 %v4792_v58, %v4816_v19  ;;  %v4814_v4 = vpop.xlane.xlu1 %4813  ;;  %6124 = vrcp.f32 %v4888_v31  ;;  %v6117_v40 = vpop.eup %6116  ;;  %v4907_v20 = vmul.f32 %v6115_v3, %v6101_v59  ;;  %v4923_v15 = vmul.f32 %v6115_v3, %v6103_v23 }
0x19f8   :  { %v4829_v44 = vmax.f32 %v4790_v29, %v4814_v4  ;;  %6126 = vrcp.f32 %v4892_v5  ;;  %v6119_v18 = vpop.eup %6118  ;;  %v4905_v57 = vmul.f32 %v6117_v40, %v10157_v10  ;;  %v4921_v60 = vmul.f32 %v6117_v40, %v10159_v22 }
0x19f9   :  { %v4838_v49 = vsub.f32 %v4792_v58, %v4830_v30  ;;  %v4862_v62 = vsub.f32 %v4816_v19, %v4830_v30  ;;  %v4906_v24 = vmul.f32 %v6119_v18, %v6099_v7  ;;  %v4922_v32 = vmul.f32 %v6119_v18, %v6105_v1 }
0x19fa   :  { %v4837_v61 = vsub.f32 %v4790_v29, %v4829_v44  ;;  %v4861_v0 = vsub.f32 %v4814_v4, %v4829_v44  ;;  %v4915_v63 = vsel %vm10657_vm13, %v4907_v20, 0.0  ;;  %v4931_v23 = vsel %vm10658_vm15, %v4923_v15, 0.0 }
0x19fb   :  { %v6121_v25 = vpop.eup %6120  ;;  %v4847_v9 = vmul.f32 1.442695, %v4838_v49  ;;  %v4871_v28 = vmul.f32 1.442695, %v4862_v62  ;;  %v4914_v10 = vsel %vm10661_vm7, %v4906_v24, 0.0  ;;  %v4930_v22 = vsel %vm10662_vm9, %v4922_v32, 0.0  ;;  %vm10677_vm7 = vmmov %vm10669_vm2 }
0x19fc   :  { %v6123_v13 = vpop.eup %6122  ;;  %v4845_v16 = vmul.f32 1.442695, %v4837_v61  ;;  %v4869_v48 = vmul.f32 1.442695, %v4861_v0  ;;  %v4939_v14 = vadd.f32 %v4931_v23, %v4915_v63  ;;  %v4938_v31 = vadd.f32 %v4930_v22, %v4914_v10  ;;  %v5078_v23 = vld [vmem:[%s10341_s9 + $0x60] sm:$0xff] }
0x19fd   :  { %v4887_v37 = vadd.f32 %v6123_v13, %v6121_v25  ;;  %6128 = vpow2.f32 %v4847_v9  ;;  %v6125_v47 = vpop.eup %6124  ;;  %vm10673_vm13 = vcmask 523264  }
0x19fe   :  { %6130 = vpow2.f32 %v4871_v28  ;;  %v6127_v11 = vpop.eup %6126  ;;  %v4904_v2 = vmul.f32 %v6125_v47, %v6107_v45  ;;  %v4920_v55 = vmul.f32 %v6125_v47, %v6109_v52  ;;  %v4913_v45 = vsel %vm10663_vm3, %v4905_v57, 0.0  ;;  %vm10674_vm15 = vmmov %vm10673_vm13 }
0x19ff   :  { %6132 = vrcp.f32 %v4887_v37  ;;  %v4908_v59 = vmul.f32 %v6127_v11, %v6111_v26  ;;  %v4924_v38 = vmul.f32 %v6127_v11, %v6113_v39  ;;  %v4929_v52 = vsel %vm10664_vm10, %v4921_v60, 0.0 }
0x1a00   :  { %6134 = vpow2.f32 %v4845_v16  ;;  %v4912_v19 = vsel %vm10665_vm11, %v4904_v2, 0.0  ;;  %v4928_v5 = vsel %vm10666_vm6, %v4920_v55, 0.0  ;;  %v4947_v3 = vmul.f32 %v4939_v14, %v9866_v8  ;;  %v5077_v2 = vld [vmem:[%s10341_s9 + $0x58] sm:$0xff]  ;;  %v5076_v55 = vld [vmem:[%s10341_s9 + $0x50] sm:$0xff] }
0x1a01   :  { %6136 = vpow2.f32 %v4869_v48  ;;  %v4916_v7 = vsel %vm10659_vm0, %v4908_v59, 0.0  ;;  %v4932_v1 = vsel %vm10660_vm14, %v4924_v38, 0.0  ;;  %v4937_v44 = vadd.f32 %v4929_v52, %v4913_v45  ;;  %vm10675_vm0 = vmmov %vm10668_vm1  ;;  %v5081_v59 = vld [vmem:[%s10341_s9 + $0x78] sm:$0xff]  ;;  %v5079_v38 = vld [vmem:[%s10341_s9 + $0x68] sm:$0xff] }
0x1a02   :  { %v4940_v56 = vadd.f32 %v4932_v1, %v4916_v7  ;;  %v4946_v62 = vmul.f32 %v4938_v31, %v9859_v35  ;;  %v4936_v18 = vadd.f32 %v4928_v5, %v4912_v19  ;;  %vm10676_vm14 = vmmov %vm10669_vm2  ;;  %5086 = vmatpush.msra.mxu3 %v5081_v59  ;;  %v5075_v7 = vld [vmem:[%s10341_s9 + $0x48] sm:$0xff]  ;;  %v5074_v1 = vld [vmem:[%s10341_s9 + $0x40] sm:$0xff] }
0x1a03   :  { %v6129_v58 = vpop.eup %6128  ;;  %v4945_v61 = vmul.f32 %v4937_v44, %v9852_v46  ;;  %vm10678_vm9 = vmmov %vm10675_vm0  ;;  %v5071_v45 = vld [vmem:[%s10341_s9 + $0x28] sm:$0xff]  ;;  %v5070_v52 = vld [vmem:[%s10341_s9 + $0x20] sm:$0xff] }
0x1a04   :  { %v6131_v36 = vpop.eup %6130  ;;  %v4948_v26 = vmul.f32 %v4940_v56, %v9874_v27  ;;  %v4944_v8 = vmul.f32 %v4936_v18, %v9845_v53  ;;  %v5068_v31 = vld [vmem:[%s10341_s9 + $0x10] sm:$0xff] }
0x1a05   :  { %v6133_v21 = vpop.eup %6132  ;;  %v4886_v33 = vadd.f32 %v6131_v36, %v6129_v58 }
0x1a06   :  { %v6135_v39 = vpop.eup %6134  ;;  %v4903_v29 = vmul.f32 %v6133_v21, %v6121_v25  ;;  %v4919_v30 = vmul.f32 %v6133_v21, %v6123_v13  ;;  %4957 = vmatpush.msrb.mxu1 %v4948_v26  ;;  %v5069_v21 = vld [vmem:[%s10341_s9 + $0x18] sm:$0xff] }
0x1a07   :  { %v6137_v4 = vpop.eup %6136  ;;  %6138 = vrcp.f32 %v4886_v33 }
0x1a08   :  { %v4885_v40 = vadd.f32 %v6137_v4, %v6135_v39  ;;  %v4911_v27 = vsel %vm10667_vm4, %v4903_v29, 0.0  ;;  %v4927_v49 = vsel %vm10668_vm1, %v4919_v30, 0.0  ;;  %4958 = vmatpush.msrb.mxu1 %v4947_v3 }
0x1a09   :  { %v4935_v0 = vadd.f32 %v4927_v49, %v4911_v27 }
0x1a0a   :  { %6140 = vrcp.f32 %v4885_v40  ;;  %4959 = vmatpush.msrb.mxu1 %v4946_v62  ;;  %v5066_v40 = vld [vmem:[%s10341_s9] sm:$0xff] }
0x1a0b   :  { %v4943_v20 = vmul.f32 %v4935_v0, %v9843_v17 }
0x1a0c   :  { %4960 = vmatpush.msrb.mxu1 %v4945_v61 }
0x1a0d   :  { %v6139_v25 = vpop.eup %6138 }
0x1a0e   :  { %v4902_v9 = vmul.f32 %v6139_v25, %v6129_v58  ;;  %v4918_v28 = vmul.f32 %v6139_v25, %v6131_v36  ;;  %4961 = vmatpush.msrb.mxu1 %v4944_v8  ;;  %v5073_v58 = vld [vmem:[%s10341_s9 + $0x38] sm:$0xff]  ;;  %v5072_v36 = vld [vmem:[%s10341_s9 + $0x30] sm:$0xff] }
0x1a10   :  { %v6141_v13 = vpop.eup %6140  ;;  %v4910_v16 = vsel %vm10669_vm2, %v4902_v9, 0.0  ;;  %v4926_v35 = vsel %vm10670_vm8, %v4918_v28, 0.0  ;;  %4962 = vmatpush.msrb.mxu1 %v4943_v20  ;;  %vm10679_vm2 = vmmov %vm10675_vm0 }
0x1a11   :  { %v4934_v15 = vadd.f32 %v4926_v35, %v4910_v16  ;;  %v4901_v46 = vmul.f32 %v6141_v13, %v6135_v39  ;;  %v4917_v37 = vmul.f32 %v6141_v13, %v6137_v4  ;;  %v5067_v4 = vld [vmem:[%s10341_s9 + $0x8] sm:$0xff]  ;;  %vm10680_vm8 = vmmov %vm10671_vm5 }
0x1a13   :  { %v4942_v48 = vmul.f32 %v4934_v15, %v9841_v42  ;;  %v4909_v53 = vsel %vm10671_vm5, %v4901_v46, 0.0  ;;  %v4925_v47 = vsel %vm10672_vm12, %v4917_v37, 0.0 }
0x1a14   :  { %v4933_v17 = vadd.f32 %v4925_v47, %v4909_v53 }
0x1a15   :  { %4963 = vmatpush.msrb.mxu1 %v4942_v48 }
0x1a16   :  { %v4941_v24 = vmul.f32 %v4933_v17, %v9839_v6 }
0x1a18   :  { %4964 = vmatpush.msrb.mxu1 %v4941_v24 }
0x1a19   :  { %5293 = vmatmul.msk.f32.vlgmr.msrb.gmra.mxu1 %vm10673_vm13, %v6990_v43 }
0x1a21   :  { %5294 = vmatmul.msk.f32.gmra.mxu1 %vm10674_vm15, %v6994_v50 }
0x1a96   :  { %v4966_v32 = vpop.f32.mrf.mxu1 }
0x1a97   :  { %v10210_v42 = vadd.f32 %v4966_v32, %v9803_v34 }
0x1a99   :  { %v4972_v11 = vmul.f32 %v10210_v42, %v10210_v42 }
0x1a9b   :  { %v5004_v63 = vsel %vm10675_vm0, %v4972_v11, 0.0  ;;  %v4974_v6 = vsel %vm10676_vm14, %v4972_v11, 0.0  ;;  %v5350_v11 = vld [vmem:[%s10338_s7 + $0x2] ss:$0 sm:$0xff] }
0x1a9c   :  { %5006 = vadd.xlane.f32.xlu0 %v5004_v63  ;;  %4976 = vadd.xlane.f32.xlu2 %v4974_v6 }
0x1a9e   :  { %v4969_v57 = vpop.f32.mrf.mxu1 }
0x1a9f   :  { %v10219_v43 = vadd.f32 %v4969_v57, %v9794_v41  ;;  %v5080_v41 = vld [vmem:[%s10341_s9 + $0x70] sm:$0xff] }
0x1aa0   :  { %5087 = vmatpush.msra.mxu3 %v5080_v41 }
0x1aa1   :  { %v4973_v50 = vmul.f32 %v10219_v43, %v10219_v43 }
0x1aa2   :  { %5088 = vmatpush.msra.mxu3 %v5079_v38 }
0x1aa3   :  { %v4975_v34 = vsel %vm10677_vm7, %v4973_v50, 0.0  ;;  %v5005_v60 = vsel %vm10678_vm9, %v4973_v50, 0.0  ;;  %v5351_v50 = vld [vmem:[%s10339_s8 + $0x2] ss:$0 sm:$0xff]  ;;  %vm10681_vm9 = vmmov %vm10679_vm2 }
0x1aa4   :  { %4978 = vadd.xlane.f32.xlu1 %v4975_v34  ;;  %5008 = vadd.xlane.f32.xlu2 %v5005_v60 }
0x1aa5   :  { %5089 = vmatpush.msra.mxu3 %v5078_v23 }
0x1aa7   :  { %5090 = vmatpush.msra.mxu3 %v5077_v2 }
0x1aa9   :  { %5091 = vmatpush.msra.mxu3 %v5076_v55 }
0x1aab   :  { %5092 = vmatpush.msra.mxu3 %v5075_v7 }
0x1aad   :  { %5093 = vmatpush.msra.mxu3 %v5074_v1 }
0x1aaf   :  { %5094 = vmatpush.msra.mxu3 %v5073_v58 }
0x1ab1   :  { %5095 = vmatpush.msra.mxu3 %v5072_v36 }
0x1ab3   :  { %5096 = vmatpush.msra.mxu3 %v5071_v45 }
0x1ab5   :  { %5097 = vmatpush.msra.mxu3 %v5070_v52 }
0x1ab7   :  { %5098 = vmatpush.msra.mxu3 %v5069_v21  ;;  %v5126_v21 = vld [vmem:[%s10343_s11 + $0x28] sm:$0xff] }
0x1ab9   :  { %5099 = vmatpush.msra.mxu3 %v5068_v31  ;;  %v5123_v31 = vld [vmem:[%s10343_s11 + $0x10] sm:$0xff] }
0x1abb   :  { %5100 = vmatpush.msra.mxu3 %v5067_v4 }
0x1abd   :  { %5101 = vmatpush.msra.mxu3 %v5066_v40 }
0x1b0f   :  { %v5007_v10 = vpop.xlane.xlu0 %5006  ;;  %v4977_v22 = vpop.xlane.xlu2 %4976 }
0x1b10   :  { %v5010_v56 = vmax.f32 %v5007_v10, 1e-24  ;;  %v4980_v14 = vmax.f32 %v4977_v22, 1e-24 }
0x1b12   :  { %6142 = vrsqrt.f32 %v5010_v56  ;;  %vm5018_vm11 = vweird.f32 %v5010_v56  ;;  %vm4988_vm4 = vweird.f32 %v4980_v14 }
0x1b13   :  { %6144 = vrsqrt.f32 %v4980_v14 }
0x1b17   :  { %v4979_v33 = vpop.xlane.xlu1 %4978  ;;  %v5009_v26 = vpop.xlane.xlu2 %5008 }
0x1b18   :  { %v6143_v39 = vpop.eup %6142  ;;  %v4981_v19 = vmax.f32 %v4979_v33, 1e-24  ;;  %v5011_v5 = vmax.f32 %v5009_v26, 1e-24  ;;  %v5125_v33 = vld [vmem:[%s10343_s11 + $0x20] sm:$0xff]  ;;  %v5124_v26 = vld [vmem:[%s10343_s11 + $0x18] sm:$0xff] }
0x1b19   :  { %v6145_v29 = vpop.eup %6144  ;;  %v5013_v30 = vmul.f32 %v6143_v39, %v5010_v56  ;;  %vm5019_vm3 = vweird.f32 %v6143_v39 }
0x1b1a   :  { %v4983_v3 = vmul.f32 %v6145_v29, %v4980_v14  ;;  %6146 = vrsqrt.f32 %v4981_v19  ;;  %vm4989_vm10 = vweird.f32 %v6145_v29  ;;  %vm5020_vm6 = vmor %vm5018_vm11, %vm5019_vm3  ;;  %vm4998_vm13 = vweird.f32 %v4981_v19 }
0x1b1b   :  { %v5014_v44 = vmul.f32 %v6143_v39, %v5013_v30  ;;  %6148 = vrsqrt.f32 %v5011_v5  ;;  %vm4990_vm1 = vmor %vm4988_vm4, %vm4989_vm10  ;;  %vm5028_vm0 = vweird.f32 %v5011_v5 }
0x1b1c   :  { %v4984_v27 = vmul.f32 %v6145_v29, %v4983_v3 }
0x1b1d   :  { %v5015_v49 = vmul.f32 0.5, %v5014_v44 }
0x1b1e   :  { %v4985_v62 = vmul.f32 0.5, %v4984_v27 }
0x1b1f   :  { %v5016_v18 = vsub.f32 1.5, %v5015_v49 }
0x1b20   :  { %v6147_v61 = vpop.eup %6146  ;;  %v4986_v0 = vsub.f32 1.5, %v4985_v62 }
0x1b21   :  { %v6149_v25 = vpop.eup %6148  ;;  %v5017_v8 = vmul.f32 %v6143_v39, %v5016_v18  ;;  %v4993_v9 = vmul.f32 %v6147_v61, %v4981_v19  ;;  %vm4999_vm5 = vweird.f32 %v6147_v61  ;;  %v5121_v19 = vld [vmem:[%s10343_s11] sm:$0xff] }
0x1b22   :  { %v4987_v28 = vmul.f32 %v6145_v29, %v4986_v0  ;;  %v5023_v20 = vmul.f32 %v6149_v25, %v5011_v5  ;;  %vm5029_vm12 = vweird.f32 %v6149_v25  ;;  %vm5000_vm15 = vmor %vm4998_vm13, %vm4999_vm5  ;;  %v5352_v5 = vld [vmem:[%s10340_s10] ss:$0 sm:$0xff] }
0x1b23   :  { %v5021_v13 = vsel %vm5020_vm6, %v6143_v39, %v5017_v8  ;;  %v4994_v16 = vmul.f32 %v6147_v61, %v4993_v9  ;;  %vm5030_vm14 = vmor %vm5028_vm0, %vm5029_vm12  ;;  %v5122_v39 = vld [vmem:[%s10343_s11 + $0x8] sm:$0xff]  ;;  %vm10682_vm6 = vcmask 523264   ;;  %v5353_v9 = vld [vmem:[%s10342_s12] ss:$0 sm:$0xff] }
0x1b24   :  { %v5032_v35 = vsel %vm10679_vm2, %v5021_v13, 0.0  ;;  %v4991_v15 = vsel %vm4990_vm1, %v6145_v29, %v4987_v28  ;;  %v5024_v46 = vmul.f32 %v6149_v25, %v5023_v20  ;;  %vm10683_vm1 = vmmov %vm10682_vm6  ;;  %vm5162_vm2 = vcmask 15360  }
0x1b25   :  { %v5002_v37 = vsel %vm10680_vm8, %v4991_v15, 0.0  ;;  %v4995_v48 = vmul.f32 0.5, %v4994_v16 }
0x1b26   :  { %v5034_v53 = vadd.f32 %v5032_v35, %v5002_v37  ;;  %v5025_v47 = vmul.f32 0.5, %v5024_v46 }
0x1b27   :  { %v4996_v17 = vsub.f32 1.5, %v4995_v48 }
0x1b28   :  { %v5036_v24 = vmul.f32 %v5034_v53, %v10210_v42  ;;  %v5026_v32 = vsub.f32 1.5, %v5025_v47 }
0x1b29   :  { %v4997_v63 = vmul.f32 %v6147_v61, %v4996_v17 }
0x1b2a   :  { %v5027_v6 = vmul.f32 %v6149_v25, %v5026_v32  ;;  %v5038_v57 = vmul.f32 %v5036_v24, %v10539_v51 }
0x1b2b   :  { %v5001_v34 = vsel %vm5000_vm15, %v6147_v61, %v4997_v63 }
0x1b2c   :  { %v5003_v42 = vsel %vm10677_vm7, %v5001_v34, 0.0  ;;  %v5031_v60 = vsel %vm5030_vm14, %v6149_v25, %v5027_v6  ;;  %v5045_v59 = vmul.f32 %v5350_v11, %v5038_v57 }
0x1b2d   :  { %v5033_v41 = vsel %vm10681_vm9, %v5031_v60, 0.0 }
0x1b2e   :  { %v5035_v38 = vadd.f32 %v5033_v41, %v5003_v42  ;;  %v5052_v23 = vadd.f32 %v5351_v50, %v5045_v59 }
0x1b30   :  { %v5037_v2 = vmul.f32 %v5035_v38, %v10219_v43  ;;  %v5056_v55 = vmin.f32 %v5052_v23, 0.0  ;;  %vm5054_vm3 = vcmp.gt.f32.partialorder %v5052_v23, 0.0  ;;  %v5127_v43 = vld [vmem:[%s10343_s11 + $0x30] sm:$0xff] }
0x1b32   :  { %v5058_v51 = vmul.f32 1.442695, %v5056_v55  ;;  %v5039_v7 = vmul.f32 %v5037_v2, %v10538_v12  ;;  %v5128_v12 = vld [vmem:[%s10343_s11 + $0x38] sm:$0xff] }
0x1b33   :  { %5147 = vmatpush.msra.mxu1 %v5128_v12 }
0x1b34   :  { %6150 = vpow2.f32 %v5058_v51  ;;  %v5046_v1 = vmul.f32 %v5350_v11, %v5039_v7 }
0x1b35   :  { %5148 = vmatpush.msra.mxu1 %v5127_v43 }
0x1b36   :  { %v5053_v10 = vadd.f32 %v5351_v50, %v5046_v1 }
0x1b37   :  { %5149 = vmatpush.msra.mxu1 %v5126_v21 }
0x1b38   :  { %v5057_v22 = vmin.f32 %v5053_v10, 0.0  ;;  %vm5055_vm10 = vcmp.gt.f32.partialorder %v5053_v10, 0.0 }
0x1b39   :  { %5150 = vmatpush.msra.mxu1 %v5125_v33 }
0x1b3a   :  { %v6151_v58 = vpop.eup %6150  ;;  %v5060_v56 = vmul.f32 1.442695, %v5057_v22 }
0x1b3b   :  { %v5297_v14 = vadd.f32 -1.0, %v6151_v58  ;;  %5151 = vmatpush.msra.mxu1 %v5124_v26 }
0x1b3c   :  { %6152 = vpow2.f32 %v5060_v56 }
0x1b3d   :  { %v5064_v36 = vsel %vm5054_vm3, %v5052_v23, %v5297_v14  ;;  %5152 = vmatpush.msra.mxu1 %v5123_v31 }
0x1b3e   :  { %5102 = vmatmul.f32.vlgmr.msra.gmra.mxu3 %v5064_v36 }
0x1b3f   :  { %5153 = vmatpush.msra.mxu1 %v5122_v39 }
0x1b41   :  { %5154 = vmatpush.msra.mxu1 %v5121_v19 }
0x1b42   :  { %v6153_v54 = vpop.eup %6152 }
0x1b43   :  { %v5298_v45 = vadd.f32 -1.0, %v6153_v54 }
0x1b45   :  { %v5065_v52 = vsel %vm5055_vm10, %v5053_v10, %v5298_v45 }
0x1b46   :  { %5105 = vmatmul.f32.gmra.mxu3 %v5065_v52 }
0x1bc1   :  { %v5103_v29 = vpop.f32.mrf.mxu3 }
0x1bc2   :  { %v5104_v30 = vadd.f32 %v5352_v5, %v5103_v29 }
0x1bc4   :  { %v5111_v4 = vmin.f32 %v5104_v30, 0.0  ;;  %vm5109_vm11 = vcmp.gt.f32.partialorder %v5104_v30, 0.0 }
0x1bc6   :  { %v5113_v3 = vmul.f32 1.442695, %v5111_v4 }
0x1bc8   :  { %6154 = vpow2.f32 %v5113_v3 }
0x1bc9   :  { %v5106_v44 = vpop.f32.mrf.mxu3 }
0x1bca   :  { %v5107_v40 = vadd.f32 %v5352_v5, %v5106_v44 }
0x1bcc   :  { %v5112_v27 = vmin.f32 %v5107_v40, 0.0  ;;  %vm5110_vm4 = vcmp.gt.f32.partialorder %v5107_v40, 0.0 }
0x1bce   :  { %v6155_v49 = vpop.eup %6154  ;;  %v5115_v62 = vmul.f32 1.442695, %v5112_v27 }
0x1bcf   :  { %v5299_v18 = vadd.f32 -1.0, %v6155_v49 }
0x1bd0   :  { %6156 = vpow2.f32 %v5115_v62 }
0x1bd1   :  { %v5119_v61 = vsel %vm5109_vm11, %v5104_v30, %v5299_v18 }
0x1bd2   :  { %5301 = vmatmul.msk.f32.vlgmr.msra.gmra.mxu1 %vm10682_vm6, %v5119_v61 }
0x1bd6   :  { %v6157_v0 = vpop.eup %6156 }
0x1bd7   :  { %v5300_v25 = vadd.f32 -1.0, %v6157_v0 }
0x1bd9   :  { %v5120_v8 = vsel %vm5110_vm4, %v5107_v40, %v5300_v25 }
0x1bda   :  { %5302 = vmatmul.msk.f32.gmra.mxu1 %vm10683_vm1, %v5120_v8 }
0x1c4f   :  { %v5156_v28 = vpop.f32.mrf.mxu1 }
0x1c50   :  { %v5157_v20 = vadd.f32 %v5353_v9, %v5156_v28 }
0x1c52   :  { %5163 = vst.msk [vmem:[%s10344_s13] sm:$0xff] %vm5162_vm2, %v5157_v20 }
0x1c57   :  { %v5159_v13 = vpop.f32.mrf.mxu1 }
0x1c58   :  { %v5160_v16 = vadd.f32 %v5353_v9, %v5159_v13 }
0x1c5a   :  { %5164 = vst.msk [vmem:[%s10344_s13 + $0x8] sm:$0xff] %vm5162_vm2, %v5160_v16 }

</bundles_post_ra>
